<compile_context>
chip_gen: v6e
topology: v6e:2x2x1
jax: 0.10.0
libtpu: 0.0.40
codegen_flags: <defaults>
</compile_context>

<pallas_src>
import functools

import numpy as np
import jax
import jax.numpy as jnp
from jax.experimental import pallas as pl
from jax.experimental.pallas import tpu as pltpu

_BN_EPS = 1e-5


# ----------------------------------------------------------------------------
# Fused residual-block kernel (one invocation, everything VMEM-resident)
# ----------------------------------------------------------------------------
def _fused_residual_block_kernel(x_ref, w1_ref, w2_ref, w3_ref, sh_ref,
                                 o_ref, xpad1, xpad, col, res,
                                 *, B, Hp, Wp, Cin, Cout):
    """Computes relu(bn3(conv3(x2)) + x1) with x1=relu(bn1(conv1(x))),
    x2=relu(bn2(conv2(x1))).  BN scales are pre-folded into the weights.

    x_ref  : (B, Hp, Wp, Cin)        bf16   pooled NHWC input
    w1_ref : (9, Cin, Cout)          bf16   tap-major conv1 weights
    w2/w3  : (9*Cout, Cout)          bf16   im2col-ordered weights
    sh_ref : (3, Cout)               f32    folded bias+BN shifts
    o_ref  : (B, Hp, Wp, Cout)       f32    block output
    xpad1  : (B, Hp+2, Wp+2, Cin)    bf16   VMEM padded plane (conv1)
    xpad   : (B, Hp+2, Wp+2, Cout)   bf16   VMEM padded plane (conv2/3, reused)
    col    : (B*Hp*Wp, 9*Cout)       bf16   VMEM im2col operand (reused)
    res    : (B*Hp*Wp, Cout)         f32    VMEM residual (x1)
    """
    M = B * Hp * Wp

    # ---------------- conv1 : Cin -> Cout  (K = Cin is tiny; 9-tap loop) ----
    xpad1[...] = jnp.zeros_like(xpad1)                  # zero halo (VMEM only)
    xpad1[:, 1:Hp + 1, 1:Wp + 1, :] = x_ref[...]        # interior fill
    acc = jnp.zeros((M, Cout), jnp.float32)
    for t in range(9):                                  # statically unrolled
        dy, dx = divmod(t, 3)
        v = xpad1[:, dy:dy + Hp, dx:dx + Wp, :].reshape(M, Cin)
        acc = acc + jnp.dot(v, w1_ref[t], preferred_element_type=jnp.float32)
    y1 = jnp.maximum(acc + sh_ref[0:1, :], 0.0)         # (M, Cout) f32
    res[...] = y1                                       # residual stays in VMEM

    # ---------------- conv2 / conv3 : one K = 9*Cout MXU matmul each --------
    xpad[...] = jnp.zeros_like(xpad)                    # halo zeroed once

    def conv9c(y_prev_bf16, w_ref, shift):
        # Interior fill of the padded plane (halo already zero), VMEM only.
        xpad[:, 1:Hp + 1, 1:Wp + 1, :] = y_prev_bf16.reshape(B, Hp, Wp, Cout)
        # Build the im2col operand in VMEM; column block t = tap (dy, dx),
        # matching the (ky, kx, cin)-major weight reshape.
        for t in range(9):                              # statically unrolled
            dy, dx = divmod(t, 3)
            col[:, t * Cout:(t + 1) * Cout] = (
                xpad[:, dy:dy + Hp, dx:dx + Wp, :].reshape(M, Cout))
        out = jnp.dot(col[...], w_ref[...],
                      preferred_element_type=jnp.float32)
        return out + shift                              # folded bias+BN shift

    y2 = jnp.maximum(conv9c(y1.astype(jnp.bfloat16), w2_ref, sh_ref[1:2, :]),
                     0.0)
    y3 = conv9c(y2.astype(jnp.bfloat16), w3_ref, sh_ref[2:3, :])

    out = jnp.maximum(y3 + res[...], 0.0)               # residual add + ReLU
    o_ref[...] = out.reshape(B, Hp, Wp, Cout)


def fused_residual_block(x_nhwc, p):
    """x_nhwc: (B, Hp, Wp, Cin) bf16 -> (B, Hp, Wp, Cout) f32."""
    B, Hp, Wp, Cin = x_nhwc.shape
    Cout = p["shifts"].shape[-1]
    M = B * Hp * Wp

    kern = functools.partial(_fused_residual_block_kernel,
                             B=B, Hp=Hp, Wp=Wp, Cin=Cin, Cout=Cout)

    # All blocks are whole arrays (last two block dims == full array dims, so
    # the (8,128) divisibility rule is satisfied for any Cin/Cout).  Total
    # VMEM (operands + scratch) is well under 1 MiB at these shapes.
    return pl.pallas_call(
        kern,
        out_shape=jax.ShapeDtypeStruct((B, Hp, Wp, Cout), jnp.float32),
        grid_spec=pltpu.PrefetchScalarGridSpec(
            num_scalar_prefetch=0,
            grid=(1,),                                   # single fused step
            in_specs=[
                pl.BlockSpec((B, Hp, Wp, Cin), lambda i: (0, 0, 0, 0)),
                pl.BlockSpec((9, Cin, Cout), lambda i: (0, 0, 0)),
                pl.BlockSpec((9 * Cout, Cout), lambda i: (0, 0)),
                pl.BlockSpec((9 * Cout, Cout), lambda i: (0, 0)),
                pl.BlockSpec((3, Cout), lambda i: (0, 0)),
            ],
            out_specs=pl.BlockSpec((B, Hp, Wp, Cout), lambda i: (0, 0, 0, 0)),
            scratch_shapes=[
                pltpu.VMEM((B, Hp + 2, Wp + 2, Cin), jnp.bfloat16),
                pltpu.VMEM((B, Hp + 2, Wp + 2, Cout), jnp.bfloat16),
                pltpu.VMEM((M, 9 * Cout), jnp.bfloat16),
                pltpu.VMEM((M, Cout), jnp.float32),
            ]),
        compiler_params=pltpu.CompilerParams(
            dimension_semantics=("arbitrary",)),
    )(x_nhwc, p["w1"], p["w2"], p["w3"], p["shifts"])


# ----------------------------------------------------------------------------
# Module forward (public NCHW interface, NHWC internals)
# ----------------------------------------------------------------------------
def unet_residual_down_block_forward(x_nchw, params, down_size=True):
    x = jnp.transpose(x_nchw, (0, 2, 3, 1)).astype(jnp.bfloat16)   # -> NHWC
    if down_size:
        B, H, W, C = x.shape
        x = x.reshape(B, H // 2, 2, W // 2, 2, C).max(axis=(2, 4))  # 2x2 pool
    y = fused_residual_block(x, params)                             # NHWC f32
    return jnp.transpose(y, (0, 3, 1, 2))                           # -> NCHW


# ----------------------------------------------------------------------------
# Parameter init (PyTorch Conv2d defaults; BN folded with __init__ stats)
# ----------------------------------------------------------------------------
def make_down_block_params(seed, cin, cout):
    keys = jax.random.split(jax.random.PRNGKey(seed), 6)
    bn_scale = 1.0 / np.sqrt(1.0 + _BN_EPS)           # gamma=1, var=1, mean=0

    def conv_params(kw, kb, ci):
        bound = 1.0 / np.sqrt(ci * 9)
        w = jax.random.uniform(kw, (3, 3, ci, cout), jnp.float32, -bound, bound)
        b = jax.random.uniform(kb, (cout,), jnp.float32, -bound, bound)
        # Fold the BN scale into the weights once (host-side, eval-mode stats);
        # the remaining per-channel shift is bn_scale * bias (beta=0, mean=0).
        w = (w * bn_scale).astype(jnp.bfloat16)
        shift = (bn_scale * b).astype(jnp.float32)
        return w, shift

    w1, s1 = conv_params(keys[0], keys[1], cin)
    w2, s2 = conv_params(keys[2], keys[3], cout)
    w3, s3 = conv_params(keys[4], keys[5], cout)
    return {
        "w1": w1.reshape(9, cin, cout),                # tap-major (ky*3+kx)
        "w2": w2.reshape(9 * cout, cout),              # matches im2col columns
        "w3": w3.reshape(9 * cout, cout),
        "shifts": jnp.stack([s1, s2, s3], axis=0),     # (3, cout) f32
    }


# ----------------------------------------------------------------------------
if __name__ == "__main__":
    B, Cin, H, W = 2, 4, 16, 16
    Cout = 64
    down_size = True

    x = jax.random.normal(jax.random.PRNGKey(0), (B, Cin, H, W), jnp.float32)
    params = make_down_block_params(0, Cin, Cout)

    fwd = jax.jit(functools.partial(unet_residual_down_block_forward,
                                    down_size=down_size))
    y = jax.block_until_ready(fwd(x, params))

    Ho, Wo = (H // 2, W // 2) if down_size else (H, W)
    assert y.shape == (B, Cout, Ho, Wo), y.shape
    assert bool(jnp.all(jnp.isfinite(y)))
    print("KERNEL_OK")
</pallas_src>

<mosaic_0001>
module attributes {stable_mosaic.version = 11 : i64} {
  func.func @_fused_residual_block_kernel(%arg0: i32, %arg1: memref<2x8x8x4xbf16, #tpu.memory_space<vmem>>, %arg2: memref<9x4x64xbf16, #tpu.memory_space<vmem>>, %arg3: memref<576x64xbf16, #tpu.memory_space<vmem>>, %arg4: memref<576x64xbf16, #tpu.memory_space<vmem>>, %arg5: memref<3x64xf32, #tpu.memory_space<vmem>>, %arg6: memref<2x8x8x64xf32, #tpu.memory_space<vmem>>, %arg7: memref<2x10x10x4xbf16, #tpu.memory_space<vmem>>, %arg8: memref<2x10x10x64xbf16, #tpu.memory_space<vmem>>, %arg9: memref<128x576xbf16, #tpu.memory_space<vmem>>, %arg10: memref<128x64xf32, #tpu.memory_space<vmem>>) attributes {dimension_semantics = [#tpu.dimension_semantics<arbitrary>], iteration_bounds = array<i64: 1>, scalar_prefetch = 0 : i64, scratch_operands = 4 : i64, tpu.core_type = #tpu.core_type<tc>, window_params = [{pipeline_mode = #tpu.pipeline_mode<synchronous>, transform_indices = @transform_0, window_bounds = array<i64: 2, 8, 8, 4>}, {pipeline_mode = #tpu.pipeline_mode<synchronous>, transform_indices = @transform_1, window_bounds = array<i64: 9, 4, 64>}, {pipeline_mode = #tpu.pipeline_mode<synchronous>, transform_indices = @transform_2, window_bounds = array<i64: 576, 64>}, {pipeline_mode = #tpu.pipeline_mode<synchronous>, transform_indices = @transform_3, window_bounds = array<i64: 576, 64>}, {pipeline_mode = #tpu.pipeline_mode<synchronous>, transform_indices = @transform_4, window_bounds = array<i64: 3, 64>}, {pipeline_mode = #tpu.pipeline_mode<synchronous>, transform_indices = @transform_5, window_bounds = array<i64: 2, 8, 8, 64>}]} {
    %cst = arith.constant 0.000000e+00 : bf16
    %0 = vector.broadcast %cst : bf16 to vector<2x10x10x4xbf16>
    %c0 = arith.constant 0 : index
    %c0_0 = arith.constant 0 : index
    %c0_1 = arith.constant 0 : index
    %c0_2 = arith.constant 0 : index
    %1 = vector.load %arg7[%c0, %c0_0, %c0_1, %c0_2] : memref<2x10x10x4xbf16, #tpu.memory_space<vmem>>, vector<2x10x10x4xbf16>
    tpu.vector_store %arg7[%c0, %c0_0, %c0_1, %c0_2], %0 {strides = array<i32>} : memref<2x10x10x4xbf16, #tpu.memory_space<vmem>>, vector<2x10x10x4xbf16>,
    %c0_3 = arith.constant 0 : index
    %c0_4 = arith.constant 0 : index
    %c0_5 = arith.constant 0 : index
    %c0_6 = arith.constant 0 : index
    %2 = vector.load %arg1[%c0_3, %c0_4, %c0_5, %c0_6] : memref<2x8x8x4xbf16, #tpu.memory_space<vmem>>, vector<2x8x8x4xbf16>
    %c0_7 = arith.constant 0 : index
    %c1 = arith.constant 1 : index
    %c1_8 = arith.constant 1 : index
    %c0_9 = arith.constant 0 : index
    %3 = vector.load %arg7[%c0_7, %c1, %c1_8, %c0_9] : memref<2x10x10x4xbf16, #tpu.memory_space<vmem>>, vector<2x8x8x4xbf16>
    tpu.vector_store %arg7[%c0_7, %c1, %c1_8, %c0_9], %2 {strides = array<i32>} : memref<2x10x10x4xbf16, #tpu.memory_space<vmem>>, vector<2x8x8x4xbf16>,
    %cst_10 = arith.constant 0.000000e+00 : f32
    %4 = vector.broadcast %cst_10 : f32 to vector<128x64xf32>
    %c0_11 = arith.constant 0 : index
    %c0_12 = arith.constant 0 : index
    %c0_13 = arith.constant 0 : index
    %c0_14 = arith.constant 0 : index
    %5 = vector.load %arg7[%c0_11, %c0_12, %c0_13, %c0_14] : memref<2x10x10x4xbf16, #tpu.memory_space<vmem>>, vector<2x8x8x4xbf16>
    %6 = vector.shape_cast %5 : vector<2x8x8x4xbf16> to vector<128x4xbf16>
    %c0_15 = arith.constant 0 : index
    %c0_16 = arith.constant 0 : index
    %c0_17 = arith.constant 0 : index
    %7 = vector.load %arg2[%c0_15, %c0_16, %c0_17] : memref<9x4x64xbf16, #tpu.memory_space<vmem>>, vector<1x4x64xbf16>
    %8 = vector.shape_cast %7 : vector<1x4x64xbf16> to vector<4x64xbf16>
    %cst_18 = arith.constant dense<0.000000e+00> : vector<128x64xf32>
    %9 = tpu.matmul %6, %8, %cst_18 {dimension_numbers = #tpu.dot_dimension_numbers<[1], [0], [0], [1], [0, 0, 1, 1], [], []>} : vector<128x4xbf16>, vector<4x64xbf16>, vector<128x64xf32> -> vector<128x64xf32>
    %10 = arith.addf %4, %9 : vector<128x64xf32>
    %c0_19 = arith.constant 0 : index
    %c0_20 = arith.constant 0 : index
    %c1_21 = arith.constant 1 : index
    %c0_22 = arith.constant 0 : index
    %11 = vector.load %arg7[%c0_19, %c0_20, %c1_21, %c0_22] : memref<2x10x10x4xbf16, #tpu.memory_space<vmem>>, vector<2x8x8x4xbf16>
    %12 = vector.shape_cast %11 : vector<2x8x8x4xbf16> to vector<128x4xbf16>
    %c1_23 = arith.constant 1 : index
    %c0_24 = arith.constant 0 : index
    %c0_25 = arith.constant 0 : index
    %13 = vector.load %arg2[%c1_23, %c0_24, %c0_25] : memref<9x4x64xbf16, #tpu.memory_space<vmem>>, vector<1x4x64xbf16>
    %14 = vector.shape_cast %13 : vector<1x4x64xbf16> to vector<4x64xbf16>
    %cst_26 = arith.constant dense<0.000000e+00> : vector<128x64xf32>
    %15 = tpu.matmul %12, %14, %cst_26 {dimension_numbers = #tpu.dot_dimension_numbers<[1], [0], [0], [1], [0, 0, 1, 1], [], []>} : vector<128x4xbf16>, vector<4x64xbf16>, vector<128x64xf32> -> vector<128x64xf32>
    %16 = arith.addf %10, %15 : vector<128x64xf32>
    %c0_27 = arith.constant 0 : index
    %c0_28 = arith.constant 0 : index
    %c2 = arith.constant 2 : index
    %c0_29 = arith.constant 0 : index
    %17 = vector.load %arg7[%c0_27, %c0_28, %c2, %c0_29] : memref<2x10x10x4xbf16, #tpu.memory_space<vmem>>, vector<2x8x8x4xbf16>
    %18 = vector.shape_cast %17 : vector<2x8x8x4xbf16> to vector<128x4xbf16>
    %c2_30 = arith.constant 2 : index
    %c0_31 = arith.constant 0 : index
    %c0_32 = arith.constant 0 : index
    %19 = vector.load %arg2[%c2_30, %c0_31, %c0_32] : memref<9x4x64xbf16, #tpu.memory_space<vmem>>, vector<1x4x64xbf16>
    %20 = vector.shape_cast %19 : vector<1x4x64xbf16> to vector<4x64xbf16>
    %cst_33 = arith.constant dense<0.000000e+00> : vector<128x64xf32>
    %21 = tpu.matmul %18, %20, %cst_33 {dimension_numbers = #tpu.dot_dimension_numbers<[1], [0], [0], [1], [0, 0, 1, 1], [], []>} : vector<128x4xbf16>, vector<4x64xbf16>, vector<128x64xf32> -> vector<128x64xf32>
    %22 = arith.addf %16, %21 : vector<128x64xf32>
    %c0_34 = arith.constant 0 : index
    %c1_35 = arith.constant 1 : index
    %c0_36 = arith.constant 0 : index
    %c0_37 = arith.constant 0 : index
    %23 = vector.load %arg7[%c0_34, %c1_35, %c0_36, %c0_37] : memref<2x10x10x4xbf16, #tpu.memory_space<vmem>>, vector<2x8x8x4xbf16>
    %24 = vector.shape_cast %23 : vector<2x8x8x4xbf16> to vector<128x4xbf16>
    %c3 = arith.constant 3 : index
    %c0_38 = arith.constant 0 : index
    %c0_39 = arith.constant 0 : index
    %25 = vector.load %arg2[%c3, %c0_38, %c0_39] : memref<9x4x64xbf16, #tpu.memory_space<vmem>>, vector<1x4x64xbf16>
    %26 = vector.shape_cast %25 : vector<1x4x64xbf16> to vector<4x64xbf16>
    %cst_40 = arith.constant dense<0.000000e+00> : vector<128x64xf32>
    %27 = tpu.matmul %24, %26, %cst_40 {dimension_numbers = #tpu.dot_dimension_numbers<[1], [0], [0], [1], [0, 0, 1, 1], [], []>} : vector<128x4xbf16>, vector<4x64xbf16>, vector<128x64xf32> -> vector<128x64xf32>
    %28 = arith.addf %22, %27 : vector<128x64xf32>
    %c0_41 = arith.constant 0 : index
    %c1_42 = arith.constant 1 : index
    %c1_43 = arith.constant 1 : index
    %c0_44 = arith.constant 0 : index
    %29 = vector.load %arg7[%c0_41, %c1_42, %c1_43, %c0_44] : memref<2x10x10x4xbf16, #tpu.memory_space<vmem>>, vector<2x8x8x4xbf16>
    %30 = vector.shape_cast %29 : vector<2x8x8x4xbf16> to vector<128x4xbf16>
    %c4 = arith.constant 4 : index
    %c0_45 = arith.constant 0 : index
    %c0_46 = arith.constant 0 : index
    %31 = vector.load %arg2[%c4, %c0_45, %c0_46] : memref<9x4x64xbf16, #tpu.memory_space<vmem>>, vector<1x4x64xbf16>
    %32 = vector.shape_cast %31 : vector<1x4x64xbf16> to vector<4x64xbf16>
    %cst_47 = arith.constant dense<0.000000e+00> : vector<128x64xf32>
    %33 = tpu.matmul %30, %32, %cst_47 {dimension_numbers = #tpu.dot_dimension_numbers<[1], [0], [0], [1], [0, 0, 1, 1], [], []>} : vector<128x4xbf16>, vector<4x64xbf16>, vector<128x64xf32> -> vector<128x64xf32>
    %34 = arith.addf %28, %33 : vector<128x64xf32>
    %c0_48 = arith.constant 0 : index
    %c1_49 = arith.constant 1 : index
    %c2_50 = arith.constant 2 : index
    %c0_51 = arith.constant 0 : index
    %35 = vector.load %arg7[%c0_48, %c1_49, %c2_50, %c0_51] : memref<2x10x10x4xbf16, #tpu.memory_space<vmem>>, vector<2x8x8x4xbf16>
    %36 = vector.shape_cast %35 : vector<2x8x8x4xbf16> to vector<128x4xbf16>
    %c5 = arith.constant 5 : index
    %c0_52 = arith.constant 0 : index
    %c0_53 = arith.constant 0 : index
    %37 = vector.load %arg2[%c5, %c0_52, %c0_53] : memref<9x4x64xbf16, #tpu.memory_space<vmem>>, vector<1x4x64xbf16>
    %38 = vector.shape_cast %37 : vector<1x4x64xbf16> to vector<4x64xbf16>
    %cst_54 = arith.constant dense<0.000000e+00> : vector<128x64xf32>
    %39 = tpu.matmul %36, %38, %cst_54 {dimension_numbers = #tpu.dot_dimension_numbers<[1], [0], [0], [1], [0, 0, 1, 1], [], []>} : vector<128x4xbf16>, vector<4x64xbf16>, vector<128x64xf32> -> vector<128x64xf32>
    %40 = arith.addf %34, %39 : vector<128x64xf32>
    %c0_55 = arith.constant 0 : index
    %c2_56 = arith.constant 2 : index
    %c0_57 = arith.constant 0 : index
    %c0_58 = arith.constant 0 : index
    %41 = vector.load %arg7[%c0_55, %c2_56, %c0_57, %c0_58] : memref<2x10x10x4xbf16, #tpu.memory_space<vmem>>, vector<2x8x8x4xbf16>
    %42 = vector.shape_cast %41 : vector<2x8x8x4xbf16> to vector<128x4xbf16>
    %c6 = arith.constant 6 : index
    %c0_59 = arith.constant 0 : index
    %c0_60 = arith.constant 0 : index
    %43 = vector.load %arg2[%c6, %c0_59, %c0_60] : memref<9x4x64xbf16, #tpu.memory_space<vmem>>, vector<1x4x64xbf16>
    %44 = vector.shape_cast %43 : vector<1x4x64xbf16> to vector<4x64xbf16>
    %cst_61 = arith.constant dense<0.000000e+00> : vector<128x64xf32>
    %45 = tpu.matmul %42, %44, %cst_61 {dimension_numbers = #tpu.dot_dimension_numbers<[1], [0], [0], [1], [0, 0, 1, 1], [], []>} : vector<128x4xbf16>, vector<4x64xbf16>, vector<128x64xf32> -> vector<128x64xf32>
    %46 = arith.addf %40, %45 : vector<128x64xf32>
    %c0_62 = arith.constant 0 : index
    %c2_63 = arith.constant 2 : index
    %c1_64 = arith.constant 1 : index
    %c0_65 = arith.constant 0 : index
    %47 = vector.load %arg7[%c0_62, %c2_63, %c1_64, %c0_65] : memref<2x10x10x4xbf16, #tpu.memory_space<vmem>>, vector<2x8x8x4xbf16>
    %48 = vector.shape_cast %47 : vector<2x8x8x4xbf16> to vector<128x4xbf16>
    %c7 = arith.constant 7 : index
    %c0_66 = arith.constant 0 : index
    %c0_67 = arith.constant 0 : index
    %49 = vector.load %arg2[%c7, %c0_66, %c0_67] : memref<9x4x64xbf16, #tpu.memory_space<vmem>>, vector<1x4x64xbf16>
    %50 = vector.shape_cast %49 : vector<1x4x64xbf16> to vector<4x64xbf16>
    %cst_68 = arith.constant dense<0.000000e+00> : vector<128x64xf32>
    %51 = tpu.matmul %48, %50, %cst_68 {dimension_numbers = #tpu.dot_dimension_numbers<[1], [0], [0], [1], [0, 0, 1, 1], [], []>} : vector<128x4xbf16>, vector<4x64xbf16>, vector<128x64xf32> -> vector<128x64xf32>
    %52 = arith.addf %46, %51 : vector<128x64xf32>
    %c0_69 = arith.constant 0 : index
    %c2_70 = arith.constant 2 : index
    %c2_71 = arith.constant 2 : index
    %c0_72 = arith.constant 0 : index
    %53 = vector.load %arg7[%c0_69, %c2_70, %c2_71, %c0_72] : memref<2x10x10x4xbf16, #tpu.memory_space<vmem>>, vector<2x8x8x4xbf16>
    %54 = vector.shape_cast %53 : vector<2x8x8x4xbf16> to vector<128x4xbf16>
    %c8 = arith.constant 8 : index
    %c0_73 = arith.constant 0 : index
    %c0_74 = arith.constant 0 : index
    %55 = vector.load %arg2[%c8, %c0_73, %c0_74] : memref<9x4x64xbf16, #tpu.memory_space<vmem>>, vector<1x4x64xbf16>
    %56 = vector.shape_cast %55 : vector<1x4x64xbf16> to vector<4x64xbf16>
    %cst_75 = arith.constant dense<0.000000e+00> : vector<128x64xf32>
    %57 = tpu.matmul %54, %56, %cst_75 {dimension_numbers = #tpu.dot_dimension_numbers<[1], [0], [0], [1], [0, 0, 1, 1], [], []>} : vector<128x4xbf16>, vector<4x64xbf16>, vector<128x64xf32> -> vector<128x64xf32>
    %58 = arith.addf %52, %57 : vector<128x64xf32>
    %c0_76 = arith.constant 0 : index
    %c0_77 = arith.constant 0 : index
    %59 = vector.load %arg5[%c0_76, %c0_77] : memref<3x64xf32, #tpu.memory_space<vmem>>, vector<1x64xf32>
    %60 = vector.broadcast %59 : vector<1x64xf32> to vector<128x64xf32>
    %61 = arith.addf %58, %60 : vector<128x64xf32>
    %cst_78 = arith.constant 0.000000e+00 : f32
    %62 = vector.broadcast %cst_78 : f32 to vector<128x64xf32>
    %63 = arith.maximumf %61, %62 : vector<128x64xf32>
    %c0_79 = arith.constant 0 : index
    %c0_80 = arith.constant 0 : index
    %64 = vector.load %arg10[%c0_79, %c0_80] : memref<128x64xf32, #tpu.memory_space<vmem>>, vector<128x64xf32>
    tpu.vector_store %arg10[%c0_79, %c0_80], %63 {strides = array<i32>} : memref<128x64xf32, #tpu.memory_space<vmem>>, vector<128x64xf32>,
    %cst_81 = arith.constant 0.000000e+00 : bf16
    %65 = vector.broadcast %cst_81 : bf16 to vector<2x10x10x64xbf16>
    %c0_82 = arith.constant 0 : index
    %c0_83 = arith.constant 0 : index
    %c0_84 = arith.constant 0 : index
    %c0_85 = arith.constant 0 : index
    %66 = vector.load %arg8[%c0_82, %c0_83, %c0_84, %c0_85] : memref<2x10x10x64xbf16, #tpu.memory_space<vmem>>, vector<2x10x10x64xbf16>
    tpu.vector_store %arg8[%c0_82, %c0_83, %c0_84, %c0_85], %65 {strides = array<i32>} : memref<2x10x10x64xbf16, #tpu.memory_space<vmem>>, vector<2x10x10x64xbf16>,
    %67 = arith.truncf %63 : vector<128x64xf32> to vector<128x64xbf16>
    %c1_86 = arith.constant 1 : index
    %c0_87 = arith.constant 0 : index
    %68 = vector.load %arg5[%c1_86, %c0_87] : memref<3x64xf32, #tpu.memory_space<vmem>>, vector<1x64xf32>
    %69 = vector.shape_cast %67 : vector<128x64xbf16> to vector<2x8x8x64xbf16>
    %c0_88 = arith.constant 0 : index
    %c1_89 = arith.constant 1 : index
    %c1_90 = arith.constant 1 : index
    %c0_91 = arith.constant 0 : index
    %70 = vector.load %arg8[%c0_88, %c1_89, %c1_90, %c0_91] : memref<2x10x10x64xbf16, #tpu.memory_space<vmem>>, vector<2x8x8x64xbf16>
    tpu.vector_store %arg8[%c0_88, %c1_89, %c1_90, %c0_91], %69 {strides = array<i32>} : memref<2x10x10x64xbf16, #tpu.memory_space<vmem>>, vector<2x8x8x64xbf16>,
    %c0_92 = arith.constant 0 : index
    %c0_93 = arith.constant 0 : index
    %c0_94 = arith.constant 0 : index
    %c0_95 = arith.constant 0 : index
    %71 = vector.load %arg8[%c0_92, %c0_93, %c0_94, %c0_95] : memref<2x10x10x64xbf16, #tpu.memory_space<vmem>>, vector<2x8x8x64xbf16>
    %72 = vector.shape_cast %71 : vector<2x8x8x64xbf16> to vector<128x64xbf16>
    %c0_96 = arith.constant 0 : index
    %c0_97 = arith.constant 0 : index
    %73 = vector.load %arg9[%c0_96, %c0_97] : memref<128x576xbf16, #tpu.memory_space<vmem>>, vector<128x64xbf16>
    tpu.vector_store %arg9[%c0_96, %c0_97], %72 {strides = array<i32>} : memref<128x576xbf16, #tpu.memory_space<vmem>>, vector<128x64xbf16>,
    %c0_98 = arith.constant 0 : index
    %c0_99 = arith.constant 0 : index
    %c1_100 = arith.constant 1 : index
    %c0_101 = arith.constant 0 : index
    %74 = vector.load %arg8[%c0_98, %c0_99, %c1_100, %c0_101] : memref<2x10x10x64xbf16, #tpu.memory_space<vmem>>, vector<2x8x8x64xbf16>
    %75 = vector.shape_cast %74 : vector<2x8x8x64xbf16> to vector<128x64xbf16>
    %c0_102 = arith.constant 0 : index
    %c64 = arith.constant 64 : index
    %76 = vector.load %arg9[%c0_102, %c64] : memref<128x576xbf16, #tpu.memory_space<vmem>>, vector<128x64xbf16>
    tpu.vector_store %arg9[%c0_102, %c64], %75 {strides = array<i32>} : memref<128x576xbf16, #tpu.memory_space<vmem>>, vector<128x64xbf16>,
    %c0_103 = arith.constant 0 : index
    %c0_104 = arith.constant 0 : index
    %c2_105 = arith.constant 2 : index
    %c0_106 = arith.constant 0 : index
    %77 = vector.load %arg8[%c0_103, %c0_104, %c2_105, %c0_106] : memref<2x10x10x64xbf16, #tpu.memory_space<vmem>>, vector<2x8x8x64xbf16>
    %78 = vector.shape_cast %77 : vector<2x8x8x64xbf16> to vector<128x64xbf16>
    %c0_107 = arith.constant 0 : index
    %c128 = arith.constant 128 : index
    %79 = vector.load %arg9[%c0_107, %c128] : memref<128x576xbf16, #tpu.memory_space<vmem>>, vector<128x64xbf16>
    tpu.vector_store %arg9[%c0_107, %c128], %78 {strides = array<i32>} : memref<128x576xbf16, #tpu.memory_space<vmem>>, vector<128x64xbf16>,
    %c0_108 = arith.constant 0 : index
    %c1_109 = arith.constant 1 : index
    %c0_110 = arith.constant 0 : index
    %c0_111 = arith.constant 0 : index
    %80 = vector.load %arg8[%c0_108, %c1_109, %c0_110, %c0_111] : memref<2x10x10x64xbf16, #tpu.memory_space<vmem>>, vector<2x8x8x64xbf16>
    %81 = vector.shape_cast %80 : vector<2x8x8x64xbf16> to vector<128x64xbf16>
    %c0_112 = arith.constant 0 : index
    %c192 = arith.constant 192 : index
    %82 = vector.load %arg9[%c0_112, %c192] : memref<128x576xbf16, #tpu.memory_space<vmem>>, vector<128x64xbf16>
    tpu.vector_store %arg9[%c0_112, %c192], %81 {strides = array<i32>} : memref<128x576xbf16, #tpu.memory_space<vmem>>, vector<128x64xbf16>,
    %c0_113 = arith.constant 0 : index
    %c1_114 = arith.constant 1 : index
    %c1_115 = arith.constant 1 : index
    %c0_116 = arith.constant 0 : index
    %83 = vector.load %arg8[%c0_113, %c1_114, %c1_115, %c0_116] : memref<2x10x10x64xbf16, #tpu.memory_space<vmem>>, vector<2x8x8x64xbf16>
    %84 = vector.shape_cast %83 : vector<2x8x8x64xbf16> to vector<128x64xbf16>
    %c0_117 = arith.constant 0 : index
    %c256 = arith.constant 256 : index
    %85 = vector.load %arg9[%c0_117, %c256] : memref<128x576xbf16, #tpu.memory_space<vmem>>, vector<128x64xbf16>
    tpu.vector_store %arg9[%c0_117, %c256], %84 {strides = array<i32>} : memref<128x576xbf16, #tpu.memory_space<vmem>>, vector<128x64xbf16>,
    %c0_118 = arith.constant 0 : index
    %c1_119 = arith.constant 1 : index
    %c2_120 = arith.constant 2 : index
    %c0_121 = arith.constant 0 : index
    %86 = vector.load %arg8[%c0_118, %c1_119, %c2_120, %c0_121] : memref<2x10x10x64xbf16, #tpu.memory_space<vmem>>, vector<2x8x8x64xbf16>
    %87 = vector.shape_cast %86 : vector<2x8x8x64xbf16> to vector<128x64xbf16>
    %c0_122 = arith.constant 0 : index
    %c320 = arith.constant 320 : index
    %88 = vector.load %arg9[%c0_122, %c320] : memref<128x576xbf16, #tpu.memory_space<vmem>>, vector<128x64xbf16>
    tpu.vector_store %arg9[%c0_122, %c320], %87 {strides = array<i32>} : memref<128x576xbf16, #tpu.memory_space<vmem>>, vector<128x64xbf16>,
    %c0_123 = arith.constant 0 : index
    %c2_124 = arith.constant 2 : index
    %c0_125 = arith.constant 0 : index
    %c0_126 = arith.constant 0 : index
    %89 = vector.load %arg8[%c0_123, %c2_124, %c0_125, %c0_126] : memref<2x10x10x64xbf16, #tpu.memory_space<vmem>>, vector<2x8x8x64xbf16>
    %90 = vector.shape_cast %89 : vector<2x8x8x64xbf16> to vector<128x64xbf16>
    %c0_127 = arith.constant 0 : index
    %c384 = arith.constant 384 : index
    %91 = vector.load %arg9[%c0_127, %c384] : memref<128x576xbf16, #tpu.memory_space<vmem>>, vector<128x64xbf16>
    tpu.vector_store %arg9[%c0_127, %c384], %90 {strides = array<i32>} : memref<128x576xbf16, #tpu.memory_space<vmem>>, vector<128x64xbf16>,
    %c0_128 = arith.constant 0 : index
    %c2_129 = arith.constant 2 : index
    %c1_130 = arith.constant 1 : index
    %c0_131 = arith.constant 0 : index
    %92 = vector.load %arg8[%c0_128, %c2_129, %c1_130, %c0_131] : memref<2x10x10x64xbf16, #tpu.memory_space<vmem>>, vector<2x8x8x64xbf16>
    %93 = vector.shape_cast %92 : vector<2x8x8x64xbf16> to vector<128x64xbf16>
    %c0_132 = arith.constant 0 : index
    %c448 = arith.constant 448 : index
    %94 = vector.load %arg9[%c0_132, %c448] : memref<128x576xbf16, #tpu.memory_space<vmem>>, vector<128x64xbf16>
    tpu.vector_store %arg9[%c0_132, %c448], %93 {strides = array<i32>} : memref<128x576xbf16, #tpu.memory_space<vmem>>, vector<128x64xbf16>,
    %c0_133 = arith.constant 0 : index
    %c2_134 = arith.constant 2 : index
    %c2_135 = arith.constant 2 : index
    %c0_136 = arith.constant 0 : index
    %95 = vector.load %arg8[%c0_133, %c2_134, %c2_135, %c0_136] : memref<2x10x10x64xbf16, #tpu.memory_space<vmem>>, vector<2x8x8x64xbf16>
    %96 = vector.shape_cast %95 : vector<2x8x8x64xbf16> to vector<128x64xbf16>
    %c0_137 = arith.constant 0 : index
    %c512 = arith.constant 512 : index
    %97 = vector.load %arg9[%c0_137, %c512] : memref<128x576xbf16, #tpu.memory_space<vmem>>, vector<128x64xbf16>
    tpu.vector_store %arg9[%c0_137, %c512], %96 {strides = array<i32>} : memref<128x576xbf16, #tpu.memory_space<vmem>>, vector<128x64xbf16>,
    %c0_138 = arith.constant 0 : index
    %c0_139 = arith.constant 0 : index
    %98 = vector.load %arg9[%c0_138, %c0_139] : memref<128x576xbf16, #tpu.memory_space<vmem>>, vector<128x576xbf16>
    %c0_140 = arith.constant 0 : index
    %c0_141 = arith.constant 0 : index
    %99 = vector.load %arg3[%c0_140, %c0_141] : memref<576x64xbf16, #tpu.memory_space<vmem>>, vector<576x64xbf16>
    %cst_142 = arith.constant dense<0.000000e+00> : vector<128x64xf32>
    %100 = tpu.matmul %98, %99, %cst_142 {dimension_numbers = #tpu.dot_dimension_numbers<[1], [0], [0], [1], [0, 0, 1, 1], [], []>} : vector<128x576xbf16>, vector<576x64xbf16>, vector<128x64xf32> -> vector<128x64xf32>
    %101 = vector.broadcast %68 : vector<1x64xf32> to vector<128x64xf32>
    %102 = arith.addf %100, %101 : vector<128x64xf32>
    %cst_143 = arith.constant 0.000000e+00 : f32
    %103 = vector.broadcast %cst_143 : f32 to vector<128x64xf32>
    %104 = arith.maximumf %102, %103 : vector<128x64xf32>
    %105 = arith.truncf %104 : vector<128x64xf32> to vector<128x64xbf16>
    %c2_144 = arith.constant 2 : index
    %c0_145 = arith.constant 0 : index
    %106 = vector.load %arg5[%c2_144, %c0_145] : memref<3x64xf32, #tpu.memory_space<vmem>>, vector<1x64xf32>
    %107 = vector.shape_cast %105 : vector<128x64xbf16> to vector<2x8x8x64xbf16>
    %c0_146 = arith.constant 0 : index
    %c1_147 = arith.constant 1 : index
    %c1_148 = arith.constant 1 : index
    %c0_149 = arith.constant 0 : index
    %108 = vector.load %arg8[%c0_146, %c1_147, %c1_148, %c0_149] : memref<2x10x10x64xbf16, #tpu.memory_space<vmem>>, vector<2x8x8x64xbf16>
    tpu.vector_store %arg8[%c0_146, %c1_147, %c1_148, %c0_149], %107 {strides = array<i32>} : memref<2x10x10x64xbf16, #tpu.memory_space<vmem>>, vector<2x8x8x64xbf16>,
    %c0_150 = arith.constant 0 : index
    %c0_151 = arith.constant 0 : index
    %c0_152 = arith.constant 0 : index
    %c0_153 = arith.constant 0 : index
    %109 = vector.load %arg8[%c0_150, %c0_151, %c0_152, %c0_153] : memref<2x10x10x64xbf16, #tpu.memory_space<vmem>>, vector<2x8x8x64xbf16>
    %110 = vector.shape_cast %109 : vector<2x8x8x64xbf16> to vector<128x64xbf16>
    %c0_154 = arith.constant 0 : index
    %c0_155 = arith.constant 0 : index
    %111 = vector.load %arg9[%c0_154, %c0_155] : memref<128x576xbf16, #tpu.memory_space<vmem>>, vector<128x64xbf16>
    tpu.vector_store %arg9[%c0_154, %c0_155], %110 {strides = array<i32>} : memref<128x576xbf16, #tpu.memory_space<vmem>>, vector<128x64xbf16>,
    %c0_156 = arith.constant 0 : index
    %c0_157 = arith.constant 0 : index
    %c1_158 = arith.constant 1 : index
    %c0_159 = arith.constant 0 : index
    %112 = vector.load %arg8[%c0_156, %c0_157, %c1_158, %c0_159] : memref<2x10x10x64xbf16, #tpu.memory_space<vmem>>, vector<2x8x8x64xbf16>
    %113 = vector.shape_cast %112 : vector<2x8x8x64xbf16> to vector<128x64xbf16>
    %c0_160 = arith.constant 0 : index
    %c64_161 = arith.constant 64 : index
    %114 = vector.load %arg9[%c0_160, %c64_161] : memref<128x576xbf16, #tpu.memory_space<vmem>>, vector<128x64xbf16>
    tpu.vector_store %arg9[%c0_160, %c64_161], %113 {strides = array<i32>} : memref<128x576xbf16, #tpu.memory_space<vmem>>, vector<128x64xbf16>,
    %c0_162 = arith.constant 0 : index
    %c0_163 = arith.constant 0 : index
    %c2_164 = arith.constant 2 : index
    %c0_165 = arith.constant 0 : index
    %115 = vector.load %arg8[%c0_162, %c0_163, %c2_164, %c0_165] : memref<2x10x10x64xbf16, #tpu.memory_space<vmem>>, vector<2x8x8x64xbf16>
    %116 = vector.shape_cast %115 : vector<2x8x8x64xbf16> to vector<128x64xbf16>
    %c0_166 = arith.constant 0 : index
    %c128_167 = arith.constant 128 : index
    %117 = vector.load %arg9[%c0_166, %c128_167] : memref<128x576xbf16, #tpu.memory_space<vmem>>, vector<128x64xbf16>
    tpu.vector_store %arg9[%c0_166, %c128_167], %116 {strides = array<i32>} : memref<128x576xbf16, #tpu.memory_space<vmem>>, vector<128x64xbf16>,
    %c0_168 = arith.constant 0 : index
    %c1_169 = arith.constant 1 : index
    %c0_170 = arith.constant 0 : index
    %c0_171 = arith.constant 0 : index
    %118 = vector.load %arg8[%c0_168, %c1_169, %c0_170, %c0_171] : memref<2x10x10x64xbf16, #tpu.memory_space<vmem>>, vector<2x8x8x64xbf16>
    %119 = vector.shape_cast %118 : vector<2x8x8x64xbf16> to vector<128x64xbf16>
    %c0_172 = arith.constant 0 : index
    %c192_173 = arith.constant 192 : index
    %120 = vector.load %arg9[%c0_172, %c192_173] : memref<128x576xbf16, #tpu.memory_space<vmem>>, vector<128x64xbf16>
    tpu.vector_store %arg9[%c0_172, %c192_173], %119 {strides = array<i32>} : memref<128x576xbf16, #tpu.memory_space<vmem>>, vector<128x64xbf16>,
    %c0_174 = arith.constant 0 : index
    %c1_175 = arith.constant 1 : index
    %c1_176 = arith.constant 1 : index
    %c0_177 = arith.constant 0 : index
    %121 = vector.load %arg8[%c0_174, %c1_175, %c1_176, %c0_177] : memref<2x10x10x64xbf16, #tpu.memory_space<vmem>>, vector<2x8x8x64xbf16>
    %122 = vector.shape_cast %121 : vector<2x8x8x64xbf16> to vector<128x64xbf16>
    %c0_178 = arith.constant 0 : index
    %c256_179 = arith.constant 256 : index
    %123 = vector.load %arg9[%c0_178, %c256_179] : memref<128x576xbf16, #tpu.memory_space<vmem>>, vector<128x64xbf16>
    tpu.vector_store %arg9[%c0_178, %c256_179], %122 {strides = array<i32>} : memref<128x576xbf16, #tpu.memory_space<vmem>>, vector<128x64xbf16>,
    %c0_180 = arith.constant 0 : index
    %c1_181 = arith.constant 1 : index
    %c2_182 = arith.constant 2 : index
    %c0_183 = arith.constant 0 : index
    %124 = vector.load %arg8[%c0_180, %c1_181, %c2_182, %c0_183] : memref<2x10x10x64xbf16, #tpu.memory_space<vmem>>, vector<2x8x8x64xbf16>
    %125 = vector.shape_cast %124 : vector<2x8x8x64xbf16> to vector<128x64xbf16>
    %c0_184 = arith.constant 0 : index
    %c320_185 = arith.constant 320 : index
    %126 = vector.load %arg9[%c0_184, %c320_185] : memref<128x576xbf16, #tpu.memory_space<vmem>>, vector<128x64xbf16>
    tpu.vector_store %arg9[%c0_184, %c320_185], %125 {strides = array<i32>} : memref<128x576xbf16, #tpu.memory_space<vmem>>, vector<128x64xbf16>,
    %c0_186 = arith.constant 0 : index
    %c2_187 = arith.constant 2 : index
    %c0_188 = arith.constant 0 : index
    %c0_189 = arith.constant 0 : index
    %127 = vector.load %arg8[%c0_186, %c2_187, %c0_188, %c0_189] : memref<2x10x10x64xbf16, #tpu.memory_space<vmem>>, vector<2x8x8x64xbf16>
    %128 = vector.shape_cast %127 : vector<2x8x8x64xbf16> to vector<128x64xbf16>
    %c0_190 = arith.constant 0 : index
    %c384_191 = arith.constant 384 : index
    %129 = vector.load %arg9[%c0_190, %c384_191] : memref<128x576xbf16, #tpu.memory_space<vmem>>, vector<128x64xbf16>
    tpu.vector_store %arg9[%c0_190, %c384_191], %128 {strides = array<i32>} : memref<128x576xbf16, #tpu.memory_space<vmem>>, vector<128x64xbf16>,
    %c0_192 = arith.constant 0 : index
    %c2_193 = arith.constant 2 : index
    %c1_194 = arith.constant 1 : index
    %c0_195 = arith.constant 0 : index
    %130 = vector.load %arg8[%c0_192, %c2_193, %c1_194, %c0_195] : memref<2x10x10x64xbf16, #tpu.memory_space<vmem>>, vector<2x8x8x64xbf16>
    %131 = vector.shape_cast %130 : vector<2x8x8x64xbf16> to vector<128x64xbf16>
    %c0_196 = arith.constant 0 : index
    %c448_197 = arith.constant 448 : index
    %132 = vector.load %arg9[%c0_196, %c448_197] : memref<128x576xbf16, #tpu.memory_space<vmem>>, vector<128x64xbf16>
    tpu.vector_store %arg9[%c0_196, %c448_197], %131 {strides = array<i32>} : memref<128x576xbf16, #tpu.memory_space<vmem>>, vector<128x64xbf16>,
    %c0_198 = arith.constant 0 : index
    %c2_199 = arith.constant 2 : index
    %c2_200 = arith.constant 2 : index
    %c0_201 = arith.constant 0 : index
    %133 = vector.load %arg8[%c0_198, %c2_199, %c2_200, %c0_201] : memref<2x10x10x64xbf16, #tpu.memory_space<vmem>>, vector<2x8x8x64xbf16>
    %134 = vector.shape_cast %133 : vector<2x8x8x64xbf16> to vector<128x64xbf16>
    %c0_202 = arith.constant 0 : index
    %c512_203 = arith.constant 512 : index
    %135 = vector.load %arg9[%c0_202, %c512_203] : memref<128x576xbf16, #tpu.memory_space<vmem>>, vector<128x64xbf16>
    tpu.vector_store %arg9[%c0_202, %c512_203], %134 {strides = array<i32>} : memref<128x576xbf16, #tpu.memory_space<vmem>>, vector<128x64xbf16>,
    %c0_204 = arith.constant 0 : index
    %c0_205 = arith.constant 0 : index
    %136 = vector.load %arg9[%c0_204, %c0_205] : memref<128x576xbf16, #tpu.memory_space<vmem>>, vector<128x576xbf16>
    %c0_206 = arith.constant 0 : index
    %c0_207 = arith.constant 0 : index
    %137 = vector.load %arg4[%c0_206, %c0_207] : memref<576x64xbf16, #tpu.memory_space<vmem>>, vector<576x64xbf16>
    %cst_208 = arith.constant dense<0.000000e+00> : vector<128x64xf32>
    %138 = tpu.matmul %136, %137, %cst_208 {dimension_numbers = #tpu.dot_dimension_numbers<[1], [0], [0], [1], [0, 0, 1, 1], [], []>} : vector<128x576xbf16>, vector<576x64xbf16>, vector<128x64xf32> -> vector<128x64xf32>
    %139 = vector.broadcast %106 : vector<1x64xf32> to vector<128x64xf32>
    %140 = arith.addf %138, %139 : vector<128x64xf32>
    %c0_209 = arith.constant 0 : index
    %c0_210 = arith.constant 0 : index
    %141 = vector.load %arg10[%c0_209, %c0_210] : memref<128x64xf32, #tpu.memory_space<vmem>>, vector<128x64xf32>
    %142 = arith.addf %140, %141 : vector<128x64xf32>
    %cst_211 = arith.constant 0.000000e+00 : f32
    %143 = vector.broadcast %cst_211 : f32 to vector<128x64xf32>
    %144 = arith.maximumf %142, %143 : vector<128x64xf32>
    %145 = vector.shape_cast %144 : vector<128x64xf32> to vector<2x8x8x64xf32>
    %c0_212 = arith.constant 0 : index
    %c0_213 = arith.constant 0 : index
    %c0_214 = arith.constant 0 : index
    %c0_215 = arith.constant 0 : index
    %146 = vector.load %arg6[%c0_212, %c0_213, %c0_214, %c0_215] : memref<2x8x8x64xf32, #tpu.memory_space<vmem>>, vector<2x8x8x64xf32>
    tpu.vector_store %arg6[%c0_212, %c0_213, %c0_214, %c0_215], %145 {strides = array<i32>} : memref<2x8x8x64xf32, #tpu.memory_space<vmem>>, vector<2x8x8x64xf32>,
    return
  }
  func.func @transform_0(%arg0: i32) -> (i32, i32, i32, i32) {
    %c0_i32 = arith.constant 0 : i32
    %c0_i32_0 = arith.constant 0 : i32
    %c0_i32_1 = arith.constant 0 : i32
    %c0_i32_2 = arith.constant 0 : i32
    %c0_i32_3 = arith.constant 0 : i32
    return %c0_i32, %c0_i32_0, %c0_i32_1, %c0_i32_2 : i32, i32, i32, i32
  }
  func.func @transform_1(%arg0: i32) -> (i32, i32, i32) {
    %c0_i32 = arith.constant 0 : i32
    %c0_i32_0 = arith.constant 0 : i32
    %c0_i32_1 = arith.constant 0 : i32
    %c0_i32_2 = arith.constant 0 : i32
    return %c0_i32, %c0_i32_0, %c0_i32_1 : i32, i32, i32
  }
  func.func @transform_2(%arg0: i32) -> (i32, i32) {
    %c0_i32 = arith.constant 0 : i32
    %c0_i32_0 = arith.constant 0 : i32
    %c0_i32_1 = arith.constant 0 : i32
    return %c0_i32, %c0_i32_0 : i32, i32
  }
  func.func @transform_3(%arg0: i32) -> (i32, i32) {
    %c0_i32 = arith.constant 0 : i32
    %c0_i32_0 = arith.constant 0 : i32
    %c0_i32_1 = arith.constant 0 : i32
    return %c0_i32, %c0_i32_0 : i32, i32
  }
  func.func @transform_4(%arg0: i32) -> (i32, i32) {
    %c0_i32 = arith.constant 0 : i32
    %c0_i32_0 = arith.constant 0 : i32
    %c0_i32_1 = arith.constant 0 : i32
    return %c0_i32, %c0_i32_0 : i32, i32
  }
  func.func @transform_5(%arg0: i32) -> (i32, i32, i32, i32) {
    %c0_i32 = arith.constant 0 : i32
    %c0_i32_0 = arith.constant 0 : i32
    %c0_i32_1 = arith.constant 0 : i32
    %c0_i32_2 = arith.constant 0 : i32
    %c0_i32_3 = arith.constant 0 : i32
    return %c0_i32, %c0_i32_0, %c0_i32_1, %c0_i32_2 : i32, i32, i32, i32
  }
}

</mosaic_0001>

<bundles_post_ra>
// kernel: unet_residual_down_block_forward.1
= control target key start
LH: loop header
LB: loop body
LE: loop exit
PB: predicated region body
PF: predicated region fallthrough
CT: control target
= control target key end

     0   :  { %vm654_vm0 = vcmask 1041408   ;;  %vm22_vm1 = vcmask 27648   ;;  %vm24_vm2 = vcmask 24576   ;;  %v10048_v2 = vmov 0   ;;  %s13749_s0 = inlined_call_operand.vmem [shape: bf16[2,8,8,4], index: 0, kind: input, shape index: {}]   ;;  %s13750_s1 = inlined_call_operand.vmem [shape: bf16[9,4,64], index: 1, kind: input, shape index: {}]   ;;  %s13751_s2 = inlined_call_operand.vmem [shape: bf16[576,64], index: 2, kind: input, shape index: {}]   ;;  %s13752_s3 = inlined_call_operand.vmem [shape: bf16[576,64], index: 3, kind: input, shape index: {}]   ;;  %s13753_s4 = inlined_call_operand.vmem [shape: f32[3,64], index: 4, kind: input, shape index: {}]   ;;  %s13754_s5 = inlined_call_operand.hbm [shape: f32[2,8,8,64], index: 5, kind: output, shape index: {}]  }
   0x1   :  { %v8716_v0 = vld [vmem:[%s13750_s1 + $0x2] sm:$0x3]  ;;  %23 = vst.msk [vmem:[#allocation2] sm:$0xf] %vm22_vm1, %v10048_v2  ;;  %26 = vst.msk [vmem:[#allocation2 + $0x8] sm:$0xf] %vm22_vm1, %v10048_v2 }
   0x2   :  { %9821 = vmatprep.subr.msk.bf16.mxu1 %vm654_vm0, %v8716_v0  ;;  %9820 = vmatprep.subr.msk.bf16.mxu0 %vm654_vm0, %v8716_v0  ;;  %v656_v1 = vsel %vm654_vm0, %v8716_v0, 0  ;;  %25 = vst.msk [vmem:[#allocation2 + $0x4] sm:$0x1] %vm24_vm2, %v10048_v2  ;;  %27 = vst.msk [vmem:[#allocation2 + $0xc] sm:$0x1] %vm24_vm2, %v10048_v2  ;;  %vm3051_vm5 = vcmask 519168  }
   0x3   :  { %v10100_v3 = vld [vmem:[%s13749_s0] sm:$0xf]  ;;  %vm242_vm3 = vsmask.f32 7938  ;;  %28 = vst.msk [vmem:[#allocation2 + $0x10] sm:$0xf] %vm22_vm1, %v10048_v2  ;;  %9819 = vmatpush3.bf16.msra.mxu1 %v656_v1  ;;  %9609 = vmatpush3.bf16.msra.mxu0 %v656_v1 }
   0x4   :  { %29 = vst.msk [vmem:[#allocation2 + $0x14] sm:$0x1] %vm24_vm2, %v10048_v2  ;;  %31 = vst.msk [vmem:[#allocation2 + $0x1c] sm:$0x1] %vm24_vm2, %v10048_v2  ;;  %v81_v4 = vshrl.u32 %v10100_v3, 16  ;;  %v84_v5 = vshll.u32 %v10100_v3, 16 }
   0x5   :  { %30 = vst.msk [vmem:[#allocation2 + $0x18] sm:$0xf] %vm22_vm1, %v10048_v2  ;;  %32 = vst.msk [vmem:[#allocation2 + $0x20] sm:$0xf] %vm22_vm1, %v10048_v2  ;;  %vm248_vm4 = vsmask.f32 256 }
   0x6   :  { %33 = vst.msk [vmem:[#allocation2 + $0x24] sm:$0x1] %vm24_vm2, %v10048_v2  ;;  %35 = vst.msk [vmem:[#allocation2 + $0x2c] sm:$0x1] %vm24_vm2, %v10048_v2  ;;  %vm3053_vm6 = vcmask 516096   ;;  %v10181_v7 = vrot.slane %v81_v4, 7 }
   0x7   :  { %34 = vst.msk [vmem:[#allocation2 + $0x28] sm:$0xf] %vm22_vm1, %v10048_v2  ;;  %36 = vst.msk [vmem:[#allocation2 + $0x30] sm:$0xf] %vm22_vm1, %v10048_v2  ;;  %v10179_v6 = vld [vmem:[%s13749_s0 + $0x20] sm:$0xf] }
   0x8   :  { %37 = vst.msk [vmem:[#allocation2 + $0x34] sm:$0x1] %vm24_vm2, %v10048_v2  ;;  %39 = vst.msk [vmem:[#allocation2 + $0x3c] sm:$0x1] %vm24_vm2, %v10048_v2  ;;  %v145_v9 = vshrl.u32 %v10179_v6, 16  ;;  %v148_v10 = vshll.u32 %v10179_v6, 16  ;;  %v86_v15 = vor.u32 %v84_v5, %v10181_v7 }
   0x9   :  { %38 = vst.msk [vmem:[#allocation2 + $0x38] sm:$0xf] %vm22_vm1, %v10048_v2  ;;  %40 = vst.msk [vmem:[#allocation2 + $0x40] sm:$0xf] %vm22_vm1, %v10048_v2  ;;  %v359_v11 = vld [vmem:[%s13750_s1] sm:$0x3] }
   0xa   :  { %41 = vst.msk [vmem:[#allocation2 + $0x44] sm:$0x1] %vm24_vm2, %v10048_v2  ;;  %43 = vst.msk [vmem:[#allocation2 + $0x4c] sm:$0x1] %vm24_vm2, %v10048_v2  ;;  %vm376_vm9 = vsmask.f32 3328  ;;  %9822 = vmatprep.subr.msk.bf16.mxu1 %vm654_vm0, %v359_v11 }
   0xb   :  { %42 = vst.msk [vmem:[#allocation2 + $0x48] sm:$0xf] %vm22_vm1, %v10048_v2  ;;  %44 = vst.msk [vmem:[#allocation2 + $0x50] sm:$0xf] %vm22_vm1, %v10048_v2  ;;  %v65_v13 = vld [vmem:[%s13749_s0 + $0x4] sm:$0xf] }
   0xc   :  { %45 = vst.msk [vmem:[#allocation2 + $0x54] sm:$0x1] %vm24_vm2, %v10048_v2  ;;  %47 = vst.msk [vmem:[#allocation2 + $0x5c] sm:$0x1] %vm24_vm2, %v10048_v2  ;;  %v66_v14 = vld [vmem:[%s13749_s0 + $0x8] sm:$0xf] }
   0xd   :  { %46 = vst.msk [vmem:[#allocation2 + $0x58] sm:$0xf] %vm22_vm1, %v10048_v2  ;;  %48 = vst.msk [vmem:[#allocation2 + $0x60] sm:$0xf] %vm22_vm1, %v10048_v2  ;;  %v87_v16 = vrot.slane %v10181_v7, 4  ;;  %v13771_v17 = vmov 0 }
   0xe   :  { %49 = vst.msk [vmem:[#allocation2 + $0x64] sm:$0x1] %vm24_vm2, %v10048_v2  ;;  %51 = vst.msk [vmem:[#allocation2 + $0x6c] sm:$0x1] %vm24_vm2, %v10048_v2  ;;  %vm377_vm10 = vsmask.f32 7440 }
   0xf   :  { %50 = vst.msk [vmem:[#allocation2 + $0x68] sm:$0xf] %vm22_vm1, %v10048_v2  ;;  %52 = vst.msk [vmem:[#allocation2 + $0x70] sm:$0xf] %vm22_vm1, %v10048_v2  ;;  %v147_v18 = vrot.slane %v145_v9, 7  ;;  %v89_v19 = vshrl.u32 %v65_v13, 16 }
  0x10   :  { %53 = vst.msk [vmem:[#allocation2 + $0x74] sm:$0x1] %vm24_vm2, %v10048_v2  ;;  %55 = vst.msk [vmem:[#allocation2 + $0x7c] sm:$0x1] %vm24_vm2, %v10048_v2  ;;  %v92_v20 = vshll.u32 %v65_v13, 16  ;;  %v97_v21 = vshrl.u32 %v66_v14, 16 }
  0x11   :  { %54 = vst.msk [vmem:[#allocation2 + $0x78] sm:$0xf] %vm22_vm1, %v10048_v2  ;;  %56 = vst.msk [vmem:[#allocation2 + $0x80] sm:$0xf] %vm22_vm1, %v10048_v2  ;;  %v10298_v22 = vld [vmem:[%s13749_s0 + $0x24] sm:$0xf]  ;;  %v150_v26 = vor.u32 %v148_v10, %v147_v18 }
  0x12   :  { %57 = vst.msk [vmem:[#allocation2 + $0x84] sm:$0x1] %vm24_vm2, %v10048_v2  ;;  %59 = vst.msk [vmem:[#allocation2 + $0x8c] sm:$0x1] %vm24_vm2, %v10048_v2  ;;  %v244_v23 = vld [vmem:[#allocation2 + $0x8] sm:$0xf] }
  0x13   :  { %58 = vst.msk [vmem:[#allocation2 + $0x88] sm:$0xf] %vm22_vm1, %v10048_v2  ;;  %60 = vst.msk [vmem:[#allocation2 + $0x90] sm:$0xf] %vm22_vm1, %v10048_v2  ;;  %v250_v24 = vld [vmem:[#allocation2 + $0xc] sm:$0x1] }
  0x14   :  { %61 = vst.msk [vmem:[#allocation2 + $0x94] sm:$0x1] %vm24_vm2, %v10048_v2  ;;  %63 = vst.msk [vmem:[#allocation2 + $0x9c] sm:$0x1] %vm24_vm2, %v10048_v2  ;;  %v10300_v25 = vld [vmem:[#allocation2] sm:$0xf] }
  0x15   :  { %62 = vst.msk [vmem:[#allocation2 + $0x98] sm:$0xf] %vm22_vm1, %v10048_v2  ;;  %vm10185_vm7 = vmand %vm22_vm1, %vm242_vm3  ;;  %v10306_v29 = vld [vmem:[#allocation2 + $0x4] sm:$0x1]  ;;  %v380_v30 = vshrl.u32 %v10300_v25, 16  ;;  %v383_v31 = vshll.u32 %v10300_v25, 16 }
  0x16   :  { %3052 = vst.msk [vmem:[#allocation3] sm:$0xf] %vm3051_vm5, %v10048_v2  ;;  %3055 = vst.msk [vmem:[#allocation3 + $0x8] sm:$0xf] %vm3051_vm5, %v10048_v2  ;;  %v245_v27 = vsel %vm10185_vm7, %v86_v15, %v244_v23  ;;  %v295_v32 = vld [vmem:[#allocation2 + $0x58] sm:$0xf] }
  0x17   :  { %3054 = vst.msk [vmem:[#allocation3 + $0x4] sm:$0x1] %vm3053_vm6, %v10048_v2  ;;  %3056 = vst.msk [vmem:[#allocation3 + $0xc] sm:$0x1] %vm3053_vm6, %v10048_v2  ;;  %v389_v33 = vshll.u32 %v10306_v29, 16  ;;  %v151_v34 = vrot.slane %v147_v18, 4  ;;  %v296_v35 = vsel %vm10185_vm7, %v150_v26, %v295_v32 }
  0x18   :  { %3057 = vst.msk [vmem:[#allocation3 + $0x10] sm:$0xf] %vm3051_vm5, %v10048_v2  ;;  %3059 = vst.msk [vmem:[#allocation3 + $0x18] sm:$0xf] %vm3051_vm5, %v10048_v2  ;;  %v298_v36 = vld [vmem:[#allocation2 + $0x5c] sm:$0x1] }
  0x19   :  { %3058 = vst.msk [vmem:[#allocation3 + $0x14] sm:$0x1] %vm3053_vm6, %v10048_v2  ;;  %3060 = vst.msk [vmem:[#allocation3 + $0x1c] sm:$0x1] %vm3053_vm6, %v10048_v2  ;;  %v100_v37 = vshll.u32 %v66_v14, 16  ;;  %v382_v38 = vrot.slane %v380_v30, 4 }
  0x1a   :  { %3061 = vst.msk [vmem:[#allocation3 + $0x20] sm:$0xf] %vm3051_vm5, %v10048_v2  ;;  %3063 = vst.msk [vmem:[#allocation3 + $0x28] sm:$0xf] %vm3051_vm5, %v10048_v2  ;;  %v385_v39 = vrot.slane %v383_v31, 5  ;;  %v153_v45 = vshrl.u32 %v10298_v22, 16 }
  0x1b   :  { %3062 = vst.msk [vmem:[#allocation3 + $0x24] sm:$0x1] %vm3053_vm6, %v10048_v2  ;;  %3064 = vst.msk [vmem:[#allocation3 + $0x2c] sm:$0x1] %vm3053_vm6, %v10048_v2  ;;  %v10313_v40 = vld [vmem:[#allocation2 + $0x50] sm:$0xf] }
  0x1c   :  { %3065 = vst.msk [vmem:[#allocation3 + $0x30] sm:$0xf] %vm3051_vm5, %v10048_v2  ;;  %3067 = vst.msk [vmem:[#allocation3 + $0x38] sm:$0xf] %vm3051_vm5, %v10048_v2  ;;  %v10315_v41 = vld [vmem:[#allocation2 + $0x54] sm:$0x1]  ;;  %v386_v46 = vor.u32 %v385_v39, %v382_v38 }
  0x1d   :  { %3066 = vst.msk [vmem:[#allocation3 + $0x34] sm:$0x1] %vm3053_vm6, %v10048_v2  ;;  %3068 = vst.msk [vmem:[#allocation3 + $0x3c] sm:$0x1] %vm3053_vm6, %v10048_v2  ;;  %v492_v43 = vshrl.u32 %v10313_v40, 16  ;;  %v495_v44 = vshll.u32 %v10313_v40, 16 }
  0x1e   :  { %3069 = vst.msk [vmem:[#allocation3 + $0x40] sm:$0xf] %vm3051_vm5, %v10048_v2  ;;  %3071 = vst.msk [vmem:[#allocation3 + $0x48] sm:$0xf] %vm3051_vm5, %v10048_v2  ;;  %v501_v47 = vshll.u32 %v10315_v41, 16  ;;  %v91_v48 = vrot.slane %v89_v19, 7 }
  0x1f   :  { %3070 = vst.msk [vmem:[#allocation3 + $0x44] sm:$0x1] %vm3053_vm6, %v10048_v2  ;;  %3072 = vst.msk [vmem:[#allocation3 + $0x4c] sm:$0x1] %vm3053_vm6, %v10048_v2  ;;  %v253_v49 = vld [vmem:[#allocation2 + $0x10] sm:$0xf] }
  0x20   :  { %3073 = vst.msk [vmem:[#allocation3 + $0x50] sm:$0xf] %vm3051_vm5, %v10048_v2  ;;  %3075 = vst.msk [vmem:[#allocation3 + $0x58] sm:$0xf] %vm3051_vm5, %v10048_v2  ;;  %v10324_v50 = vsel %vm654_vm0, %v359_v11, 0  ;;  %v10326_v51 = vrot.slane %v389_v33, 5  ;;  %v94_v59 = vor.u32 %v92_v20, %v91_v48 }
  0x21   :  { %3074 = vst.msk [vmem:[#allocation3 + $0x54] sm:$0x1] %vm3053_vm6, %v10048_v2  ;;  %3076 = vst.msk [vmem:[#allocation3 + $0x5c] sm:$0x1] %vm3053_vm6, %v10048_v2  ;;  %v494_v52 = vrot.slane %v492_v43, 4  ;;  %v497_v53 = vrot.slane %v495_v44, 5 }
  0x22   :  { %3077 = vst.msk [vmem:[#allocation3 + $0x60] sm:$0xf] %vm3051_vm5, %v10048_v2  ;;  %3079 = vst.msk [vmem:[#allocation3 + $0x68] sm:$0xf] %vm3051_vm5, %v10048_v2  ;;  %v99_v54 = vrot.slane %v97_v21, 7  ;;  %v13774_v56 = vmov 0  ;;  %v254_v6 = vsel %vm10185_vm7, %v94_v59, %v253_v49 }
  0x23   :  { %3078 = vst.msk [vmem:[#allocation3 + $0x64] sm:$0x1] %vm3053_vm6, %v10048_v2  ;;  %3080 = vst.msk [vmem:[#allocation3 + $0x6c] sm:$0x1] %vm3053_vm6, %v10048_v2  ;;  %v256_v55 = vld [vmem:[#allocation2 + $0x14] sm:$0x1]  ;;  %v498_v61 = vor.u32 %v497_v53, %v494_v52 }
  0x24   :  { %3081 = vst.msk [vmem:[#allocation3 + $0x70] sm:$0xf] %vm3051_vm5, %v10048_v2  ;;  %3083 = vst.msk [vmem:[#allocation3 + $0x78] sm:$0xf] %vm3051_vm5, %v10048_v2  ;;  %v10334_v57 = vrot.slane %v386_v46, 4  ;;  %v972_v58 = vrot.slane %v10306_v29, 5  ;;  %v102_v62 = vor.u32 %v100_v37, %v99_v54 }
  0x25   :  { %3082 = vst.msk [vmem:[#allocation3 + $0x74] sm:$0x1] %vm3053_vm6, %v10048_v2  ;;  %3084 = vst.msk [vmem:[#allocation3 + $0x7c] sm:$0x1] %vm3053_vm6, %v10048_v2  ;;  %v95_v60 = vrot.slane %v91_v48, 4  ;;  %v103_v63 = vrot.slane %v99_v54, 4 }
  0x26   :  { %3085 = vst.msk [vmem:[#allocation3 + $0x80] sm:$0xf] %vm3051_vm5, %v10048_v2  ;;  %3087 = vst.msk [vmem:[#allocation3 + $0x88] sm:$0xf] %vm3051_vm5, %v10048_v2  ;;  %v259_v0 = vld [vmem:[#allocation2 + $0x18] sm:$0xf] }
  0x27   :  { %3086 = vst.msk [vmem:[#allocation3 + $0x84] sm:$0x1] %vm3053_vm6, %v10048_v2  ;;  %3088 = vst.msk [vmem:[#allocation3 + $0x8c] sm:$0x1] %vm3053_vm6, %v10048_v2  ;;  %v262_v1 = vld [vmem:[#allocation2 + $0x1c] sm:$0x1]  ;;  %v260_v20 = vsel %vm10185_vm7, %v102_v62, %v259_v0 }
  0x28   :  { %3089 = vst.msk [vmem:[#allocation3 + $0x90] sm:$0xf] %vm3051_vm5, %v10048_v2  ;;  %3091 = vst.msk [vmem:[#allocation3 + $0x98] sm:$0xf] %vm3051_vm5, %v10048_v2  ;;  %v10341_v5 = vrot.slane %v501_v47, 5  ;;  %v156_v10 = vshll.u32 %v10298_v22, 16 }
  0x29   :  { %3090 = vst.msk [vmem:[#allocation3 + $0x94] sm:$0x1] %vm3053_vm6, %v10048_v2  ;;  %3092 = vst.msk [vmem:[#allocation3 + $0x9c] sm:$0x1] %vm3053_vm6, %v10048_v2  ;;  %v155_v2 = vrot.slane %v153_v45, 7  ;;  %vm629_vm13 = vcmask 31744  }
  0x2a   :  { %vm10276_vm8 = vmand %vm24_vm2, %vm248_vm4  ;;  %246 = vst [vmem:[#allocation2 + $0x8] sm:$0xf] %v245_v27  ;;  %v74_v9 = vld [vmem:[%s13749_s0 + $0x28] sm:$0xf]  ;;  %v304_v22 = vld [vmem:[#allocation2 + $0x64] sm:$0x1] }
  0x2b   :  { %vm10291_vm11 = vmand %vm3053_vm6, %vm248_vm4  ;;  %v251_v28 = vsel %vm10276_vm8, %v87_v16, %v250_v24  ;;  %297 = vst [vmem:[#allocation2 + $0x58] sm:$0xf] %v296_v35  ;;  %v299_v42 = vsel %vm10276_vm8, %v151_v34, %v298_v36  ;;  %v257_v7 = vsel %vm10276_vm8, %v95_v60, %v256_v55  ;;  %v159_v21 = vrot.slane %v155_v2, 4  ;;  %v301_v34 = vld [vmem:[#allocation2 + $0x60] sm:$0xf] }
  0x2c   :  { %v13772_v17 = vsel %vm10291_vm11, 4294967295, %v13771_v17  ;;  %252 = vst [vmem:[#allocation2 + $0xc] sm:$0x1] %v251_v28  ;;  %300 = vst [vmem:[#allocation2 + $0x5c] sm:$0x1] %v299_v42  ;;  %v499_v27 = vrot.slane %v498_v61, 4  ;;  %v263_v28 = vsel %vm10276_vm8, %v103_v63, %v262_v1  ;;  %v158_v37 = vor.u32 %v156_v10, %v155_v2 }
  0x2d   :  { %13773 = vst [vmem:[#allocation9_spill] sm:$0xff] %v13772_v17  ;;  %vm10330_vm12 = vmor %vm376_vm9, %vm377_vm10  ;;  %v161_v38 = vshrl.u32 %v74_v9, 16  ;;  %v8765_v39 = vld [vmem:[%s13750_s1 + $0x4] sm:$0x3]  ;;  %v67_v42 = vld [vmem:[%s13749_s0 + $0xc] sm:$0xf]  ;;  %v305_v46 = vsel %vm10276_vm8, %v159_v21, %v304_v22 }
  0x2e   :  { %v13775_v56 = vsel %vm10330_vm12, 4294967295, %v13774_v56  ;;  %v392_v11 = vsel %vm10330_vm12, %v10334_v57, %v10326_v51  ;;  %255 = vst [vmem:[#allocation2 + $0x10] sm:$0xf] %v254_v6  ;;  %258 = vst [vmem:[#allocation2 + $0x14] sm:$0x1] %v257_v7  ;;  %v164_v45 = vshll.u32 %v74_v9, 16  ;;  %9823 = vmatprep.subr.msk.bf16.mxu0 %vm654_vm0, %v8765_v39  ;;  %v504_v48 = vsel %vm10330_vm12, %v499_v27, %v10341_v5 }
  0x2f   :  { %13776 = vst [vmem:[#allocation10_spill] sm:$0xff] %v13775_v56  ;;  %261 = vst [vmem:[#allocation2 + $0x18] sm:$0xf] %v260_v20  ;;  %v163_v49 = vrot.slane %v161_v38, 7  ;;  %v302_v51 = vsel %vm10185_vm7, %v158_v37, %v301_v34  ;;  %v105_v55 = vshrl.u32 %v67_v42, 16  ;;  %v10402_v7 = vsel %vm654_vm0, %v8765_v39, 0 }
  0x30   :  { %264 = vst [vmem:[#allocation2 + $0x1c] sm:$0x1] %v263_v28  ;;  %306 = vst [vmem:[#allocation2 + $0x64] sm:$0x1] %v305_v46  ;;  %v307_v6 = vld [vmem:[#allocation2 + $0x68] sm:$0xf] }
  0x31   :  { %v10337_v3 = vld [vmem:[#allocation2 + $0x8] sm:$0xf]  ;;  %303 = vst [vmem:[#allocation2 + $0x60] sm:$0xf] %v302_v51  ;;  %v166_v5 = vor.u32 %v164_v45, %v163_v49  ;;  %v310_v21 = vld [vmem:[#allocation2 + $0x6c] sm:$0x1] }
  0x32   :  { %v394_v13 = vshrl.u32 %v10337_v3, 16  ;;  %v397_v14 = vshll.u32 %v10337_v3, 16  ;;  %v10358_v16 = vld [vmem:[#allocation2 + $0x58] sm:$0xf]  ;;  %v8733_v57 = vcombine.low %v10300_v25, %v10337_v3  ;;  %v68_v27 = vld [vmem:[%s13749_s0 + $0x10] sm:$0xf] }
  0x33   :  { %v10339_v4 = vld [vmem:[#allocation2 + $0xc] sm:$0x1]  ;;  %v506_v18 = vshrl.u32 %v10358_v16, 16  ;;  %v509_v19 = vshll.u32 %v10358_v16, 16  ;;  %v10364_v26 = vld [vmem:[#allocation2 + $0x5c] sm:$0x1] }
  0x34   :  { %v403_v15 = vshll.u32 %v10339_v4, 16  ;;  %v396_v23 = vrot.slane %v394_v13, 4  ;;  %v399_v24 = vrot.slane %v397_v14, 5  ;;  %v976_v30 = vrot.slane %v10339_v4, 5 }
  0x35   :  { %v508_v31 = vrot.slane %v506_v18, 4  ;;  %v511_v32 = vrot.slane %v509_v19, 5  ;;  %v515_v33 = vshll.u32 %v10364_v26, 16  ;;  %v10384_v53 = vld [vmem:[#allocation2 + $0x10] sm:$0xf]  ;;  %v107_v28 = vrot.slane %v105_v55, 7 }
  0x36   :  { %v400_v35 = vor.u32 %v399_v24, %v396_v23  ;;  %v405_v36 = vrot.slane %v403_v15, 5  ;;  %v10386_v54 = vld [vmem:[#allocation2 + $0x14] sm:$0x1]  ;;  %v408_v61 = vshrl.u32 %v10384_v53, 16  ;;  %v411_v62 = vshll.u32 %v10384_v53, 16 }
  0x37   :  { %v512_v43 = vor.u32 %v511_v32, %v508_v31  ;;  %v517_v44 = vrot.slane %v515_v33, 5  ;;  %v417_v63 = vshll.u32 %v10386_v54, 16  ;;  %v10399_v2 = vld [vmem:[#allocation2 + $0x18] sm:$0xf]  ;;  %v10404_v10 = vld [vmem:[#allocation2 + $0x1c] sm:$0x1]  ;;  %v308_v24 = vsel %vm10185_vm7, %v166_v5, %v307_v6 }
  0x38   :  { %v401_v47 = vrot.slane %v400_v35, 4  ;;  %v410_v13 = vrot.slane %v408_v61, 4  ;;  %v413_v14 = vrot.slane %v411_v62, 5  ;;  %v980_v15 = vrot.slane %v10386_v54, 5  ;;  %v265_v31 = vld [vmem:[#allocation2 + $0x20] sm:$0xf] }
  0x39   :  { %v513_v52 = vrot.slane %v512_v43, 4  ;;  %v422_v18 = vshrl.u32 %v10399_v2, 16  ;;  %v425_v19 = vshll.u32 %v10399_v2, 16  ;;  %v431_v20 = vshll.u32 %v10404_v10, 16  ;;  %309 = vst [vmem:[#allocation2 + $0x68] sm:$0xf] %v308_v24 }
  0x3a   :  { %v406_v60 = vsel %vm10330_vm12, %v401_v47, %v405_v36  ;;  %v414_v22 = vor.u32 %v413_v14, %v410_v13  ;;  %v167_v23 = vrot.slane %v163_v49, 4  ;;  %v10417_v35 = vld [vmem:[#allocation2 + $0x64] sm:$0x1]  ;;  %v108_v36 = vshll.u32 %v67_v42, 16  ;;  %v10421_v39 = vld [vmem:[#allocation2 + $0x60] sm:$0xf] }
  0x3b   :  { %v8717_v0 = vcombine.low %v392_v11, %v406_v60  ;;  %v518_v1 = vsel %vm10330_vm12, %v513_v52, %v517_v44  ;;  %v419_v11 = vrot.slane %v417_v63, 5  ;;  %v424_v32 = vrot.slane %v422_v18, 4  ;;  %v268_v49 = vld [vmem:[#allocation2 + $0x24] sm:$0x1]  ;;  %v75_v42 = vld [vmem:[%s13749_s0 + $0x2c] sm:$0xf] }
  0x3c   :  { %v8721_v9 = vcombine.low %v504_v48, %v518_v1  ;;  %v427_v33 = vrot.slane %v425_v19, 5  ;;  %v433_v34 = vrot.slane %v431_v20, 5  ;;  %v415_v37 = vrot.slane %v414_v22, 4  ;;  %v76_v61 = vld [vmem:[%s13749_s0 + $0x30] sm:$0xf] }
  0x3d   :  { %9610 = vmatprep.mubr.msk.bf16.mxu0 %vm629_vm13, %v8717_v0  ;;  %v311_v38 = vsel %vm10276_vm8, %v167_v23, %v310_v21  ;;  %v529_v43 = vshll.u32 %v10417_v35, 16  ;;  %v111_v44 = vrot.slane %v107_v28, 4  ;;  %v520_v46 = vshrl.u32 %v10421_v39, 16  ;;  %v274_v19 = vld [vmem:[#allocation2 + $0x2c] sm:$0x1] }
  0x3e   :  { %9618 = vmatprep.mubr.msk.bf16.mxu1 %vm629_vm13, %v8721_v9  ;;  %v428_v45 = vor.u32 %v427_v33, %v424_v32  ;;  %312 = vst [vmem:[#allocation2 + $0x6c] sm:$0x1] %v311_v38  ;;  %v523_v47 = vshll.u32 %v10421_v39, 16  ;;  %v110_v48 = vor.u32 %v108_v36, %v107_v28  ;;  %v420_v51 = vsel %vm10330_vm12, %v415_v37, %v419_v11  ;;  %v271_v9 = vld [vmem:[#allocation2 + $0x28] sm:$0xf] }
  0x3f   :  { %v10431_v52 = vrot.slane %v529_v43, 5  ;;  %v113_v55 = vshrl.u32 %v68_v27, 16  ;;  %v116_v60 = vshll.u32 %v68_v27, 16  ;;  %v522_v63 = vrot.slane %v520_v46, 4  ;;  %v313_v22 = vld [vmem:[#allocation2 + $0x70] sm:$0xf] }
  0x40   :  { %v429_v62 = vrot.slane %v428_v45, 4  ;;  %v525_v0 = vrot.slane %v523_v47, 5  ;;  %v266_v1 = vsel %vm10185_vm7, %v110_v48, %v265_v31  ;;  %v269_v6 = vsel %vm10276_vm8, %v111_v44, %v268_v49  ;;  %v10442_v24 = vld [vmem:[#allocation2 + $0x68] sm:$0xf]  ;;  %v316_v32 = vld [vmem:[#allocation2 + $0x74] sm:$0x1] }
  0x41   :  { %v115_v5 = vrot.slane %v113_v55, 7  ;;  %267 = vst [vmem:[#allocation2 + $0x20] sm:$0xf] %v266_v1  ;;  %v169_v13 = vshrl.u32 %v75_v42, 16  ;;  %v172_v14 = vshll.u32 %v75_v42, 16  ;;  %v177_v20 = vshrl.u32 %v76_v61, 16 }
  0x42   :  { %v434_v11 = vsel %vm10330_vm12, %v429_v62, %v433_v34  ;;  %v526_v18 = vor.u32 %v525_v0, %v522_v63  ;;  %270 = vst [vmem:[#allocation2 + $0x24] sm:$0x1] %v269_v6  ;;  %v180_v21 = vshll.u32 %v76_v61, 16  ;;  %v534_v36 = vshrl.u32 %v10442_v24, 16  ;;  %v319_v34 = vld [vmem:[#allocation2 + $0x78] sm:$0xf] }
  0x43   :  { %v8718_v23 = vcombine.low %v420_v51, %v434_v11  ;;  %v118_v27 = vor.u32 %v116_v60, %v115_v5  ;;  %v119_v28 = vrot.slane %v115_v5, 4  ;;  %v171_v31 = vrot.slane %v169_v13, 7  ;;  %v69_v48 = vld [vmem:[%s13749_s0 + $0x14] sm:$0xf]  ;;  %v322_v60 = vld [vmem:[#allocation2 + $0x7c] sm:$0x1] }
  0x44   :  { %v527_v33 = vrot.slane %v526_v18, 4  ;;  %v537_v37 = vshll.u32 %v10442_v24, 16  ;;  %v179_v38 = vrot.slane %v177_v20, 7  ;;  %v536_v42 = vrot.slane %v534_v36, 4  ;;  %v10471_v1 = vld [vmem:[%s13749_s0 + $0x34] sm:$0xf] }
  0x45   :  { %9611 = vmatmul.mubr.msk.bf16.vlgmr.msra.gmra.mxu0 %vm629_vm13, %v8718_v23  ;;  %v10447_v43 = vld [vmem:[#allocation2 + $0x6c] sm:$0x1]  ;;  %v272_v44 = vsel %vm10185_vm7, %v118_v27, %v271_v9  ;;  %v275_v45 = vsel %vm10276_vm8, %v119_v28, %v274_v19  ;;  %v174_v46 = vor.u32 %v172_v14, %v171_v31  ;;  %v175_v47 = vrot.slane %v171_v31, 4  ;;  %v927_v54 = vld [vmem:[#allocation2 + $0x50] sm:$0xe] }
  0x46   :  { %v532_v49 = vsel %vm10330_vm12, %v527_v33, %v10431_v52  ;;  %v539_v51 = vrot.slane %v537_v37, 5  ;;  %v543_v55 = vshll.u32 %v10447_v43, 16  ;;  %9645 = vmatpush3.bf16.msra.mxu0 %v10402_v7  ;;  %273 = vst [vmem:[#allocation2 + $0x28] sm:$0xf] %v272_v44  ;;  %276 = vst [vmem:[#allocation2 + $0x2c] sm:$0x1] %v275_v45  ;;  %v182_v61 = vor.u32 %v180_v21, %v179_v38 }
  0x47   :  { %v183_v62 = vrot.slane %v179_v38, 4  ;;  %v314_v63 = vsel %vm10185_vm7, %v174_v46, %v313_v22  ;;  %v317_v0 = vsel %vm10276_vm8, %v175_v47, %v316_v32  ;;  %v70_v52 = vld [vmem:[%s13749_s0 + $0x18] sm:$0xf]  ;;  %v121_v9 = vshrl.u32 %v69_v48, 16  ;;  %v277_v33 = vld [vmem:[#allocation2 + $0x30] sm:$0xf] }
  0x48   :  { %v540_v7 = vor.u32 %v539_v51, %v536_v42  ;;  %v545_v5 = vrot.slane %v543_v55, 5  ;;  %v10473_v6 = vld [vmem:[#allocation2 + $0x20] sm:$0xf]  ;;  %315 = vst [vmem:[#allocation2 + $0x70] sm:$0xf] %v314_v63  ;;  %v124_v13 = vshll.u32 %v69_v48, 16  ;;  %v320_v19 = vsel %vm10185_vm7, %v182_v61, %v319_v34 }
  0x49   :  { %318 = vst [vmem:[#allocation2 + $0x74] sm:$0x1] %v317_v0  ;;  %v10475_v14 = vld [vmem:[#allocation2 + $0x24] sm:$0x1]  ;;  %v436_v11 = vshrl.u32 %v10473_v6, 16  ;;  %v439_v18 = vshll.u32 %v10473_v6, 16  ;;  %v323_v20 = vsel %vm10276_vm8, %v183_v62, %v322_v60 }
  0x4a   :  { %v541_v21 = vrot.slane %v540_v7, 4  ;;  %v445_v22 = vshll.u32 %v10475_v14, 16  ;;  %321 = vst [vmem:[#allocation2 + $0x78] sm:$0xf] %v320_v19  ;;  %324 = vst [vmem:[#allocation2 + $0x7c] sm:$0x1] %v323_v20 }
  0x4b   :  { %v123_v23 = vrot.slane %v121_v9, 7  ;;  %v129_v27 = vshrl.u32 %v70_v52, 16  ;;  %v438_v28 = vrot.slane %v436_v11, 4  ;;  %v441_v31 = vrot.slane %v439_v18, 5  ;;  %v280_v45 = vld [vmem:[#allocation2 + $0x34] sm:$0x1] }
  0x4c   :  { %v132_v32 = vshll.u32 %v70_v52, 16  ;;  %v185_v36 = vshrl.u32 %v10471_v1, 16  ;;  %v546_v37 = vsel %vm10330_vm12, %v541_v21, %v545_v5  ;;  %v10487_v38 = vrot.slane %v445_v22, 5  ;;  %v283_v46 = vld [vmem:[#allocation2 + $0x38] sm:$0xf] }
  0x4d   :  { %v126_v34 = vor.u32 %v124_v13, %v123_v23  ;;  %v127_v44 = vrot.slane %v123_v23, 4  ;;  %v8722_v47 = vcombine.low %v532_v49, %v546_v37  ;;  %v10489_v48 = vld [vmem:[#allocation2 + $0x28] sm:$0xf]  ;;  %v10491_v42 = vld [vmem:[#allocation2 + $0x2c] sm:$0x1]  ;;  %v442_v51 = vor.u32 %v441_v31, %v438_v28 }
  0x4e   :  { %v131_v55 = vrot.slane %v129_v27, 7  ;;  %v10493_v60 = vrot.slane %v185_v36, 7  ;;  %v450_v61 = vshrl.u32 %v10489_v48, 16  ;;  %v453_v62 = vshll.u32 %v10489_v48, 16  ;;  %v286_v52 = vld [vmem:[#allocation2 + $0x3c] sm:$0x1] }
  0x4f   :  { %v459_v63 = vshll.u32 %v10491_v42, 16  ;;  %v278_v0 = vsel %vm10185_vm7, %v126_v34, %v277_v33  ;;  %v10503_v49 = vld [vmem:[%s13750_s1 + $0x6] sm:$0x3]  ;;  %9619 = vmatmul.mubr.msk.bf16.vlgmr.msra.gmra.mxu1 %vm629_vm13, %v8722_v47  ;;  %v443_v7 = vrot.slane %v442_v51, 4  ;;  %v10506_v5 = vld [vmem:[#allocation2 + $0x70] sm:$0xf]  ;;  %v281_v18 = vsel %vm10276_vm8, %v127_v44, %v280_v45 }
  0x50   :  { %v10508_v9 = vld [vmem:[#allocation2 + $0x74] sm:$0x1]  ;;  %v134_v13 = vor.u32 %v132_v32, %v131_v55  ;;  %v135_v11 = vrot.slane %v131_v55, 4  ;;  %279 = vst [vmem:[#allocation2 + $0x30] sm:$0xf] %v278_v0  ;;  %9627 = vmatpush3.bf16.msra.mxu1 %v10324_v50  ;;  %v452_v19 = vrot.slane %v450_v61, 4 }
  0x51   :  { %v455_v20 = vrot.slane %v453_v62, 5  ;;  %v461_v21 = vrot.slane %v459_v63, 5  ;;  %v548_v22 = vshrl.u32 %v10506_v5, 16  ;;  %282 = vst [vmem:[#allocation2 + $0x34] sm:$0x1] %v281_v18  ;;  %vm967_vm14 = vcmask 1042432   ;;  %9824 = vmatprep.subr.msk.bf16.mxu1 %vm654_vm0, %v10503_v49 }
  0x52   :  { %v10517_v23 = vld [vmem:[%s13749_s0 + $0x38] sm:$0xf]  ;;  %vm968_vm15 = vcmask 1046532   ;;  %v448_v27 = vsel %vm10330_vm12, %v443_v7, %v10487_v38  ;;  %v10524_v50 = vld [vmem:[#allocation2 + $0x7c] sm:$0x1]  ;;  %v551_v31 = vshll.u32 %v10506_v5, 16  ;;  %v284_v33 = vsel %vm10185_vm7, %v134_v13, %v283_v46 }
  0x53   :  { %v10522_v28 = vld [vmem:[#allocation2 + $0x78] sm:$0xf]  ;;  %v557_v32 = vshll.u32 %v10508_v9, 16  ;;  %v456_v36 = vor.u32 %v455_v20, %v452_v19  ;;  %v550_v37 = vrot.slane %v548_v22, 4  ;;  %285 = vst [vmem:[#allocation2 + $0x38] sm:$0xf] %v284_v33  ;;  %v287_v46 = vsel %vm10276_vm8, %v135_v11, %v286_v52  ;;  %vm10575_vm1 = vmor %vm967_vm14, %vm968_vm15 }
  0x54   :  { %v562_v34 = vshrl.u32 %v10522_v28, 16  ;;  %v565_v38 = vshll.u32 %v10522_v28, 16  ;;  %v10537_v44 = vld [vmem:[%s13750_s1 + $0x8] sm:$0x3]  ;;  %v553_v45 = vrot.slane %v551_v31, 5  ;;  %v571_v51 = vshll.u32 %v10524_v50, 16 }
  0x55   :  { %v559_v47 = vrot.slane %v557_v32, 5  ;;  %9825 = vmatprep.subr.msk.bf16.mxu0 %vm654_vm0, %v10537_v44  ;;  %v457_v55 = vrot.slane %v456_v36, 4  ;;  %288 = vst [vmem:[#allocation2 + $0x3c] sm:$0x1] %v287_v46  ;;  %v188_v63 = vshll.u32 %v10471_v1, 16  ;;  %v191_v13 = vrot.slane %v10493_v60, 4 }
  0x56   :  { %v564_v61 = vrot.slane %v562_v34, 4  ;;  %v567_v62 = vrot.slane %v565_v38, 5  ;;  %v554_v0 = vor.u32 %v553_v45, %v550_v37  ;;  %v573_v7 = vrot.slane %v571_v51, 5  ;;  %v325_v19 = vld [vmem:[#allocation2 + $0x80] sm:$0xf] }
  0x57   :  { %v193_v18 = vshrl.u32 %v10517_v23, 16  ;;  %v462_v20 = vsel %vm10330_vm12, %v457_v55, %v461_v21  ;;  %v10549_v11 = vld [vmem:[#allocation2 + $0x30] sm:$0xf]  ;;  %v190_v22 = vor.u32 %v188_v63, %v10493_v60  ;;  %v196_v31 = vshll.u32 %v10517_v23, 16  ;;  %v328_v32 = vld [vmem:[#allocation2 + $0x84] sm:$0x1] }
  0x58   :  { %v568_v52 = vor.u32 %v567_v62, %v564_v61  ;;  %v8719_v33 = vcombine.low %v448_v27, %v462_v20  ;;  %v555_v1 = vrot.slane %v554_v0, 4  ;;  %v10553_v36 = vld [vmem:[#allocation2 + $0x34] sm:$0x1]  ;;  %v464_v37 = vshrl.u32 %v10549_v11, 16  ;;  %v331_v46 = vld [vmem:[#allocation2 + $0x88] sm:$0xf] }
  0x59   :  { %v467_v34 = vshll.u32 %v10549_v11, 16  ;;  %v473_v45 = vshll.u32 %v10553_v36, 16  ;;  %v195_v21 = vrot.slane %v193_v18, 7  ;;  %v326_v51 = vsel %vm10185_vm7, %v190_v22, %v325_v19  ;;  %v334_v60 = vld [vmem:[#allocation2 + $0x8c] sm:$0x1] }
  0x5a   :  { %v569_v38 = vrot.slane %v568_v52, 4  ;;  %9614 = vmatprep.mubr.msk.bf16.mxu0 %vm629_vm13, %v8719_v33  ;;  %v560_v23 = vsel %vm10330_vm12, %v555_v1, %v559_v47  ;;  %v10563_v27 = vld [vmem:[#allocation2 + $0x38] sm:$0xf]  ;;  %v466_v55 = vrot.slane %v464_v37, 4  ;;  %327 = vst [vmem:[#allocation2 + $0x80] sm:$0xf] %v326_v51  ;;  %v329_v62 = vsel %vm10276_vm8, %v191_v13, %v328_v32 }
  0x5b   :  { %v469_v61 = vrot.slane %v467_v34, 5  ;;  %v919_v63 = vld [vmem:[#allocation2] sm:$0xe]  ;;  %v475_v18 = vrot.slane %v473_v45, 5  ;;  %v478_v19 = vshrl.u32 %v10563_v27, 16  ;;  %v481_v20 = vshll.u32 %v10563_v27, 16 }
  0x5c   :  { %v574_v0 = vsel %vm10330_vm12, %v569_v38, %v573_v7  ;;  %330 = vst [vmem:[#allocation2 + $0x84] sm:$0x1] %v329_v62  ;;  %v920_v52 = vld [vmem:[#allocation2 + $0x8] sm:$0xe]  ;;  %v10571_v22 = vld [vmem:[#allocation2 + $0x3c] sm:$0x1]  ;;  %v198_v1 = vor.u32 %v196_v31, %v195_v21 }
  0x5d   :  { %v8723_v47 = vcombine.low %v560_v23, %v574_v0  ;;  %v470_v33 = vor.u32 %v469_v61, %v466_v55  ;;  %v199_v37 = vrot.slane %v195_v21, 4  ;;  %v13777_v13 = vmov 0  ;;  %v921_v7 = vld [vmem:[#allocation2 + $0x10] sm:$0xe]  ;;  %v922_v51 = vld [vmem:[#allocation2 + $0x18] sm:$0xe] }
  0x5e   :  { %v13778_v13 = vsel %vm10575_vm1, 4294967295, %v13777_v13  ;;  %v480_v32 = vrot.slane %v478_v19, 4  ;;  %v483_v34 = vrot.slane %v481_v20, 5  ;;  %v487_v38 = vshll.u32 %v10571_v22, 16  ;;  %v924_v4 = vld [vmem:[#allocation2 + $0x28] sm:$0xe] }
  0x5f   :  { %13779 = vst [vmem:[#allocation11_spill] sm:$0xff] %v13778_v13  ;;  %v8749_v45 = vrot.slane %v919_v63, 9  ;;  %9622 = vmatprep.mubr.msk.bf16.mxu1 %vm629_vm13, %v8723_v47  ;;  %v471_v23 = vrot.slane %v470_v33, 4  ;;  %v332_v31 = vsel %vm10185_vm7, %v198_v1, %v331_v46  ;;  %v335_v21 = vsel %vm10276_vm8, %v199_v37, %v334_v60  ;;  %v923_v47 = vld [vmem:[#allocation2 + $0x20] sm:$0xe] }
  0x60   :  { %v8750_v55 = vrot.slane %v920_v52, 9  ;;  %v984_v61 = vrot.slane %v10404_v10, 5  ;;  %v484_v62 = vor.u32 %v483_v34, %v480_v32  ;;  %v489_v0 = vrot.slane %v487_v38, 5  ;;  %333 = vst [vmem:[#allocation2 + $0x88] sm:$0xf] %v332_v31 }
  0x61   :  { %336 = vst [vmem:[#allocation2 + $0x8c] sm:$0x1] %v335_v21  ;;  %v973_v63 = vsel %vm10575_vm1, %v8749_v45, %v972_v58  ;;  %v8751_v19 = vrot.slane %v921_v7, 9  ;;  %v8752_v20 = vrot.slane %v922_v51, 9  ;;  %v476_v60 = vsel %vm10330_vm12, %v471_v23, %v475_v18  ;;  %v10596_v52 = vld [vmem:[#allocation2 + $0x80] sm:$0xf] }
  0x62   :  { %v977_v46 = vsel %vm10575_vm1, %v8750_v55, %v976_v30  ;;  %v485_v10 = vrot.slane %v484_v62, 4  ;;  %v576_v29 = vshrl.u32 %v10596_v52, 16  ;;  %v579_v58 = vshll.u32 %v10596_v52, 16  ;;  %v925_v32 = vld [vmem:[#allocation2 + $0x30] sm:$0xe] }
  0x63   :  { %v10598_v33 = vld [vmem:[#allocation2 + $0x84] sm:$0x1]  ;;  %v8766_v1 = vcombine.low %v973_v63, %v977_v46  ;;  %v981_v18 = vsel %vm10575_vm1, %v8751_v19, %v980_v15  ;;  %v985_v7 = vsel %vm10575_vm1, %v8752_v20, %v984_v61  ;;  %v8753_v51 = vrot.slane %v923_v47, 9  ;;  %v926_v23 = vld [vmem:[#allocation2 + $0x38] sm:$0xe] }
  0x64   :  { %v490_v30 = vsel %vm10330_vm12, %v485_v10, %v489_v0  ;;  %v585_v37 = vshll.u32 %v10598_v33, 16  ;;  %v578_v38 = vrot.slane %v576_v29, 4  ;;  %v581_v45 = vrot.slane %v579_v58, 5  ;;  %v928_v0 = vld [vmem:[#allocation2 + $0x58] sm:$0xe] }
  0x65   :  { %v8720_v34 = vcombine.low %v476_v60, %v490_v30  ;;  %v1004_v31 = vrot.slane %v10315_v41, 5  ;;  %v988_v21 = vrot.slane %v10475_v14, 5  ;;  %v8754_v55 = vrot.slane %v924_v4, 9  ;;  %v1823_v8 = vld [vmem:[#allocation2 + $0x20] sm:$0xe] }
  0x66   :  { %v992_v62 = vrot.slane %v10491_v42, 5  ;;  %v1008_v15 = vrot.slane %v10364_v26, 5  ;;  %v582_v46 = vor.u32 %v581_v45, %v578_v38  ;;  %v587_v19 = vrot.slane %v585_v37, 5  ;;  %v929_v42 = vld [vmem:[#allocation2 + $0x60] sm:$0xe] }
  0x67   :  { %9615 = vmatmul.mubr.msk.bf16.gmra.mxu0 %vm629_vm13, %v8720_v34  ;;  %v10616_v61 = vld [vmem:[#allocation2 + $0x88] sm:$0xf]  ;;  %v8767_v20 = vcombine.low %v981_v18, %v985_v7  ;;  %v989_v26 = vsel %vm10575_vm1, %v8753_v51, %v988_v21  ;;  %v8755_v29 = vrot.slane %v925_v32, 9  ;;  %v996_v58 = vrot.slane %v10553_v36, 5  ;;  %v931_v32 = vld [vmem:[#allocation2 + $0x70] sm:$0xe] }
  0x68   :  { %v10618_v63 = vld [vmem:[#allocation2 + $0x8c] sm:$0x1]  ;;  %v590_v41 = vshrl.u32 %v10616_v61, 16  ;;  %v593_v14 = vshll.u32 %v10616_v61, 16  ;;  %9646 = vmatprep.mubr.msk.bf16.mxu0 %vm629_vm13, %v8766_v1  ;;  %v583_v10 = vrot.slane %v582_v46, 4  ;;  %v993_v47 = vsel %vm10575_vm1, %v8754_v55, %v992_v62 }
  0x69   :  { %v599_v60 = vshll.u32 %v10618_v63, 16  ;;  %v8756_v18 = vrot.slane %v926_v23, 9  ;;  %v930_v7 = vld [vmem:[#allocation2 + $0x68] sm:$0xe]  ;;  %v8768_v34 = vcombine.low %v989_v26, %v993_v47  ;;  %v1000_v38 = vrot.slane %v10571_v22, 5 }
  0x6a   :  { %v592_v4 = vrot.slane %v590_v41, 4  ;;  %v595_v30 = vrot.slane %v593_v14, 5  ;;  %v8757_v1 = vrot.slane %v927_v54, 9  ;;  %v8758_v45 = vrot.slane %v928_v0, 9  ;;  %v932_v54 = vld [vmem:[#allocation2 + $0x78] sm:$0xe] }
  0x6b   :  { %v601_v37 = vrot.slane %v599_v60, 5  ;;  %v8738_v51 = vcombine.low %v10421_v39, %v10442_v24  ;;  %v8759_v21 = vrot.slane %v929_v42, 9  ;;  %v1012_v55 = vrot.slane %v10417_v35, 5  ;;  %v10648_v14 = vld [vmem:[%s13750_s1 + $0xc] sm:$0x3] }
  0x6c   :  { %v596_v59 = vor.u32 %v595_v30, %v592_v4  ;;  %v8734_v36 = vcombine.low %v10384_v53, %v10399_v2  ;;  %v1705_v23 = vsel %vm654_vm0, %v10537_v44, 0  ;;  %v997_v62 = vsel %vm10575_vm1, %v8755_v29, %v996_v58  ;;  %v10671_v58 = vld [vmem:[#allocation2 + $0xc] sm:$0x1]  ;;  %v1400_v4 = vld [vmem:[#allocation2 + $0x10] sm:$0xf] }
  0x6d   :  { %v8760_v22 = vrot.slane %v930_v7, 9  ;;  %v588_v0 = vsel %vm10330_vm12, %v583_v10, %v587_v19  ;;  %v1001_v41 = vsel %vm10575_vm1, %v8756_v18, %v1000_v38  ;;  %v1005_v35 = vsel %vm10575_vm1, %v8757_v1, %v1004_v31  ;;  %v933_v10 = vld [vmem:[#allocation2 + $0x80] sm:$0xe]  ;;  %v1402_v1 = vld [vmem:[#allocation2 + $0x18] sm:$0xf] }
  0x6e   :  { %v597_v46 = vrot.slane %v596_v59, 4  ;;  %v1009_v44 = vsel %vm10575_vm1, %v8758_v45, %v1008_v15  ;;  %v1016_v60 = vrot.slane %v10447_v43, 5  ;;  %v8761_v19 = vrot.slane %v931_v32, 9  ;;  %v1398_v15 = vld [vmem:[#allocation2 + $0x8] sm:$0xf] }
  0x6f   :  { %9647 = vmatmul.mubr.msk.bf16.vlgmr.msra.gmra.mxu0 %vm629_vm13, %v8767_v20  ;;  %v1020_v59 = vrot.slane %v10508_v9, 5  ;;  %v10660_v31 = vsel %vm10575_vm1, %v8759_v21, %v1012_v55  ;;  %v8762_v42 = vrot.slane %v932_v54, 9  ;;  %v1024_v20 = vrot.slane %v10524_v50, 5 }
  0x70   :  { %v602_v26 = vsel %vm10330_vm12, %v597_v46, %v601_v37  ;;  %9681 = vmatpush3.bf16.msra.mxu0 %v1705_v23  ;;  %9650 = vmatprep.mubr.msk.bf16.mxu0 %vm629_vm13, %v8768_v34  ;;  %v1283_v43 = vsel %vm654_vm0, %v10503_v49, 0  ;;  %v8735_v9 = vcombine.low %v10473_v6, %v10489_v48  ;;  %v10669_v29 = vsel %vm10575_vm1, %v8760_v22, %v1016_v60  ;;  %v934_v6 = vld [vmem:[#allocation2 + $0x88] sm:$0xe]  ;;  %v10681_v48 = vld [vmem:[#allocation2 + $0x14] sm:$0x1] }
  0x71   :  { %v8724_v47 = vcombine.low %v588_v0, %v602_v26  ;;  %9827 = vmatprep.subr.msk.bf16.mxu0 %vm654_vm0, %v10648_v14  ;;  %v8736_v50 = vcombine.low %v10549_v11, %v10563_v27  ;;  %v8769_v30 = vcombine.low %v997_v62, %v1001_v41  ;;  %v8770_v37 = vcombine.low %v1005_v35, %v1009_v44  ;;  %v10695_v23 = vld [vmem:[#allocation2 + $0x1c] sm:$0x1]  ;;  %v1404_v46 = vld [vmem:[#allocation2 + $0x20] sm:$0xf]  ;;  %v10707_v26 = vld [vmem:[#allocation2 + $0x24] sm:$0x1] }
  0x72   :  { %v10679_v49 = vsel %vm10575_vm1, %v8761_v19, %v1020_v59  ;;  %v8771_v18 = vcombine.low %v10660_v31, %v10669_v29  ;;  %v8763_v7 = vrot.slane %v933_v10, 9  ;;  %v1431_v34 = vshrl.u32 %v1398_v15, 16  ;;  %v1416_v11 = vld [vmem:[#allocation2 + $0x60] sm:$0xf] }
  0x73   :  { %9623 = vmatmul.mubr.msk.bf16.gmra.mxu1 %vm629_vm13, %v8724_v47  ;;  %v1434_v38 = vshll.u32 %v1398_v15, 16  ;;  %v10692_v45 = vsel %vm10575_vm1, %v8762_v42, %v1024_v20  ;;  %v1440_v21 = vshll.u32 %v10671_v58, 16  ;;  %v1445_v55 = vshrl.u32 %v1400_v4, 16 }
  0x74   :  { %9628 = vmatprep.mubr.msk.bf16.mxu1 %vm629_vm13, %v8733_v57  ;;  %v1448_v32 = vshll.u32 %v1400_v4, 16  ;;  %v1028_v62 = vrot.slane %v10598_v33, 5  ;;  %v1433_v22 = vrot.slane %v1431_v34, 4  ;;  %v1454_v0 = vshll.u32 %v10681_v48, 16  ;;  %v10705_v33 = vld [vmem:[%s13750_s1 + $0xa] sm:$0x3] }
  0x75   :  { %v1436_v54 = vrot.slane %v1434_v38, 5  ;;  %v8764_v25 = vrot.slane %v934_v6, 9  ;;  %v1032_v3 = vrot.slane %v10618_v63, 5  ;;  %v1447_v57 = vrot.slane %v1445_v55, 4 }
  0x76   :  { %v1450_v41 = vrot.slane %v1448_v32, 5  ;;  %v1442_v44 = vrot.slane %v1440_v21, 5  ;;  %v1459_v60 = vshrl.u32 %v1402_v1, 16  ;;  %v1462_v19 = vshll.u32 %v1402_v1, 16  ;;  %v10712_v1 = vld [vmem:[#allocation2 + $0x2c] sm:$0x1] }
  0x77   :  { %9651 = vmatmul.mubr.msk.bf16.gmra.mxu0 %vm629_vm13, %v8769_v30  ;;  %v1437_v35 = vor.u32 %v1436_v54, %v1433_v22  ;;  %v1468_v63 = vshll.u32 %v10695_v23, 16  ;;  %v1473_v42 = vshrl.u32 %v1404_v46, 16  ;;  %v1476_v20 = vshll.u32 %v1404_v46, 16  ;;  %v1406_v30 = vld [vmem:[#allocation2 + $0x28] sm:$0xf] }
  0x78   :  { %9654 = vmatprep.mubr.msk.bf16.mxu0 %vm629_vm13, %v8770_v37  ;;  %v1451_v59 = vor.u32 %v1450_v41, %v1447_v57  ;;  %v1456_v15 = vrot.slane %v1454_v0, 5  ;;  %v1461_v47 = vrot.slane %v1459_v60, 4  ;;  %v1464_v4 = vrot.slane %v1462_v19, 5  ;;  %v10727_v22 = vld [vmem:[#allocation2 + $0x34] sm:$0x1] }
  0x79   :  { %v1438_v10 = vrot.slane %v1437_v35, 4  ;;  %v8772_v37 = vcombine.low %v10679_v49, %v10692_v45  ;;  %v1475_v34 = vrot.slane %v1473_v42, 4  ;;  %v1478_v38 = vrot.slane %v1476_v20, 5  ;;  %v1408_v45 = vld [vmem:[#allocation2 + $0x30] sm:$0xf] }
  0x7a   :  { %v1452_v6 = vrot.slane %v1451_v59, 4  ;;  %v10720_v21 = vsel %vm10575_vm1, %v8763_v7, %v1028_v62  ;;  %v10724_v55 = vsel %vm10575_vm1, %v8764_v25, %v1032_v3  ;;  %v1465_v32 = vor.u32 %v1464_v4, %v1461_v47  ;;  %v1410_v19 = vld [vmem:[#allocation2 + $0x38] sm:$0xf]  ;;  %v292_v4 = vld [vmem:[#allocation2 + $0x44] sm:$0x1] }
  0x7b   :  { %9629 = vmatmul.mubr.msk.bf16.vlgmr.msra.gmra.mxu1 %vm629_vm13, %v8734_v36  ;;  %v1482_v49 = vshll.u32 %v10707_v26, 16  ;;  %v1443_v53 = vsel %vm10330_vm12, %v1438_v10, %v1442_v44  ;;  %v1470_v2 = vrot.slane %v1468_v63, 5  ;;  %v1479_v36 = vor.u32 %v1478_v38, %v1475_v34  ;;  %v1414_v10 = vld [vmem:[#allocation2 + $0x58] sm:$0xf] }
  0x7c   :  { %9663 = vmatpush3.bf16.msra.mxu1 %v1283_v43  ;;  %9632 = vmatprep.mubr.msk.bf16.mxu1 %vm629_vm13, %v8735_v9  ;;  %v1487_v7 = vshrl.u32 %v1406_v30, 16  ;;  %v1457_v62 = vsel %vm10330_vm12, %v1452_v6, %v1456_v15  ;;  %v1466_v54 = vrot.slane %v1465_v32, 4  ;;  %v1490_v0 = vshll.u32 %v1406_v30, 16  ;;  %v71_v43 = vld [vmem:[%s13749_s0 + $0x1c] sm:$0xf] }
  0x7d   :  { %9826 = vmatprep.subr.msk.bf16.mxu1 %vm654_vm0, %v10705_v33  ;;  %v1496_v46 = vshll.u32 %v10712_v1, 16  ;;  %v8773_v9 = vcombine.low %v10720_v21, %v10724_v55  ;;  %v1501_v3 = vshrl.u32 %v1408_v45, 16  ;;  %v1504_v57 = vshll.u32 %v1408_v45, 16  ;;  %v10750_v30 = vld [vmem:[#allocation2 + $0x3c] sm:$0x1] }
  0x7e   :  { %v1489_v25 = vrot.slane %v1487_v7, 4  ;;  %v1480_v41 = vrot.slane %v1479_v36, 4  ;;  %v1484_v35 = vrot.slane %v1482_v49, 5  ;;  %v1492_v44 = vrot.slane %v1490_v0, 5  ;;  %v10758_v32 = vld [vmem:[#allocation2 + $0x5c] sm:$0x1] }
  0x7f   :  { %9655 = vmatmul.mubr.msk.bf16.gmra.mxu0 %vm629_vm13, %v8771_v18  ;;  %v1510_v60 = vshll.u32 %v10727_v22, 16  ;;  %v8800_v59 = vcombine.low %v1443_v53, %v1457_v62  ;;  %v1503_v63 = vrot.slane %v1501_v3, 4  ;;  %v1506_v42 = vrot.slane %v1504_v57, 5  ;;  %v289_v18 = vld [vmem:[#allocation2 + $0x40] sm:$0xf] }
  0x80   :  { %9658 = vmatprep.mubr.msk.bf16.mxu0 %vm629_vm13, %v8772_v37  ;;  %v137_v20 = vshrl.u32 %v71_v43, 16  ;;  %v1471_v15 = vsel %vm10330_vm12, %v1466_v54, %v1470_v2  ;;  %v1493_v47 = vor.u32 %v1492_v44, %v1489_v25  ;;  %v1498_v31 = vrot.slane %v1496_v46, 5  ;;  %v1418_v46 = vld [vmem:[#allocation2 + $0x68] sm:$0xf] }
  0x81   :  { %v140_v29 = vshll.u32 %v71_v43, 16  ;;  %v1507_v6 = vor.u32 %v1506_v42, %v1503_v63  ;;  %v1515_v38 = vshrl.u32 %v1410_v19, 16  ;;  %v1518_v21 = vshll.u32 %v1410_v19, 16  ;;  %v1420_v19 = vld [vmem:[#allocation2 + $0x70] sm:$0xf] }
  0x82   :  { %v139_v34 = vrot.slane %v137_v20, 7  ;;  %v1485_v37 = vsel %vm10330_vm12, %v1480_v41, %v1484_v35  ;;  %v1512_v55 = vrot.slane %v1510_v60, 5  ;;  %v1543_v49 = vshrl.u32 %v1414_v10, 16  ;;  %v10772_v41 = vld [vmem:[#allocation2 + $0x64] sm:$0x1] }
  0x83   :  { %9633 = vmatmul.mubr.msk.bf16.gmra.mxu1 %vm629_vm13, %v8736_v50  ;;  %v1546_v45 = vshll.u32 %v1414_v10, 16  ;;  %v13780_v53 = vcombine.low %v10313_v40, %v10358_v16  ;;  %v1494_v2 = vrot.slane %v1493_v47, 4  ;;  %v1517_v62 = vrot.slane %v1515_v38, 4  ;;  %v10782_v10 = vld [vmem:[#allocation2 + $0x6c] sm:$0x1] }
  0x84   :  { %v142_v36 = vor.u32 %v140_v29, %v139_v34  ;;  %v143_v7 = vrot.slane %v139_v34, 4  ;;  %v1508_v27 = vrot.slane %v1507_v6, 4  ;;  %v1520_v50 = vrot.slane %v1518_v21, 5 }
  0x85   :  { %9636 = vmatprep.mubr.msk.bf16.mxu1 %vm629_vm13, %v13780_v53  ;;  %v1524_v54 = vshll.u32 %v10750_v30, 16  ;;  %v1545_v0 = vrot.slane %v1543_v49, 4  ;;  %v8739_v43 = vcombine.low %v10506_v5, %v10522_v28  ;;  %v1548_v16 = vrot.slane %v1546_v45, 5  ;;  %v10795_v53 = vld [vmem:[#allocation2 + $0x74] sm:$0x1] }
  0x86   :  { %v290_v25 = vsel %vm10185_vm7, %v142_v36, %v289_v18  ;;  %v293_v40 = vsel %vm10276_vm8, %v143_v7, %v292_v4  ;;  %v8801_v3 = vcombine.low %v1471_v15, %v1485_v37  ;;  %v1521_v57 = vor.u32 %v1520_v50, %v1517_v62  ;;  %v1424_v50 = vld [vmem:[#allocation2 + $0x80] sm:$0xf] }
  0x87   :  { %9659 = vmatmul.mubr.msk.bf16.gmra.mxu0 %vm629_vm13, %v8773_v9  ;;  %291 = vst [vmem:[#allocation2 + $0x40] sm:$0xf] %v290_v25  ;;  %294 = vst [vmem:[#allocation2 + $0x44] sm:$0x1] %v293_v40  ;;  %v1552_v35 = vshll.u32 %v10758_v32, 16  ;;  %v1557_v44 = vshrl.u32 %v1416_v11, 16  ;;  %v1499_v5 = vsel %vm10330_vm12, %v1494_v2, %v1498_v31  ;;  %v1549_v28 = vor.u32 %v1548_v16, %v1545_v0 }
  0x88   :  { %9682 = vmatprep.mubr.msk.bf16.mxu0 %vm629_vm13, %v8800_v59  ;;  %v1560_v60 = vshll.u32 %v1416_v11, 16  ;;  %v1571_v63 = vshrl.u32 %v1418_v46, 16  ;;  %v1513_v9 = vsel %vm10330_vm12, %v1508_v27, %v1512_v55  ;;  %v10780_v42 = vrot.slane %v1524_v54, 5  ;;  %v1422_v31 = vld [vmem:[#allocation2 + $0x78] sm:$0xf] }
  0x89   :  { %v1559_v20 = vrot.slane %v1557_v44, 4  ;;  %v1574_v15 = vshll.u32 %v1418_v46, 16  ;;  %v10784_v47 = vrot.slane %v1521_v57, 4  ;;  %v1566_v59 = vshll.u32 %v10772_v41, 16  ;;  %v10803_v27 = vld [vmem:[#allocation2 + $0x7c] sm:$0x1] }
  0x8a   :  { %v1562_v29 = vrot.slane %v1560_v60, 5  ;;  %v1573_v18 = vrot.slane %v1571_v63, 4  ;;  %v1550_v4 = vrot.slane %v1549_v28, 4  ;;  %v1554_v6 = vrot.slane %v1552_v35, 5  ;;  %v10810_v46 = vld [vmem:[#allocation2 + $0x84] sm:$0x1] }
  0x8b   :  { %9637 = vmatmul.mubr.msk.bf16.gmra.mxu1 %vm629_vm13, %v8738_v51  ;;  %v1576_v34 = vrot.slane %v1574_v15, 5  ;;  %v1585_v38 = vshrl.u32 %v1420_v19, 16  ;;  %v8802_v21 = vcombine.low %v1499_v5, %v1513_v9  ;;  %v1580_v55 = vshll.u32 %v10782_v10, 16  ;;  %v9842_v51 = vld [vmem:[#allocation2 + $0x8] ss:$8 sps:$4 sm:$0xff]  }
  0x8c   :  { %9640 = vmatprep.mubr.msk.bf16.mxu1 %vm629_vm13, %v8739_v43  ;;  %v1563_v37 = vor.u32 %v1562_v29, %v1559_v20  ;;  %v1588_v49 = vshll.u32 %v1420_v19, 16  ;;  %v2182_v45 = vsel %vm654_vm0, %v10648_v14, 0  ;;  %v1599_v39 = vshrl.u32 %v1422_v31, 16  ;;  %v79_v5 = vld [vmem:[%s13749_s0 + $0x3c] sm:$0xf] }
  0x8d   :  { %v1577_v2 = vor.u32 %v1576_v34, %v1573_v18  ;;  %v8740_v24 = vcombine.low %v10596_v52, %v10616_v61  ;;  %v1527_v7 = vsel %vm10330_vm12, %v10784_v47, %v10780_v42  ;;  %v1568_v62 = vrot.slane %v1566_v59, 5 }
  0x8e   :  { %v1412_v36 = vld [vmem:[#allocation2 + $0x40] sm:$0xf]  ;;  %v1587_v11 = vrot.slane %v1585_v38, 4  ;;  %v10806_v14 = vld [vmem:[#allocation2 + $0x44] sm:$0x1]  ;;  %v1555_v52 = vsel %vm10330_vm12, %v1550_v4, %v1554_v6  ;;  %v1564_v61 = vrot.slane %v1563_v37, 4 }
  0x8f   :  { %9683 = vmatmul.mubr.msk.bf16.vlgmr.msra.gmra.mxu0 %vm629_vm13, %v8801_v3  ;;  %v1529_v54 = vshrl.u32 %v1412_v36, 16  ;;  %v1532_v0 = vshll.u32 %v1412_v36, 16  ;;  %v1538_v43 = vshll.u32 %v10806_v14, 16  ;;  %v10814_v25 = vrot.slane %v1580_v55, 5  ;;  %v9843_v4 = vld [vmem:[#allocation2 + $0x18] ss:$8 sps:$4 sm:$0xff]  }
  0x90   :  { %9717 = vmatpush3.bf16.msra.mxu0 %v2182_v45  ;;  %9686 = vmatprep.mubr.msk.bf16.mxu0 %vm629_vm13, %v8802_v21  ;;  %v1590_v40 = vrot.slane %v1588_v49, 5  ;;  %v1594_v16 = vshll.u32 %v10795_v53, 16  ;;  %v10817_v35 = vrot.slane %v1577_v2, 4  ;;  %v1601_v44 = vrot.slane %v1599_v39, 4  ;;  %v1426_v37 = vld [vmem:[#allocation2 + $0x88] sm:$0xf] }
  0x91   :  { %v1531_v3 = vrot.slane %v1529_v54, 4  ;;  %v1534_v57 = vrot.slane %v1532_v0, 5  ;;  %v1540_v28 = vrot.slane %v1538_v43, 5  ;;  %v1569_v60 = vsel %vm10330_vm12, %v1564_v61, %v1568_v62  ;;  %v9844_v55 = vld [vmem:[#allocation2 + $0x28] ss:$8 sps:$4 sm:$0xff]  }
  0x92   :  { %v1591_v19 = vor.u32 %v1590_v40, %v1587_v11  ;;  %v1602_v63 = vshll.u32 %v1422_v31, 16  ;;  %v1608_v42 = vshll.u32 %v10803_v27, 16  ;;  %v1613_v20 = vshrl.u32 %v1424_v50, 16  ;;  %v340_v31 = vld [vmem:[#allocation2 + $0x94] sm:$0x1] }
  0x93   :  { %9641 = vmatmul.mubr.msk.bf16.gmra.mxu1 %vm629_vm13, %v8740_v24  ;;  %v1535_v9 = vor.u32 %v1534_v57, %v1531_v3  ;;  %v1616_v15 = vshll.u32 %v1424_v50, 16  ;;  %v1596_v47 = vrot.slane %v1594_v16, 5  ;;  %v1622_v59 = vshll.u32 %v10810_v46, 16  ;;  %v337_v24 = vld [vmem:[#allocation2 + $0x90] sm:$0xf] }
  0x94   :  { %9664 = vmatprep.mubr.msk.bf16.mxu1 %vm629_vm13, %v9842_v51  ;;  %v1604_v29 = vrot.slane %v1602_v63, 5  ;;  %v201_v18 = vshrl.u32 %v79_v5, 16  ;;  %v8804_v34 = vcombine.low %v1555_v52, %v1569_v60  ;;  %v1615_v38 = vrot.slane %v1613_v20, 4  ;;  %v10831_v51 = vld [vmem:[%s13750_s1 + $0x10] sm:$0x3] }
  0x95   :  { %v1536_v6 = vrot.slane %v1535_v9, 4  ;;  %v1618_v21 = vrot.slane %v1616_v15, 5  ;;  %v1592_v49 = vrot.slane %v1591_v19, 4  ;;  %v1610_v2 = vrot.slane %v1608_v42, 5  ;;  %v10835_v54 = vld [vmem:[#allocation2 + $0x8c] sm:$0x1]  ;;  %9829 = vmatprep.subr.msk.bf16.mxu0 %vm654_vm0, %v10831_v51 }
  0x96   :  { %v1605_v45 = vor.u32 %v1604_v29, %v1601_v44  ;;  %v203_v39 = vrot.slane %v201_v18, 7  ;;  %v1624_v11 = vrot.slane %v1622_v59, 5  ;;  %v204_v50 = vshll.u32 %v79_v5, 16  ;;  %v8866_v60 = vld [vmem:[%s13750_s1 + $0xe] sm:$0x3] }
  0x97   :  { %v1541_v36 = vsel %vm10330_vm12, %v1536_v6, %v1540_v28  ;;  %v1619_v62 = vor.u32 %v1618_v21, %v1615_v38  ;;  %v1627_v43 = vshrl.u32 %v1426_v37, 16  ;;  %v1983_v40 = vsel %vm654_vm0, %v10705_v33, 0  ;;  %v1820_v28 = vld [vmem:[#allocation2 + $0x8] sm:$0xe]  ;;  %v1821_v9 = vld [vmem:[#allocation2 + $0x10] sm:$0xe] }
  0x98   :  { %v8803_v0 = vcombine.low %v1527_v7, %v1541_v36  ;;  %v1606_v52 = vrot.slane %v1605_v45, 4  ;;  %v207_v61 = vrot.slane %v203_v39, 4  ;;  %v206_v3 = vor.u32 %v204_v50, %v203_v39  ;;  %v1822_v42 = vld [vmem:[#allocation2 + $0x18] sm:$0xe]  ;;  %v1825_v29 = vld [vmem:[#allocation2 + $0x30] sm:$0xe] }
  0x99   :  { %v1620_v16 = vrot.slane %v1619_v62, 4  ;;  %v1630_v57 = vshll.u32 %v1426_v37, 16  ;;  %v1583_v44 = vsel %vm10330_vm12, %v10817_v35, %v10814_v25  ;;  %v1629_v7 = vrot.slane %v1627_v43, 4  ;;  %v9845_v20 = vld [vmem:[#allocation2 + $0x38] ss:$8 sps:$4 sm:$0xff]  }
  0x9a   :  { %9687 = vmatmul.mubr.msk.bf16.gmra.mxu0 %vm629_vm13, %v8803_v0  ;;  %v341_v5 = vsel %vm10276_vm8, %v207_v61, %v340_v31  ;;  %v1597_v33 = vsel %vm10330_vm12, %v1592_v49, %v1596_v47  ;;  %v338_v19 = vsel %vm10185_vm7, %v206_v3, %v337_v24  ;;  %v1636_v12 = vshll.u32 %v10835_v54, 16  ;;  %v1824_v47 = vld [vmem:[#allocation2 + $0x28] sm:$0xe]  ;;  %v9846_v59 = vld [vmem:[#allocation2 + $0x58] ss:$8 sps:$4 sm:$0xff]  }
  0x9b   :  { %9665 = vmatmul.mubr.msk.bf16.vlgmr.msra.gmra.mxu1 %vm629_vm13, %v9843_v4  ;;  %9690 = vmatprep.mubr.msk.bf16.mxu0 %vm629_vm13, %v8804_v34  ;;  %342 = vst [vmem:[#allocation2 + $0x94] sm:$0x1] %v341_v5  ;;  %v1632_v25 = vrot.slane %v1630_v57, 5  ;;  %v1611_v35 = vsel %vm10330_vm12, %v1606_v52, %v1610_v2  ;;  %v1625_v63 = vsel %vm10330_vm12, %v1620_v16, %v1624_v11  ;;  %339 = vst [vmem:[#allocation2 + $0x90] sm:$0xf] %v338_v19 }
  0x9c   :  { %9699 = vmatpush3.bf16.msra.mxu1 %v1983_v40  ;;  %9668 = vmatprep.mubr.msk.bf16.mxu1 %vm629_vm13, %v9844_v55  ;;  %v8805_v18 = vcombine.low %v1583_v44, %v1597_v33  ;;  %v8816_v4 = vrot.slane %v1820_v28, 9  ;;  %v1826_v6 = vld [vmem:[#allocation2 + $0x38] sm:$0xe]  ;;  %v8806_v34 = vcombine.low %v1611_v35, %v1625_v63  ;;  %v10864_v38 = vrot.slane %v1636_v12, 5  ;;  %v1827_v2 = vld [vmem:[#allocation2 + $0x40] sm:$0xe] }
  0x9d   :  { %v1633_v15 = vor.u32 %v1632_v25, %v1629_v7  ;;  %9828 = vmatprep.subr.msk.bf16.mxu1 %vm654_vm0, %v8866_v60  ;;  %v1870_v21 = vrot.slane %v10671_v58, 5  ;;  %v8817_v31 = vrot.slane %v1821_v9, 9  ;;  %v1874_v37 = vrot.slane %v10681_v48, 5  ;;  %v9847_v40 = vld [vmem:[#allocation2 + $0x68] ss:$8 sps:$4 sm:$0xff]  }
  0x9e   :  { %v8818_v55 = vrot.slane %v1822_v42, 9  ;;  %v1878_v49 = vrot.slane %v10695_v23, 5  ;;  %v8819_v45 = vrot.slane %v1823_v8, 9  ;;  %v1882_v24 = vrot.slane %v10707_v26, 5  ;;  %v1828_v57 = vld [vmem:[#allocation2 + $0x58] sm:$0xe] }
  0x9f   :  { %v10869_v39 = vrot.slane %v1633_v15, 4  ;;  %v8820_v36 = vrot.slane %v1824_v47, 9  ;;  %v1886_v62 = vrot.slane %v10712_v1, 5  ;;  %v8821_v58 = vrot.slane %v1825_v29, 9  ;;  %v9848_v44 = vld [vmem:[#allocation2 + $0x78] ss:$8 sps:$4 sm:$0xff]  }
  0xa0   :  { %v1890_v50 = vrot.slane %v10727_v22, 5  ;;  %v8822_v48 = vrot.slane %v1826_v6, 9  ;;  %v1894_v0 = vrot.slane %v10750_v30, 5  ;;  %v8823_v52 = vrot.slane %v1827_v2, 9  ;;  %v1829_v19 = vld [vmem:[#allocation2 + $0x60] sm:$0xe] }
  0xa1   :  { %v1898_v26 = vrot.slane %v10806_v14, 5  ;;  %v10885_v22 = vsel %vm10575_vm1, %v8816_v4, %v1870_v21  ;;  %v10889_v30 = vsel %vm10575_vm1, %v8817_v31, %v1874_v37  ;;  %v10893_v16 = vsel %vm10575_vm1, %v8818_v55, %v1878_v49  ;;  %v1831_v63 = vld [vmem:[#allocation2 + $0x70] sm:$0xe]  ;;  %v1832_v9 = vld [vmem:[#allocation2 + $0x78] sm:$0xe] }
  0xa2   :  { %9691 = vmatmul.mubr.msk.bf16.gmra.mxu0 %vm629_vm13, %v8805_v18  ;;  %v10874_v11 = vld [vmem:[#allocation2 + $0x94] sm:$0x1]  ;;  %v1428_v23 = vld [vmem:[#allocation2 + $0x90] sm:$0xf]  ;;  %v10896_v14 = vsel %vm654_vm0, %v8866_v60, 0  ;;  %v10900_v3 = vsel %vm654_vm0, %v10831_v51, 0  ;;  %v1639_v5 = vsel %vm10330_vm12, %v10869_v39, %v10864_v38  ;;  %v10908_v33 = vsel %vm10575_vm1, %v8819_v45, %v1882_v24 }
  0xa3   :  { %9669 = vmatmul.mubr.msk.bf16.gmra.mxu1 %vm629_vm13, %v9845_v20  ;;  %9694 = vmatprep.mubr.msk.bf16.mxu0 %vm629_vm13, %v8806_v34  ;;  %v1641_v1 = vshrl.u32 %v1428_v23, 16  ;;  %v1644_v61 = vshll.u32 %v1428_v23, 16  ;;  %v1650_v43 = vshll.u32 %v10874_v11, 16  ;;  %v1830_v60 = vld [vmem:[#allocation2 + $0x68] sm:$0xe]  ;;  %v10912_v25 = vsel %vm10575_vm1, %v8820_v36, %v1886_v62 }
  0xa4   :  { %9672 = vmatprep.mubr.msk.bf16.mxu1 %vm629_vm13, %v9846_v59  ;;  %v10916_v51 = vsel %vm10575_vm1, %v8821_v58, %v1890_v50  ;;  %v10920_v12 = vsel %vm10575_vm1, %v8822_v48, %v1894_v0  ;;  %v10924_v35 = vsel %vm10575_vm1, %v8823_v52, %v1898_v26  ;;  %v8824_v15 = vrot.slane %v1828_v57, 9  ;;  %v1833_v4 = vld [vmem:[#allocation2 + $0x80] sm:$0xe]  ;;  %v9850_v34 = vld [vmem:[#allocation2 + $0x10] ss:$8 sps:$4 sm:$0xff]  }
  0xa5   :  { %v1643_v7 = vrot.slane %v1641_v1, 4  ;;  %v1646_v28 = vrot.slane %v1644_v61, 5  ;;  %v1652_v20 = vrot.slane %v1650_v43, 5  ;;  %v1902_v8 = vrot.slane %v10758_v32, 5  ;;  %v10937_v55 = vld [vmem:[#allocation2 + $0x88] sm:$0xe] }
  0xa6   :  { %v8825_v47 = vrot.slane %v1829_v19, 9  ;;  %v1906_v29 = vrot.slane %v10772_v41, 5  ;;  %v8826_v59 = vrot.slane %v1830_v60, 9  ;;  %v1910_v18 = vrot.slane %v10782_v10, 5  ;;  %v10944_v2 = vld [vmem:[#allocation2 + $0x90] sm:$0xe] }
  0xa7   :  { %v1647_v42 = vor.u32 %v1646_v28, %v1643_v7  ;;  %v8827_v38 = vrot.slane %v1831_v63, 9  ;;  %v1914_v21 = vrot.slane %v10795_v53, 5  ;;  %v8828_v31 = vrot.slane %v1832_v9, 9  ;;  %v2297_v58 = vld [vmem:[#allocation2 + $0x10] sm:$0xf] }
  0xa8   :  { %v8833_v37 = vcombine.low %v10885_v22, %v10889_v30  ;;  %v8834_v32 = vcombine.low %v10893_v16, %v10908_v33  ;;  %v8835_v41 = vcombine.low %v10912_v25, %v10916_v51  ;;  %v1918_v53 = vrot.slane %v10803_v27, 5  ;;  %v10956_v50 = vld [vmem:[#allocation2 + $0x14] sm:$0x1]  ;;  %v2299_v27 = vld [vmem:[#allocation2 + $0x18] sm:$0xf] }
  0xa9   :  { %v1648_v6 = vrot.slane %v1647_v42, 4  ;;  %v8829_v49 = vrot.slane %v1833_v4, 9  ;;  %v1922_v45 = vrot.slane %v10810_v46, 5  ;;  %v8836_v24 = vcombine.low %v10920_v12, %v10924_v35  ;;  %v10967_v23 = vld [vmem:[#allocation2 + $0x1c] sm:$0x1] }
  0xaa   :  { %v10950_v36 = vsel %vm10575_vm1, %v8824_v15, %v1902_v8  ;;  %v10954_v62 = vsel %vm10575_vm1, %v8825_v47, %v1906_v29  ;;  %v10960_v46 = vsel %vm10575_vm1, %v8826_v59, %v1910_v18  ;;  %v10964_v48 = vsel %vm10575_vm1, %v8827_v38, %v1914_v21  ;;  %v2719_v26 = vld [vmem:[#allocation2 + $0x10] sm:$0xe]  ;;  %v2301_v7 = vld [vmem:[#allocation2 + $0x20] sm:$0xf]  ;;  %v2720_v63 = vld [vmem:[#allocation2 + $0x18] sm:$0xe] }
  0xab   :  { %9673 = vmatmul.mubr.msk.bf16.gmra.mxu1 %vm629_vm13, %v9847_v40  ;;  %v1653_v10 = vsel %vm10330_vm12, %v1648_v6, %v1652_v20  ;;  %v8830_v0 = vrot.slane %v10937_v55, 9  ;;  %v2330_v52 = vshrl.u32 %v2297_v58, 16  ;;  %v9849_v1 = vld [vmem:[#allocation2 + $0x88] ss:$8 sps:$4 sm:$0xff]   ;;  %v1926_v61 = vrot.slane %v10835_v54, 5 }
  0xac   :  { %9676 = vmatprep.mubr.msk.bf16.mxu1 %vm629_vm13, %v9848_v44  ;;  %v8807_v39 = vcombine.low %v1639_v5, %v1653_v10  ;;  %v2333_v43 = vshll.u32 %v2297_v58, 16  ;;  %v2339_v22 = vshll.u32 %v10956_v50, 16  ;;  %v2344_v40 = vshrl.u32 %v2299_v27, 16  ;;  %v10986_v15 = vld [vmem:[#allocation2 + $0x24] sm:$0x1] }
  0xad   :  { %v8831_v30 = vrot.slane %v10944_v2, 9  ;;  %v1930_v57 = vrot.slane %v10874_v11, 5  ;;  %v2332_v44 = vrot.slane %v2330_v52, 4  ;;  %v2347_v5 = vshll.u32 %v2299_v27, 16  ;;  %v2303_v8 = vld [vmem:[#allocation2 + $0x28] sm:$0xf] }
  0xae   :  { %9695 = vmatmul.mubr.msk.bf16.gmra.mxu0 %vm629_vm13, %v8807_v39  ;;  %v2335_v28 = vrot.slane %v2333_v43, 5  ;;  %v2346_v19 = vrot.slane %v2344_v40, 4  ;;  %v2353_v60 = vshll.u32 %v10967_v23, 16  ;;  %v8883_v9 = vrot.slane %v2719_v26, 9  ;;  %v9851_v47 = vld [vmem:[#allocation2 + $0x20] ss:$8 sps:$4 sm:$0xff]  }
  0xaf   :  { %9718 = vmatprep.mubr.msk.bf16.mxu0 %vm629_vm13, %v9850_v34  ;;  %v10978_v54 = vsel %vm10575_vm1, %v8828_v31, %v1918_v53  ;;  %v10982_v42 = vsel %vm10575_vm1, %v8829_v49, %v1922_v45  ;;  %v10984_v20 = vrot.slane %v2339_v22, 5  ;;  %v2349_v11 = vrot.slane %v2347_v5, 5  ;;  %v9852_v6 = vld [vmem:[#allocation2 + $0x30] ss:$8 sps:$4 sm:$0xff]   ;;  %v10994_v10 = vld [vmem:[#allocation2 + $0x2c] sm:$0x1] }
  0xb0   :  { %v2336_v29 = vor.u32 %v2335_v28, %v2332_v44  ;;  %v2769_v59 = vrot.slane %v10956_v50, 5  ;;  %v2358_v18 = vshrl.u32 %v2301_v7, 16  ;;  %v2361_v4 = vshll.u32 %v2301_v7, 16  ;;  %v2721_v26 = vld [vmem:[#allocation2 + $0x20] sm:$0xe] }
  0xb1   :  { %v2350_v34 = vor.u32 %v2349_v11, %v2346_v19  ;;  %v8884_v38 = vrot.slane %v2720_v63, 9  ;;  %v2773_v21 = vrot.slane %v10967_v23, 5  ;;  %v2372_v31 = vshrl.u32 %v2303_v8, 16  ;;  %v2307_v44 = vld [vmem:[#allocation2 + $0x38] sm:$0xf] }
  0xb2   :  { %v10992_v55 = vrot.slane %v2336_v29, 4  ;;  %v2360_v53 = vrot.slane %v2358_v18, 4  ;;  %v2363_v49 = vrot.slane %v2361_v4, 5  ;;  %v2367_v45 = vshll.u32 %v10986_v15, 16  ;;  %v9853_v5 = vld [vmem:[#allocation2 + $0x40] ss:$8 sps:$4 sm:$0xff]  }
  0xb3   :  { %9677 = vmatmul.mubr.msk.bf16.gmra.mxu1 %vm629_vm13, %v9849_v1  ;;  %v8837_v2 = vcombine.low %v10950_v36, %v10954_v62  ;;  %v2374_v39 = vrot.slane %v2372_v31, 4  ;;  %v2375_v58 = vshll.u32 %v2303_v8, 16  ;;  %v8839_v50 = vcombine.low %v10978_v54, %v10982_v42  ;;  %v2305_v1 = vld [vmem:[#allocation2 + $0x30] sm:$0xf]  ;;  %v11033_v28 = vld [vmem:[#allocation2 + $0x34] sm:$0x1] }
  0xb4   :  { %9700 = vmatprep.mubr.msk.bf16.mxu1 %vm629_vm13, %v8833_v37  ;;  %v8838_v37 = vcombine.low %v10960_v46, %v10964_v48  ;;  %v11006_v27 = vsel %vm10575_vm1, %v8830_v0, %v1926_v61  ;;  %v11008_v23 = vrot.slane %v2353_v60, 5  ;;  %v2364_v52 = vor.u32 %v2363_v49, %v2360_v53  ;;  %v2722_v61 = vld [vmem:[#allocation2 + $0x28] sm:$0xe]  ;;  %v11035_v63 = vld [vmem:[#allocation2 + $0x3c] sm:$0x1] }
  0xb5   :  { %v11014_v43 = vsel %vm10575_vm1, %v8831_v30, %v1930_v57  ;;  %v11018_v22 = vsel %vm10575_vm1, %v8883_v9, %v2769_v59  ;;  %v2377_v40 = vrot.slane %v2375_v58, 5  ;;  %v2381_v0 = vshll.u32 %v10994_v10, 16  ;;  %v2309_v18 = vld [vmem:[#allocation2 + $0x40] sm:$0xf]  ;;  %v2311_v31 = vld [vmem:[#allocation2 + $0x48] sm:$0xf] }
  0xb6   :  { %9719 = vmatmul.mubr.msk.bf16.vlgmr.msra.gmra.mxu0 %vm629_vm13, %v9851_v47  ;;  %v11025_v7 = vrot.slane %v2350_v34, 4  ;;  %v11029_v30 = vsel %vm10575_vm1, %v8884_v38, %v2773_v21  ;;  %v11031_v57 = vrot.slane %v2367_v45, 5  ;;  %v8885_v60 = vrot.slane %v2721_v26, 9  ;;  %v9854_v4 = vld [vmem:[#allocation2 + $0x60] ss:$8 sps:$4 sm:$0xff]  }
  0xb7   :  { %9753 = vmatpush3.bf16.msra.mxu0 %v10900_v3  ;;  %9722 = vmatprep.mubr.msk.bf16.mxu0 %vm629_vm13, %v9852_v6  ;;  %v2342_v3 = vsel %vm10330_vm12, %v10992_v55, %v10984_v20  ;;  %v2378_v19 = vor.u32 %v2377_v40, %v2374_v39  ;;  %v2386_v9 = vshrl.u32 %v2305_v1, 16  ;;  %v2389_v11 = vshll.u32 %v2305_v1, 16  ;;  %v11050_v49 = vld [vmem:[#allocation2 + $0x44] sm:$0x1]  ;;  %v11064_v58 = vld [vmem:[#allocation2 + $0x4c] sm:$0x1] }
  0xb8   :  { %v2365_v8 = vrot.slane %v2364_v52, 4  ;;  %v2777_v47 = vrot.slane %v10986_v15, 5  ;;  %v8886_v29 = vrot.slane %v2722_v61, 9  ;;  %v2400_v59 = vshrl.u32 %v2307_v44, 16  ;;  %v9855_v40 = vld [vmem:[#allocation2 + $0x70] ss:$8 sps:$4 sm:$0xff]  }
  0xb9   :  { %v2383_v6 = vrot.slane %v2381_v0, 5  ;;  %v2781_v34 = vrot.slane %v10994_v10, 5  ;;  %v2388_v16 = vrot.slane %v2386_v9, 4  ;;  %v2391_v33 = vrot.slane %v2389_v11, 5  ;;  %v11088_v35 = vld [vmem:[#allocation2 + $0x40] sm:$0xe] }
  0xba   :  { %v2395_v38 = vshll.u32 %v11033_v28, 16  ;;  %v2402_v15 = vrot.slane %v2400_v59, 4  ;;  %v2403_v21 = vshll.u32 %v2307_v44, 16  ;;  %v2414_v25 = vshrl.u32 %v2309_v18, 16  ;;  %v11110_v55 = vld [vmem:[#allocation2 + $0x6c] sm:$0x1] }
  0xbb   :  { %9701 = vmatmul.mubr.msk.bf16.vlgmr.msra.gmra.mxu1 %vm629_vm13, %v8834_v32  ;;  %v2379_v32 = vrot.slane %v2378_v19, 4  ;;  %v2392_v53 = vor.u32 %v2391_v33, %v2388_v16  ;;  %v2417_v51 = vshll.u32 %v2309_v18, 16  ;;  %v2370_v10 = vsel %vm10330_vm12, %v2365_v8, %v11031_v57  ;;  %v9856_v57 = vld [vmem:[#allocation2 + $0x80] ss:$8 sps:$4 sm:$0xff]   ;;  %v2724_v18 = vld [vmem:[#allocation2 + $0x38] sm:$0xe] }
  0xbc   :  { %9735 = vmatpush3.bf16.msra.mxu1 %v10896_v14  ;;  %9704 = vmatprep.mubr.msk.bf16.mxu1 %vm629_vm13, %v8835_v41  ;;  %v2409_v14 = vshll.u32 %v11035_v63, 16  ;;  %v2356_v41 = vsel %vm10330_vm12, %v11025_v7, %v11008_v23  ;;  %v11062_v45 = vsel %vm10575_vm1, %v8885_v60, %v2777_v47  ;;  %v2405_v39 = vrot.slane %v2403_v21, 5  ;;  %v2723_v7 = vld [vmem:[#allocation2 + $0x30] sm:$0xe]  ;;  %v11103_v33 = vld [vmem:[#allocation2 + $0x64] sm:$0x1] }
  0xbd   :  { %v11069_v52 = vsel %vm10575_vm1, %v8886_v29, %v2781_v34  ;;  %v2416_v26 = vrot.slane %v2414_v25, 4  ;;  %v2419_v1 = vrot.slane %v2417_v51, 5  ;;  %v2428_v23 = vshrl.u32 %v2311_v31, 16  ;;  %v2726_v25 = vld [vmem:[#allocation2 + $0x48] sm:$0xe] }
  0xbe   :  { %9723 = vmatmul.mubr.msk.bf16.gmra.mxu0 %vm629_vm13, %v9853_v5  ;;  %v2397_v0 = vrot.slane %v2395_v38, 5  ;;  %v2406_v61 = vor.u32 %v2405_v39, %v2402_v15  ;;  %v2423_v44 = vshll.u32 %v11050_v49, 16  ;;  %v2431_v5 = vshll.u32 %v2311_v31, 16  ;;  %v2727_v46 = vld [vmem:[#allocation2 + $0x60] sm:$0xe] }
  0xbf   :  { %9726 = vmatprep.mubr.msk.bf16.mxu0 %vm629_vm13, %v9854_v4  ;;  %v2384_v19 = vsel %vm10330_vm12, %v2379_v32, %v2383_v6  ;;  %v2393_v60 = vrot.slane %v2392_v53, 4  ;;  %v2411_v9 = vrot.slane %v2409_v14, 5  ;;  %v2437_v11 = vshll.u32 %v11064_v58, 16  ;;  %v11152_v42 = vld [vmem:[#allocation2 + $0x70] sm:$0xe] }
  0xc0   :  { %v2407_v8 = vrot.slane %v2406_v61, 4  ;;  %v2420_v47 = vor.u32 %v2419_v1, %v2416_v26  ;;  %v2430_v29 = vrot.slane %v2428_v23, 4  ;;  %v2433_v59 = vrot.slane %v2431_v5, 5 }
  0xc1   :  { %v8840_v4 = vcombine.low %v11006_v27, %v11014_v43  ;;  %v8900_v6 = vcombine.low %v11018_v22, %v11029_v30  ;;  %v8887_v34 = vrot.slane %v2723_v7, 9  ;;  %v2785_v12 = vrot.slane %v11033_v28, 5  ;;  %v2315_v28 = vld [vmem:[#allocation2 + $0x68] sm:$0xf]  ;;  %v11132_v7 = vld [vmem:[#allocation2 + $0x74] sm:$0x1] }
  0xc2   :  { %v11095_v36 = vcombine.low %v2342_v3, %v2356_v41  ;;  %v11097_v62 = vcombine.low %v2370_v10, %v2384_v19  ;;  %v11101_v16 = vrot.slane %v2423_v44, 5  ;;  %v2398_v32 = vsel %vm10330_vm12, %v2393_v60, %v2397_v0  ;;  %v9857_v10 = vld [vmem:[#allocation2 + $0x90] ss:$8 sps:$4 sm:$0xff]   ;;  %v2323_v30 = vld [vmem:[#allocation2 + $0x88] sm:$0xf] }
  0xc3   :  { %9705 = vmatmul.mubr.msk.bf16.gmra.mxu1 %vm629_vm13, %v8836_v24  ;;  %v2313_v24 = vld [vmem:[#allocation2 + $0x60] sm:$0xf]  ;;  %v11107_v38 = vrot.slane %v2437_v11, 5  ;;  %v8888_v15 = vrot.slane %v2724_v18, 9  ;;  %v2789_v20 = vrot.slane %v11035_v63, 5  ;;  %v2412_v3 = vsel %vm10330_vm12, %v2407_v8, %v2411_v9 }
  0xc4   :  { %9708 = vmatprep.mubr.msk.bf16.mxu1 %vm629_vm13, %v8837_v2  ;;  %v8901_v2 = vcombine.low %v11062_v45, %v11069_v52  ;;  %v11115_v21 = vrot.slane %v2420_v47, 4  ;;  %v2434_v31 = vor.u32 %v2433_v59, %v2430_v29  ;;  %v8889_v53 = vrot.slane %v11088_v35, 9  ;;  %v11140_v11 = vld [vmem:[#allocation2 + $0x7c] sm:$0x1] }
  0xc5   :  { %v11121_v14 = vsel %vm10575_vm1, %v8887_v34, %v2785_v12  ;;  %v2442_v63 = vshrl.u32 %v2313_v24, 16  ;;  %v2445_v51 = vshll.u32 %v2313_v24, 16  ;;  %v2456_v41 = vshrl.u32 %v2315_v28, 16  ;;  %v2728_v12 = vld [vmem:[#allocation2 + $0x68] sm:$0xe] }
  0xc6   :  { %9727 = vmatmul.mubr.msk.bf16.gmra.mxu0 %vm629_vm13, %v9855_v40  ;;  %v2793_v39 = vrot.slane %v11050_v49, 5  ;;  %v2451_v26 = vshll.u32 %v11103_v33, 16  ;;  %v2459_v1 = vshll.u32 %v2315_v28, 16  ;;  %v2465_v23 = vshll.u32 %v11110_v55, 16  ;;  %v2317_v40 = vld [vmem:[#allocation2 + $0x70] sm:$0xf] }
  0xc7   :  { %9730 = vmatprep.mubr.msk.bf16.mxu0 %vm629_vm13, %v9856_v57  ;;  %v11126_v0 = vcombine.low %v2398_v32, %v2412_v3  ;;  %v11130_v61 = vsel %vm10575_vm1, %v8888_v15, %v2789_v20  ;;  %v2444_v44 = vrot.slane %v2442_v63, 4  ;;  %v2447_v5 = vrot.slane %v2445_v51, 5  ;;  %v2319_v57 = vld [vmem:[#allocation2 + $0x78] sm:$0xf]  ;;  %v2321_v20 = vld [vmem:[#allocation2 + $0x80] sm:$0xf] }
  0xc8   :  { %v11138_v49 = vrot.slane %v2434_v31, 4  ;;  %v8890_v19 = vrot.slane %v2726_v25, 9  ;;  %v2458_v60 = vrot.slane %v2456_v41, 4  ;;  %v2461_v9 = vrot.slane %v2459_v1, 5  ;;  %v11167_v51 = vld [vmem:[#allocation2 + $0x78] sm:$0xe] }
  0xc9   :  { %v2797_v8 = vrot.slane %v11064_v58, 5  ;;  %v2448_v47 = vor.u32 %v2447_v5, %v2444_v44  ;;  %v2470_v29 = vshrl.u32 %v2317_v40, 16  ;;  %v2473_v59 = vshll.u32 %v2317_v40, 16  ;;  %v11184_v40 = vld [vmem:[#allocation2 + $0x84] sm:$0x1] }
  0xca   :  { %v11147_v48 = vrot.slane %v2451_v26, 5  ;;  %v2484_v18 = vshrl.u32 %v2319_v57, 16  ;;  %v2487_v34 = vshll.u32 %v2319_v57, 16  ;;  %v2462_v35 = vor.u32 %v2461_v9, %v2458_v60  ;;  %v2325_v44 = vld [vmem:[#allocation2 + $0x90] sm:$0xf] }
  0xcb   :  { %9709 = vmatmul.mubr.msk.bf16.gmra.mxu1 %vm629_vm13, %v8838_v37  ;;  %v11149_v37 = vrot.slane %v2465_v23, 5  ;;  %v2472_v24 = vrot.slane %v2470_v29, 4  ;;  %v2475_v28 = vrot.slane %v2473_v59, 5  ;;  %v2479_v54 = vshll.u32 %v11132_v7, 16  ;;  %v11206_v57 = vld [vmem:[#allocation2 + $0x94] sm:$0x1] }
  0xcc   :  { %9712 = vmatprep.mubr.msk.bf16.mxu1 %vm629_vm13, %v8839_v50  ;;  %v11155_v50 = vrot.slane %v2448_v47, 4  ;;  %v2486_v58 = vrot.slane %v2484_v18, 4  ;;  %v2489_v32 = vrot.slane %v2487_v34, 5  ;;  %v2493_v15 = vshll.u32 %v11140_v11, 16  ;;  %v11228_v34 = vld [vmem:[#allocation2 + $0x9c] sm:$0x1] }
  0xcd   :  { %v2426_v3 = vsel %vm10330_vm12, %v11115_v21, %v11101_v16  ;;  %v2476_v31 = vor.u32 %v2475_v28, %v2472_v24  ;;  %v8891_v25 = vrot.slane %v2727_v46, 9  ;;  %v2801_v63 = vrot.slane %v11103_v33, 5  ;;  %v2731_v24 = vld [vmem:[#allocation2 + $0x80] sm:$0xe]  ;;  %v2732_v28 = vld [vmem:[#allocation2 + $0x88] sm:$0xe] }
  0xce   :  { %9731 = vmatmul.mubr.msk.bf16.gmra.mxu0 %vm629_vm13, %v9857_v10  ;;  %v8902_v41 = vcombine.low %v11121_v14, %v11130_v61  ;;  %v2490_v10 = vor.u32 %v2489_v32, %v2486_v58  ;;  %v8892_v26 = vrot.slane %v2728_v12, 9  ;;  %v2805_v22 = vrot.slane %v11110_v55, 5  ;;  %v11197_v61 = vld [vmem:[#allocation2 + $0x8c] sm:$0x1] }
  0xcf   :  { %9754 = vmatprep.mubr.msk.bf16.mxu0 %vm629_vm13, %v8900_v6  ;;  %v11174_v6 = vsel %vm10575_vm1, %v8889_v53, %v2793_v39  ;;  %v11178_v1 = vsel %vm10575_vm1, %v8890_v19, %v2797_v8  ;;  %v11180_v23 = vrot.slane %v2462_v35, 4  ;;  %v11182_v33 = vrot.slane %v2479_v54, 5  ;;  %v2327_v19 = vld [vmem:[#allocation2 + $0x98] sm:$0xf] }
  0xd0   :  { %v11190_v55 = vrot.slane %v2476_v31, 4  ;;  %v11192_v14 = vrot.slane %v2490_v10, 4  ;;  %v11194_v53 = vrot.slane %v2493_v15, 5  ;;  %v8893_v39 = vrot.slane %v11152_v42, 9 }
  0xd1   :  { %v2802_v5 = vsel %vm10575_vm1, %v8891_v25, %v2801_v63  ;;  %v2806_v27 = vsel %vm10575_vm1, %v8892_v26, %v2805_v22  ;;  %v2809_v43 = vrot.slane %v11132_v7, 5  ;;  %v2440_v60 = vsel %vm10330_vm12, %v11138_v49, %v11107_v38 }
  0xd2   :  { %v8894_v9 = vrot.slane %v11167_v51, 9  ;;  %v2501_v8 = vshll.u32 %v2321_v20, 16  ;;  %v2454_v7 = vsel %vm10330_vm12, %v11155_v50, %v11147_v48  ;;  %v2468_v47 = vsel %vm10330_vm12, %v11180_v23, %v11149_v37 }
  0xd3   :  { %9713 = vmatmul.mubr.msk.bf16.gmra.mxu1 %vm629_vm13, %v8840_v4  ;;  %v2498_v4 = vshrl.u32 %v2321_v20, 16  ;;  %v2512_v59 = vshrl.u32 %v2323_v30, 16  ;;  %v8904_v38 = vcombine.low %v2802_v5, %v2806_v27  ;;  %v2507_v46 = vshll.u32 %v11184_v40, 16  ;;  %v2733_v20 = vld [vmem:[#allocation2 + $0x90] sm:$0xe] }
  0xd4   :  { %9736 = vmatprep.mubr.msk.bf16.mxu1 %vm629_vm13, %v11095_v36  ;;  %v8903_v36 = vcombine.low %v11174_v6, %v11178_v1  ;;  %v2503_v49 = vrot.slane %v2501_v8, 5  ;;  %v2515_v18 = vshll.u32 %v2323_v30, 16  ;;  %v2521_v12 = vshll.u32 %v11197_v61, 16 }
  0xd5   :  { %v2500_v29 = vrot.slane %v2498_v4, 4  ;;  %v2514_v48 = vrot.slane %v2512_v59, 4  ;;  %v2526_v37 = vshrl.u32 %v2325_v44, 16  ;;  %v2529_v35 = vshll.u32 %v2325_v44, 16 }
  0xd6   :  { %9755 = vmatmul.mubr.msk.bf16.vlgmr.msra.gmra.mxu0 %vm629_vm13, %v8901_v2  ;;  %v2517_v45 = vrot.slane %v2515_v18, 5  ;;  %v2535_v52 = vshll.u32 %v11206_v57, 16  ;;  %v2540_v2 = vshrl.u32 %v2327_v19, 16  ;;  %v2813_v50 = vrot.slane %v11140_v11, 5  ;;  %v2734_v11 = vld [vmem:[#allocation2 + $0x98] sm:$0xe] }
  0xd7   :  { %9758 = vmatprep.mubr.msk.bf16.mxu0 %vm629_vm13, %v8902_v41  ;;  %v2504_v54 = vor.u32 %v2503_v49, %v2500_v29  ;;  %v2528_v58 = vrot.slane %v2526_v37, 4  ;;  %v2531_v32 = vrot.slane %v2529_v35, 5  ;;  %v2543_v15 = vshll.u32 %v2327_v19, 16 }
  0xd8   :  { %v2509_v31 = vrot.slane %v2507_v46, 5  ;;  %v2518_v25 = vor.u32 %v2517_v45, %v2514_v48  ;;  %v2523_v63 = vrot.slane %v2521_v12, 5  ;;  %v2542_v51 = vrot.slane %v2540_v2, 4 }
  0xd9   :  { %v2505_v41 = vrot.slane %v2504_v54, 4  ;;  %v2532_v10 = vor.u32 %v2531_v32, %v2528_v58  ;;  %v2545_v26 = vrot.slane %v2543_v15, 5  ;;  %v2549_v22 = vshll.u32 %v11228_v34, 16 }
  0xda   :  { %v2537_v30 = vrot.slane %v2535_v52, 5  ;;  %v8895_v6 = vrot.slane %v2731_v24, 9  ;;  %v2817_v1 = vrot.slane %v11184_v40, 5  ;;  %v8896_v23 = vrot.slane %v2732_v28, 9 }
  0xdb   :  { %9737 = vmatmul.mubr.msk.bf16.vlgmr.msra.gmra.mxu1 %vm629_vm13, %v11097_v62  ;;  %v2519_v44 = vrot.slane %v2518_v25, 4  ;;  %v2533_v62 = vrot.slane %v2532_v10, 4  ;;  %v2546_v5 = vor.u32 %v2545_v26, %v2542_v51  ;;  %v2821_v27 = vrot.slane %v11197_v61, 5 }
  0xdc   :  { %9740 = vmatprep.mubr.msk.bf16.mxu1 %vm629_vm13, %v11126_v0  ;;  %v8870_v0 = vcombine.low %v2426_v3, %v2440_v60  ;;  %v8871_v4 = vcombine.low %v2454_v7, %v2468_v47  ;;  %v2551_v19 = vrot.slane %v2549_v22, 5  ;;  %v8897_v8 = vrot.slane %v2733_v20, 9 }
  0xdd   :  { %v2810_v40 = vsel %vm10575_vm1, %v8893_v39, %v2809_v43  ;;  %v2814_v61 = vsel %vm10575_vm1, %v8894_v9, %v2813_v50  ;;  %v2547_v29 = vrot.slane %v2546_v5, 4  ;;  %v2825_v59 = vrot.slane %v11206_v57, 5 }
  0xde   :  { %9759 = vmatmul.mubr.msk.bf16.gmra.mxu0 %vm629_vm13, %v8903_v36  ;;  %v2818_v16 = vsel %vm10575_vm1, %v8895_v6, %v2817_v1  ;;  %v2822_v21 = vsel %vm10575_vm1, %v8896_v23, %v2821_v27  ;;  %v8898_v3 = vrot.slane %v2734_v11, 9  ;;  %v2829_v60 = vrot.slane %v11228_v34, 5 }
  0xdf   :  { %9762 = vmatprep.mubr.msk.bf16.mxu0 %vm629_vm13, %v8904_v38  ;;  %v8905_v42 = vcombine.low %v2810_v40, %v2814_v61  ;;  %v2482_v39 = vsel %vm10330_vm12, %v11190_v55, %v11182_v33  ;;  %v2496_v43 = vsel %vm10330_vm12, %v11192_v14, %v11194_v53  ;;  %v8906_v57 = vcombine.low %v2818_v16, %v2822_v21 }
  0xe0   :  { %v2510_v36 = vsel %vm10330_vm12, %v2505_v41, %v2509_v31  ;;  %v2524_v9 = vsel %vm10330_vm12, %v2519_v44, %v2523_v63  ;;  %v8872_v7 = vcombine.low %v2482_v39, %v2496_v43  ;;  %v2826_v33 = vsel %vm10575_vm1, %v8897_v8, %v2825_v59 }
  0xe1   :  { %v8873_v47 = vcombine.low %v2510_v36, %v2524_v9  ;;  %v2830_v55 = vsel %vm10575_vm1, %v8898_v3, %v2829_v60  ;;  %v2538_v53 = vsel %vm10330_vm12, %v2533_v62, %v2537_v30  ;;  %v2552_v38 = vsel %vm10330_vm12, %v2547_v29, %v2551_v19 }
  0xe2   :  { %v8907_v14 = vcombine.low %v2826_v33, %v2830_v55  ;;  %v8874_v49 = vcombine.low %v2538_v53, %v2552_v38 }
  0xe3   :  { %9741 = vmatmul.mubr.msk.bf16.gmra.mxu1 %vm629_vm13, %v8870_v0 }
  0xe4   :  { %9744 = vmatprep.mubr.msk.bf16.mxu1 %vm629_vm13, %v8871_v4 }
  0xe6   :  { %9763 = vmatmul.mubr.msk.bf16.gmra.mxu0 %vm629_vm13, %v8905_v42 }
  0xe7   :  { %9766 = vmatprep.mubr.msk.bf16.mxu0 %vm629_vm13, %v8906_v57 }
  0xeb   :  { %9745 = vmatmul.mubr.msk.bf16.gmra.mxu1 %vm629_vm13, %v8872_v7 }
  0xec   :  { %9748 = vmatprep.mubr.msk.bf16.mxu1 %vm629_vm13, %v8873_v47 }
  0xee   :  { %9767 = vmatmul.mubr.msk.bf16.gmra.mxu0 %vm629_vm13, %v8907_v14 }
  0xf3   :  { %9749 = vmatmul.mubr.msk.bf16.gmra.mxu1 %vm629_vm13, %v8874_v49 }
  0xf4   :  { %10 = vsyncpa [#allocation7], 0  ;;  %v3435_v58 = vld [vmem:[#allocation3] sm:$0xf]  ;;  %v3436_v10 = vld [vmem:[#allocation3 + $0x4] sm:$0x1] }
  0xf5   :  { %v3468_v32 = vshrl.u32 %v3435_v58, 16  ;;  %v3471_v15 = vshll.u32 %v3435_v58, 16  ;;  %v3477_v22 = vshll.u32 %v3436_v10, 16  ;;  %s10049_s1 = smov 64   ;;  %vm3034_vm0 = vcmask 523264   ;;  %vm11544_vm2 = vmand %vm3051_vm5, %vm242_vm3 }
  0xf6   :  { %vm3739_vm3 = vcmask 1043968  }
  0xf7   :  { %v3470_v25 = vrot.slane %v3468_v32, 4  ;;  %v3473_v63 = vrot.slane %v3471_v15, 5  ;;  %v3479_v1 = vrot.slane %v3477_v22, 5 }
  0xf9   :  { %v3474_v26 = vor.u32 %v3473_v63, %v3470_v25 }
  0xfb   :  { %v3475_v6 = vrot.slane %v3474_v26, 4 }
  0xfd   :  { %v3480_v62 = vsel %vm10330_vm12, %v3475_v6, %v3479_v1 }
  0xfe   :  { %3691 = vrot.lane.b32.xlu0 %v3480_v62, %s10049_s1 }
 0x105   :  { %v9612_v46 = vpop.f32.mrf.mxu0 }
 0x107   :  { %v692_v18 = vpop.f32.mrf.mxu0 }
 0x109   :  { %v9613_v34 = vpop.f32.mrf.mxu0 }
 0x10b   :  { %v11288_v12 = vpop.f32.mrf.mxu0 }
 0x10f   :  { %v9620_v48 = vpop.f32.mrf.mxu1 }
 0x111   :  { %v11290_v37 = vpop.f32.mrf.mxu1 }
 0x113   :  { %v11292_v28 = vpop.f32.mrf.mxu1 }
 0x115   :  { %v11296_v52 = vpop.f32.mrf.mxu1 }
 0x127   :  { %v9616_v35 = vpop.f32.mrf.mxu0 }
 0x129   :  { %v708_v24 = vpop.f32.mrf.mxu0 }
 0x12b   :  { %v9617_v54 = vpop.f32.mrf.mxu0 }
 0x12d   :  { %v11294_v45 = vpop.f32.mrf.mxu0 }
 0x12f   :  { %v9648_v2 = vpop.f32.mrf.mxu0 }
 0x131   :  { %v1121_v50 = vpop.f32.mrf.mxu0 }
 0x133   :  { %v9624_v20 = vpop.f32.mrf.mxu1  ;;  %v9649_v31 = vpop.f32.mrf.mxu0 }
 0x135   :  { %v740_v51 = vpop.f32.mrf.mxu1  ;;  %v11298_v41 = vpop.f32.mrf.mxu0 }
 0x137   :  { %v9625_v11 = vpop.f32.mrf.mxu1  ;;  %v9652_v30 = vpop.f32.mrf.mxu0 }
 0x139   :  { %v11300_v23 = vpop.f32.mrf.mxu1  ;;  %v1137_v44 = vpop.f32.mrf.mxu0 }
 0x13b   :  { %v9630_v5 = vpop.f32.mrf.mxu1  ;;  %v9653_v27 = vpop.f32.mrf.mxu0 }
 0x13c   :  { %v865_v0 = vadd.f32 %v9630_v5, %v9612_v46 }
 0x13d   :  { %v856_v4 = vpop.f32.mrf.mxu1  ;;  %v11305_v19 = vpop.f32.mrf.mxu0 }
 0x13e   :  { %v11307_v8 = vadd.f32 %v9648_v2, %v865_v0  ;;  %v857_v40 = vadd.f32 %v856_v4, %v692_v18 }
 0x13f   :  { %v9631_v61 = vpop.f32.mrf.mxu1  ;;  %v9656_v29 = vpop.f32.mrf.mxu0 }
 0x140   :  { %v11309_v59 = vadd.f32 %v1121_v50, %v857_v40  ;;  %v868_v16 = vadd.f32 %v9631_v61, %v9613_v34 }
 0x141   :  { %v11311_v21 = vpop.f32.mrf.mxu1  ;;  %v1153_v3 = vpop.f32.mrf.mxu0 }
 0x142   :  { %v11313_v60 = vadd.f32 %v9649_v31, %v868_v16 }
 0x143   :  { %v9634_v42 = vpop.f32.mrf.mxu1  ;;  %v9657_v39 = vpop.f32.mrf.mxu0 }
 0x144   :  { %v881_v43 = vadd.f32 %v9634_v42, %v9616_v35 }
 0x145   :  { %v872_v57 = vpop.f32.mrf.mxu1  ;;  %v11315_v36 = vpop.f32.mrf.mxu0 }
 0x146   :  { %v11317_v9 = vadd.f32 %v9652_v30, %v881_v43  ;;  %v873_v7 = vadd.f32 %v872_v57, %v708_v24 }
 0x147   :  { %v9635_v47 = vpop.f32.mrf.mxu1  ;;  %v9660_v33 = vpop.f32.mrf.mxu0 }
 0x148   :  { %v11319_v55 = vadd.f32 %v1137_v44, %v873_v7  ;;  %v884_v14 = vadd.f32 %v9635_v47, %v9617_v54 }
 0x149   :  { %v11321_v53 = vpop.f32.mrf.mxu1  ;;  %v1169_v38 = vpop.f32.mrf.mxu0 }
 0x14a   :  { %v11323_v49 = vadd.f32 %v9653_v27, %v884_v14 }
 0x14b   :  { %v9638_v46 = vpop.f32.mrf.mxu1  ;;  %v9661_v18 = vpop.f32.mrf.mxu0 }
 0x14c   :  { %v897_v34 = vadd.f32 %v9638_v46, %v9620_v48 }
 0x14d   :  { %v888_v35 = vpop.f32.mrf.mxu1  ;;  %v11325_v2 = vpop.f32.mrf.mxu0 }
 0x14e   :  { %v11327_v50 = vadd.f32 %v9656_v29, %v897_v34  ;;  %v889_v24 = vadd.f32 %v888_v35, %v11290_v37 }
 0x14f   :  { %v9639_v58 = vpop.f32.mrf.mxu1  ;;  %v11330_v32 = vpop.f32.mrf.mxu0 }
 0x150   :  { %v1192_v15 = vadd.f32 %v1153_v3, %v889_v24  ;;  %v900_v54 = vadd.f32 %v9639_v58, %v11292_v28 }
 0x151   :  { %v11333_v31 = vpop.f32.mrf.mxu1  ;;  %v11335_v25 = vpop.f32.mrf.mxu0 }
 0x152   :  { %v1195_v63 = vadd.f32 %v9657_v39, %v900_v54 }
 0x153   :  { %v9642_v10 = vpop.f32.mrf.mxu1  ;;  %v11337_v48 = vpop.f32.mrf.mxu0 }
 0x154   :  { %v913_v26 = vadd.f32 %v9642_v10, %v9624_v20 }
 0x155   :  { %v904_v22 = vpop.f32.mrf.mxu1  ;;  %v11339_v1 = vpop.f32.mrf.mxu0 }
 0x156   :  { %v1198_v30 = vadd.f32 %v9660_v33, %v913_v26  ;;  %v905_v6 = vadd.f32 %v904_v22, %v740_v51 }
 0x157   :  { %v9643_v37 = vpop.f32.mrf.mxu1 }
 0x158   :  { %v1196_v44 = vadd.f32 %v1169_v38, %v905_v6  ;;  %v916_v62 = vadd.f32 %v9643_v37, %v9625_v11 }
 0x159   :  { %v11341_v5 = vpop.f32.mrf.mxu1 }
 0x15a   :  { %v1199_v28 = vadd.f32 %v9661_v18, %v916_v62  ;;  %v11343_v27 = vpop.f32.mrf.mxu0 }
 0x15b   :  { %v9666_v0 = vpop.f32.mrf.mxu1 }
 0x15c   :  { %v11345_v4 = vpop.f32.mrf.mxu0 }
 0x15d   :  { %v11347_v40 = vpop.f32.mrf.mxu1 }
 0x15e   :  { %v11349_v61 = vpop.f32.mrf.mxu0 }
 0x15f   :  { %v11351_v20 = vpop.f32.mrf.mxu1 }
 0x160   :  { %v11353_v51 = vpop.f32.mrf.mxu0 }
 0x161   :  { %v11355_v29 = vpop.f32.mrf.mxu1 }
 0x162   :  { %v11357_v16 = vpop.f32.mrf.mxu0 }
 0x163   :  { %v11359_v11 = vpop.f32.mrf.mxu1 }
 0x164   :  { %v1773_v3 = vpop.f32.mrf.mxu0 }
 0x165   :  { %v11361_v42 = vpop.f32.mrf.mxu1 }
 0x166   :  { %v9693_v43 = vpop.f32.mrf.mxu0 }
 0x167   :  { %v11363_v39 = vpop.f32.mrf.mxu1 }
 0x168   :  { %v11369_v47 = vpop.f32.mrf.mxu0 }
 0x169   :  { %v11365_v57 = vpop.f32.mrf.mxu1 }
 0x16b   :  { %v11367_v7 = vpop.f32.mrf.mxu1 }
 0x16d   :  { %v1351_v33 = vpop.f32.mrf.mxu1 }
 0x16e   :  { %v1390_v14 = vadd.f32 %v1351_v33, %v1192_v15  ;;  %v9696_v46 = vpop.f32.mrf.mxu0 }
 0x16f   :  { %v9675_v38 = vpop.f32.mrf.mxu1 }
 0x170   :  { %v11371_v18 = vadd.f32 %v1773_v3, %v1390_v14  ;;  %v1393_v34 = vadd.f32 %v9675_v38, %v1195_v63  ;;  %v1789_v24 = vpop.f32.mrf.mxu0 }
 0x171   :  { %v11373_v35 = vpop.f32.mrf.mxu1 }
 0x172   :  { %13781 = vst [vmem:[#allocation12_spill] sm:$0xff] %v11371_v18  ;;  %v11375_v58 = vadd.f32 %v9693_v43, %v1393_v34  ;;  %v9697_v10 = vpop.f32.mrf.mxu0  ;;  %v892_v18 = vadd.f32 %v11333_v31, %v11296_v52 }
 0x173   :  { %v9678_v54 = vpop.f32.mrf.mxu1 }
 0x174   :  { %13782 = vst [vmem:[#allocation13_spill] sm:$0xff] %v11375_v58  ;;  %v1396_v26 = vadd.f32 %v9678_v54, %v1198_v30  ;;  %v11377_v6 = vpop.f32.mrf.mxu0 }
 0x175   :  { %v1367_v22 = vpop.f32.mrf.mxu1 }
 0x176   :  { %v11379_v37 = vadd.f32 %v9696_v46, %v1396_v26  ;;  %v1394_v62 = vadd.f32 %v1367_v22, %v1196_v44  ;;  %v11381_v33 = vpop.f32.mrf.mxu0 }
 0x177   :  { %v9679_v15 = vpop.f32.mrf.mxu1 }
 0x178   :  { %13783 = vst [vmem:[#allocation14_spill] sm:$0xff] %v11379_v37  ;;  %v11383_v3 = vadd.f32 %v1789_v24, %v1394_v62  ;;  %v1397_v63 = vadd.f32 %v9679_v15, %v1199_v28  ;;  %v11385_v38 = vpop.f32.mrf.mxu0 }
 0x179   :  { %v1370_v14 = vpop.f32.mrf.mxu1 }
 0x17a   :  { %13784 = vst [vmem:[#allocation15_spill] sm:$0xff] %v11383_v3  ;;  %v11387_v43 = vadd.f32 %v9697_v10, %v1397_v63  ;;  %v11389_v56 = vpop.f32.mrf.mxu0 }
 0x17b   :  { %v9702_v34 = vpop.f32.mrf.mxu1 }
 0x17c   :  { %13785 = vst [vmem:[#allocation16_spill] sm:$0xff] %v11387_v43  ;;  %v11391_v54 = vpop.f32.mrf.mxu0 }
 0x17d   :  { %v2019_v30 = vpop.f32.mrf.mxu1 }
 0x17e   :  { %v11393_v26 = vpop.f32.mrf.mxu0 }
 0x17f   :  { %v9703_v46 = vpop.f32.mrf.mxu1 }
 0x180   :  { %v11395_v22 = vpop.f32.mrf.mxu0 }
 0x181   :  { %v2022_v44 = vpop.f32.mrf.mxu1  ;;  %13786 = vst [vmem:[#allocation17_spill] sm:$0xff] %v11395_v22 }
 0x182   :  { %v11397_v62 = vpop.f32.mrf.mxu0 }
 0x183   :  { %v9706_v24 = vpop.f32.mrf.mxu1  ;;  %13787 = vst [vmem:[#allocation18_spill] sm:$0xff] %v11397_v62  ;;  %v860_v62 = vadd.f32 %v11311_v21, %v11288_v12  ;;  %v908_v12 = vadd.f32 %v11341_v5, %v11300_v23  ;;  %v1382_v21 = vadd.f32 %v11347_v40, %v11309_v59  ;;  %v1193_v23 = vadd.f32 %v11315_v36, %v892_v18  ;;  %v11468_v18 = vld [vmem:[#allocation3 + $0x50] sm:$0xf] }
 0x184   :  { %v11401_v15 = vpop.f32.mrf.mxu0 }
 0x185   :  { %v11399_v28 = vpop.f32.mrf.mxu1  ;;  %13788 = vst [vmem:[#allocation19_spill] sm:$0xff] %v11401_v15  ;;  %v1804_v40 = vadd.f32 %v11335_v25, %v1382_v21 }
 0x186   :  { %v11405_v63 = vpop.f32.mrf.mxu0 }
 0x187   :  { %v11403_v10 = vpop.f32.mrf.mxu1  ;;  %13789 = vst [vmem:[#allocation20_spill] sm:$0xff] %v11405_v63  ;;  %v1384_v63 = vadd.f32 %v9666_v0, %v11307_v8  ;;  %v1385_v8 = vadd.f32 %v11351_v20, %v11313_v60  ;;  %v1197_v60 = vadd.f32 %v11325_v2, %v908_v12  ;;  %v1386_v20 = vadd.f32 %v11361_v42, %v11319_v55 }
 0x188   :  { %v11409_v17 = vpop.f32.mrf.mxu0  ;;  %v1391_v55 = vadd.f32 %v11373_v35, %v1193_v23  ;;  %v2082_v42 = vadd.f32 %v2019_v30, %v1804_v40 }
 0x189   :  { %v11407_v13 = vpop.f32.mrf.mxu1  ;;  %13790 = vst [vmem:[#allocation21_spill] sm:$0xff] %v11409_v17  ;;  %v876_v17 = vadd.f32 %v11321_v53, %v11294_v45  ;;  %v1806_v52 = vadd.f32 %v11330_v32, %v1384_v63 }
 0x18a   :  { %v11413_v3 = vpop.f32.mrf.mxu0  ;;  %v2281_v63 = vadd.f32 %v11385_v38, %v2082_v42 }
 0x18b   :  { %v11411_v43 = vpop.f32.mrf.mxu1  ;;  %13791 = vst [vmem:[#allocation22_spill] sm:$0xff] %v11413_v3  ;;  %v1189_v31 = vadd.f32 %v11305_v19, %v876_v17  ;;  %v2084_v32 = vadd.f32 %v9702_v34, %v1806_v52  ;;  %v1392_v19 = vadd.f32 %v11367_v7, %v11327_v50  ;;  %v1808_v50 = vadd.f32 %v11345_v4, %v1386_v20 }
 0x18c   :  { %v11417_v22 = vpop.f32.mrf.mxu0 }
 0x18d   :  { %v11415_v37 = vpop.f32.mrf.mxu1  ;;  %13793 = vst [vmem:[#allocation24_spill] sm:$0xff] %v11417_v22  ;;  %v1185_v22 = vadd.f32 %v11298_v41, %v860_v62  ;;  %v1388_v41 = vadd.f32 %v11359_v11, %v11317_v9  ;;  %v1389_v9 = vadd.f32 %v11363_v39, %v11323_v49  ;;  %v1387_v17 = vadd.f32 %v11365_v57, %v1189_v31 }
 0x18e   :  { %13792 = vst [vmem:[#allocation23_spill] sm:$0xff] %v11415_v37  ;;  %v11423_v58 = vpop.f32.mrf.mxu0  ;;  %v2283_v57 = vadd.f32 %v11381_v33, %v2084_v32  ;;  %v1814_v35 = vadd.f32 %v11357_v16, %v1392_v19  ;;  %v2086_v4 = vadd.f32 %v11399_v28, %v1808_v50  ;;  %v11488_v16 = vld [vmem:[%s13753_s4] ss:$0 sm:$0xff]  ;;  %v13798_v32 = vld [vmem:[#allocation18_spill] sm:$0xff] }
 0x18f   :  { %v11421_v15 = vpop.f32.mrf.mxu1  ;;  %v1383_v53 = vadd.f32 %v11355_v29, %v1185_v22  ;;  %v1807_v29 = vadd.f32 %v11337_v48, %v1385_v8  ;;  %v1810_v25 = vadd.f32 %v11343_v27, %v1388_v41  ;;  %v1395_v48 = vadd.f32 %v1370_v14, %v1197_v60  ;;  %v13797_v60 = vld [vmem:[#allocation17_spill] sm:$0xff] }
 0x190   :  { %v11432_v37 = vpop.f32.mrf.mxu0  ;;  %v1809_v27 = vadd.f32 %v11353_v51, %v1387_v17  ;;  %v3580_v14 = vshrl.u32 %v11468_v18, 16  ;;  %v2285_v40 = vadd.f32 %v13797_v60, %v2086_v4  ;;  %v13800_v17 = vld [vmem:[#allocation14_spill] sm:$0xff]  ;;  %v13803_v50 = vld [vmem:[#allocation21_spill] sm:$0xff] }
 0x191   :  { %v11430_v3 = vpop.f32.mrf.mxu1  ;;  %v1805_v2 = vadd.f32 %v11339_v1, %v1383_v53  ;;  %v2085_v34 = vadd.f32 %v9703_v46, %v1807_v29  ;;  %v2088_v22 = vadd.f32 %v9706_v24, %v1810_v25  ;;  %v1811_v1 = vadd.f32 %v11349_v61, %v1389_v9  ;;  %v13796_v53 = vld [vmem:[#allocation13_spill] sm:$0xff]  ;;  %v13799_v9 = vld [vmem:[#allocation19_spill] sm:$0xff] }
 0x192   :  { %v11443_v45 = vpop.f32.mrf.mxu0  ;;  %v1813_v46 = vadd.f32 %v11369_v47, %v1391_v55  ;;  %v1817_v33 = vadd.f32 %v11377_v6, %v1395_v48  ;;  %v2087_v51 = vadd.f32 %v11407_v13, %v1809_v27  ;;  %v2092_v6 = vadd.f32 %v11411_v43, %v1814_v35 }
 0x193   :  { %v11441_v0 = vpop.f32.mrf.mxu1  ;;  %v2083_v7 = vadd.f32 %v2022_v44, %v1805_v2  ;;  %v2284_v44 = vadd.f32 %v11389_v56, %v2085_v34  ;;  %v2089_v61 = vadd.f32 %v11403_v10, %v1811_v1  ;;  %v2287_v28 = vadd.f32 %v11393_v26, %v2088_v22  ;;  %v13794_v56 = vld [vmem:[#allocation12_spill] sm:$0xff] }
 0x194   :  { %v11451_v59 = vpop.f32.mrf.mxu0  ;;  %v2093_v13 = vadd.f32 %v11421_v15, %v13796_v53  ;;  %v2091_v41 = vadd.f32 %v11430_v3, %v1813_v46  ;;  %v11502_v43 = vadd.f32 %v13799_v9, %v2087_v51  ;;  %v2096_v19 = vadd.f32 %v11441_v0, %v13800_v17  ;;  %v13802_v34 = vld [vmem:[#allocation20_spill] sm:$0xff]  ;;  %v3305_v17 = vld [vmem:[#allocation3 + $0x8] sm:$0xf] }
 0x195   :  { %v2067_v5 = vpop.f32.mrf.mxu1  ;;  %v2282_v38 = vadd.f32 %v11391_v54, %v2083_v7  ;;  %v13795_v52 = vld [vmem:[#allocation23_spill] sm:$0xff]  ;;  %v2288_v29 = vadd.f32 %v13798_v32, %v2089_v61  ;;  %v13804_v7 = vld [vmem:[#allocation22_spill] sm:$0xff]  ;;  %v13805_v1 = vld [vmem:[#allocation24_spill] sm:$0xff] }
 0x196   :  { %v9756_v11 = vpop.f32.mrf.mxu0  ;;  %v2090_v10 = vadd.f32 %v13795_v52, %v13794_v56  ;;  %v11515_v22 = vadd.f32 %v13804_v7, %v2093_v13  ;;  %v11518_v0 = vadd.f32 %v13805_v1, %v2091_v41  ;;  %v3322_v13 = vld [vmem:[#allocation3 + $0x1c] sm:$0x1] }
 0x197   :  { %v11463_v36 = vpop.f32.mrf.mxu1 }
 0x198   :  { %v2918_v39 = vpop.f32.mrf.mxu0 }
 0x199   :  { %v11470_v49 = vpop.f32.mrf.mxu1 }
 0x19a   :  { %v9757_v62 = vpop.f32.mrf.mxu0 }
 0x19b   :  { %v9738_v30 = vpop.f32.mrf.mxu1 }
 0x19c   :  { %v2705_v12 = vadd.f32 %v9738_v30, %v2283_v57  ;;  %v2921_v47 = vpop.f32.mrf.mxu0  ;;  %v11512_v57 = vadd.f32 %v13803_v50, %v2090_v10 }
 0x19d   :  { %v2640_v24 = vpop.f32.mrf.mxu1 }
 0x19e   :  { %v2983_v21 = vadd.f32 %v9756_v11, %v2705_v12  ;;  %v2703_v8 = vadd.f32 %v2640_v24, %v2281_v63  ;;  %v9760_v23 = vpop.f32.mrf.mxu0  ;;  %v13801_v11 = vld [vmem:[#allocation15_spill] sm:$0xff]  ;;  %v11525_v63 = vadd.f32 %v11423_v58, %v2096_v19  ;;  %v13806_v12 = vld [vmem:[#allocation16_spill] sm:$0xff]  ;;  %v3310_v19 = vld [vmem:[#allocation3 + $0xc] sm:$0x1] }
 0x19f   :  { %v9739_v31 = vpop.f32.mrf.mxu1  ;;  %v2094_v15 = vadd.f32 %v2067_v5, %v13801_v11 }
 0x1a0   :  { %v3004_v54 = vadd.f32 %v11488_v16, %v2983_v21  ;;  %v2981_v20 = vadd.f32 %v2918_v39, %v2703_v8  ;;  %v2706_v26 = vadd.f32 %v9739_v31, %v2284_v44  ;;  %v2934_v3 = vpop.f32.mrf.mxu0  ;;  %v11509_v39 = vadd.f32 %v13802_v34, %v2092_v6 }
 0x1a1   :  { %v2643_v2 = vpop.f32.mrf.mxu1  ;;  %v11528_v4 = vadd.f32 %v11432_v37, %v2094_v15  ;;  %v11532_v44 = vadd.f32 %v11463_v36, %v13806_v12  ;;  %v3325_v12 = vld [vmem:[#allocation3 + $0x20] sm:$0xf] }
 0x1a2   :  { %v3020_v25 = vmax.f32 %v3004_v54, 0.0  ;;  %v3002_v55 = vadd.f32 %v11488_v16, %v2981_v20  ;;  %v2984_v42 = vadd.f32 %v9757_v62, %v2706_v26  ;;  %v2704_v48 = vadd.f32 %v2643_v2, %v2282_v38  ;;  %v11520_v27 = vpop.f32.mrf.mxu0 }
 0x1a3   :  { %v9742_v5 = vpop.f32.mrf.mxu1  ;;  %v11537_v38 = vadd.f32 %v11470_v49, %v1817_v33  ;;  %v13807_v49 = vmov 0  ;;  %v3319_v33 = vld [vmem:[#allocation3 + $0x18] sm:$0xf] }
 0x1a4   :  { %3037 = vst.msk [vmem:[#allocation5 + $0x10] sm:$0xff] %vm3034_vm0, %v3020_v25  ;;  %v9217_v35 = vpack.c.bf16 %v3020_v25, %v3020_v25  ;;  %v3018_v30 = vmax.f32 %v3002_v55, 0.0  ;;  %v3005_v62 = vadd.f32 %v11488_v16, %v2984_v42  ;;  %v2982_v46 = vadd.f32 %v2921_v47, %v2704_v48  ;;  %v11534_v24 = vpop.f32.mrf.mxu0 }
 0x1a5   :  { %v2709_v61 = vadd.f32 %v9742_v5, %v2287_v28  ;;  %v2656_v51 = vpop.f32.mrf.mxu1  ;;  %v13808_v49 = vsel %vm11544_vm2, 4294967295, %v13807_v49 }
 0x1a6   :  { %v3159_v21 = vshrl.u32 %v9217_v35, 16  ;;  %3035 = vst.msk [vmem:[#allocation5] sm:$0xff] %vm3034_vm0, %v3018_v30  ;;  %v9215_v47 = vpack.c.bf16 %v3018_v30, %v3018_v30  ;;  %v3021_v58 = vmax.f32 %v3005_v62, 0.0  ;;  %v3162_v8 = vshll.u32 %v9217_v35, 16  ;;  %13809 = vst [vmem:[#allocation12_spill] sm:$0xff] %v13808_v49  ;;  %v11549_v54 = vpop.f32.mrf.mxu0 }
 0x1a7   :  { %v3003_v37 = vadd.f32 %v11488_v16, %v2982_v46  ;;  %v2987_v6 = vadd.f32 %v9760_v23, %v2709_v61  ;;  %v2707_v56 = vadd.f32 %v2656_v51, %v2285_v40  ;;  %v9743_v52 = vpop.f32.mrf.mxu1  ;;  %v3328_v61 = vld [vmem:[#allocation3 + $0x24] sm:$0x1] }
 0x1a8   :  { %v3161_v36 = vrot.slane %v3159_v21, 7  ;;  %v3143_v10 = vshrl.u32 %v9215_v47, 16  ;;  %v3146_v28 = vshll.u32 %v9215_v47, 16  ;;  %3038 = vst.msk [vmem:[#allocation5 + $0x18] sm:$0xff] %vm3034_vm0, %v3021_v58  ;;  %v9218_v53 = vpack.c.bf16 %v3021_v58, %v3021_v58  ;;  %v11558_v30 = vpop.f32.mrf.mxu0 }
 0x1a9   :  { %v3019_v41 = vmax.f32 %v3003_v37, 0.0  ;;  %v3008_v31 = vadd.f32 %v11488_v16, %v2987_v6  ;;  %v2985_v23 = vadd.f32 %v2934_v3, %v2707_v56  ;;  %v2710_v60 = vadd.f32 %v9743_v52, %v2288_v29  ;;  %v2659_v40 = vpop.f32.mrf.mxu1  ;;  %v3313_v56 = vld [vmem:[#allocation3 + $0x10] sm:$0xf]  ;;  %v3316_v52 = vld [vmem:[#allocation3 + $0x14] sm:$0x1] }
 0x1aa   :  { %v3164_v20 = vor.u32 %v3162_v8, %v3161_v36  ;;  %v3165_v26 = vrot.slane %v3161_v36, 4  ;;  %v3145_v32 = vrot.slane %v3143_v10, 7  ;;  %v3167_v9 = vshrl.u32 %v9218_v53, 16 }
 0x1ab   :  { %v3170_v11 = vshll.u32 %v9218_v53, 16  ;;  %3036 = vst.msk [vmem:[#allocation5 + $0x8] sm:$0xff] %vm3034_vm0, %v3019_v41  ;;  %v9216_v15 = vpack.c.bf16 %v3019_v41, %v3019_v41  ;;  %v3024_v2 = vmax.f32 %v3008_v31, 0.0  ;;  %v3006_v25 = vadd.f32 %v11488_v16, %v2985_v23  ;;  %v9746_v55 = vpop.f32.mrf.mxu1  ;;  %v9765_v31 = vpop.f32.mrf.mxu0 }
 0x1ac   :  { %v3320_v29 = vsel %vm11544_vm2, %v3164_v20, %v3319_v33  ;;  %v3323_v42 = vsel %vm10291_vm11, %v3165_v26, %v3322_v13  ;;  %v3148_v48 = vor.u32 %v3146_v28, %v3145_v32  ;;  %v3149_v34 = vrot.slane %v3145_v32, 4 }
 0x1ad   :  { %3321 = vst [vmem:[#allocation3 + $0x18] sm:$0xf] %v3320_v29  ;;  %3324 = vst [vmem:[#allocation3 + $0x1c] sm:$0x1] %v3323_v42  ;;  %v3169_v50 = vrot.slane %v3167_v9, 7  ;;  %v3151_v7 = vshrl.u32 %v9216_v15, 16  ;;  %v9221_v5 = vpack.c.bf16 %v3024_v2, %v3024_v2  ;;  %v2672_v35 = vpop.f32.mrf.mxu1  ;;  %v2988_v21 = vadd.f32 %v11520_v27, %v2710_v60 }
 0x1ae   :  { %v3154_v1 = vshll.u32 %v9216_v15, 16  ;;  %3041 = vst.msk [vmem:[#allocation5 + $0x30] sm:$0xff] %vm3034_vm0, %v3024_v2  ;;  %v3306_v62 = vsel %vm11544_vm2, %v3148_v48, %v3305_v17  ;;  %v3311_v46 = vsel %vm10291_vm11, %v3149_v34, %v3310_v19  ;;  %v3022_v51 = vmax.f32 %v3006_v25, 0.0  ;;  %v3346_v17 = vld [vmem:[#allocation3 + $0x3c] sm:$0x1] }
 0x1af   :  { %3307 = vst [vmem:[#allocation3 + $0x8] sm:$0xf] %v3306_v62  ;;  %3312 = vst [vmem:[#allocation3 + $0xc] sm:$0x1] %v3311_v46  ;;  %v3172_v47 = vor.u32 %v3170_v11, %v3169_v50  ;;  %v3173_v58 = vrot.slane %v3169_v50, 4  ;;  %v3153_v8 = vrot.slane %v3151_v7, 7  ;;  %v9747_v6 = vpop.f32.mrf.mxu1  ;;  %v3009_v28 = vadd.f32 %v11488_v16, %v2988_v21 }
 0x1b0   :  { %v3191_v37 = vshrl.u32 %v9221_v5, 16  ;;  %v3194_v36 = vshll.u32 %v9221_v5, 16  ;;  %3039 = vst.msk [vmem:[#allocation5 + $0x20] sm:$0xff] %vm3034_vm0, %v3022_v51  ;;  %v9219_v10 = vpack.c.bf16 %v3022_v51, %v3022_v51  ;;  %v2708_v53 = vadd.f32 %v2659_v40, %v11502_v43  ;;  %v3343_v40 = vld [vmem:[#allocation3 + $0x38] sm:$0xf] }
 0x1b1   :  { %v3326_v27 = vsel %vm11544_vm2, %v3172_v47, %v3325_v12  ;;  %v3329_v33 = vsel %vm10291_vm11, %v3173_v58, %v3328_v61  ;;  %v3156_v13 = vor.u32 %v3154_v1, %v3153_v8  ;;  %v3157_v41 = vrot.slane %v3153_v8, 4  ;;  %v2675_v32 = vpop.f32.mrf.mxu1  ;;  %v3331_v48 = vld [vmem:[#allocation3 + $0x28] sm:$0xf]  ;;  %v3334_v34 = vld [vmem:[#allocation3 + $0x2c] sm:$0x1] }
 0x1b2   :  { %3327 = vst [vmem:[#allocation3 + $0x20] sm:$0xf] %v3326_v27  ;;  %3330 = vst [vmem:[#allocation3 + $0x24] sm:$0x1] %v3329_v33  ;;  %v3193_v23 = vrot.slane %v3191_v37, 7  ;;  %v3175_v60 = vshrl.u32 %v9219_v10, 16  ;;  %v2986_v19 = vadd.f32 %v11534_v24, %v2708_v53  ;;  %v2713_v11 = vadd.f32 %v9746_v55, %v11509_v39  ;;  %v2953_v39 = vpop.f32.mrf.mxu0 }
 0x1b3   :  { %v3178_v20 = vshll.u32 %v9219_v10, 16  ;;  %v3025_v26 = vmax.f32 %v3009_v28, 0.0  ;;  %v3314_v9 = vsel %vm11544_vm2, %v3156_v13, %v3313_v56  ;;  %v3317_v43 = vsel %vm10291_vm11, %v3157_v41, %v3316_v52  ;;  %v9750_v12 = vpop.f32.mrf.mxu1  ;;  %v3352_v53 = vld [vmem:[#allocation3 + $0x44] sm:$0x1] }
 0x1b4   :  { %3315 = vst [vmem:[#allocation3 + $0x10] sm:$0xf] %v3314_v9  ;;  %3318 = vst [vmem:[#allocation3 + $0x14] sm:$0x1] %v3317_v43  ;;  %v3196_v15 = vor.u32 %v3194_v36, %v3193_v23  ;;  %v3197_v2 = vrot.slane %v3193_v23, 4  ;;  %v3177_v25 = vrot.slane %v3175_v60, 7  ;;  %v3007_v50 = vadd.f32 %v11488_v16, %v2986_v19  ;;  %v9768_v10 = vpop.f32.mrf.mxu0 }
 0x1b5   :  { %3042 = vst.msk [vmem:[#allocation5 + $0x38] sm:$0xff] %vm3034_vm0, %v3025_v26  ;;  %v9222_v29 = vpack.c.bf16 %v3025_v26, %v3025_v26  ;;  %v3918_v42 = vld [vmem:[#allocation3 + $0x18] sm:$0xf]  ;;  %v2711_v7 = vadd.f32 %v2672_v35, %v11512_v57  ;;  %v2991_v1 = vadd.f32 %v11549_v54, %v2713_v11  ;;  %v2714_v24 = vadd.f32 %v9747_v6, %v11515_v22  ;;  %v3349_v6 = vld [vmem:[#allocation3 + $0x40] sm:$0xf]  ;;  %v2688_v33 = vpop.f32.mrf.mxu1 }
 0x1b6   :  { %3952 = vrot.lane.b32.xlu0 %v3918_v42, %s10049_s1  ;;  %v3344_v55 = vsel %vm11544_vm2, %v3196_v15, %v3343_v40  ;;  %v3347_v5 = vsel %vm10291_vm11, %v3197_v2, %v3346_v17  ;;  %v3180_v62 = vor.u32 %v3178_v20, %v3177_v25  ;;  %v3181_v46 = vrot.slane %v3177_v25, 4  ;;  %v3916_v61 = vld [vmem:[#allocation3 + $0x8] sm:$0xf]  ;;  %v9859_v9 = vld [vmem:[%s13751_s2 + $0x38] sm:$0xff]   ;;  %v3340_v19 = vld [vmem:[#allocation3 + $0x34] sm:$0x1]  ;;  %v2966_v11 = vpop.f32.mrf.mxu0 }
 0x1b7   :  { %3345 = vst [vmem:[#allocation3 + $0x38] sm:$0xf] %v3344_v55  ;;  %3348 = vst [vmem:[#allocation3 + $0x3c] sm:$0x1] %v3347_v5  ;;  %v3199_v57 = vshrl.u32 %v9222_v29, 16  ;;  %v3202_v35 = vshll.u32 %v9222_v29, 16  ;;  %v3012_v22 = vadd.f32 %v11488_v16, %v2991_v1  ;;  %3948 = vrot.lane.b32.xlu1 %v3916_v61, %s10049_s1  ;;  %v2989_v47 = vadd.f32 %v11558_v30, %v2711_v7 }
 0x1b8   :  { %v3023_v54 = vmax.f32 %v3007_v50, 0.0  ;;  %v3332_v51 = vsel %vm11544_vm2, %v3180_v62, %v3331_v48  ;;  %v3335_v21 = vsel %vm10291_vm11, %v3181_v46, %v3334_v34  ;;  %v2712_v58 = vadd.f32 %v2675_v32, %v11518_v0  ;;  %v9860_v15 = vld [vmem:[%s13751_s2 + $0x70] sm:$0xff]   ;;  %v9751_v48 = vpop.f32.mrf.mxu1 }
 0x1b9   :  { %v11596_v8 = vld [vmem:[#allocation3 + $0x20] sm:$0xe]  ;;  %3333 = vst [vmem:[#allocation3 + $0x28] sm:$0xf] %v3332_v51  ;;  %3336 = vst [vmem:[#allocation3 + $0x2c] sm:$0x1] %v3335_v21  ;;  %v2992_v36 = vadd.f32 %v9765_v31, %v2714_v24  ;;  %v2296_v28 = vadd.f32 %v11443_v45, %v11532_v44  ;;  %v11603_v30 = vadd.f32 %v11451_v59, %v11537_v38  ;;  %v9769_v51 = vpop.f32.mrf.mxu0 }
 0x1ba   :  { %v3201_v37 = vrot.slane %v3199_v57, 7  ;;  %3040 = vst.msk [vmem:[#allocation5 + $0x28] sm:$0xff] %vm3034_vm0, %v3023_v54  ;;  %v9220_v56 = vpack.c.bf16 %v3023_v54, %v3023_v54  ;;  %v3028_v52 = vmax.f32 %v3012_v22, 0.0  ;;  %v8967_v0 = vrot.slane %v11596_v8, 9  ;;  %v3919_v13 = vld [vmem:[#allocation3 + $0x20] sm:$0xf] }
 0x1bb   :  { %v3010_v27 = vadd.f32 %v11488_v16, %v2989_v47  ;;  %v11607_v41 = vld [vmem:[#allocation3 + $0x24] sm:$0x1]  ;;  %v2717_v45 = vadd.f32 %v9750_v12, %v11525_v63  ;;  %3954 = vrot.lane.b32.xlu1 %v3919_v13, %s10049_s1  ;;  %v9858_v59 = vld [vmem:[%s13751_s2 + $0x78] sm:$0xff]   ;;  %v3337_v44 = vld [vmem:[#allocation3 + $0x30] sm:$0xf]  ;;  %v3013_v26 = vadd.f32 %v11488_v16, %v2992_v36  ;;  %v2990_v32 = vadd.f32 %v2953_v39, %v2712_v58 }
 0x1bc   :  { %v3204_v23 = vor.u32 %v3202_v35, %v3201_v37  ;;  %v3205_v60 = vrot.slane %v3201_v37, 4  ;;  %v3183_v31 = vshrl.u32 %v9220_v56, 16  ;;  %3045 = vst.msk [vmem:[#allocation5 + $0x50] sm:$0xff] %vm3034_vm0, %v3028_v52  ;;  %v9225_v38 = vpack.c.bf16 %v3028_v52, %v3028_v52  ;;  %9328 = vmatprep.subr.bf16.mxu1 %v9858_v59  ;;  %v3917_v34 = vld [vmem:[#allocation3 + $0x10] sm:$0xf] }
 0x1bd   :  { %v3026_v20 = vmax.f32 %v3010_v27, 0.0  ;;  %v3186_v17 = vshll.u32 %v9220_v56, 16  ;;  %v4919_v2 = vrot.slane %v11607_v41, 5  ;;  %v3029_v42 = vmax.f32 %v3013_v26, 0.0  ;;  %9329 = vmatpush3.bf16.msra.mxu1 %v9859_v9  ;;  %v9861_v50 = vld [vmem:[%s13751_s2 + $0x30] sm:$0xff]   ;;  %v9862_v56 = vld [vmem:[%s13751_s2 + $0x68] sm:$0xff]  }
 0x1be   :  { %v3350_v43 = vsel %vm11544_vm2, %v3204_v23, %v3349_v6  ;;  %v3353_v63 = vsel %vm10291_vm11, %v3205_v60, %v3352_v53  ;;  %v3185_v40 = vrot.slane %v3183_v31, 7  ;;  %v3223_v25 = vshrl.u32 %v9225_v38, 16  ;;  %9330 = vmatprep.subr.bf16.mxu1 %v9860_v15  ;;  %v3367_v57 = vld [vmem:[#allocation3 + $0x68] sm:$0xf]  ;;  %v3370_v35 = vld [vmem:[#allocation3 + $0x6c] sm:$0x1] }
 0x1bf   :  { %3351 = vst [vmem:[#allocation3 + $0x40] sm:$0xf] %v3350_v43  ;;  %3354 = vst [vmem:[#allocation3 + $0x44] sm:$0x1] %v3353_v63  ;;  %v9223_v29 = vpack.c.bf16 %v3026_v20, %v3026_v20  ;;  %v3011_v24 = vadd.f32 %v11488_v16, %v2990_v32  ;;  %v2995_v39 = vadd.f32 %v9768_v10, %v2717_v45  ;;  %3950 = vrot.lane.b32.xlu1 %v3917_v34, %s10049_s1  ;;  %v3355_v6 = vld [vmem:[#allocation3 + $0x58] sm:$0xf] }
 0x1c0   :  { %3043 = vst.msk [vmem:[#allocation5 + $0x40] sm:$0xff] %vm3034_vm0, %v3026_v20  ;;  %v3188_v7 = vor.u32 %v3186_v17, %v3185_v40  ;;  %v3189_v1 = vrot.slane %v3185_v40, 4  ;;  %v3225_v55 = vrot.slane %v3223_v25, 7  ;;  %v3226_v5 = vshll.u32 %v9225_v38, 16  ;;  %3046 = vst.msk [vmem:[#allocation5 + $0x58] sm:$0xff] %vm3034_vm0, %v3029_v42  ;;  %v9863_v27 = vld [vmem:[%s13751_s2 + $0x28] sm:$0xff]   ;;  %v2969_v38 = vpop.f32.mrf.mxu0 }
 0x1c1   :  { %v3207_v62 = vshrl.u32 %v9223_v29, 16  ;;  %v9226_v46 = vpack.c.bf16 %v3029_v42, %v3029_v42  ;;  %v2715_v54 = vadd.f32 %v2688_v33, %v11528_v4  ;;  %v2718_v22 = vadd.f32 %v9751_v48, %v2296_v28  ;;  %9331 = vmatpush3.bf16.msra.mxu1 %v9861_v50  ;;  %v3358_v52 = vld [vmem:[#allocation3 + $0x5c] sm:$0x1]  ;;  %v2691_v28 = vpop.f32.mrf.mxu1  ;;  %v3373_v32 = vld [vmem:[#allocation3 + $0x70] sm:$0xf] }
 0x1c2   :  { %v3338_v12 = vsel %vm11544_vm2, %v3188_v7, %v3337_v44  ;;  %v3341_v61 = vsel %vm10291_vm11, %v3189_v1, %v3340_v19  ;;  %v3228_v21 = vor.u32 %v3226_v5, %v3225_v55  ;;  %v3229_v47 = vrot.slane %v3225_v55, 4  ;;  %9332 = vmatprep.subr.bf16.mxu1 %v9862_v56  ;;  %v3376_v9 = vld [vmem:[#allocation3 + $0x74] sm:$0x1]  ;;  %v3437_v40 = vld [vmem:[#allocation3 + $0x8] sm:$0xf] }
 0x1c3   :  { %3339 = vst [vmem:[#allocation3 + $0x30] sm:$0xf] %v3338_v12  ;;  %3342 = vst [vmem:[#allocation3 + $0x34] sm:$0x1] %v3341_v61  ;;  %v3209_v58 = vrot.slane %v3207_v62, 7  ;;  %v3210_v37 = vshll.u32 %v9223_v29, 16  ;;  %v3016_v4 = vadd.f32 %v11488_v16, %v2995_v39  ;;  %v2993_v44 = vadd.f32 %v2966_v11, %v2715_v54 }
 0x1c4   :  { %v3231_v36 = vshrl.u32 %v9226_v46, 16  ;;  %v3234_v10 = vshll.u32 %v9226_v46, 16  ;;  %v3027_v53 = vmax.f32 %v3011_v24, 0.0  ;;  %v3368_v33 = vsel %vm11544_vm2, %v3228_v21, %v3367_v57  ;;  %v11656_v17 = vld [vmem:[#allocation3 + $0x28] sm:$0xe]  ;;  %v9864_v29 = vld [vmem:[%s13751_s2 + $0x60] sm:$0xff]  }
 0x1c5   :  { %v3371_v13 = vsel %vm10291_vm11, %v3229_v47, %v3370_v35  ;;  %v3212_v23 = vor.u32 %v3210_v37, %v3209_v58  ;;  %v3213_v60 = vrot.slane %v3209_v58, 4  ;;  %3369 = vst [vmem:[#allocation3 + $0x68] sm:$0xf] %v3368_v33  ;;  %v3032_v59 = vmax.f32 %v3016_v4, 0.0  ;;  %9333 = vmatpush3.bf16.msra.mxu1 %v9863_v27  ;;  %v3361_v24 = vld [vmem:[#allocation3 + $0x60] sm:$0xf] }
 0x1c6   :  { %3372 = vst [vmem:[#allocation3 + $0x6c] sm:$0x1] %v3371_v13  ;;  %v3233_v31 = vrot.slane %v3231_v36, 7  ;;  %3044 = vst.msk [vmem:[#allocation5 + $0x48] sm:$0xff] %vm3034_vm0, %v3027_v53  ;;  %v9224_v45 = vpack.c.bf16 %v3027_v53, %v3027_v53  ;;  %v2716_v43 = vadd.f32 %v2691_v28, %v11603_v30  ;;  %v2996_v63 = vadd.f32 %v9769_v51, %v2718_v22  ;;  %v3364_v5 = vld [vmem:[#allocation3 + $0x64] sm:$0x1] }
 0x1c7   :  { %v3356_v20 = vsel %vm11544_vm2, %v3212_v23, %v3355_v6  ;;  %v3359_v26 = vsel %vm10291_vm11, %v3213_v60, %v3358_v52  ;;  %3049 = vst.msk [vmem:[#allocation5 + $0x70] sm:$0xff] %vm3034_vm0, %v3032_v59  ;;  %v9229_v42 = vpack.c.bf16 %v3032_v59, %v3032_v59  ;;  %v3014_v30 = vadd.f32 %v11488_v16, %v2993_v44  ;;  %v3438_v22 = vld [vmem:[#allocation3 + $0xc] sm:$0x1]  ;;  %v3391_v56 = vld [vmem:[#allocation3 + $0x88] sm:$0xf]  ;;  %v9865_v27 = vld [vmem:[%s13751_s2 + $0x20] sm:$0xff]  }
 0x1c8   :  { %3357 = vst [vmem:[#allocation3 + $0x58] sm:$0xf] %v3356_v20  ;;  %3360 = vst [vmem:[#allocation3 + $0x5c] sm:$0x1] %v3359_v26  ;;  %v3236_v19 = vor.u32 %v3234_v10, %v3233_v31  ;;  %v3237_v11 = vrot.slane %v3233_v31, 4  ;;  %v3215_v15 = vshrl.u32 %v9224_v45, 16  ;;  %v3017_v48 = vadd.f32 %v11488_v16, %v2996_v63  ;;  %9334 = vmatprep.subr.bf16.mxu1 %v9864_v29 }
 0x1c9   :  { %v3218_v25 = vshll.u32 %v9224_v45, 16  ;;  %v2994_v34 = vadd.f32 %v2969_v38, %v2716_v43  ;;  %v3482_v39 = vshrl.u32 %v3437_v40, 16  ;;  %v8968_v55 = vrot.slane %v11656_v17, 9  ;;  %v3394_v52 = vld [vmem:[#allocation3 + $0x8c] sm:$0x1]  ;;  %v9866_v59 = vld [vmem:[%s13751_s2 + $0x58] sm:$0xff]   ;;  %9335 = vmatpush3.bf16.msra.mxu1 %v9865_v27 }
 0x1ca   :  { %v3374_v50 = vsel %vm11544_vm2, %v3236_v19, %v3373_v32  ;;  %v3377_v7 = vsel %vm10291_vm11, %v3237_v11, %v3376_v9  ;;  %v3217_v1 = vrot.slane %v3215_v15, 7  ;;  %v3255_v62 = vshrl.u32 %v9229_v42, 16  ;;  %v11679_v33 = vld [vmem:[#allocation3 + $0x2c] sm:$0x1]  ;;  %v3379_v23 = vld [vmem:[#allocation3 + $0x78] sm:$0xf]  ;;  %9336 = vmatprep.subr.bf16.mxu1 %v9866_v59 }
 0x1cb   :  { %3375 = vst [vmem:[#allocation3 + $0x70] sm:$0xf] %v3374_v50  ;;  %3378 = vst [vmem:[#allocation3 + $0x74] sm:$0x1] %v3377_v7  ;;  %v3030_v46 = vmax.f32 %v3014_v30, 0.0  ;;  %v3033_v12 = vmax.f32 %v3017_v48, 0.0  ;;  %v3015_v54 = vadd.f32 %v11488_v16, %v2994_v34 }
 0x1cc   :  { %v3220_v61 = vor.u32 %v3218_v25, %v3217_v1  ;;  %v3221_v57 = vrot.slane %v3217_v1, 4  ;;  %v3258_v35 = vshll.u32 %v9229_v42, 16  ;;  %v3257_v51 = vrot.slane %v3255_v62, 7  ;;  %v3382_v26 = vld [vmem:[#allocation3 + $0x7c] sm:$0x1] }
 0x1cd   :  { %3047 = vst.msk [vmem:[#allocation5 + $0x60] sm:$0xff] %vm3034_vm0, %v3030_v46  ;;  %v9227_v21 = vpack.c.bf16 %v3030_v46, %v3030_v46  ;;  %3050 = vst.msk [vmem:[#allocation5 + $0x78] sm:$0xff] %vm3034_vm0, %v3033_v12  ;;  %v9230_v47 = vpack.c.bf16 %v3033_v12, %v3033_v12  ;;  %v3485_v58 = vshll.u32 %v3437_v40, 16  ;;  %v3031_v36 = vmax.f32 %v3015_v54, 0.0  ;;  %v3397_v9 = vld [vmem:[#allocation3 + $0x90] sm:$0xf] }
 0x1ce   :  { %v3362_v37 = vsel %vm11544_vm2, %v3220_v61, %v3361_v24  ;;  %v3365_v6 = vsel %vm10291_vm11, %v3221_v57, %v3364_v5  ;;  %v3484_v10 = vrot.slane %v3482_v39, 4  ;;  %v3260_v16 = vor.u32 %v3258_v35, %v3257_v51  ;;  %v3400_v63 = vld [vmem:[#allocation3 + $0x94] sm:$0x1]  ;;  %v3441_v11 = vld [vmem:[#allocation3 + $0x18] sm:$0xf] }
 0x1cf   :  { %3363 = vst [vmem:[#allocation3 + $0x60] sm:$0xf] %v3362_v37  ;;  %3366 = vst [vmem:[#allocation3 + $0x64] sm:$0x1] %v3365_v6  ;;  %v3261_v53 = vrot.slane %v3257_v51, 4  ;;  %v3239_v4 = vshrl.u32 %v9227_v21, 16  ;;  %v9228_v31 = vpack.c.bf16 %v3031_v36, %v3031_v36  ;;  %v4920_v25 = vsel %vm10575_vm1, %v8967_v0, %v4919_v2 }
 0x1d0   :  { %v3491_v28 = vshll.u32 %v3438_v22, 16  ;;  %v3242_v13 = vshll.u32 %v9227_v21, 16  ;;  %v3263_v60 = vshrl.u32 %v9230_v47, 16  ;;  %3048 = vst.msk [vmem:[#allocation5 + $0x68] sm:$0xff] %vm3034_vm0, %v3031_v36  ;;  %v3487_v45 = vrot.slane %v3485_v58, 5  ;;  %v9867_v7 = vld [vmem:[%s13751_s2 + $0x18] sm:$0xff]  }
 0x1d1   :  { %v3392_v44 = vsel %vm11544_vm2, %v3260_v16, %v3391_v56  ;;  %v3395_v38 = vsel %vm10291_vm11, %v3261_v53, %v3394_v52  ;;  %v3241_v20 = vrot.slane %v3239_v4, 7  ;;  %v3266_v32 = vshll.u32 %v9230_v47, 16  ;;  %v3385_v48 = vld [vmem:[#allocation3 + $0x80] sm:$0xf]  ;;  %v3388_v34 = vld [vmem:[#allocation3 + $0x84] sm:$0x1]  ;;  %9337 = vmatpush3.bf16.msra.mxu1 %v9867_v7 }
 0x1d2   :  { %3393 = vst [vmem:[#allocation3 + $0x88] sm:$0xf] %v3392_v44  ;;  %3396 = vst [vmem:[#allocation3 + $0x8c] sm:$0x1] %v3395_v38  ;;  %v3265_v43 = vrot.slane %v3263_v60, 7  ;;  %v3247_v40 = vshrl.u32 %v9228_v31, 16  ;;  %v3488_v19 = vor.u32 %v3487_v45, %v3484_v10 }
 0x1d3   :  { %v4923_v29 = vrot.slane %v11679_v33, 5  ;;  %v3244_v42 = vor.u32 %v3242_v13, %v3241_v20  ;;  %v3245_v30 = vrot.slane %v3241_v20, 4  ;;  %v3493_v50 = vrot.slane %v3491_v28, 5  ;;  %4991 = vst.msk [vmem:[#allocation4 + $0x38] sm:$0xf] %vm3051_vm5, %v4920_v25  ;;  %v9868_v0 = vld [vmem:[%s13751_s2 + $0x50] sm:$0xff]  }
 0x1d4   :  { %v11700_v1 = vld [vmem:[#allocation3 + $0x70] sm:$0xe]  ;;  %v3268_v41 = vor.u32 %v3266_v32, %v3265_v43  ;;  %v3269_v8 = vrot.slane %v3265_v43, 4  ;;  %v3249_v24 = vrot.slane %v3247_v40, 7  ;;  %v3250_v39 = vshll.u32 %v9228_v31, 16  ;;  %9338 = vmatprep.subr.bf16.mxu1 %v9868_v0  ;;  %v9870_v36 = vld [vmem:[%s13751_s2 + $0x48] sm:$0xff]  }
 0x1d5   :  { %v3380_v2 = vsel %vm11544_vm2, %v3244_v42, %v3379_v23  ;;  %v3383_v5 = vsel %vm10291_vm11, %v3245_v30, %v3382_v26  ;;  %v3489_v62 = vrot.slane %v3488_v19, 4  ;;  %v3442_v46 = vld [vmem:[#allocation3 + $0x1c] sm:$0x1]  ;;  %v3510_v12 = vshrl.u32 %v3441_v11, 16  ;;  %v3443_v61 = vld [vmem:[#allocation3 + $0x20] sm:$0xf] }
 0x1d6   :  { %v4866_v57 = vld [vmem:[#allocation3 + $0x74] sm:$0x1]  ;;  %3381 = vst [vmem:[#allocation3 + $0x78] sm:$0xf] %v3380_v2  ;;  %3384 = vst [vmem:[#allocation3 + $0x7c] sm:$0x1] %v3383_v5  ;;  %v3398_v35 = vsel %vm11544_vm2, %v3268_v41, %v3397_v9  ;;  %v3401_v54 = vsel %vm10291_vm11, %v3269_v8, %v3400_v63  ;;  %v3252_v22 = vor.u32 %v3250_v39, %v3249_v24 }
 0x1d7   :  { %v3253_v51 = vrot.slane %v3249_v24, 4  ;;  %v3439_v21 = vld [vmem:[#allocation3 + $0x10] sm:$0xf]  ;;  %v8975_v58 = vrot.slane %v11700_v1, 9  ;;  %3399 = vst [vmem:[#allocation3 + $0x90] sm:$0xf] %v3398_v35  ;;  %v3494_v6 = vsel %vm10330_vm12, %v3489_v62, %v3493_v50 }
 0x1d8   :  { %v9869_v47 = vld [vmem:[%s13751_s2 + $0x10] sm:$0xff]   ;;  %3402 = vst [vmem:[#allocation3 + $0x94] sm:$0x1] %v3401_v54  ;;  %v3512_v56 = vrot.slane %v3510_v12, 4  ;;  %v3513_v52 = vshll.u32 %v3441_v11, 16  ;;  %v3386_v10 = vsel %vm11544_vm2, %v3252_v22, %v3385_v48  ;;  %3693 = vrot.lane.b32.xlu0 %v3494_v6, %s10049_s1  ;;  %v3524_v4 = vshrl.u32 %v3443_v61, 16 }
 0x1d9   :  { %v3389_v16 = vsel %vm10291_vm11, %v3253_v51, %v3388_v34  ;;  %v3444_v53 = vld [vmem:[#allocation3 + $0x24] sm:$0x1]  ;;  %v3527_v28 = vshll.u32 %v3443_v61, 16  ;;  %v3449_v27 = vld [vmem:[#allocation3 + $0x38] sm:$0xf]  ;;  %v4951_v13 = vrot.slane %v4866_v57, 5  ;;  %9339 = vmatpush3.bf16.msra.mxu1 %v9869_v47  ;;  %v4924_v34 = vsel %vm10575_vm1, %v8968_v55, %v4923_v29 }
 0x1da   :  { %3387 = vst [vmem:[#allocation3 + $0x80] sm:$0xf] %v3386_v10  ;;  %3390 = vst [vmem:[#allocation3 + $0x84] sm:$0x1] %v3389_v16  ;;  %v3515_v23 = vrot.slane %v3513_v52, 5  ;;  %v3519_v60 = vshll.u32 %v3442_v46, 16  ;;  %9340 = vmatprep.subr.bf16.mxu1 %v9870_v36 }
 0x1db   :  { %v3496_v31 = vshrl.u32 %v3439_v21, 16  ;;  %v3526_v45 = vrot.slane %v3524_v4, 4  ;;  %v3529_v59 = vrot.slane %v3527_v28, 5  ;;  %v3499_v44 = vshll.u32 %v3439_v21, 16  ;;  %v3440_v32 = vld [vmem:[#allocation3 + $0x14] sm:$0x1] }
 0x1dc   :  { %v3583_v38 = vshll.u32 %v11468_v18, 16  ;;  %v3516_v20 = vor.u32 %v3515_v23, %v3512_v56  ;;  %v3533_v26 = vshll.u32 %v3444_v53, 16  ;;  %v3566_v43 = vshrl.u32 %v3449_v27, 16  ;;  %v9871_v63 = vld [vmem:[%s13751_s2 + $0x8] sm:$0xff]   ;;  %v9872_v25 = vld [vmem:[%s13751_s2 + $0x40] sm:$0xff]   ;;  %v9876_v23 = vld [vmem:[%s13751_s2 + $0x118] sm:$0xff]  }
 0x1dd   :  { %v3498_v9 = vrot.slane %v3496_v31, 4  ;;  %v3530_v40 = vor.u32 %v3529_v59, %v3526_v45  ;;  %v3501_v19 = vrot.slane %v3499_v44, 5  ;;  %v3569_v11 = vshll.u32 %v3449_v27, 16  ;;  %v3445_v48 = vld [vmem:[#allocation3 + $0x28] sm:$0xf]  ;;  %9341 = vmatpush3.bf16.msra.mxu1 %v9871_v63  ;;  %v9873_v0 = vld [vmem:[%s13751_s2] sm:$0xff]  }
 0x1de   :  { %v3517_v42 = vrot.slane %v3516_v20, 4  ;;  %v3521_v30 = vrot.slane %v3519_v60, 5  ;;  %v4952_v50 = vsel %vm10575_vm1, %v8975_v58, %v4951_v13  ;;  %v3505_v1 = vshll.u32 %v3440_v32, 16  ;;  %v3450_v41 = vld [vmem:[#allocation3 + $0x3c] sm:$0x1]  ;;  %9342 = vmatprep.subr.bf16.mxu1 %v9872_v25 }
 0x1df   :  { %v3502_v7 = vor.u32 %v3501_v19, %v3498_v9  ;;  %v3568_v8 = vrot.slane %v3566_v43, 4  ;;  %v3582_v24 = vrot.slane %v3580_v14, 4  ;;  %4992 = vst.msk [vmem:[#allocation4 + $0x4c] sm:$0xf] %vm3051_vm5, %v4924_v34  ;;  %4999 = vst.msk [vmem:[#allocation4 + $0xd8] sm:$0xf] %vm3051_vm5, %v4952_v50 }
 0x1e0   :  { %v3522_v17 = vsel %vm10330_vm12, %v3517_v42, %v3521_v30  ;;  %v3531_v33 = vrot.slane %v3530_v40, 4  ;;  %v3535_v55 = vrot.slane %v3533_v26, 5  ;;  %v3452_v29 = vld [vmem:[#allocation3 + $0x54] sm:$0x1]  ;;  %v3585_v39 = vrot.slane %v3583_v38, 5 }
 0x1e1   :  { %3697 = vrot.lane.b32.xlu1 %v3522_v17, %s10049_s1  ;;  %v3503_v18 = vrot.slane %v3502_v7, 4  ;;  %v3571_v14 = vrot.slane %v3569_v11, 5  ;;  %v3446_v2 = vld [vmem:[#allocation3 + $0x2c] sm:$0x1]  ;;  %v3538_v5 = vshrl.u32 %v3445_v48, 16  ;;  %v3575_v46 = vshll.u32 %v3450_v41, 16  ;;  %9343 = vmatpush3.bf16.msra.mxu1 %v9873_v0 }
 0x1e2   :  { %v3536_v62 = vsel %vm10330_vm12, %v3531_v33, %v3535_v55  ;;  %v3541_v12 = vshll.u32 %v3445_v48, 16  ;;  %v3447_v61 = vld [vmem:[#allocation3 + $0x30] sm:$0xf]  ;;  %v3507_v57 = vrot.slane %v3505_v1, 5  ;;  %v3589_v22 = vshll.u32 %v3452_v29, 16  ;;  %9770 = vmatprep.subr.bf16.mxu1 %v9876_v23 }
 0x1e3   :  { %3699 = vrot.lane.b32.xlu0 %v3536_v62, %s10049_s1  ;;  %v3572_v35 = vor.u32 %v3571_v14, %v3568_v8  ;;  %v3540_v54 = vrot.slane %v3538_v5, 4  ;;  %v3457_v51 = vld [vmem:[#allocation3 + $0x68] sm:$0xf]  ;;  %v3921_v21 = vld [vmem:[#allocation3 + $0x30] sm:$0xf]  ;;  %v3547_v58 = vshll.u32 %v3446_v2, 16  ;;  %v3586_v6 = vor.u32 %v3585_v39, %v3582_v24 }
 0x1e4   :  { %v3543_v47 = vrot.slane %v3541_v12, 5  ;;  %v3453_v56 = vld [vmem:[#allocation3 + $0x58] sm:$0xf]  ;;  %v3508_v52 = vsel %vm10330_vm12, %v3503_v18, %v3507_v57  ;;  %v3552_v10 = vshrl.u32 %v3447_v61, 16  ;;  %v3555_v16 = vshll.u32 %v3447_v61, 16 }
 0x1e5   :  { %3958 = vrot.lane.b32.xlu1 %v3921_v21, %s10049_s1  ;;  %v3573_v36 = vrot.slane %v3572_v35, 4  ;;  %v3577_v53 = vrot.slane %v3575_v46, 5  ;;  %v3622_v28 = vshrl.u32 %v3457_v51, 16  ;;  %v3625_v27 = vshll.u32 %v3457_v51, 16  ;;  %v3459_v13 = vld [vmem:[#allocation3 + $0x70] sm:$0xf] }
 0x1e6   :  { %v3544_v4 = vor.u32 %v3543_v47, %v3540_v54  ;;  %v11762_v60 = vrot.slane %v3589_v22, 5  ;;  %v3594_v31 = vshrl.u32 %v3453_v56, 16  ;;  %v3920_v59 = vld [vmem:[#allocation3 + $0x28] sm:$0xf]  ;;  %v11766_v38 = vrot.slane %v3586_v6, 4 }
 0x1e7   :  { %3695 = vrot.lane.b32.xlu0 %v3508_v52, %s10049_s1  ;;  %v3578_v45 = vsel %vm10330_vm12, %v3573_v36, %v3577_v53  ;;  %v3448_v20 = vld [vmem:[#allocation3 + $0x34] sm:$0x1]  ;;  %v3455_v26 = vld [vmem:[#allocation3 + $0x60] sm:$0xf]  ;;  %v3554_v32 = vrot.slane %v3552_v10, 4  ;;  %v3557_v9 = vrot.slane %v3555_v16, 5 }
 0x1e8   :  { %v3545_v44 = vrot.slane %v3544_v4, 4  ;;  %v3597_v43 = vshll.u32 %v3453_v56, 16  ;;  %v3636_v63 = vshrl.u32 %v3459_v13, 16  ;;  %v3465_v40 = vld [vmem:[#allocation3 + $0x88] sm:$0xf]  ;;  %v3549_v11 = vrot.slane %v3547_v58, 5 }
 0x1e9   :  { %3705 = vrot.lane.b32.xlu1 %v3578_v45, %s10049_s1  ;;  %v11769_v19 = vld [vmem:[#allocation3 + $0x78] sm:$0xe]  ;;  %v3458_v25 = vld [vmem:[#allocation3 + $0x6c] sm:$0x1]  ;;  %v3624_v42 = vrot.slane %v3622_v28, 4  ;;  %v3627_v30 = vrot.slane %v3625_v27, 5  ;;  %v3592_v39 = vsel %vm10330_vm12, %v11766_v38, %v11762_v60  ;;  %v3558_v0 = vor.u32 %v3557_v9, %v3554_v32 }
 0x1ea   :  { %v3639_v48 = vshll.u32 %v3459_v13, 16  ;;  %v11771_v34 = vld [vmem:[#allocation3 + $0x7c] sm:$0x1]  ;;  %v3561_v50 = vshll.u32 %v3448_v20, 16  ;;  %v3596_v7 = vrot.slane %v3594_v31, 4  ;;  %v3599_v1 = vrot.slane %v3597_v43, 5 }
 0x1eb   :  { %3956 = vrot.lane.b32.xlu0 %v3920_v59, %s10049_s1  ;;  %v11774_v41 = vld [vmem:[#allocation3 + $0x90] sm:$0xe]  ;;  %v3550_v8 = vsel %vm10330_vm12, %v3545_v44, %v3549_v11  ;;  %v3922_v24 = vld [vmem:[#allocation3 + $0x38] sm:$0xf]  ;;  %v3638_v17 = vrot.slane %v3636_v63, 4  ;;  %v3608_v55 = vshrl.u32 %v3455_v26, 16  ;;  %v3628_v46 = vor.u32 %v3627_v30, %v3624_v42 }
 0x1ec   :  { %v3641_v33 = vrot.slane %v3639_v48, 5  ;;  %v3454_v18 = vld [vmem:[#allocation3 + $0x5c] sm:$0x1]  ;;  %v3611_v14 = vshll.u32 %v3455_v26, 16  ;;  %v3461_v2 = vld [vmem:[#allocation3 + $0x78] sm:$0xf]  ;;  %v3600_v51 = vor.u32 %v3599_v1, %v3596_v7 }
 0x1ed   :  { %3701 = vrot.lane.b32.xlu1 %v3550_v8, %s10049_s1  ;;  %v3923_v62 = vld [vmem:[#allocation3 + $0x40] sm:$0xf]  ;;  %v3460_v12 = vld [vmem:[#allocation3 + $0x74] sm:$0x1]  ;;  %v3678_v61 = vshrl.u32 %v3465_v40, 16  ;;  %v3681_v57 = vshll.u32 %v3465_v40, 16 }
 0x1ee   :  { %v3563_v54 = vrot.slane %v3561_v50, 5  ;;  %v3631_v22 = vshll.u32 %v3458_v25, 16  ;;  %v3456_v21 = vld [vmem:[#allocation3 + $0x64] sm:$0x1]  ;;  %v3642_v47 = vor.u32 %v3641_v33, %v3638_v17  ;;  %v3610_v58 = vrot.slane %v3608_v55, 4 }
 0x1ef   :  { %3960 = vrot.lane.b32.xlu0 %v3922_v24, %s10049_s1  ;;  %v3613_v6 = vrot.slane %v3611_v14, 5  ;;  %v3466_v56 = vld [vmem:[#allocation3 + $0x8c] sm:$0x1]  ;;  %v3650_v52 = vshrl.u32 %v3461_v2, 16  ;;  %v11787_v36 = vld [vmem:[#allocation3 + $0x94] sm:$0x1] }
 0x1f0   :  { %v3559_v10 = vrot.slane %v3558_v0, 4  ;;  %v3603_v16 = vshll.u32 %v3454_v18, 16  ;;  %v3645_v53 = vshll.u32 %v3460_v12, 16  ;;  %v3653_v4 = vshll.u32 %v3461_v2, 16  ;;  %v3925_v28 = vld [vmem:[#allocation3 + $0x60] sm:$0xf] }
 0x1f1   :  { %3962 = vrot.lane.b32.xlu1 %v3923_v62, %s10049_s1  ;;  %v3629_v27 = vrot.slane %v3628_v46, 4  ;;  %v3617_v13 = vshll.u32 %v3456_v21, 16  ;;  %v3680_v23 = vrot.slane %v3678_v61, 4  ;;  %v3683_v60 = vrot.slane %v3681_v57, 5  ;;  %v3463_v31 = vld [vmem:[#allocation3 + $0x80] sm:$0xf] }
 0x1f2   :  { %v11791_v45 = vrot.slane %v3600_v51, 4  ;;  %v3687_v59 = vshll.u32 %v3466_v56, 16  ;;  %v3462_v44 = vld [vmem:[#allocation3 + $0x7c] sm:$0x1]  ;;  %v3652_v38 = vrot.slane %v3650_v52, 4  ;;  %v3655_v20 = vrot.slane %v3653_v4, 5 }
 0x1f3   :  { %3707 = vrot.lane.b32.xlu0 %v3592_v39, %s10049_s1  ;;  %v4527_v26 = vld [vmem:[#allocation3 + $0x18] sm:$0xf]  ;;  %v3633_v9 = vrot.slane %v3631_v22, 5  ;;  %v11794_v43 = vrot.slane %v3642_v47, 4  ;;  %v3614_v63 = vor.u32 %v3613_v6, %v3610_v58  ;;  %v3403_v40 = vld [vmem:[#allocation3] sm:$0xf]  ;;  %v3564_v11 = vsel %vm10330_vm12, %v3559_v10, %v3563_v54 }
 0x1f4   :  { %v3605_v25 = vrot.slane %v3603_v16, 5  ;;  %v11799_v42 = vrot.slane %v3645_v53, 5  ;;  %v4300_v30 = vld [vmem:[#allocation3 + $0x8] sm:$0xe]  ;;  %v3664_v48 = vshrl.u32 %v3463_v31, 16  ;;  %v3684_v7 = vor.u32 %v3683_v60, %v3680_v23  ;;  %v9882_v53 = vld [vmem:[%s13751_s2 + $0xf8] sm:$0xff]  }
 0x1f5   :  { %3966 = vrot.lane.b32.xlu1 %v3925_v28, %s10049_s1  ;;  %3419 = vst.msk [vmem:[#allocation4] sm:$0xf] %vm3051_vm5, %v3403_v40  ;;  %v3634_v50 = vsel %vm10330_vm12, %v3629_v27, %v3633_v9  ;;  %v3659_v1 = vshll.u32 %v3462_v44, 16  ;;  %v4301_v8 = vld [vmem:[#allocation3 + $0xc] sm:$0x1]  ;;  %v3667_v24 = vshll.u32 %v3463_v31, 16  ;;  %v3656_v0 = vor.u32 %v3655_v20, %v3652_v38  ;;  %9392 = vmatprep.subr.bf16.mxu0 %v9882_v53 }
 0x1f6   :  { %v4525_v17 = vld [vmem:[#allocation3 + $0x10] sm:$0xf]  ;;  %v3606_v33 = vsel %vm10330_vm12, %v11791_v45, %v3605_v25  ;;  %v11808_v55 = vrot.slane %v3617_v13, 5  ;;  %v11810_v39 = vrot.slane %v3687_v59, 5  ;;  %v4303_v14 = vld [vmem:[#allocation3 + $0x14] sm:$0x1]  ;;  %v3648_v62 = vsel %vm10330_vm12, %v11794_v43, %v11799_v42 }
 0x1f7   :  { %3703 = vrot.lane.b32.xlu0 %v3564_v11, %s10049_s1  ;;  %v4302_v18 = vld [vmem:[#allocation3 + $0x10] sm:$0xe]  ;;  %v4528_v2 = vld [vmem:[#allocation3 + $0x1c] sm:$0x1]  ;;  %v11816_v46 = vrot.slane %v3614_v63, 4  ;;  %v4572_v61 = vshrl.u32 %v4527_v26, 16 }
 0x1f8   :  { %v3464_v12 = vld [vmem:[#allocation3 + $0x84] sm:$0x1]  ;;  %v4575_v57 = vshll.u32 %v4527_v26, 16  ;;  %v4526_v54 = vld [vmem:[#allocation3 + $0x14] sm:$0x1]  ;;  %v3666_v51 = vrot.slane %v3664_v48, 4 }
 0x1f9   :  { %3713 = vrot.lane.b32.xlu1 %v3634_v50, %s10049_s1  ;;  %v3924_v22 = vld [vmem:[#allocation3 + $0x58] sm:$0xf]  ;;  %v3669_v21 = vrot.slane %v3667_v24, 5  ;;  %v4558_v47 = vshrl.u32 %v4525_v17, 16  ;;  %v4561_v58 = vshll.u32 %v4525_v17, 16  ;;  %v11819_v56 = vrot.slane %v3684_v7, 4 }
 0x1fa   :  { %v4531_v6 = vld [vmem:[#allocation3 + $0x28] sm:$0xf]  ;;  %v11821_v52 = vrot.slane %v3659_v1, 5  ;;  %v8949_v10 = vrot.slane %v4300_v30, 9  ;;  %v4366_v16 = vrot.slane %v4301_v8, 5  ;;  %v11827_v4 = vrot.slane %v3656_v0, 4 }
 0x1fb   :  { %3964 = vrot.lane.b32.xlu0 %v3924_v22, %s10049_s1  ;;  %v8950_v28 = vrot.slane %v4302_v18, 9  ;;  %v4370_v27 = vrot.slane %v4303_v14, 5  ;;  %v3673_v13 = vshll.u32 %v3464_v12, 16  ;;  %v4306_v23 = vld [vmem:[#allocation3 + $0x20] sm:$0xe]  ;;  %v9883_v60 = vld [vmem:[%s13751_s2 + $0xb8] sm:$0xff]   ;;  %v3620_v31 = vsel %vm10330_vm12, %v11816_v46, %v11808_v55 }
 0x1fc   :  { %v4574_v45 = vrot.slane %v4572_v61, 4  ;;  %v4577_v59 = vrot.slane %v4575_v57, 5  ;;  %v4581_v44 = vshll.u32 %v4528_v2, 16  ;;  %v4529_v38 = vld [vmem:[#allocation3 + $0x20] sm:$0xf]  ;;  %v3670_v20 = vor.u32 %v3669_v21, %v3666_v51  ;;  %9393 = vmatpush3.bf16.msra.mxu0 %v9883_v60  ;;  %v9884_v14 = vld [vmem:[%s13751_s2 + $0xf0] sm:$0xff]  }
 0x1fd   :  { %3709 = vrot.lane.b32.xlu1 %v3606_v33, %s10049_s1  ;;  %v4560_v26 = vrot.slane %v4558_v47, 4  ;;  %v4563_v9 = vrot.slane %v4561_v58, 5  ;;  %v4567_v63 = vshll.u32 %v4526_v54, 16  ;;  %v4307_v40 = vld [vmem:[#allocation3 + $0x24] sm:$0x1]  ;;  %v3690_v30 = vsel %vm10330_vm12, %v11819_v56, %v11810_v39  ;;  %9394 = vmatprep.subr.bf16.mxu0 %v9884_v14  ;;  %v9885_v53 = vld [vmem:[%s13751_s2 + $0xb0] sm:$0xff]  }
 0x1fe   :  { %v11837_v11 = vld [vmem:[#allocation3 + $0x18] sm:$0xe]  ;;  %v3926_v25 = vld [vmem:[#allocation3 + $0x68] sm:$0xf]  ;;  %v11845_v48 = vsel %vm10575_vm1, %v8949_v10, %v4366_v16  ;;  %v11847_v50 = vld [vmem:[#allocation3 + $0x1c] sm:$0x1]  ;;  %v3662_v8 = vsel %vm10330_vm12, %v11827_v4, %v11821_v52  ;;  %v11856_v24 = vsel %vm10575_vm1, %v8950_v28, %v4370_v27  ;;  %v4578_v12 = vor.u32 %v4577_v59, %v4574_v45 }
 0x1ff   :  { %v4600_v7 = vshrl.u32 %v4531_v6, 16  ;;  %v4603_v1 = vshll.u32 %v4531_v6, 16  ;;  %3968 = vrot.lane.b32.xlu0 %v3926_v25, %s10049_s1  ;;  %v11858_v17 = vrot.slane %v3673_v13, 5  ;;  %v11860_v33 = vld [vmem:[#allocation3 + $0x2c] sm:$0x1]  ;;  %v4586_v0 = vshrl.u32 %v4529_v38, 16 }
 0x200   :  { %v4535_v18 = vld [vmem:[#allocation3 + $0x38] sm:$0xf]  ;;  %v3927_v2 = vld [vmem:[#allocation3 + $0x70] sm:$0xf]  ;;  %v8952_v61 = vrot.slane %v4306_v23, 9  ;;  %v4378_v57 = vrot.slane %v4307_v40, 5  ;;  %v4564_v47 = vor.u32 %v4563_v9, %v4560_v26  ;;  %9395 = vmatpush3.bf16.msra.mxu0 %v9885_v53 }
 0x201   :  { %v11865_v54 = vld [vmem:[#allocation3 + $0x24] sm:$0x1]  ;;  %v4589_v22 = vshll.u32 %v4529_v38, 16  ;;  %3970 = vrot.lane.b32.xlu1 %v3927_v2, %s10049_s1  ;;  %v11868_v51 = vrot.slane %v3670_v20, 4  ;;  %v11870_v21 = vrot.slane %v4581_v44, 5  ;;  %v11872_v58 = vrot.slane %v4567_v63, 5 }
 0x202   :  { %v11874_v6 = vld [vmem:[#allocation3 + $0x30] sm:$0xe]  ;;  %v11876_v10 = vld [vmem:[#allocation3 + $0x34] sm:$0x1]  ;;  %v8951_v28 = vrot.slane %v11837_v11, 9  ;;  %v4374_v27 = vrot.slane %v11847_v50, 5  ;;  %v11899_v63 = vsel %vm10575_vm1, %v8952_v61, %v4378_v57 }
 0x203   :  { %v4533_v16 = vld [vmem:[#allocation3 + $0x30] sm:$0xf]  ;;  %v4602_v13 = vrot.slane %v4600_v7, 4  ;;  %v4605_v23 = vrot.slane %v4603_v1, 5  ;;  %v9886_v60 = vld [vmem:[%s13751_s2 + $0xe8] sm:$0xff]   ;;  %3715 = vrot.lane.b32.xlu0 %v3648_v62, %s10049_s1  ;;  %v4588_v45 = vrot.slane %v4586_v0, 4  ;;  %v3676_v11 = vsel %vm10330_vm12, %v11868_v51, %v11858_v17 }
 0x204   :  { %v4591_v59 = vrot.slane %v4589_v22, 5  ;;  %v4628_v44 = vshrl.u32 %v4535_v18, 16  ;;  %v4631_v38 = vshll.u32 %v4535_v18, 16  ;;  %v9887_v20 = vld [vmem:[%s13751_s2 + $0xa8] sm:$0xff]   ;;  %v3929_v26 = vld [vmem:[#allocation3 + $0x80] sm:$0xf]  ;;  %9396 = vmatprep.subr.bf16.mxu0 %v9886_v60  ;;  %v11936_v55 = vsel %vm10575_vm1, %v8951_v28, %v4374_v27 }
 0x205   :  { %v11895_v9 = vrot.slane %v4578_v12, 4  ;;  %v4609_v40 = vshll.u32 %v11860_v33, 16  ;;  %v4614_v43 = vshrl.u32 %v4533_v16, 16  ;;  %v4539_v42 = vld [vmem:[#allocation3 + $0x48] sm:$0xf]  ;;  %v9888_v62 = vld [vmem:[%s13751_s2 + $0xe0] sm:$0xff]   ;;  %3974 = vrot.lane.b32.xlu1 %v3929_v26, %s10049_s1  ;;  %v4606_v12 = vor.u32 %v4605_v23, %v4602_v13  ;;  %9397 = vmatpush3.bf16.msra.mxu0 %v9887_v20 }
 0x206   :  { %v11910_v25 = vrot.slane %v4564_v47, 4  ;;  %v4595_v50 = vshll.u32 %v11865_v54, 16  ;;  %v4536_v7 = vld [vmem:[#allocation3 + $0x3c] sm:$0x1]  ;;  %v4617_v1 = vshll.u32 %v4533_v16, 16  ;;  %v8954_v33 = vrot.slane %v11874_v6, 9  ;;  %9398 = vmatprep.subr.bf16.mxu0 %v9888_v62 }
 0x207   :  { %v4386_v0 = vrot.slane %v11876_v10, 5  ;;  %v11915_v18 = vld [vmem:[#allocation3 + $0x28] sm:$0xe]  ;;  %v4630_v14 = vrot.slane %v4628_v44, 4  ;;  %v4633_v2 = vrot.slane %v4631_v38, 5  ;;  %3711 = vrot.lane.b32.xlu0 %v3620_v31, %s10049_s1  ;;  %v4592_v61 = vor.u32 %v4591_v59, %v4588_v45  ;;  %v9891_v47 = vld [vmem:[%s13751_s2 + $0xa0] sm:$0xff]  }
 0x208   :  { %v11923_v57 = vld [vmem:[#allocation3 + $0x2c] sm:$0x1]  ;;  %v11925_v54 = vrot.slane %v4614_v43, 4  ;;  %v4619_v22 = vrot.slane %v4617_v1, 5  ;;  %v3928_v6 = vld [vmem:[#allocation3 + $0x78] sm:$0xf]  ;;  %v4584_v10 = vsel %vm10330_vm12, %v11895_v9, %v11870_v21  ;;  %v4570_v28 = vsel %vm10330_vm12, %v11910_v25, %v11872_v58 }
 0x209   :  { %v11938_v46 = vrot.slane %v4609_v40, 5  ;;  %v4637_v31 = vshll.u32 %v4536_v7, 16  ;;  %v11940_v16 = vld [vmem:[#allocation3 + $0x34] sm:$0x1]  ;;  %v11942_v53 = vld [vmem:[#allocation3 + $0x40] sm:$0xe]  ;;  %3721 = vrot.lane.b32.xlu1 %v3690_v30, %s10049_s1  ;;  %v11968_v20 = vsel %vm10575_vm1, %v8954_v33, %v4386_v0  ;;  %v4634_v56 = vor.u32 %v4633_v2, %v4630_v14  ;;  %9399 = vmatpush3.bf16.msra.mxu0 %v9891_v47 }
 0x20a   :  { %v11944_v13 = vld [vmem:[#allocation3 + $0x44] sm:$0x1]  ;;  %v11946_v23 = vld [vmem:[#allocation3 + $0x4c] sm:$0x1]  ;;  %v9893_v60 = vld [vmem:[%s13751_s2 + $0xd8] sm:$0xff]   ;;  %v11961_v27 = vrot.slane %v4595_v50, 5  ;;  %v4620_v50 = vor.u32 %v4619_v22, %v11925_v54 }
 0x20b   :  { %v8953_v45 = vrot.slane %v11915_v18, 9  ;;  %v11964_v59 = vld [vmem:[#allocation3 + $0x38] sm:$0xe]  ;;  %v4656_v44 = vshrl.u32 %v4539_v42, 16  ;;  %v4537_v38 = vld [vmem:[#allocation3 + $0x40] sm:$0xf]  ;;  %3972 = vrot.lane.b32.xlu0 %v3928_v6, %s10049_s1  ;;  %9400 = vmatprep.subr.bf16.mxu0 %v9893_v60 }
 0x20c   :  { %v4382_v39 = vrot.slane %v11923_v57, 5  ;;  %v11971_v30 = vld [vmem:[#allocation3 + $0x3c] sm:$0x1]  ;;  %v4659_v26 = vshll.u32 %v4539_v42, 16  ;;  %v3404_v40 = vld [vmem:[#allocation3 + $0x8] sm:$0xf] }
 0x20d   :  { %v11974_v43 = vrot.slane %v4606_v12, 4  ;;  %v11976_v62 = vrot.slane %v4592_v61, 4  ;;  %v4658_v7 = vrot.slane %v4656_v44, 4  ;;  %v4543_v1 = vld [vmem:[#allocation3 + $0x68] sm:$0xf]  ;;  %v9894_v33 = vld [vmem:[%s13751_s2 + $0x98] sm:$0xff]   ;;  %3717 = vrot.lane.b32.xlu1 %v3662_v8, %s10049_s1 }
 0x20e   :  { %3420 = vst.msk [vmem:[#allocation4 + $0x14] sm:$0xf] %vm3051_vm5, %v3404_v40  ;;  %v3930_v0 = vld [vmem:[#allocation3 + $0x88] sm:$0xf]  ;;  %v11983_v42 = vrot.slane %v4637_v31, 5  ;;  %v4661_v18 = vrot.slane %v4659_v26, 5  ;;  %9401 = vmatpush3.bf16.msra.mxu0 %v9894_v33 }
 0x20f   :  { %v11985_v14 = vld [vmem:[#allocation3 + $0x44] sm:$0x1]  ;;  %v4642_v2 = vshrl.u32 %v4537_v38, 16  ;;  %v4645_v12 = vshll.u32 %v4537_v38, 16  ;;  %v11987_v61 = vld [vmem:[#allocation3 + $0x60] sm:$0xe]  ;;  %3976 = vrot.lane.b32.xlu0 %v3930_v0, %s10049_s1 }
 0x210   :  { %v9897_v57 = vld [vmem:[%s13751_s2 + $0xd0] sm:$0xff]   ;;  %v4623_v54 = vshll.u32 %v11940_v16, 16  ;;  %v8956_v22 = vrot.slane %v11942_v53, 9  ;;  %v4394_v47 = vrot.slane %v11944_v13, 5  ;;  %v4665_v6 = vshll.u32 %v11946_v23, 16  ;;  %v9904_v17 = vld [vmem:[%s13751_s2 + $0x80] sm:$0xff]  }
 0x211   :  { %v12002_v31 = vld [vmem:[#allocation3 + $0x64] sm:$0x1]  ;;  %v12004_v60 = vld [vmem:[#allocation3 + $0x58] sm:$0xe]  ;;  %v4541_v44 = vld [vmem:[#allocation3 + $0x60] sm:$0xf]  ;;  %v4662_v4 = vor.u32 %v4661_v18, %v4658_v7  ;;  %v12013_v16 = vsel %vm10575_vm1, %v8953_v45, %v4382_v39  ;;  %9402 = vmatprep.subr.bf16.mxu0 %v9897_v57 }
 0x212   :  { %v3931_v38 = vld [vmem:[#allocation3 + $0x90] sm:$0xf]  ;;  %v12006_v26 = vrot.slane %v4634_v56, 4  ;;  %v8955_v40 = vrot.slane %v11964_v59, 9  ;;  %v4390_v52 = vrot.slane %v11971_v30, 5  ;;  %v12015_v53 = vrot.slane %v4620_v50, 4 }
 0x213   :  { %v4317_v8 = vld [vmem:[#allocation3 + $0x5c] sm:$0x1]  ;;  %v4684_v13 = vshrl.u32 %v4543_v1, 16  ;;  %v4687_v23 = vshll.u32 %v4543_v1, 16  ;;  %v3406_v35 = vld [vmem:[#allocation3 + $0x18] sm:$0xf]  ;;  %v4612_v56 = vsel %vm10330_vm12, %v11974_v43, %v11938_v46  ;;  %3978 = vrot.lane.b32.xlu1 %v3931_v38, %s10049_s1  ;;  %4428 = vrot.lane.b32.xlu0 %v11845_v48, %s10049_s1 }
 0x214   :  { %v9898_v59 = vld [vmem:[%s13751_s2 + $0x90] sm:$0xff]   ;;  %v12024_v30 = vrot.slane %v4642_v2, 4  ;;  %v12026_v7 = vrot.slane %v4645_v12, 5  ;;  %v4670_v45 = vshrl.u32 %v4541_v44, 16  ;;  %3422 = vst.msk [vmem:[#allocation4 + $0x3c] sm:$0xf] %vm3051_vm5, %v3406_v35 }
 0x215   :  { %v3407_v39 = vld [vmem:[#allocation3 + $0x20] sm:$0xf]  ;;  %v9899_v50 = vld [vmem:[%s13751_s2 + $0xc8] sm:$0xff]   ;;  %v12033_v1 = vrot.slane %v4665_v6, 5  ;;  %v4651_v33 = vshll.u32 %v11985_v14, 16  ;;  %v8958_v0 = vrot.slane %v11987_v61, 9  ;;  %9403 = vmatpush3.bf16.msra.mxu0 %v9898_v59 }
 0x216   :  { %v4544_v18 = vld [vmem:[#allocation3 + $0x6c] sm:$0x1]  ;;  %v4673_v2 = vshll.u32 %v4541_v44, 16  ;;  %3423 = vst.msk [vmem:[#allocation4 + $0x50] sm:$0xf] %vm3051_vm5, %v3407_v39  ;;  %v12038_v12 = vrot.slane %v4662_v4, 4  ;;  %9404 = vmatprep.subr.bf16.mxu0 %v9899_v50  ;;  %v3692_v50 = vpop.permute.xlu0 %3691 }
 0x217   :  { %v4402_v35 = vrot.slane %v12002_v31, 5  ;;  %v8957_v57 = vrot.slane %v12004_v60, 9  ;;  %v4398_v32 = vrot.slane %v4317_v8, 5  ;;  %v12042_v29 = vld [vmem:[#allocation3 + $0x64] sm:$0x1]  ;;  %v9900_v6 = vld [vmem:[%s13751_s2 + $0x88] sm:$0xff]   ;;  %v4598_v31 = vsel %vm10330_vm12, %v11976_v62, %v11961_v27  ;;  %4430 = vrot.lane.b32.xlu1 %v11856_v24, %s10049_s1  ;;  %3719 = vrot.lane.b32.xlu0 %v3676_v11, %s10049_s1 }
 0x218   :  { %v12049_v14 = vrot.slane %v4684_v13, 4  ;;  %v4689_v61 = vrot.slane %v4687_v23, 5  ;;  %v4672_v44 = vrot.slane %v4670_v45, 4  ;;  %v4675_v38 = vrot.slane %v4673_v2, 5  ;;  %v3405_v4 = vld [vmem:[#allocation3 + $0x10] sm:$0xf] }
 0x219   :  { %v12055_v60 = vrot.slane %v4623_v54, 5  ;;  %v4648_v8 = vor.u32 %v12026_v7, %v12024_v30  ;;  %v4693_v39 = vshll.u32 %v4544_v18, 16  ;;  %v12059_v5 = vld [vmem:[#allocation3 + $0x70] sm:$0xe]  ;;  %v12061_v48 = vld [vmem:[#allocation3 + $0x74] sm:$0x1]  ;;  %v12077_v30 = vsel %vm10575_vm1, %v8956_v22, %v4394_v47  ;;  %9405 = vmatpush3.bf16.msra.mxu0 %v9900_v6 }
 0x21a   :  { %v12063_v13 = vld [vmem:[#allocation3 + $0x68] sm:$0xe]  ;;  %3421 = vst.msk [vmem:[#allocation4 + $0x28] sm:$0xf] %vm3051_vm5, %v3405_v4  ;;  %v3410_v23 = vld [vmem:[#allocation3 + $0x38] sm:$0xf]  ;;  %v12081_v7 = vsel %vm10575_vm1, %v8955_v40, %v4390_v52  ;;  %v12094_v22 = vsel %vm10575_vm1, %v8958_v0, %v4402_v35  ;;  %v12098_v47 = vsel %vm10575_vm1, %v8957_v57, %v4398_v32  ;;  %v4690_v32 = vor.u32 %v4689_v61, %v12049_v14 }
 0x21b   :  { %v9901_v59 = vld [vmem:[%s13751_s2 + $0xc0] sm:$0xff]   ;;  %v12083_v45 = vld [vmem:[#allocation3 + $0x6c] sm:$0x1]  ;;  %v4547_v18 = vld [vmem:[#allocation3 + $0x78] sm:$0xf]  ;;  %v12090_v2 = vrot.slane %v4651_v33, 5  ;;  %v4676_v0 = vor.u32 %v4675_v38, %v4672_v44  ;;  %4783 = vrot.lane.b32.xlu1 %v4584_v10, %s10049_s1  ;;  %4781 = vrot.lane.b32.xlu0 %v4570_v28, %s10049_s1 }
 0x21c   :  { %3426 = vst.msk [vmem:[#allocation4 + $0x8c] sm:$0xf] %vm3051_vm5, %v3410_v23  ;;  %v12101_v40 = vld [vmem:[#allocation3 + $0x7c] sm:$0x1]  ;;  %v3760_v52 = vld [vmem:[#allocation3 + $0x10] sm:$0xe]  ;;  %9406 = vmatprep.subr.bf16.mxu0 %v9901_v59 }
 0x21d   :  { %3740 = vst.msk [vmem:[#allocation4] sm:$0xf] %vm3739_vm3, %v3692_v50  ;;  %v3408_v4 = vld [vmem:[#allocation3 + $0x28] sm:$0xf]  ;;  %v4679_v35 = vshll.u32 %v12042_v29, 16  ;;  %v12119_v51 = vrot.slane %v4648_v8, 4  ;;  %9407 = vmatpush3.bf16.msra.mxu0 %v9904_v17 }
 0x21e   :  { %v4545_v57 = vld [vmem:[#allocation3 + $0x70] sm:$0xf]  ;;  %v3761_v23 = vld [vmem:[#allocation3 + $0x14] sm:$0x1]  ;;  %3424 = vst.msk [vmem:[#allocation4 + $0x64] sm:$0xf] %vm3051_vm5, %v3408_v4 }
 0x21f   :  { %v12121_v11 = vrot.slane %v4693_v39, 5  ;;  %v4712_v50 = vshrl.u32 %v4547_v18, 16  ;;  %v4715_v33 = vshll.u32 %v4547_v18, 16  ;;  %v4546_v24 = vld [vmem:[#allocation3 + $0x74] sm:$0x1]  ;;  %v8960_v29 = vrot.slane %v12059_v5, 9  ;;  %4434 = vrot.lane.b32.xlu1 %v11899_v63, %s10049_s1  ;;  %4432 = vrot.lane.b32.xlu0 %v11936_v55, %s10049_s1 }
 0x220   :  { %v3756_v14 = vld [vmem:[#allocation3] sm:$0xe]  ;;  %v4410_v6 = vrot.slane %v12061_v48, 5  ;;  %v8959_v61 = vrot.slane %v12063_v13, 9  ;;  %v8935_v44 = vrot.slane %v3760_v52, 9  ;;  %v4406_v8 = vrot.slane %v12083_v45, 5 }
 0x221   :  { %v3757_v38 = vld [vmem:[#allocation3 + $0x4] sm:$0x1]  ;;  %v4698_v39 = vshrl.u32 %v4545_v57, 16  ;;  %v4701_v18 = vshll.u32 %v4545_v57, 16  ;;  %v3830_v59 = vrot.slane %v3761_v23, 5  ;;  %v12139_v5 = vrot.slane %v4690_v32, 4 }
 0x222   :  { %v4551_v4 = vld [vmem:[#allocation3 + $0x88] sm:$0xf]  ;;  %v12141_v21 = vrot.slane %v4676_v0, 4  ;;  %v12143_v9 = vrot.slane %v4679_v35, 5  ;;  %v4721_v10 = vshll.u32 %v12101_v40, 16  ;;  %v12146_v13 = vrot.slane %v4712_v50, 4 }
 0x223   :  { %v3411_v48 = vld [vmem:[#allocation3 + $0x50] sm:$0xf]  ;;  %v12148_v45 = vrot.slane %v4715_v33, 5  ;;  %v3831_v52 = vsel %vm10575_vm1, %v8935_v44, %v3830_v59  ;;  %v8933_v57 = vrot.slane %v3756_v14, 9  ;;  %v4549_v58 = vld [vmem:[#allocation3 + $0x80] sm:$0xf]  ;;  %v12161_v28 = vsel %vm10575_vm1, %v8960_v29, %v4410_v6  ;;  %4787 = vrot.lane.b32.xlu1 %v4612_v56, %s10049_s1  ;;  %4785 = vrot.lane.b32.xlu0 %v4598_v31, %s10049_s1 }
 0x224   :  { %3427 = vst.msk [vmem:[#allocation4 + $0xa0] sm:$0xf] %vm3051_vm5, %v3411_v48  ;;  %v4707_v40 = vshll.u32 %v4546_v24, 16  ;;  %3902 = vst.msk [vmem:[#allocation4 + $0x2c] sm:$0xf] %vm3051_vm5, %v3831_v52  ;;  %v3822_v33 = vrot.slane %v3757_v38, 5  ;;  %v12166_v35 = vsel %vm10575_vm1, %v8959_v61, %v4406_v8 }
 0x225   :  { %v3409_v32 = vld [vmem:[#allocation3 + $0x30] sm:$0xf]  ;;  %v3414_v0 = vld [vmem:[#allocation3 + $0x68] sm:$0xf]  ;;  %v12168_v63 = vrot.slane %v4698_v39, 4  ;;  %v12170_v23 = vrot.slane %v4701_v18, 5  ;;  %v4718_v59 = vor.u32 %v12148_v45, %v12146_v13 }
 0x226   :  { %v12172_v17 = vld [vmem:[#allocation3 + $0x80] sm:$0xe]  ;;  %v12174_v50 = vld [vmem:[#allocation3 + $0x84] sm:$0x1]  ;;  %v12176_v14 = vld [vmem:[#allocation3 + $0x8c] sm:$0x1]  ;;  %v3823_v44 = vsel %vm10575_vm1, %v8933_v57, %v3822_v33 }
 0x227   :  { %v4740_v24 = vshrl.u32 %v4551_v4, 16  ;;  %3425 = vst.msk [vmem:[#allocation4 + $0x78] sm:$0xf] %vm3051_vm5, %v3409_v32  ;;  %3430 = vst.msk [vmem:[#allocation4 + $0xdc] sm:$0xf] %vm3051_vm5, %v3414_v0  ;;  %v4743_v38 = vshll.u32 %v4551_v4, 16  ;;  %4438 = vrot.lane.b32.xlu1 %v11968_v20, %s10049_s1  ;;  %4436 = vrot.lane.b32.xlu0 %v12013_v16, %s10049_s1 }
 0x228   :  { %v12186_v6 = vld [vmem:[#allocation3 + $0x78] sm:$0xe]  ;;  %v12188_v61 = vld [vmem:[#allocation3 + $0x7c] sm:$0x1]  ;;  %v4726_v8 = vshrl.u32 %v4549_v58, 16  ;;  %v12198_v48 = vrot.slane %v4721_v10, 5 }
 0x229   :  { %v3762_v39 = vld [vmem:[#allocation3 + $0x18] sm:$0xe]  ;;  %v3763_v18 = vld [vmem:[#allocation3 + $0x1c] sm:$0x1]  ;;  %3900 = vst.msk [vmem:[#allocation4 + $0x4] sm:$0xf] %vm3051_vm5, %v3823_v44 }
 0x22a   :  { %v4550_v52 = vld [vmem:[#allocation3 + $0x84] sm:$0x1]  ;;  %v4729_v32 = vshll.u32 %v4549_v58, 16  ;;  %v3758_v0 = vld [vmem:[#allocation3 + $0x8] sm:$0xe]  ;;  %v12207_v4 = vrot.slane %v4707_v40, 5  ;;  %v4704_v58 = vor.u32 %v12170_v23, %v12168_v63 }
 0x22b   :  { %v12209_v57 = vld [vmem:[#allocation3] sm:$0xe]  ;;  %v12211_v33 = vld [vmem:[#allocation3 + $0x4] sm:$0x1]  ;;  %v12213_v10 = vrot.slane %v4740_v24, 4  ;;  %v4745_v13 = vrot.slane %v4743_v38, 5 }
 0x22c   :  { %v4728_v45 = vrot.slane %v4726_v8, 4  ;;  %v3412_v44 = vld [vmem:[#allocation3 + $0x58] sm:$0xf]  ;;  %v4731_v55 = vrot.slane %v4729_v32, 5  ;;  %v8936_v29 = vrot.slane %v3762_v39, 9  ;;  %v3834_v25 = vrot.slane %v3763_v18, 5 }
 0x22d   :  { %v12217_v54 = vld [vmem:[#allocation3 + $0x90] sm:$0xe]  ;;  %v3759_v46 = vld [vmem:[#allocation3 + $0xc] sm:$0x1]  ;;  %3428 = vst.msk [vmem:[#allocation4 + $0xb4] sm:$0xf] %vm3051_vm5, %v3412_v44 }
 0x22e   :  { %13813 = vst [vmem:[#allocation23_spill] sm:$0xff] %v12217_v54  ;;  %v4749_v40 = vshll.u32 %v12176_v14, 16  ;;  %v4735_v63 = vshll.u32 %v4550_v52, 16  ;;  %v12229_v23 = vld [vmem:[#allocation3 + $0x94] sm:$0x1]  ;;  %v3835_v62 = vsel %vm10575_vm1, %v8936_v29, %v3834_v25  ;;  %v8934_v31 = vrot.slane %v3758_v0, 9 }
 0x22f   :  { %v12231_v24 = vld [vmem:[#allocation3 + $0x88] sm:$0xe]  ;;  %v12233_v38 = vld [vmem:[#allocation3 + $0x8c] sm:$0x1]  ;;  %v12235_v8 = vld [vmem:[#allocation3 + $0x98] sm:$0xf]  ;;  %v4746_v52 = vor.u32 %v4745_v13, %v12213_v10  ;;  %v4732_v44 = vor.u32 %v4731_v55, %v4728_v45 }
 0x230   :  { %13814 = vst [vmem:[#allocation13_spill] sm:$0xff] %v12231_v24  ;;  %13815 = vst [vmem:[#allocation17_spill] sm:$0xff] %v12233_v38  ;;  %v3766_v18 = vld [vmem:[#allocation3 + $0x28] sm:$0xe]  ;;  %v3767_v32 = vld [vmem:[#allocation3 + $0x2c] sm:$0x1] }
 0x231   :  { %v12243_v14 = vrot.slane %v4718_v59, 4  ;;  %3903 = vst.msk [vmem:[#allocation4 + $0x40] sm:$0xf] %vm3051_vm5, %v3835_v62  ;;  %v3826_v43 = vrot.slane %v3759_v46, 5  ;;  %v12247_v39 = vld [vmem:[#allocation3 + $0x9c] sm:$0x1] }
 0x232   :  { %v3764_v27 = vld [vmem:[#allocation3 + $0x20] sm:$0xe]  ;;  %v3765_v56 = vld [vmem:[#allocation3 + $0x24] sm:$0x1]  ;;  %v3415_v3 = vld [vmem:[#allocation3 + $0x70] sm:$0xf] }
 0x233   :  { %v12249_v25 = vrot.slane %v4704_v58, 4  ;;  %v4768_v20 = vshrl.u32 %v12235_v8, 16  ;;  %v12254_v59 = vld [vmem:[#allocation3 + $0x90] sm:$0xf]  ;;  %v3769_v55 = vld [vmem:[#allocation3 + $0x34] sm:$0x1]  ;;  %v3827_v46 = vsel %vm10575_vm1, %v8934_v31, %v3826_v43  ;;  %v13817_v43 = vsel %vm10330_vm12, %v12006_v26, %v11983_v42  ;;  %v3953_v31 = vpop.permute.xlu0 %3952 }
 0x234   :  { %v3768_v10 = vld [vmem:[#allocation3 + $0x30] sm:$0xe]  ;;  %3431 = vst.msk [vmem:[#allocation4 + $0xf0] sm:$0xf] %vm3051_vm5, %v3415_v3  ;;  %v12259_v13 = vrot.slane %v4749_v40, 5  ;;  %v12261_v45 = vrot.slane %v4735_v63, 5  ;;  %4791 = vrot.lane.b32.xlu1 %v13817_v43, %s10049_s1  ;;  %v13818_v26 = vsel %vm10330_vm12, %v12015_v53, %v12055_v60 }
 0x235   :  { %v12266_v62 = vld [vmem:[#allocation3 + $0x38] sm:$0xe]  ;;  %v3413_v29 = vld [vmem:[#allocation3 + $0x60] sm:$0xf]  ;;  %3901 = vst.msk [vmem:[#allocation4 + $0x18] sm:$0xf] %vm3051_vm5, %v3827_v46  ;;  %4789 = vrot.lane.b32.xlu0 %v13818_v26, %s10049_s1 }
 0x236   :  { %13816 = vst [vmem:[#allocation18_spill] sm:$0xff] %v12261_v45  ;;  %v4771_v16 = vshll.u32 %v12235_v8, 16  ;;  %v3771_v40 = vld [vmem:[#allocation3 + $0x3c] sm:$0x1]  ;;  %v3774_v63 = vld [vmem:[#allocation3 + $0x58] sm:$0xe] }
 0x237   :  { %v3775_v45 = vld [vmem:[#allocation3 + $0x5c] sm:$0x1]  ;;  %3429 = vst.msk [vmem:[#allocation4 + $0xc8] sm:$0xf] %vm3051_vm5, %v3413_v29  ;;  %v3418_v58 = vld [vmem:[#allocation3 + $0x88] sm:$0xf] }
 0x238   :  { %v12280_v49 = vrot.slane %v4746_v52, 4  ;;  %v12282_v3 = vrot.slane %v4732_v44, 4  ;;  %v8938_v46 = vrot.slane %v3766_v18, 9  ;;  %v3842_v8 = vrot.slane %v3767_v32, 5  ;;  %v3772_v0 = vld [vmem:[#allocation3 + $0x50] sm:$0xe]  ;;  %v3949_v18 = vpop.permute.xlu1 %3948  ;;  %4442 = vrot.lane.b32.xlu1 %v12077_v30, %s10049_s1 }
 0x239   :  { %3434 = vst.msk [vmem:[#allocation4 + $0x12c] sm:$0xf] %vm3051_vm5, %v3418_v58  ;;  %v12286_v29 = vrot.slane %v4768_v20, 4  ;;  %v8937_v38 = vrot.slane %v3764_v27, 9  ;;  %v3838_v54 = vrot.slane %v3765_v56, 5  ;;  %v4754_v32 = vshrl.u32 %v12254_v59, 16  ;;  %4440 = vrot.lane.b32.xlu0 %v12081_v7, %s10049_s1 }
 0x23a   :  { %3998 = vst.msk [vmem:[#allocation4 + $0x2c] sm:$0xf] %vm3739_vm3, %v3953_v31  ;;  %v3773_v42 = vld [vmem:[#allocation3 + $0x54] sm:$0x1]  ;;  %v3843_v52 = vsel %vm10575_vm1, %v8938_v46, %v3842_v8  ;;  %v8939_v44 = vrot.slane %v3768_v10, 9  ;;  %v3846_v20 = vrot.slane %v3769_v55, 5 }
 0x23b   :  { %v3776_v58 = vld [vmem:[#allocation3 + $0x60] sm:$0xe]  ;;  %v3777_v43 = vld [vmem:[#allocation3 + $0x64] sm:$0x1]  ;;  %v3416_v27 = vld [vmem:[#allocation3 + $0x78] sm:$0xf]  ;;  %v3839_v53 = vsel %vm10575_vm1, %v8937_v38, %v3838_v54 }
 0x23c   :  { %3996 = vst.msk [vmem:[#allocation4 + $0x4] sm:$0xf] %vm3739_vm3, %v3949_v18  ;;  %v12299_v56 = vrot.slane %v4771_v16, 5  ;;  %v4757_v31 = vshll.u32 %v12254_v59, 16  ;;  %v8940_v60 = vrot.slane %v12266_v62, 9  ;;  %v3847_v55 = vsel %vm10575_vm1, %v8939_v44, %v3846_v20 }
 0x23d   :  { %3905 = vst.msk [vmem:[#allocation4 + $0x68] sm:$0xf] %vm3051_vm5, %v3843_v52  ;;  %v3778_v26 = vld [vmem:[#allocation3 + $0x68] sm:$0xe]  ;;  %v3779_v46 = vld [vmem:[#allocation3 + $0x6c] sm:$0x1] }
 0x23e   :  { %v12306_v10 = vld [vmem:[#allocation3 + $0x78] sm:$0xe]  ;;  %3432 = vst.msk [vmem:[#allocation4 + $0x104] sm:$0xf] %vm3051_vm5, %v3416_v27  ;;  %3904 = vst.msk [vmem:[#allocation4 + $0x54] sm:$0xf] %vm3051_vm5, %v3839_v53 }
 0x23f   :  { %v3850_v16 = vrot.slane %v3771_v40, 5  ;;  %v8942_v8 = vrot.slane %v3774_v63, 9  ;;  %v3858_v18 = vrot.slane %v3775_v45, 5  ;;  %v3783_v54 = vld [vmem:[#allocation3 + $0x7c] sm:$0x1]  ;;  %v13819_v52 = vrot.slane %v12174_v50, 5 }
 0x240   :  { %v3780_v38 = vld [vmem:[#allocation3 + $0x70] sm:$0xe]  ;;  %v3781_v62 = vld [vmem:[#allocation3 + $0x74] sm:$0x1]  ;;  %v13820_v24 = vrot.slane %v12172_v17, 9  ;;  %v13821_v30 = vrot.slane %v12188_v61, 5  ;;  %v4724_v17 = vsel %vm10330_vm12, %v12243_v14, %v12198_v48  ;;  %v3955_v61 = vpop.permute.xlu1 %3954 }
 0x241   :  { %v13822_v53 = vrot.slane %v12186_v6, 9  ;;  %3906 = vst.msk [vmem:[#allocation4 + $0x7c] sm:$0xf] %vm3051_vm5, %v3847_v55  ;;  %v8941_v45 = vrot.slane %v3772_v0, 9  ;;  %v3854_v63 = vrot.slane %v3773_v42, 5  ;;  %v4710_v6 = vsel %vm10330_vm12, %v12249_v25, %v12207_v4 }
 0x242   :  { %v12320_v27 = vsel %vm10575_vm1, %v13820_v24, %v13819_v52  ;;  %v3784_v44 = vld [vmem:[#allocation3 + $0x80] sm:$0xe]  ;;  %v3785_v50 = vld [vmem:[#allocation3 + $0x84] sm:$0x1]  ;;  %v3851_v24 = vsel %vm10575_vm1, %v8940_v60, %v3850_v16  ;;  %v3859_v0 = vsel %vm10575_vm1, %v8942_v8, %v3858_v18  ;;  %v3786_v42 = vld [vmem:[#allocation3 + $0x88] sm:$0xe] }
 0x243   :  { %v12328_v40 = vsel %vm10575_vm1, %v13822_v53, %v13821_v30  ;;  %v3787_v20 = vld [vmem:[#allocation3 + $0x8c] sm:$0x1]  ;;  %v4012_v7 = vld [vmem:[#allocation3 + $0x8] sm:$0xf]  ;;  %v13823_v55 = vrot.slane %v12211_v33, 5  ;;  %v13824_v52 = vrot.slane %v12209_v57, 9  ;;  %v3855_v60 = vsel %vm10575_vm1, %v8941_v45, %v3854_v63 }
 0x244   :  { %3999 = vst.msk [vmem:[#allocation4 + $0x40] sm:$0xf] %vm3739_vm3, %v3955_v61  ;;  %v8943_v16 = vrot.slane %v3776_v58, 9  ;;  %v3862_v8 = vrot.slane %v3777_v43, 5  ;;  %v4013_v18 = vld [vmem:[#allocation3 + $0xc] sm:$0x1]  ;;  %v13825_v57 = vsel %vm10330_vm12, %v12038_v12, %v12033_v1  ;;  %v13826_v12 = vsel %vm10330_vm12, %v12119_v51, %v12090_v2 }
 0x245   :  { %v6600_v30 = vsel %vm10575_vm1, %v13824_v52, %v13823_v55  ;;  %3907 = vst.msk [vmem:[#allocation4 + $0x90] sm:$0xf] %vm3051_vm5, %v3851_v24  ;;  %3909 = vst.msk [vmem:[#allocation4 + $0xb8] sm:$0xf] %vm3051_vm5, %v3859_v0  ;;  %v4014_v53 = vld [vmem:[#allocation3 + $0x10] sm:$0xf]  ;;  %4795 = vrot.lane.b32.xlu1 %v13825_v57, %s10049_s1  ;;  %4793 = vrot.lane.b32.xlu0 %v13826_v12, %s10049_s1 }
 0x246   :  { %v12362_v33 = vrot.slane %v4754_v32, 4  ;;  %3908 = vst.msk [vmem:[#allocation4 + $0xa4] sm:$0xf] %vm3051_vm5, %v3855_v60  ;;  %v8944_v61 = vrot.slane %v3778_v26, 9  ;;  %v3866_v24 = vrot.slane %v3779_v46, 5  ;;  %v8946_v0 = vrot.slane %v12306_v10, 9  ;;  %v3951_v26 = vpop.permute.xlu1 %3950 }
 0x247   :  { %v4015_v45 = vld [vmem:[#allocation3 + $0x14] sm:$0x1]  ;;  %v3417_v58 = vld [vmem:[#allocation3 + $0x80] sm:$0xf]  ;;  %v3863_v43 = vsel %vm10575_vm1, %v8943_v16, %v3862_v8  ;;  %v3874_v63 = vrot.slane %v3783_v54, 5  ;;  %v8945_v55 = vrot.slane %v3780_v38, 9 }
 0x248   :  { %v3870_v52 = vrot.slane %v3781_v62, 5  ;;  %3433 = vst.msk [vmem:[#allocation4 + $0x118] sm:$0xf] %vm3051_vm5, %v3417_v58  ;;  %v4494_v1 = vld [vmem:[#allocation3 + $0x18] sm:$0xf]  ;;  %v12375_v32 = vld [vmem:[#allocation4] sm:$0xff]  ;;  %v3867_v46 = vsel %vm10575_vm1, %v8944_v61, %v3866_v24 }
 0x249   :  { %3910 = vst.msk [vmem:[#allocation4 + $0xcc] sm:$0xf] %vm3051_vm5, %v3863_v43  ;;  %v8947_v10 = vrot.slane %v3784_v44, 9  ;;  %v3878_v54 = vrot.slane %v3785_v50, 5  ;;  %v8948_v38 = vrot.slane %v3786_v42, 9  ;;  %v3875_v2 = vsel %vm10575_vm1, %v8946_v0, %v3874_v63  ;;  %4446 = vrot.lane.b32.xlu1 %v12094_v22, %s10049_s1  ;;  %4444 = vrot.lane.b32.xlu0 %v12098_v47, %s10049_s1 }
 0x24a   :  { %4510 = vst.msk [vmem:[#allocation4 + $0x20] sm:$0xf] %vm3051_vm5, %v4494_v1  ;;  %v4493_v62 = vld [vmem:[#allocation3 + $0x10] sm:$0xf]  ;;  %6677 = vst.msk [vmem:[#allocation4 + $0x4] sm:$0xf] %vm3051_vm5, %v6600_v30  ;;  %v3871_v51 = vsel %vm10575_vm1, %v8945_v55, %v3870_v52  ;;  %v13827_v47 = vsel %vm10330_vm12, %v12139_v5, %v12121_v11 }
 0x24b   :  { %3997 = vst.msk [vmem:[#allocation4 + $0x18] sm:$0xf] %vm3739_vm3, %v3951_v26  ;;  %v3882_v60 = vrot.slane %v3787_v20, 5  ;;  %v4045_v16 = vshrl.u32 %v4012_v7, 16  ;;  %v4018_v44 = vld [vmem:[#allocation3 + $0x20] sm:$0xf]  ;;  %v3879_v42 = vsel %vm10575_vm1, %v8947_v10, %v3878_v54 }
 0x24c   :  { %3911 = vst.msk [vmem:[#allocation4 + $0xe0] sm:$0xf] %vm3051_vm5, %v3867_v46  ;;  %4509 = vst.msk [vmem:[#allocation4 + $0xc] sm:$0xf] %vm3051_vm5, %v4493_v62  ;;  %v4019_v50 = vld [vmem:[#allocation3 + $0x24] sm:$0x1] }
 0x24d   :  { %3913 = vst.msk [vmem:[#allocation4 + $0x108] sm:$0xf] %vm3051_vm5, %v3875_v2  ;;  %3912 = vst.msk [vmem:[#allocation4 + $0xf4] sm:$0xf] %vm3051_vm5, %v3871_v51  ;;  %v4048_v30 = vshll.u32 %v4012_v7, 16  ;;  %v4054_v8 = vshll.u32 %v4013_v18, 16  ;;  %v3883_v20 = vsel %vm10575_vm1, %v8948_v38, %v3882_v60  ;;  %4799 = vrot.lane.b32.xlu1 %v13827_v47, %s10049_s1 }
 0x24e   :  { %v4059_v57 = vshrl.u32 %v4014_v53, 16  ;;  %v4016_v61 = vld [vmem:[#allocation3 + $0x18] sm:$0xf]  ;;  %3914 = vst.msk [vmem:[#allocation4 + $0x11c] sm:$0xf] %vm3051_vm5, %v3879_v42  ;;  %v4047_v24 = vrot.slane %v4045_v16, 4 }
 0x24f   :  { %v4062_v0 = vshll.u32 %v4014_v53, 16  ;;  %v4068_v58 = vshll.u32 %v4015_v45, 16  ;;  %v4017_v22 = vld [vmem:[#allocation3 + $0x1c] sm:$0x1]  ;;  %3915 = vst.msk [vmem:[#allocation4 + $0x130] sm:$0xf] %vm3051_vm5, %v3883_v20 }
 0x250   :  { %v4050_v43 = vrot.slane %v4048_v30, 5  ;;  %v4056_v63 = vrot.slane %v4054_v8, 5  ;;  %v4061_v7 = vrot.slane %v4059_v57, 4  ;;  %v4087_v18 = vshrl.u32 %v4018_v44, 16  ;;  %v4496_v55 = vld [vmem:[#allocation3 + $0x28] sm:$0xf] }
 0x251   :  { %v4064_v52 = vrot.slane %v4062_v0, 5  ;;  %v4070_v1 = vrot.slane %v4068_v58, 5  ;;  %v4090_v12 = vshll.u32 %v4018_v44, 16  ;;  %v4096_v26 = vshll.u32 %v4019_v50, 16  ;;  %4512 = vst.msk [vmem:[#allocation4 + $0x48] sm:$0xf] %vm3051_vm5, %v4496_v55  ;;  %4450 = vrot.lane.b32.xlu1 %v12161_v28, %s10049_s1 }
 0x252   :  { %v4495_v46 = vld [vmem:[#allocation3 + $0x20] sm:$0xf]  ;;  %v4051_v53 = vor.u32 %v4050_v43, %v4047_v24  ;;  %v4089_v45 = vrot.slane %v4087_v18, 4  ;;  %v4073_v10 = vshrl.u32 %v4016_v61, 16  ;;  %v4076_v54 = vshll.u32 %v4016_v61, 16 }
 0x253   :  { %4511 = vst.msk [vmem:[#allocation4 + $0x34] sm:$0xf] %vm3051_vm5, %v4495_v46  ;;  %v4845_v38 = vld [vmem:[#allocation3 + $0x10] sm:$0xe]  ;;  %v4065_v62 = vor.u32 %v4064_v52, %v4061_v7  ;;  %v4092_v2 = vrot.slane %v4090_v12, 5  ;;  %v4098_v51 = vrot.slane %v4096_v26, 5  ;;  %v13828_v44 = vsel %vm10330_vm12, %v12141_v21, %v12143_v9 }
 0x254   :  { %v4082_v60 = vshll.u32 %v4017_v22, 16  ;;  %v4846_v16 = vld [vmem:[#allocation3 + $0x14] sm:$0x1]  ;;  %4797 = vrot.lane.b32.xlu0 %v13828_v44, %s10049_s1  ;;  %v4052_v11 = vrot.slane %v4051_v53, 4  ;;  %v4075_v5 = vrot.slane %v4073_v10, 4  ;;  %v4078_v50 = vrot.slane %v4076_v54, 5 }
 0x255   :  { %v4847_v42 = vld [vmem:[#allocation3 + $0x18] sm:$0xe]  ;;  %v8965_v30 = vrot.slane %v4845_v38, 9  ;;  %v4066_v8 = vrot.slane %v4065_v62, 4  ;;  %v4093_v57 = vor.u32 %v4092_v2, %v4089_v45  ;;  %v4848_v20 = vld [vmem:[#allocation3 + $0x1c] sm:$0x1]  ;;  %4803 = vrot.lane.b32.xlu1 %v4724_v17, %s10049_s1 }
 0x256   :  { %v4084_v61 = vrot.slane %v4082_v60, 5  ;;  %v4911_v24 = vrot.slane %v4846_v16, 5  ;;  %v4057_v0 = vsel %vm10330_vm12, %v4052_v11, %v4056_v63  ;;  %v4079_v58 = vor.u32 %v4078_v50, %v4075_v5  ;;  %v4022_v9 = vld [vmem:[#allocation3 + $0x30] sm:$0xf]  ;;  %v4023_v43 = vld [vmem:[#allocation3 + $0x34] sm:$0x1] }
 0x257   :  { %v8966_v22 = vrot.slane %v4847_v42, 9  ;;  %v4915_v21 = vrot.slane %v4848_v20, 5  ;;  %v12419_v7 = vld [vmem:[#allocation3 + $0x94] sm:$0x1]  ;;  %4284 = vst.msk [vmem:[#allocation4 + $0x8] sm:$0xf] %vm3051_vm5, %v4057_v0  ;;  %v4071_v18 = vsel %vm10330_vm12, %v4066_v8, %v4070_v1  ;;  %v4774_v42 = vor.u32 %v12299_v56, %v12286_v29 }
 0x258   :  { %v4094_v55 = vrot.slane %v4093_v57, 4  ;;  %v4912_v52 = vsel %vm10575_vm1, %v8965_v30, %v4911_v24  ;;  %v4115_v28 = vshrl.u32 %v4022_v9, 16  ;;  %v4020_v12 = vld [vmem:[#allocation3 + $0x28] sm:$0xf]  ;;  %v4021_v26 = vld [vmem:[#allocation3 + $0x2c] sm:$0x1]  ;;  %4448 = vrot.lane.b32.xlu0 %v12166_v35, %s10049_s1 }
 0x259   :  { %4285 = vst.msk [vmem:[#allocation4 + $0x1c] sm:$0xf] %vm3051_vm5, %v4071_v18  ;;  %v4080_v63 = vrot.slane %v4079_v58, 4  ;;  %v4916_v46 = vsel %vm10575_vm1, %v8966_v22, %v4915_v21  ;;  %4989 = vst.msk [vmem:[#allocation4 + $0x10] sm:$0xf] %vm3051_vm5, %v4912_v52  ;;  %v4118_v47 = vshll.u32 %v4022_v9, 16  ;;  %4454 = vrot.lane.b32.xlu1 %v12320_v27, %s10049_s1 }
 0x25a   :  { %v4124_v1 = vshll.u32 %v4023_v43, 16  ;;  %v4498_v53 = vld [vmem:[#allocation3 + $0x38] sm:$0xf]  ;;  %v4099_v45 = vsel %vm10330_vm12, %v4094_v55, %v4098_v51  ;;  %4990 = vst.msk [vmem:[#allocation4 + $0x24] sm:$0xf] %vm3051_vm5, %v4916_v46  ;;  %v4117_v10 = vrot.slane %v4115_v28, 4 }
 0x25b   :  { %v4101_v54 = vshrl.u32 %v4020_v12, 16  ;;  %v4104_v38 = vshll.u32 %v4020_v12, 16  ;;  %4514 = vst.msk [vmem:[#allocation4 + $0x70] sm:$0xf] %vm3051_vm5, %v4498_v53  ;;  %v4497_v35 = vld [vmem:[#allocation3 + $0x30] sm:$0xf]  ;;  %v4085_v2 = vsel %vm10330_vm12, %v4080_v63, %v4084_v61 }
 0x25c   :  { %v4759_v62 = vrot.slane %v4757_v31, 5  ;;  %4287 = vst.msk [vmem:[#allocation4 + $0x44] sm:$0xf] %vm3051_vm5, %v4099_v45  ;;  %v4120_v51 = vrot.slane %v4118_v47, 5  ;;  %v4110_v60 = vshll.u32 %v4021_v26, 16  ;;  %v13829_v11 = vrot.slane %v11771_v34, 5  ;;  %4801 = vrot.lane.b32.xlu0 %v4710_v6, %s10049_s1 }
 0x25d   :  { %4513 = vst.msk [vmem:[#allocation4 + $0x5c] sm:$0xf] %vm3051_vm5, %v4497_v35  ;;  %4286 = vst.msk [vmem:[#allocation4 + $0x30] sm:$0xf] %vm3051_vm5, %v4085_v2  ;;  %v4103_v16 = vrot.slane %v4101_v54, 4  ;;  %v4106_v44 = vrot.slane %v4104_v38, 5 }
 0x25e   :  { %v13830_v48 = vrot.slane %v11769_v19, 9  ;;  %v13831_v59 = vrot.slane %v11787_v36, 5  ;;  %v13832_v31 = vrot.slane %v11774_v41, 9  ;;  %v4752_v19 = vsel %vm10330_vm12, %v12280_v49, %v12259_v13  ;;  %v4853_v41 = vld [vmem:[#allocation3 + $0x30] sm:$0xe] }
 0x25f   :  { %v4763_v34 = vshll.u32 %v12419_v7, 16  ;;  %v4121_v36 = vor.u32 %v4120_v51, %v4117_v10  ;;  %v4126_v5 = vrot.slane %v4124_v1, 5  ;;  %v4854_v50 = vld [vmem:[#allocation3 + $0x34] sm:$0x1]  ;;  %v4107_v4 = vor.u32 %v4106_v44, %v4103_v16  ;;  %v4855_v25 = vld [vmem:[#allocation3 + $0x38] sm:$0xe]  ;;  %4807 = vrot.lane.b32.xlu1 %v4752_v19, %s10049_s1  ;;  %v3694_v10 = vpop.permute.xlu0 %3693 }
 0x260   :  { %v4956_v14 = vsel %vm10575_vm1, %v13830_v48, %v13829_v11  ;;  %v4968_v17 = vsel %vm10575_vm1, %v13832_v31, %v13831_v59  ;;  %v4856_v6 = vld [vmem:[#allocation3 + $0x3c] sm:$0x1]  ;;  %v8969_v30 = vrot.slane %v4853_v41, 9  ;;  %v4927_v8 = vrot.slane %v4854_v50, 5  ;;  %v4026_v20 = vld [vmem:[#allocation3 + $0x40] sm:$0xf]  ;;  %4452 = vrot.lane.b32.xlu0 %v12328_v40, %s10049_s1 }
 0x261   :  { %5000 = vst.msk [vmem:[#allocation4 + $0xec] sm:$0xf] %vm3051_vm5, %v4956_v14  ;;  %5003 = vst.msk [vmem:[#allocation4 + $0x128] sm:$0xf] %vm3051_vm5, %v4968_v17  ;;  %v4122_v49 = vrot.slane %v4121_v36, 4  ;;  %v4112_v13 = vrot.slane %v4110_v60, 5  ;;  %v4760_v24 = vor.u32 %v4759_v62, %v12362_v33 }
 0x262   :  { %v8970_v57 = vrot.slane %v4855_v25, 9  ;;  %v4931_v61 = vrot.slane %v4856_v6, 5  ;;  %v4108_v0 = vrot.slane %v4107_v4, 4  ;;  %v4928_v58 = vsel %vm10575_vm1, %v8969_v30, %v4927_v8  ;;  %v4027_v29 = vld [vmem:[#allocation3 + $0x44] sm:$0x1]  ;;  %v13833_v33 = vld [vmem:[#allocation18_spill] sm:$0xff] }
 0x263   :  { %v4143_v56 = vshrl.u32 %v4026_v20, 16  ;;  %v4127_v22 = vsel %vm10330_vm12, %v4122_v49, %v4126_v5  ;;  %4993 = vst.msk [vmem:[#allocation4 + $0x60] sm:$0xf] %vm3051_vm5, %v4928_v58  ;;  %v4146_v21 = vshll.u32 %v4026_v20, 16  ;;  %v4152_v9 = vshll.u32 %v4027_v29, 16  ;;  %v13836_v60 = vld [vmem:[#allocation23_spill] sm:$0xff] }
 0x264   :  { %v4932_v27 = vsel %vm10575_vm1, %v8970_v57, %v4931_v61  ;;  %v4738_v43 = vsel %vm10330_vm12, %v12282_v3, %v13833_v33  ;;  %v13834_v7 = vshll.u32 %v12247_v39, 16  ;;  %4289 = vst.msk [vmem:[#allocation4 + $0x6c] sm:$0xf] %vm3051_vm5, %v4127_v22  ;;  %v4113_v40 = vsel %vm10330_vm12, %v4108_v0, %v4112_v13  ;;  %v4024_v52 = vld [vmem:[#allocation3 + $0x38] sm:$0xf]  ;;  %v13838_v5 = vld [vmem:[#allocation17_spill] sm:$0xff] }
 0x265   :  { %4994 = vst.msk [vmem:[#allocation4 + $0x74] sm:$0xf] %vm3051_vm5, %v4932_v27  ;;  %v4145_v55 = vrot.slane %v4143_v56, 4  ;;  %v4025_v28 = vld [vmem:[#allocation3 + $0x3c] sm:$0x1]  ;;  %v4765_v12 = vrot.slane %v4763_v34, 5  ;;  %4805 = vrot.lane.b32.xlu0 %v4738_v43, %s10049_s1 }
 0x266   :  { %v4779_v18 = vrot.slane %v13834_v7, 5  ;;  %4288 = vst.msk [vmem:[#allocation4 + $0x58] sm:$0xf] %vm3051_vm5, %v4113_v40  ;;  %v4148_v26 = vrot.slane %v4146_v21, 5  ;;  %v4129_v3 = vshrl.u32 %v4024_v52, 16  ;;  %v4132_v63 = vshll.u32 %v4024_v52, 16  ;;  %v3698_v40 = vpop.permute.xlu1 %3697 }
 0x267   :  { %v4500_v39 = vld [vmem:[#allocation3 + $0x48] sm:$0xf]  ;;  %v4775_v46 = vrot.slane %v4774_v42, 4  ;;  %v4761_v47 = vrot.slane %v4760_v24, 4  ;;  %v4154_v1 = vrot.slane %v4152_v9, 5  ;;  %v4138_v53 = vshll.u32 %v4025_v28, 16 }
 0x268   :  { %4516 = vst.msk [vmem:[#allocation4 + $0x98] sm:$0xf] %vm3051_vm5, %v4500_v39  ;;  %v4499_v45 = vld [vmem:[#allocation3 + $0x40] sm:$0xf]  ;;  %v4149_v54 = vor.u32 %v4148_v26, %v4145_v55  ;;  %v4131_v38 = vrot.slane %v4129_v3, 4  ;;  %v4134_v35 = vrot.slane %v4132_v63, 5 }
 0x269   :  { %4515 = vst.msk [vmem:[#allocation4 + $0x84] sm:$0xf] %vm3051_vm5, %v4499_v45  ;;  %v4857_v62 = vld [vmem:[#allocation3 + $0x40] sm:$0xe]  ;;  %v4858_v2 = vld [vmem:[#allocation3 + $0x44] sm:$0x1]  ;;  %v4780_v4 = vsel %vm10330_vm12, %v4775_v46, %v4779_v18  ;;  %v4766_v58 = vsel %vm10330_vm12, %v4761_v47, %v4765_v12 }
 0x26a   :  { %v13835_v51 = vrot.slane %v12229_v23, 5  ;;  %v13837_v16 = vrot.slane %v13836_v60, 9  ;;  %3741 = vst.msk [vmem:[#allocation4 + $0x14] sm:$0xf] %vm3739_vm3, %v3694_v10  ;;  %v4140_v11 = vrot.slane %v4138_v53, 5  ;;  %v8971_v59 = vrot.slane %v4857_v62, 9  ;;  %v3700_v53 = vpop.permute.xlu0 %3699  ;;  %v3959_v62 = vpop.permute.xlu1 %3958 }
 0x26b   :  { %v4859_v48 = vld [vmem:[#allocation3 + $0x48] sm:$0xe]  ;;  %v4860_v14 = vld [vmem:[#allocation3 + $0x4c] sm:$0x1]  ;;  %v4150_v31 = vrot.slane %v4149_v54, 4  ;;  %v4135_v17 = vor.u32 %v4134_v35, %v4131_v38  ;;  %v4935_v19 = vrot.slane %v4858_v2, 5 }
 0x26c   :  { %v4427_v44 = vsel %vm10575_vm1, %v13837_v16, %v13835_v51  ;;  %v8972_v34 = vrot.slane %v4859_v48, 9  ;;  %v7635_v36 = vld [vmem:[#allocation3 + $0x48] sm:$0xe]  ;;  %v13839_v23 = vrot.slane %v13838_v5, 5  ;;  %v13840_v41 = vld [vmem:[#allocation13_spill] sm:$0xff]  ;;  %v4939_v25 = vrot.slane %v4860_v14, 5 }
 0x26d   :  { %4458 = vrot.lane.b32.xlu1 %v4427_v44, %s10049_s1  ;;  %v13841_v50 = vrot.slane %v13840_v41, 9  ;;  %v7636_v6 = vld [vmem:[#allocation3 + $0x4c] sm:$0x1]  ;;  %v9121_v30 = vrot.slane %v7635_v36, 9  ;;  %v4155_v8 = vsel %vm10330_vm12, %v4150_v31, %v4154_v1  ;;  %v4136_v49 = vrot.slane %v4135_v17, 4  ;;  %v9881_v45 = vld [vmem:[%s13751_s2 + $0x110] sm:$0xff]  }
 0x26e   :  { %v4936_v13 = vsel %vm10575_vm1, %v8971_v59, %v4935_v19  ;;  %v7715_v57 = vrot.slane %v7636_v6, 5  ;;  %4291 = vst.msk [vmem:[#allocation4 + $0x94] sm:$0xf] %vm3051_vm5, %v4155_v8  ;;  %v4940_v61 = vsel %vm10575_vm1, %v8972_v34, %v4939_v25  ;;  %v4861_v20 = vld [vmem:[#allocation3 + $0x60] sm:$0xe]  ;;  %v9892_v2 = vld [vmem:[%s13751_s2 + $0x108] sm:$0xff]   ;;  %v3696_v31 = vpop.permute.xlu0 %3695 }
 0x26f   :  { %v4423_v42 = vsel %vm10575_vm1, %v13841_v50, %v13839_v23  ;;  %4995 = vst.msk [vmem:[#allocation4 + $0x88] sm:$0xf] %vm3051_vm5, %v4936_v13  ;;  %v4862_v24 = vld [vmem:[#allocation3 + $0x64] sm:$0x1]  ;;  %v4863_v0 = vld [vmem:[#allocation3 + $0x68] sm:$0xe]  ;;  %v4141_v29 = vsel %vm10330_vm12, %v4136_v49, %v4140_v11 }
 0x270   :  { %4456 = vrot.lane.b32.xlu0 %v4423_v42, %s10049_s1  ;;  %4996 = vst.msk [vmem:[#allocation4 + $0x9c] sm:$0xf] %vm3051_vm5, %v4940_v61  ;;  %v4864_v56 = vld [vmem:[#allocation3 + $0x6c] sm:$0x1]  ;;  %v8973_v22 = vrot.slane %v4861_v20, 9  ;;  %v4943_v27 = vrot.slane %v4862_v24, 5 }
 0x271   :  { %4811 = vrot.lane.b32.xlu1 %v4780_v4, %s10049_s1  ;;  %v4030_v21 = vld [vmem:[#allocation3 + $0x60] sm:$0xf]  ;;  %4290 = vst.msk [vmem:[#allocation4 + $0x80] sm:$0xf] %vm3051_vm5, %v4141_v29  ;;  %v8974_v9 = vrot.slane %v4863_v0, 9  ;;  %v4947_v33 = vrot.slane %v4864_v56, 5  ;;  %v3706_v4 = vpop.permute.xlu1 %3705 }
 0x272   :  { %v4031_v43 = vld [vmem:[#allocation3 + $0x64] sm:$0x1]  ;;  %v4171_v7 = vshrl.u32 %v4030_v21, 16  ;;  %v4174_v18 = vshll.u32 %v4030_v21, 16  ;;  %v5008_v55 = vld [vmem:[#allocation4 + $0x14] sm:$0xff]  ;;  %v4944_v52 = vsel %vm10575_vm1, %v8973_v22, %v4943_v27  ;;  %v3957_v61 = vpop.permute.xlu0 %3956 }
 0x273   :  { %v4180_v28 = vshll.u32 %v4031_v43, 16  ;;  %v4028_v12 = vld [vmem:[#allocation3 + $0x58] sm:$0xf]  ;;  %v4029_v26 = vld [vmem:[#allocation3 + $0x5c] sm:$0x1]  ;;  %v8983_v3 = vcombine.high %v12375_v32, %v5008_v55  ;;  %v8982_v63 = vcombine.low %v12375_v32, %v5008_v55  ;;  %v4948_v39 = vsel %vm10575_vm1, %v8974_v9, %v4947_v33  ;;  %v9905_v49 = vld [vmem:[%s13751_s2 + $0x100] sm:$0xff]  }
 0x274   :  { %4809 = vrot.lane.b32.xlu0 %v4766_v58, %s10049_s1  ;;  %3743 = vst.msk [vmem:[#allocation4 + $0x3c] sm:$0xf] %vm3739_vm3, %v3698_v40  ;;  %v4173_v46 = vrot.slane %v4171_v7, 4  ;;  %v4502_v47 = vld [vmem:[#allocation3 + $0x68] sm:$0xf]  ;;  %v4176_v10 = vrot.slane %v4174_v18, 5  ;;  %v7716_v32 = vsel %vm10575_vm1, %v9121_v30, %v7715_v57 }
 0x275   :  { %4997 = vst.msk [vmem:[#allocation4 + $0xb0] sm:$0xf] %vm3051_vm5, %v4944_v52  ;;  %v4501_v1 = vld [vmem:[#allocation3 + $0x60] sm:$0xf]  ;;  %4998 = vst.msk [vmem:[#allocation4 + $0xc4] sm:$0xf] %vm3051_vm5, %v4948_v39  ;;  %5601 = vmatprep.mubr.bf16.mxu1 %v8983_v3  ;;  %v3702_v33 = vpop.permute.xlu1 %3701 }
 0x276   :  { %v4157_v54 = vshrl.u32 %v4028_v12, 16  ;;  %v4160_v38 = vshll.u32 %v4028_v12, 16  ;;  %4518 = vst.msk [vmem:[#allocation4 + $0xc0] sm:$0xf] %vm3051_vm5, %v4502_v47  ;;  %4517 = vst.msk [vmem:[#allocation4 + $0xac] sm:$0xf] %vm3051_vm5, %v4501_v1  ;;  %5602 = vmatmul.mubr.bf16.vlgmr.msra.gmra.mxu1 %v8982_v63  ;;  %v4177_v51 = vor.u32 %v4176_v10, %v4173_v46  ;;  %v3961_v12 = vpop.permute.xlu0 %3960 }
 0x277   :  { %3744 = vst.msk [vmem:[#allocation4 + $0x50] sm:$0xf] %vm3739_vm3, %v3700_v53  ;;  %v4166_v35 = vshll.u32 %v4029_v26, 16  ;;  %v4869_v44 = vld [vmem:[#allocation3 + $0x80] sm:$0xe]  ;;  %v10024_v11 = vld [vmem:[%s13751_s2 + $0x118] sm:$0xff]  }
 0x278   :  { %v4159_v60 = vrot.slane %v4157_v54, 4  ;;  %v4162_v16 = vrot.slane %v4160_v38, 5  ;;  %4001 = vst.msk [vmem:[#allocation4 + $0x68] sm:$0xf] %vm3739_vm3, %v3959_v62  ;;  %9771 = vmatpush3.bf16.msra.mxu1 %v10024_v11  ;;  %v12560_v48 = vld [vmem:[#allocation4 + $0x88] ss:$20 sps:$4 sm:$0xff]  }
 0x279   :  { %v4182_v14 = vrot.slane %v4180_v28, 5  ;;  %v8977_v59 = vrot.slane %v4869_v44, 9  ;;  %9772 = vmatprep.subr.bf16.mxu1 %v9881_v45  ;;  %7772 = vst.msk [vmem:[#allocation4 + $0x9c] sm:$0xf] %vm3051_vm5, %v7716_v32  ;;  %v4178_v17 = vrot.slane %v4177_v51, 4  ;;  %v4168_v34 = vrot.slane %v4166_v35, 5  ;;  %v3963_v54 = vpop.permute.xlu1 %3962 }
 0x27a   :  { %v4163_v19 = vor.u32 %v4162_v16, %v4159_v60  ;;  %v4870_v36 = vld [vmem:[#allocation3 + $0x84] sm:$0x1]  ;;  %v4871_v5 = vld [vmem:[#allocation3 + $0x88] sm:$0xe]  ;;  %3742 = vst.msk [vmem:[#allocation4 + $0x28] sm:$0xf] %vm3739_vm3, %v3696_v31  ;;  %v3708_v44 = vpop.permute.xlu0 %3707 }
 0x27b   :  { %v4872_v23 = vld [vmem:[#allocation3 + $0x8c] sm:$0x1]  ;;  %v4959_v41 = vrot.slane %v4870_v36, 5  ;;  %v8978_v50 = vrot.slane %v4871_v5, 9  ;;  %v4034_v42 = vld [vmem:[#allocation3 + $0x70] sm:$0xf]  ;;  %v4183_v25 = vsel %vm10330_vm12, %v4178_v17, %v4182_v14 }
 0x27c   :  { %v4164_v6 = vrot.slane %v4163_v19, 4  ;;  %v4963_v30 = vrot.slane %v4872_v23, 5  ;;  %v4199_v8 = vshrl.u32 %v4034_v42, 16  ;;  %3747 = vst.msk [vmem:[#allocation4 + $0x8c] sm:$0xf] %vm3739_vm3, %v3706_v4  ;;  %9773 = vmatpush3.bf16.msra.mxu1 %v9881_v45  ;;  %v4202_v58 = vshll.u32 %v4034_v42, 16 }
 0x27d   :  { %4293 = vst.msk [vmem:[#allocation4 + $0xbc] sm:$0xf] %vm3051_vm5, %v4183_v25  ;;  %v4960_v13 = vsel %vm10575_vm1, %v8977_v59, %v4959_v41  ;;  %v4035_v57 = vld [vmem:[#allocation3 + $0x74] sm:$0x1]  ;;  %9774 = vmatprep.subr.bf16.mxu1 %v9892_v2  ;;  %v4032_v29 = vld [vmem:[#allocation3 + $0x68] sm:$0xf]  ;;  %v3967_v23 = vpop.permute.xlu1 %3966 }
 0x27e   :  { %v4169_v20 = vsel %vm10330_vm12, %v4164_v6, %v4168_v34  ;;  %v4964_v24 = vsel %vm10575_vm1, %v8978_v50, %v4963_v30  ;;  %5001 = vst.msk [vmem:[#allocation4 + $0x100] sm:$0xf] %vm3051_vm5, %v4960_v13  ;;  %v4201_v0 = vrot.slane %v4199_v8, 4  ;;  %v4033_v56 = vld [vmem:[#allocation3 + $0x6c] sm:$0x1]  ;;  %v4208_v22 = vshll.u32 %v4035_v57, 16  ;;  %v3704_v13 = vpop.permute.xlu0 %3703 }
 0x27f   :  { %4000 = vst.msk [vmem:[#allocation4 + $0x54] sm:$0xf] %vm3739_vm3, %v3957_v61  ;;  %v4185_v27 = vshrl.u32 %v4032_v29, 16  ;;  %v4188_v21 = vshll.u32 %v4032_v29, 16  ;;  %v4504_v9 = vld [vmem:[#allocation3 + $0x78] sm:$0xf] }
 0x280   :  { %4292 = vst.msk [vmem:[#allocation4 + $0xa8] sm:$0xf] %vm3051_vm5, %v4169_v20  ;;  %5002 = vst.msk [vmem:[#allocation4 + $0x114] sm:$0xf] %vm3051_vm5, %v4964_v24  ;;  %v4204_v43 = vrot.slane %v4202_v58, 5  ;;  %v4194_v7 = vshll.u32 %v4033_v56, 16  ;;  %9775 = vmatpush3.bf16.msra.mxu1 %v9892_v2 }
 0x281   :  { %4520 = vst.msk [vmem:[#allocation4 + $0xe8] sm:$0xf] %vm3051_vm5, %v4504_v9  ;;  %v4503_v18 = vld [vmem:[#allocation3 + $0x70] sm:$0xf]  ;;  %v4875_v40 = vld [vmem:[#allocation3 + $0x98] sm:$0xe]  ;;  %9776 = vmatprep.subr.bf16.mxu1 %v9905_v49 }
 0x282   :  { %3745 = vst.msk [vmem:[#allocation4 + $0x64] sm:$0xf] %vm3739_vm3, %v3702_v33  ;;  %v4187_v55 = vrot.slane %v4185_v27, 4  ;;  %v4190_v52 = vrot.slane %v4188_v21, 5  ;;  %v4876_v28 = vld [vmem:[#allocation3 + $0x9c] sm:$0x1]  ;;  %v4205_v39 = vor.u32 %v4204_v43, %v4201_v0  ;;  %v3714_v33 = vpop.permute.xlu1 %3713 }
 0x283   :  { %4519 = vst.msk [vmem:[#allocation4 + $0xd4] sm:$0xf] %vm3051_vm5, %v4503_v18  ;;  %v5011_v26 = vld [vmem:[#allocation4 + $0x28] sm:$0xff]  ;;  %v5014_v3 = vld [vmem:[#allocation4 + $0x3c] sm:$0xff]  ;;  %v8980_v46 = vrot.slane %v4875_v40, 9  ;;  %v4971_v47 = vrot.slane %v4876_v28, 5 }
 0x284   :  { %v9874_v63 = vld [vmem:[#allocation4 + $0x2c] ss:$20 sps:$4 sm:$0xff]   ;;  %4002 = vst.msk [vmem:[#allocation4 + $0x7c] sm:$0xf] %vm3739_vm3, %v3961_v12  ;;  %v8987_v1 = vcombine.low %v5011_v26, %v5014_v3  ;;  %v4191_v53 = vor.u32 %v4190_v52, %v4187_v55  ;;  %v7651_v45 = vld [vmem:[#allocation3 + $0x98] sm:$0xe]  ;;  %9777 = vmatpush3.bf16.msra.mxu1 %v9905_v49  ;;  %v3965_v3 = vpop.permute.xlu0 %3964 }
 0x285   :  { %v7652_v10 = vld [vmem:[#allocation3 + $0x9c] sm:$0x1]  ;;  %5609 = vmatprep.mubr.bf16.mxu1 %v9874_v63  ;;  %v4206_v38 = vrot.slane %v4205_v39, 4  ;;  %v4210_v32 = vrot.slane %v4208_v22, 5  ;;  %v4196_v35 = vrot.slane %v4194_v7, 5  ;;  %v4972_v62 = vsel %vm10575_vm1, %v8980_v46, %v4971_v47 }
 0x286   :  { %v4038_v2 = vld [vmem:[#allocation3 + $0x80] sm:$0xf]  ;;  %4003 = vst.msk [vmem:[#allocation4 + $0x90] sm:$0xf] %vm3739_vm3, %v3963_v54  ;;  %5610 = vmatmul.mubr.bf16.gmra.mxu1 %v8987_v1  ;;  %v4192_v51 = vrot.slane %v4191_v53, 4  ;;  %v9129_v14 = vrot.slane %v7651_v45, 9 }
 0x287   :  { %5004 = vst.msk [vmem:[#allocation4 + $0x13c] sm:$0xf] %vm3051_vm5, %v4972_v62  ;;  %v4039_v60 = vld [vmem:[#allocation3 + $0x84] sm:$0x1]  ;;  %v4227_v16 = vshrl.u32 %v4038_v2, 16  ;;  %v4211_v11 = vsel %vm10330_vm12, %v4206_v38, %v4210_v32  ;;  %v7747_v59 = vrot.slane %v7652_v10, 5  ;;  %v3710_v32 = vpop.permute.xlu1 %3709 }
 0x288   :  { %v4230_v31 = vshll.u32 %v4038_v2, 16  ;;  %3748 = vst.msk [vmem:[#allocation4 + $0xa0] sm:$0xf] %vm3739_vm3, %v3708_v44  ;;  %v4197_v17 = vsel %vm10330_vm12, %v4192_v51, %v4196_v35  ;;  %v4236_v34 = vshll.u32 %v4039_v60, 16  ;;  %v4036_v36 = vld [vmem:[#allocation3 + $0x78] sm:$0xf] }
 0x289   :  { %4295 = vst.msk [vmem:[#allocation4 + $0xe4] sm:$0xf] %vm3051_vm5, %v4211_v11  ;;  %v4229_v19 = vrot.slane %v4227_v16, 4  ;;  %v4037_v5 = vld [vmem:[#allocation3 + $0x7c] sm:$0x1]  ;;  %v5020_v41 = vld [vmem:[#allocation4 + $0x64] sm:$0xff]  ;;  %v7748_v61 = vsel %vm10575_vm1, %v9129_v14, %v7747_v59  ;;  %v3969_v16 = vpop.permute.xlu0 %3968 }
 0x28a   :  { %v9877_v50 = vld [vmem:[#allocation4 + $0x54] ss:$20 sps:$4 sm:$0xff]   ;;  %4294 = vst.msk [vmem:[#allocation4 + $0xd0] sm:$0xf] %vm3051_vm5, %v4197_v17  ;;  %v4232_v42 = vrot.slane %v4230_v31, 5  ;;  %v4213_v4 = vshrl.u32 %v4036_v36, 16 }
 0x28b   :  { %v4216_v25 = vshll.u32 %v4036_v36, 16  ;;  %4005 = vst.msk [vmem:[#allocation4 + $0xb8] sm:$0xf] %vm3739_vm3, %v3967_v23  ;;  %v5017_v6 = vld [vmem:[#allocation4 + $0x50] sm:$0xff]  ;;  %v4222_v30 = vshll.u32 %v4037_v5, 16  ;;  %5617 = vmatprep.mubr.bf16.mxu1 %v9877_v50  ;;  %v4238_v18 = vrot.slane %v4236_v34, 5  ;;  %v3971_v34 = vpop.permute.xlu1 %3970 }
 0x28c   :  { %v4506_v8 = vld [vmem:[#allocation3 + $0x88] sm:$0xf]  ;;  %v4505_v49 = vld [vmem:[#allocation3 + $0x80] sm:$0xf]  ;;  %v6549_v57 = vld [vmem:[#allocation3 + $0x50] sm:$0xe]  ;;  %v4233_v20 = vor.u32 %v4232_v42, %v4229_v19  ;;  %v8992_v56 = vcombine.low %v5017_v6, %v5020_v41 }
 0x28d   :  { %v4215_v24 = vrot.slane %v4213_v4, 4  ;;  %v4218_v0 = vrot.slane %v4216_v25, 5  ;;  %4522 = vst.msk [vmem:[#allocation4 + $0x110] sm:$0xf] %vm3051_vm5, %v4506_v8  ;;  %4521 = vst.msk [vmem:[#allocation4 + $0xfc] sm:$0xf] %vm3051_vm5, %v4505_v49  ;;  %v3716_v41 = vpop.permute.xlu0 %3715 }
 0x28e   :  { %v4042_v58 = vld [vmem:[#allocation3 + $0x90] sm:$0xf]  ;;  %v4043_v29 = vld [vmem:[#allocation3 + $0x94] sm:$0x1]  ;;  %3746 = vst.msk [vmem:[#allocation4 + $0x78] sm:$0xf] %vm3739_vm3, %v3704_v13  ;;  %5618 = vmatmul.mubr.bf16.gmra.mxu1 %v8992_v56 }
 0x28f   :  { %v6550_v22 = vld [vmem:[#allocation3 + $0x54] sm:$0x1]  ;;  %v4255_v27 = vshrl.u32 %v4042_v58, 16  ;;  %v4258_v21 = vshll.u32 %v4042_v58, 16  ;;  %v4040_v9 = vld [vmem:[#allocation3 + $0x88] sm:$0xf]  ;;  %v4219_v40 = vor.u32 %v4218_v0, %v4215_v24  ;;  %v3975_v42 = vpop.permute.xlu1 %3974 }
 0x290   :  { %v12602_v43 = vld [vmem:[#allocation4 + $0x128] ss:$20 sps:$4 sm:$0xff]   ;;  %v4234_v7 = vrot.slane %v4233_v20, 4  ;;  %3751 = vst.msk [vmem:[#allocation4 + $0xdc] sm:$0xf] %vm3739_vm3, %v3714_v33  ;;  %v4264_v28 = vshll.u32 %v4043_v29, 16 }
 0x291   :  { %7780 = vst.msk [vmem:[#allocation4 + $0x13c] sm:$0xf] %vm3051_vm5, %v7748_v61  ;;  %v4257_v55 = vrot.slane %v4255_v27, 4  ;;  %v4260_v52 = vrot.slane %v4258_v21, 5  ;;  %v4041_v12 = vld [vmem:[#allocation3 + $0x8c] sm:$0x1]  ;;  %v3712_v6 = vpop.permute.xlu0 %3711 }
 0x292   :  { %v4241_v26 = vshrl.u32 %v4040_v9, 16  ;;  %v4239_v63 = vsel %vm10330_vm12, %v4234_v7, %v4238_v18  ;;  %v4220_v39 = vrot.slane %v4219_v40, 4  ;;  %v4224_v46 = vrot.slane %v4222_v30, 5  ;;  %v4508_v1 = vld [vmem:[#allocation3 + $0x98] sm:$0xf]  ;;  %v5026_v11 = vld [vmem:[#allocation4 + $0x8c] sm:$0xff] }
 0x293   :  { %v4244_v47 = vshll.u32 %v4040_v9, 16  ;;  %v9090_v53 = vrot.slane %v6549_v57, 9  ;;  %4004 = vst.msk [vmem:[#allocation4 + $0xa4] sm:$0xf] %vm3739_vm3, %v3965_v3  ;;  %v4261_v45 = vor.u32 %v4260_v52, %v4257_v55  ;;  %v4507_v54 = vld [vmem:[#allocation3 + $0x90] sm:$0xf]  ;;  %v3722_v8 = vpop.permute.xlu1 %3721 }
 0x294   :  { %4297 = vst.msk [vmem:[#allocation4 + $0x10c] sm:$0xf] %vm3051_vm5, %v4239_v63  ;;  %v4243_v10 = vrot.slane %v4241_v26, 4  ;;  %4524 = vst.msk [vmem:[#allocation4 + $0x138] sm:$0xf] %vm3051_vm5, %v4508_v1  ;;  %v6631_v38 = vrot.slane %v6550_v22, 5  ;;  %v4225_v35 = vsel %vm10330_vm12, %v4220_v39, %v4224_v46 }
 0x295   :  { %v4246_v62 = vrot.slane %v4244_v47, 5  ;;  %v4250_v2 = vshll.u32 %v4041_v12, 16  ;;  %4523 = vst.msk [vmem:[#allocation4 + $0x124] sm:$0xf] %vm3051_vm5, %v4507_v54  ;;  %4296 = vst.msk [vmem:[#allocation4 + $0xf8] sm:$0xf] %vm3051_vm5, %v4225_v35  ;;  %v3973_v49 = vpop.permute.xlu0 %3972 }
 0x296   :  { %3749 = vst.msk [vmem:[#allocation4 + $0xb4] sm:$0xf] %vm3739_vm3, %v3710_v32  ;;  %v4262_v51 = vrot.slane %v4261_v45, 4  ;;  %v4266_v60 = vrot.slane %v4264_v28, 5  ;;  %v5023_v44 = vld [vmem:[#allocation4 + $0x78] sm:$0xff]  ;;  %v6632_v19 = vsel %vm10575_vm1, %v9090_v53, %v6631_v38 }
 0x297   :  { %v9879_v14 = vld [vmem:[#allocation4 + $0x7c] ss:$20 sps:$4 sm:$0xff]   ;;  %v4247_v59 = vor.u32 %v4246_v62, %v4243_v10  ;;  %4006 = vst.msk [vmem:[#allocation4 + $0xcc] sm:$0xf] %vm3739_vm3, %v3969_v16  ;;  %v8997_v31 = vcombine.low %v5023_v44, %v5026_v11  ;;  %v4252_v5 = vrot.slane %v4250_v2, 5  ;;  %v3718_v13 = vpop.permute.xlu1 %3717 }
 0x298   :  { %v4267_v17 = vsel %vm10330_vm12, %v4262_v51, %v4266_v60  ;;  %5625 = vmatprep.mubr.bf16.mxu1 %v9879_v14  ;;  %4007 = vst.msk [vmem:[#allocation4 + $0xe0] sm:$0xf] %vm3739_vm3, %v3971_v34  ;;  %3752 = vst.msk [vmem:[#allocation4 + $0xf0] sm:$0xf] %vm3739_vm3, %v3716_v41  ;;  %v9906_v63 = vld [vmem:[#allocation4 + $0x10] ss:$20 sps:$4 sm:$0xff]  }
 0x299   :  { %4299 = vst.msk [vmem:[#allocation4 + $0x134] sm:$0xf] %vm3051_vm5, %v4267_v17  ;;  %v4248_v36 = vrot.slane %v4247_v59, 4  ;;  %5626 = vmatmul.mubr.bf16.gmra.mxu1 %v8997_v31  ;;  %v3977_v57 = vpop.permute.xlu0 %3976  ;;  %v9910_v45 = vld [vmem:[#allocation4 + $0x38] ss:$20 sps:$4 sm:$0xff]  }
 0x29a   :  { %v5029_v23 = vld [vmem:[#allocation4 + $0xa0] sm:$0xff]  ;;  %4009 = vst.msk [vmem:[#allocation4 + $0x108] sm:$0xf] %vm3739_vm3, %v3975_v42  ;;  %3750 = vst.msk [vmem:[#allocation4 + $0xc8] sm:$0xf] %vm3739_vm3, %v3712_v6 }
 0x29b   :  { %v4253_v50 = vsel %vm10330_vm12, %v4248_v36, %v4252_v5  ;;  %6685 = vst.msk [vmem:[#allocation4 + $0xa4] sm:$0xf] %vm3051_vm5, %v6632_v19  ;;  %v3979_v58 = vpop.permute.xlu1 %3978  ;;  %v9911_v54 = vld [vmem:[#allocation4 + $0x60] ss:$20 sps:$4 sm:$0xff]   ;;  %v9916_v60 = vld [vmem:[#allocation4 + $0xb0] ss:$20 sps:$4 sm:$0xff]  }
 0x29c   :  { %4298 = vst.msk [vmem:[#allocation4 + $0x120] sm:$0xf] %vm3051_vm5, %v4253_v50  ;;  %v7276_v59 = vld [vmem:[#allocation3 + $0x48] sm:$0xf]  ;;  %v9920_v17 = vld [vmem:[#allocation4 + $0xd8] ss:$20 sps:$4 sm:$0xff]  }
 0x29d   :  { %v5032_v4 = vld [vmem:[#allocation4 + $0xb4] sm:$0xff]  ;;  %3755 = vst.msk [vmem:[#allocation4 + $0x12c] sm:$0xf] %vm3739_vm3, %v3722_v8  ;;  %4008 = vst.msk [vmem:[#allocation4 + $0xf4] sm:$0xf] %vm3739_vm3, %v3973_v49  ;;  %v4429_v29 = vpop.permute.xlu0 %4428 }
 0x29e   :  { %v9003_v25 = vcombine.high %v5029_v23, %v5032_v4  ;;  %v9002_v30 = vcombine.low %v5029_v23, %v5032_v4  ;;  %3753 = vst.msk [vmem:[#allocation4 + $0x104] sm:$0xf] %vm3739_vm3, %v3718_v13  ;;  %4010 = vst.msk [vmem:[#allocation4 + $0x11c] sm:$0xf] %vm3739_vm3, %v3977_v57 }
 0x29f   :  { %v5038_v20 = vld [vmem:[#allocation4 + $0xdc] sm:$0xff]  ;;  %4011 = vst.msk [vmem:[#allocation4 + $0x130] sm:$0xf] %vm3739_vm3, %v3979_v58  ;;  %4476 = vst.msk [vmem:[#allocation4 + $0x8] sm:$0xf] %vm3739_vm3, %v4429_v29  ;;  %v4431_v56 = vpop.permute.xlu1 %4430 }
 0x2a0   :  { %5633 = vmatprep.mubr.bf16.mxu1 %v9003_v25  ;;  %v9889_v24 = vld [vmem:[#allocation4 + $0xcc] ss:$20 sps:$4 sm:$0xff]   ;;  %4477 = vst.msk [vmem:[#allocation4 + $0x1c] sm:$0xf] %vm3739_vm3, %v4431_v56 }
 0x2a1   :  { %5634 = vmatmul.mubr.bf16.gmra.mxu1 %v9002_v30  ;;  %v5035_v61 = vld [vmem:[#allocation4 + $0xc8] sm:$0xff]  ;;  %v3720_v21 = vpop.permute.xlu0 %3719 }
 0x2a2   :  { %v9007_v0 = vcombine.low %v5035_v61, %v5038_v20  ;;  %5641 = vmatprep.mubr.bf16.mxu1 %v9889_v24  ;;  %3754 = vst.msk [vmem:[#allocation4 + $0x118] sm:$0xf] %vm3739_vm3, %v3720_v21 }
 0x2a3   :  { %v4784_v7 = vpop.permute.xlu1 %4783 }
 0x2a4   :  { %v9895_v27 = vld [vmem:[#allocation4 + $0xf4] ss:$20 sps:$4 sm:$0xff]   ;;  %4830 = vst.msk [vmem:[#allocation4 + $0x20] sm:$0xf] %vm3739_vm3, %v4784_v7  ;;  %v6213_v7 = vld [vmem:[#allocation3] sm:$0xf] }
 0x2a5   :  { %v5044_v22 = vld [vmem:[#allocation4 + $0x104] sm:$0xff]  ;;  %v5041_v9 = vld [vmem:[#allocation4 + $0xf0] sm:$0xff]  ;;  %v4782_v18 = vpop.permute.xlu0 %4781 }
 0x2a6   :  { %v9012_v33 = vcombine.low %v5041_v9, %v5044_v22  ;;  %4829 = vst.msk [vmem:[#allocation4 + $0xc] sm:$0xf] %vm3739_vm3, %v4782_v18  ;;  %v5050_v28 = vld [vmem:[#allocation4 + $0x12c] sm:$0xff]  ;;  %v7284_v22 = vld [vmem:[#allocation3 + $0x98] sm:$0xf] }
 0x2a7   :  { %v4435_v40 = vpop.permute.xlu1 %4434  ;;  %v9902_v12 = vld [vmem:[#allocation4 + $0x11c] ss:$20 sps:$4 sm:$0xff]   ;;  %v6214_v18 = vld [vmem:[#allocation3 + $0x4] sm:$0x1] }
 0x2a8   :  { %4479 = vst.msk [vmem:[#allocation4 + $0x44] sm:$0xf] %vm3739_vm3, %v4435_v40  ;;  %v9909_v47 = vld [vmem:[#allocation4 + $0x8] ss:$20 sps:$4 sm:$0xff]   ;;  %v6246_v40 = vshrl.u32 %v6213_v7, 16 }
 0x2a9   :  { %5642 = vmatmul.mubr.bf16.gmra.mxu1 %v9007_v0  ;;  %v4433_v55 = vpop.permute.xlu0 %4432  ;;  %v5047_v52 = vld [vmem:[#allocation4 + $0x118] sm:$0xff] }
 0x2aa   :  { %5649 = vmatprep.mubr.bf16.mxu1 %v9895_v27  ;;  %4478 = vst.msk [vmem:[#allocation4 + $0x30] sm:$0xf] %vm3739_vm3, %v4433_v55  ;;  %v9017_v26 = vcombine.low %v5047_v52, %v5050_v28  ;;  %v6249_v55 = vshll.u32 %v6213_v7, 16  ;;  %v6255_v52 = vshll.u32 %v6214_v18, 16  ;;  %v6248_v28 = vrot.slane %v6246_v40, 4 }
 0x2ab   :  { %v4788_v3 = vpop.permute.xlu1 %4787 }
 0x2ac   :  { %4832 = vst.msk [vmem:[#allocation4 + $0x48] sm:$0xf] %vm3739_vm3, %v4788_v3  ;;  %v6230_v3 = vld [vmem:[#allocation3 + $0x54] sm:$0x1] }
 0x2ad   :  { %v4786_v39 = vpop.permute.xlu0 %4785  ;;  %v9907_v46 = vld [vmem:[#allocation4 + $0xc] ss:$20 sps:$4 sm:$0xff]  }
 0x2ae   :  { %4831 = vst.msk [vmem:[#allocation4 + $0x34] sm:$0xf] %vm3739_vm3, %v4786_v39  ;;  %5698 = vmatprep.mubr.bf16.mxu0 %v9907_v46 }
 0x2af   :  { %v4439_v1 = vpop.permute.xlu1 %4438  ;;  %5699 = vmatmul.mubr.bf16.vlgmr.msra.gmra.mxu0 %v9909_v47  ;;  %v6257_v47 = vrot.slane %v6255_v52, 5 }
 0x2b0   :  { %4481 = vst.msk [vmem:[#allocation4 + $0x6c] sm:$0xf] %vm3739_vm3, %v4439_v1  ;;  %v6367_v1 = vshll.u32 %v6230_v3, 16 }
 0x2b1   :  { %5650 = vmatmul.mubr.bf16.gmra.mxu1 %v9012_v33  ;;  %v4437_v53 = vpop.permute.xlu0 %4436  ;;  %v9914_v35 = vld [vmem:[#allocation4 + $0x30] ss:$20 sps:$4 sm:$0xff]  }
 0x2b2   :  { %5657 = vmatprep.mubr.bf16.mxu1 %v9902_v12  ;;  %4480 = vst.msk [vmem:[#allocation4 + $0x58] sm:$0xf] %vm3739_vm3, %v4437_v53  ;;  %v6251_v12 = vrot.slane %v6249_v55, 5 }
 0x2b3   :  { %v4792_v10 = vpop.permute.xlu1 %4791 }
 0x2b4   :  { %4834 = vst.msk [vmem:[#allocation4 + $0x70] sm:$0xf] %vm3739_vm3, %v4792_v10  ;;  %v6252_v46 = vor.u32 %v6251_v12, %v6248_v28 }
 0x2b5   :  { %v4790_v38 = vpop.permute.xlu0 %4789  ;;  %v9912_v32 = vld [vmem:[#allocation4 + $0x34] ss:$20 sps:$4 sm:$0xff]  }
 0x2b6   :  { %4833 = vst.msk [vmem:[#allocation4 + $0x5c] sm:$0xf] %vm3739_vm3, %v4790_v38  ;;  %5706 = vmatprep.mubr.bf16.mxu0 %v9912_v32  ;;  %v6253_v10 = vrot.slane %v6252_v46, 4  ;;  %v6369_v38 = vrot.slane %v6367_v1, 5 }
 0x2b7   :  { %v4443_v62 = vpop.permute.xlu1 %4442  ;;  %5707 = vmatmul.mubr.bf16.gmra.mxu0 %v9914_v35 }
 0x2b8   :  { %4483 = vst.msk [vmem:[#allocation4 + $0x94] sm:$0xf] %vm3739_vm3, %v4443_v62  ;;  %v6258_v32 = vsel %vm10330_vm12, %v6253_v10, %v6257_v47 }
 0x2b9   :  { %5658 = vmatmul.mubr.bf16.gmra.mxu1 %v9017_v26  ;;  %v4441_v2 = vpop.permute.xlu0 %4440  ;;  %v9919_v11 = vld [vmem:[#allocation4 + $0x58] ss:$20 sps:$4 sm:$0xff]   ;;  %v6229_v26 = vld [vmem:[#allocation3 + $0x50] sm:$0xf]  ;;  %6469 = vrot.lane.b32.xlu0 %v6258_v32, %s10049_s1 }
 0x2ba   :  { %9778 = vmatprep.mubr.msk.bf16.mxu1 %vm3034_vm0, %v9906_v63  ;;  %4482 = vst.msk [vmem:[#allocation4 + $0x80] sm:$0xf] %vm3739_vm3, %v4441_v2  ;;  %v6358_v63 = vshrl.u32 %v6229_v26, 16  ;;  %v6361_v39 = vshll.u32 %v6229_v26, 16 }
 0x2bb   :  { %v4796_v51 = vpop.permute.xlu1 %4795 }
 0x2bc   :  { %4836 = vst.msk [vmem:[#allocation4 + $0x98] sm:$0xf] %vm3739_vm3, %v4796_v51  ;;  %v6360_v53 = vrot.slane %v6358_v63, 4 }
 0x2bd   :  { %v4794_v16 = vpop.permute.xlu0 %4793  ;;  %v9917_v44 = vld [vmem:[#allocation4 + $0x5c] ss:$20 sps:$4 sm:$0xff]  }
 0x2be   :  { %4835 = vst.msk [vmem:[#allocation4 + $0x84] sm:$0xf] %vm3739_vm3, %v4794_v16  ;;  %5714 = vmatprep.mubr.bf16.mxu0 %v9917_v44 }
 0x2bf   :  { %v4447_v14 = vpop.permute.xlu1 %4446  ;;  %5715 = vmatmul.mubr.bf16.gmra.mxu0 %v9919_v11 }
 0x2c0   :  { %4485 = vst.msk [vmem:[#allocation4 + $0xbc] sm:$0xf] %vm3739_vm3, %v4447_v14 }
 0x2c1   :  { %9779 = vmatmul.mubr.msk.bf16.vlgmr.msra.gmra.mxu1 %vm3034_vm0, %v9910_v45  ;;  %v4445_v31 = vpop.permute.xlu0 %4444  ;;  %v6363_v45 = vrot.slane %v6361_v39, 5 }
 0x2c2   :  { %9782 = vmatprep.mubr.msk.bf16.mxu1 %vm3034_vm0, %v9911_v54  ;;  %4484 = vst.msk [vmem:[#allocation4 + $0xa8] sm:$0xf] %vm3739_vm3, %v4445_v31 }
 0x2c3   :  { %v5027_v19 = vld [vmem:[#allocation4 + $0x94] sm:$0xff]  ;;  %v4800_v34 = vpop.permute.xlu1 %4799  ;;  %v6364_v54 = vor.u32 %v6363_v45, %v6360_v53 }
 0x2c4   :  { %7292 = vst.msk [vmem:[#allocation4 + $0x98] sm:$0xf] %vm3051_vm5, %v7276_v59 }
 0x2c5   :  { %4838 = vst.msk [vmem:[#allocation4 + $0xc0] sm:$0xf] %vm3739_vm3, %v4800_v34  ;;  %v5024_v5 = vld [vmem:[#allocation4 + $0x80] sm:$0xff]  ;;  %v6365_v35 = vrot.slane %v6364_v54, 4 }
 0x2c6   :  { %v4798_v36 = vpop.permute.xlu0 %4797  ;;  %v9000_v23 = vcombine.high %v5024_v5, %v5027_v19  ;;  %v8999_v41 = vcombine.low %v5024_v5, %v5027_v19 }
 0x2c7   :  { %4837 = vst.msk [vmem:[#allocation4 + $0xac] sm:$0xf] %vm3739_vm3, %v4798_v36  ;;  %v4451_v50 = vpop.permute.xlu1 %4450  ;;  %v6370_v62 = vsel %vm10330_vm12, %v6365_v35, %v6369_v38 }
 0x2c8   :  { %4487 = vst.msk [vmem:[#allocation4 + $0xe4] sm:$0xf] %vm3739_vm3, %v4451_v50  ;;  %5722 = vmatprep.mubr.bf16.mxu0 %v9000_v23  ;;  %6485 = vrot.lane.b32.xlu0 %v6370_v62, %s10049_s1 }
 0x2c9   :  { %9783 = vmatmul.mubr.msk.bf16.gmra.mxu1 %vm3034_vm0, %v12560_v48  ;;  %v9921_v48 = vld [vmem:[#allocation4 + $0x100] ss:$20 sps:$4 sm:$0xff]   ;;  %5723 = vmatmul.mubr.bf16.gmra.mxu0 %v8999_v41  ;;  %v9925_v8 = vld [vmem:[#allocation4 + $0xa8] ss:$20 sps:$4 sm:$0xff]  }
 0x2ca   :  { %9786 = vmatprep.mubr.msk.bf16.mxu1 %vm3034_vm0, %v9916_v60  ;;  %v4449_v42 = vpop.permute.xlu0 %4448 }
 0x2cb   :  { %4486 = vst.msk [vmem:[#allocation4 + $0xd0] sm:$0xf] %vm3739_vm3, %v4449_v42  ;;  %v4804_v4 = vpop.permute.xlu1 %4803 }
 0x2cc   :  { %4840 = vst.msk [vmem:[#allocation4 + $0xe8] sm:$0xf] %vm3739_vm3, %v4804_v4 }
 0x2ce   :  { %v4802_v25 = vpop.permute.xlu0 %4801  ;;  %v9923_v6 = vld [vmem:[#allocation4 + $0xac] ss:$20 sps:$4 sm:$0xff]  }
 0x2cf   :  { %4839 = vst.msk [vmem:[#allocation4 + $0xd4] sm:$0xf] %vm3739_vm3, %v4802_v25  ;;  %v4455_v30 = vpop.permute.xlu1 %4454  ;;  %5730 = vmatprep.mubr.bf16.mxu0 %v9923_v6 }
 0x2d0   :  { %4489 = vst.msk [vmem:[#allocation4 + $0x10c] sm:$0xf] %vm3739_vm3, %v4455_v30 }
 0x2d1   :  { %9787 = vmatmul.mubr.msk.bf16.gmra.mxu1 %vm3034_vm0, %v9920_v17  ;;  %5731 = vmatmul.mubr.bf16.gmra.mxu0 %v9925_v8 }
 0x2d2   :  { %9790 = vmatprep.mubr.msk.bf16.mxu1 %vm3034_vm0, %v9921_v48  ;;  %v4453_v49 = vpop.permute.xlu0 %4452  ;;  %v9928_v20 = vld [vmem:[#allocation4 + $0xd0] ss:$20 sps:$4 sm:$0xff]  }
 0x2d3   :  { %4488 = vst.msk [vmem:[#allocation4 + $0xf8] sm:$0xf] %vm3739_vm3, %v4453_v49  ;;  %v4808_v13 = vpop.permute.xlu1 %4807 }
 0x2d4   :  { %4842 = vst.msk [vmem:[#allocation4 + $0x110] sm:$0xf] %vm3739_vm3, %v4808_v13 }
 0x2d6   :  { %v9926_v61 = vld [vmem:[#allocation4 + $0xd4] ss:$20 sps:$4 sm:$0xff]  }
 0x2d7   :  { %v4806_v57 = vpop.permute.xlu0 %4805  ;;  %5738 = vmatprep.mubr.bf16.mxu0 %v9926_v61 }
 0x2d8   :  { %4841 = vst.msk [vmem:[#allocation4 + $0xfc] sm:$0xf] %vm3739_vm3, %v4806_v57 }
 0x2d9   :  { %9791 = vmatmul.mubr.msk.bf16.gmra.mxu1 %vm3034_vm0, %v12602_v43  ;;  %5739 = vmatmul.mubr.bf16.gmra.mxu0 %v9928_v20 }
 0x2da   :  { %v9931_v56 = vld [vmem:[#allocation4 + $0xf8] ss:$20 sps:$4 sm:$0xff]  }
 0x2df   :  { %v4459_v43 = vpop.permute.xlu1 %4458  ;;  %v9929_v29 = vld [vmem:[#allocation4 + $0xfc] ss:$20 sps:$4 sm:$0xff]  }
 0x2e0   :  { %4491 = vst.msk [vmem:[#allocation4 + $0x134] sm:$0xf] %vm3739_vm3, %v4459_v43  ;;  %5746 = vmatprep.mubr.bf16.mxu0 %v9929_v29 }
 0x2e1   :  { %5747 = vmatmul.mubr.bf16.gmra.mxu0 %v9931_v56 }
 0x2e2   :  { %v4457_v24 = vpop.permute.xlu0 %4456 }
 0x2e3   :  { %4490 = vst.msk [vmem:[#allocation4 + $0x120] sm:$0xf] %vm3739_vm3, %v4457_v24  ;;  %v4812_v0 = vpop.permute.xlu1 %4811 }
 0x2e4   :  { %4844 = vst.msk [vmem:[#allocation4 + $0x138] sm:$0xf] %vm3739_vm3, %v4812_v0  ;;  %v12701_v0 = vld [vmem:[%s13753_s4 + $0x1] ss:$0 sm:$0xff] }
 0x2e6   :  { %v4810_v58 = vpop.permute.xlu0 %4809 }
 0x2e7   :  { %4843 = vst.msk [vmem:[#allocation4 + $0x124] sm:$0xf] %vm3739_vm3, %v4810_v58 }
 0x2eb   :  { %v5051_v27 = vld [vmem:[#allocation4 + $0x134] sm:$0xff] }
 0x2ec   :  { %7300 = vst.msk [vmem:[#allocation4 + $0x138] sm:$0xf] %vm3051_vm5, %v7284_v22 }
 0x2ee   :  { %v5048_v21 = vld [vmem:[#allocation4 + $0x120] sm:$0xff] }
 0x2ef   :  { %v9020_v9 = vcombine.high %v5048_v21, %v5051_v27  ;;  %v9019_v33 = vcombine.low %v5048_v21, %v5051_v27 }
 0x2f1   :  { %5754 = vmatprep.mubr.bf16.mxu0 %v9020_v9 }
 0x2f2   :  { %5755 = vmatmul.mubr.bf16.gmra.mxu0 %v9019_v33 }
 0x336   :  { %v9344_v2 = vpop.f32.mrf.mxu1 }
 0x338   :  { %v9345_v51 = vpop.f32.mrf.mxu1 }
 0x339   :  { %v9346_v24 = vadd.f32 %v9345_v51, %v9344_v2 }
 0x33a   :  { %v9347_v60 = vpop.f32.mrf.mxu1 }
 0x33b   :  { %v5604_v27 = vadd.f32 %v9346_v24, %v12701_v0 }
 0x33c   :  { %v9348_v16 = vpop.f32.mrf.mxu1 }
 0x33d   :  { %v9349_v21 = vadd.f32 %v9348_v16, %v9347_v60 }
 0x33f   :  { %v5607_v28 = vadd.f32 %v9349_v21, %v12701_v0 }
 0x346   :  { %v9350_v44 = vpop.f32.mrf.mxu1 }
 0x348   :  { %v9351_v11 = vpop.f32.mrf.mxu1 }
 0x349   :  { %v9352_v40 = vadd.f32 %v9351_v11, %v9350_v44 }
 0x34a   :  { %v9353_v14 = vpop.f32.mrf.mxu1 }
 0x34b   :  { %v5612_v10 = vadd.f32 %v9352_v40, %v12701_v0 }
 0x34c   :  { %v9354_v59 = vpop.f32.mrf.mxu1 }
 0x34d   :  { %v9355_v12 = vadd.f32 %v9354_v59, %v9353_v14 }
 0x34e   :  { %v9356_v31 = vpop.f32.mrf.mxu1 }
 0x34f   :  { %v5615_v2 = vadd.f32 %v9355_v12, %v12701_v0 }
 0x350   :  { %v9357_v17 = vpop.f32.mrf.mxu1 }
 0x351   :  { %v9358_v63 = vadd.f32 %v9357_v17, %v9356_v31 }
 0x352   :  { %v9359_v19 = vpop.f32.mrf.mxu1 }
 0x353   :  { %v5620_v44 = vadd.f32 %v9358_v63, %v12701_v0 }
 0x354   :  { %v9360_v34 = vpop.f32.mrf.mxu1 }
 0x355   :  { %v9361_v39 = vadd.f32 %v9360_v34, %v9359_v19 }
 0x357   :  { %v12713_v11 = vadd.f32 %v9361_v39, %v12701_v0 }
 0x359   :  { %v9362_v48 = vpop.f32.mrf.mxu1 }
 0x35b   :  { %v9363_v36 = vpop.f32.mrf.mxu1 }
 0x35c   :  { %v9364_v1 = vadd.f32 %v9363_v36, %v9362_v48  ;;  %v7315_v36 = vld [vmem:[#allocation3 + $0x48] sm:$0xf] }
 0x35d   :  { %v9365_v5 = vpop.f32.mrf.mxu1  ;;  %v7435_v21 = vshll.u32 %v7315_v36, 16 }
 0x35e   :  { %v12716_v17 = vadd.f32 %v9364_v1, %v12701_v0  ;;  %v9954_v1 = vld [vmem:[%s13752_s3] sm:$0xff]  }
 0x35f   :  { %v9366_v23 = vpop.f32.mrf.mxu1 }
 0x360   :  { %v9367_v54 = vadd.f32 %v9366_v23, %v9365_v5 }
 0x361   :  { %v9368_v41 = vpop.f32.mrf.mxu1 }
 0x362   :  { %v12719_v5 = vadd.f32 %v9367_v54, %v12701_v0  ;;  %v7316_v54 = vld [vmem:[#allocation3 + $0x4c] sm:$0x1] }
 0x363   :  { %v9369_v50 = vpop.f32.mrf.mxu1 }
 0x364   :  { %v9370_v38 = vadd.f32 %v9369_v50, %v9368_v41 }
 0x365   :  { %v9371_v42 = vpop.f32.mrf.mxu1 }
 0x366   :  { %v12722_v23 = vadd.f32 %v9370_v38, %v12701_v0 }
 0x367   :  { %v9372_v4 = vpop.f32.mrf.mxu1 }
 0x368   :  { %v9373_v32 = vadd.f32 %v9372_v4, %v9371_v42 }
 0x369   :  { %v9374_v25 = vpop.f32.mrf.mxu1 }
 0x36a   :  { %v12725_v41 = vadd.f32 %v9373_v32, %v12701_v0 }
 0x36b   :  { %v9375_v6 = vpop.f32.mrf.mxu1 }
 0x36c   :  { %v9376_v14 = vadd.f32 %v9375_v6, %v9374_v25 }
 0x36d   :  { %v9377_v30 = vpop.f32.mrf.mxu1 }
 0x36e   :  { %v12730_v24 = vadd.f32 %v9376_v14, %v12701_v0 }
 0x36f   :  { %v9378_v8 = vpop.f32.mrf.mxu1  ;;  %v9408_v29 = vpop.f32.mrf.mxu0 }
 0x370   :  { %v9379_v59 = vadd.f32 %v9378_v8, %v9377_v30 }
 0x371   :  { %v12686_v49 = vpop.f32.mrf.mxu1  ;;  %v9409_v22 = vpop.f32.mrf.mxu0 }
 0x372   :  { %v9410_v9 = vadd.f32 %v9409_v22, %v9408_v29  ;;  %v12733_v29 = vadd.f32 %v9379_v59, %v12701_v0 }
 0x373   :  { %v12688_v13 = vpop.f32.mrf.mxu1  ;;  %v9411_v33 = vpop.f32.mrf.mxu0 }
 0x374   :  { %v5701_v18 = vadd.f32 %v9410_v9, %v5604_v27  ;;  %v7432_v27 = vshrl.u32 %v7315_v36, 16 }
 0x375   :  { %v12690_v57 = vpop.f32.mrf.mxu1  ;;  %v9412_v55 = vpop.f32.mrf.mxu0 }
 0x376   :  { %v9413_v26 = vadd.f32 %v9412_v55, %v9411_v33  ;;  %v9382_v55 = vadd.f32 %v12688_v13, %v12686_v49  ;;  %v7434_v38 = vrot.slane %v7432_v27, 4 }
 0x377   :  { %v12692_v61 = vpop.f32.mrf.mxu1  ;;  %v9414_v46 = vpop.f32.mrf.mxu0 }
 0x378   :  { %v5704_v45 = vadd.f32 %v9413_v26, %v5607_v28  ;;  %v6088_v28 = vld [vmem:[#allocation3 + $0xc] sm:$0x1]  ;;  %v12752_v36 = vadd.f32 %v9382_v55, %v12701_v0 }
 0x379   :  { %v12694_v43 = vpop.f32.mrf.mxu1  ;;  %v9415_v35 = vpop.f32.mrf.mxu0 }
 0x37a   :  { %v9416_v60 = vadd.f32 %v9415_v35, %v9414_v46 }
 0x37b   :  { %v12696_v20 = vpop.f32.mrf.mxu1  ;;  %v9417_v31 = vpop.f32.mrf.mxu0 }
 0x37c   :  { %v5709_v34 = vadd.f32 %v9416_v60, %v5612_v10  ;;  %v9388_v49 = vadd.f32 %v12696_v20, %v12694_v43 }
 0x37d   :  { %v12703_v58 = vpop.f32.mrf.mxu1  ;;  %v9418_v4 = vpop.f32.mrf.mxu0 }
 0x37e   :  { %v9419_v8 = vadd.f32 %v9418_v4, %v9417_v31  ;;  %v12759_v27 = vadd.f32 %v9388_v49, %v12701_v0 }
 0x37f   :  { %v12705_v56 = vpop.f32.mrf.mxu1  ;;  %v9420_v22 = vpop.f32.mrf.mxu0 }
 0x380   :  { %v5712_v26 = vadd.f32 %v9419_v8, %v5615_v2  ;;  %v6091_v2 = vld [vmem:[#allocation3 + $0x10] sm:$0xf] }
 0x381   :  { %v9780_v7 = vpop.f32.mrf.mxu1  ;;  %v9421_v63 = vpop.f32.mrf.mxu0 }
 0x382   :  { %v5806_v6 = vadd.f32 %v9780_v7, %v5709_v34  ;;  %v9385_v7 = vadd.f32 %v12692_v61, %v12690_v57  ;;  %v9422_v57 = vadd.f32 %v9421_v63, %v9420_v22  ;;  %v7441_v34 = vshll.u32 %v7316_v54, 16 }
 0x383   :  { %v5797_v52 = vpop.f32.mrf.mxu1  ;;  %v9423_v61 = vpop.f32.mrf.mxu0 }
 0x384   :  { %v5798_v3 = vadd.f32 %v5797_v52, %v5701_v18  ;;  %v5862_v18 = vmax.f32 %v5806_v6, 0.0  ;;  %v6085_v52 = vld [vmem:[#allocation3 + $0x8] sm:$0xf]  ;;  %v5717_v31 = vadd.f32 %v9422_v57, %v5620_v44 }
 0x385   :  { %v9781_v47 = vpop.f32.mrf.mxu1 }
 0x386   :  { %v5860_v53 = vmax.f32 %v5798_v3, 0.0  ;;  %v5809_v13 = vadd.f32 %v9781_v47, %v5712_v26 }
 0x387   :  { %v5800_v62 = vpop.f32.mrf.mxu1 }
 0x388   :  { %v9231_v51 = vpack.c.bf16 %v5860_v53, %v5860_v53  ;;  %v5801_v16 = vadd.f32 %v5800_v62, %v5704_v45  ;;  %v9233_v45 = vpack.c.bf16 %v5862_v18, %v5862_v18  ;;  %v5863_v14 = vmax.f32 %v5809_v13, 0.0 }
 0x389   :  { %v12727_v42 = vpop.f32.mrf.mxu1 }
 0x38a   :  { %v5926_v19 = vshrl.u32 %v9231_v51, 16  ;;  %v5861_v48 = vmax.f32 %v5801_v16, 0.0  ;;  %v5929_v50 = vshll.u32 %v9231_v51, 16  ;;  %v5942_v32 = vshrl.u32 %v9233_v45, 16  ;;  %v6094_v16 = vld [vmem:[#allocation3 + $0x14] sm:$0x1] }
 0x38b   :  { %v5813_v3 = vpop.f32.mrf.mxu1  ;;  %v7437_v51 = vrot.slane %v7435_v21, 5  ;;  %v5945_v60 = vshll.u32 %v9233_v45, 16  ;;  %v9234_v4 = vpack.c.bf16 %v5863_v14, %v5863_v14  ;;  %v12763_v21 = vadd.f32 %v12705_v56, %v12703_v58  ;;  %v6103_v45 = vld [vmem:[#allocation3 + $0x20] sm:$0xf] }
 0x38c   :  { %v5928_v25 = vrot.slane %v5926_v19, 7  ;;  %v9232_v30 = vpack.c.bf16 %v5861_v48, %v5861_v48  ;;  %v9424_v19 = vpop.f32.mrf.mxu0  ;;  %v5944_v43 = vrot.slane %v5942_v32, 7  ;;  %v5814_v44 = vadd.f32 %v5813_v3, %v5717_v31  ;;  %v9933_v32 = vld [vmem:[%s13752_s3 + $0x38] sm:$0xff]  }
 0x38d   :  { %v12745_v59 = vpop.f32.mrf.mxu1  ;;  %v9425_v48 = vadd.f32 %v9424_v19, %v9423_v61  ;;  %v7438_v22 = vor.u32 %v7437_v51, %v7434_v38  ;;  %v5950_v18 = vshrl.u32 %v9234_v4, 16  ;;  %v12773_v3 = vrot.slane %v7441_v34, 5  ;;  %v9932_v38 = vld [vmem:[%s13752_s3 + $0x78] sm:$0xff]  }
 0x38e   :  { %v5931_v9 = vor.u32 %v5929_v50, %v5928_v25  ;;  %v5932_v33 = vrot.slane %v5928_v25, 4  ;;  %v5934_v40 = vshrl.u32 %v9232_v30, 16  ;;  %v5937_v12 = vshll.u32 %v9232_v30, 16  ;;  %v9426_v8 = vpop.f32.mrf.mxu0  ;;  %9468 = vmatprep.subr.bf16.mxu0 %v9932_v38 }
 0x38f   :  { %v12755_v50 = vadd.f32 %v9385_v7, %v12701_v0  ;;  %v5947_v25 = vor.u32 %v5945_v60, %v5944_v43  ;;  %v5948_v6 = vrot.slane %v5944_v43, 4  ;;  %v5720_v30 = vadd.f32 %v9425_v48, %v12713_v11  ;;  %v5816_v55 = vpop.f32.mrf.mxu1  ;;  %v6181_v60 = vld [vmem:[#allocation3] sm:$0xf]  ;;  %9469 = vmatpush3.bf16.msra.mxu0 %v9933_v32 }
 0x390   :  { %v6086_v46 = vsel %vm11544_vm2, %v5931_v9, %v6085_v52  ;;  %v6089_v53 = vsel %vm10291_vm11, %v5932_v33, %v6088_v28  ;;  %v5936_v10 = vrot.slane %v5934_v40, 7  ;;  %v6097_v9 = vld [vmem:[#allocation3 + $0x18] sm:$0xf]  ;;  %v6100_v33 = vld [vmem:[#allocation3 + $0x1c] sm:$0x1]  ;;  %v5864_v40 = vmax.f32 %v5814_v44, 0.0  ;;  %v9427_v28 = vpop.f32.mrf.mxu0 }
 0x391   :  { %6090 = vst [vmem:[#allocation3 + $0xc] sm:$0x1] %v6089_v53  ;;  %6087 = vst [vmem:[#allocation3 + $0x8] sm:$0xf] %v6086_v46  ;;  %v6098_v7 = vsel %vm11544_vm2, %v5947_v25, %v6097_v9  ;;  %v6101_v11 = vsel %vm10291_vm11, %v5948_v6, %v6100_v33  ;;  %v5817_v52 = vadd.f32 %v5816_v55, %v5720_v30  ;;  %v5952_v58 = vrot.slane %v5950_v18, 7  ;;  %v12788_v14 = vpop.f32.mrf.mxu1 }
 0x392   :  { %v5939_v35 = vor.u32 %v5937_v12, %v5936_v10  ;;  %v5940_v62 = vrot.slane %v5936_v10, 4  ;;  %6099 = vst [vmem:[#allocation3 + $0x18] sm:$0xf] %v6098_v7  ;;  %6102 = vst [vmem:[#allocation3 + $0x1c] sm:$0x1] %v6101_v11  ;;  %v5953_v56 = vshll.u32 %v9234_v4, 16  ;;  %v9235_v63 = vpack.c.bf16 %v5864_v40, %v5864_v40  ;;  %v9429_v49 = vpop.f32.mrf.mxu0 }
 0x393   :  { %v9428_v46 = vadd.f32 %v9427_v28, %v9426_v8  ;;  %v6106_v10 = vld [vmem:[#allocation3 + $0x24] sm:$0x1]  ;;  %v5865_v54 = vmax.f32 %v5817_v52, 0.0  ;;  %v12779_v61 = vrot.slane %v7438_v22, 4  ;;  %6197 = vst.msk [vmem:[#allocation4] sm:$0xf] %vm3051_vm5, %v6181_v60  ;;  %v12807_v52 = vadd.f32 %v12763_v21, %v12701_v0 }
 0x394   :  { %v6092_v20 = vsel %vm11544_vm2, %v5939_v35, %v6091_v2  ;;  %v6095_v47 = vsel %vm10291_vm11, %v5940_v62, %v6094_v16  ;;  %v5955_v35 = vor.u32 %v5953_v56, %v5952_v58  ;;  %v5956_v62 = vrot.slane %v5952_v58, 4  ;;  %v9430_v34 = vpop.f32.mrf.mxu0  ;;  %v6112_v40 = vld [vmem:[#allocation3 + $0x2c] sm:$0x1]  ;;  %v6189_v11 = vld [vmem:[#allocation3 + $0x50] sm:$0xf]  ;;  %v5829_v58 = vpop.f32.mrf.mxu1 }
 0x395   :  { %6096 = vst [vmem:[#allocation3 + $0x14] sm:$0x1] %v6095_v47  ;;  %6093 = vst [vmem:[#allocation3 + $0x10] sm:$0xf] %v6092_v20  ;;  %v5958_v2 = vshrl.u32 %v9235_v63, 16  ;;  %v5961_v16 = vshll.u32 %v9235_v63, 16  ;;  %v9236_v31 = vpack.c.bf16 %v5865_v54, %v5865_v54  ;;  %v5725_v19 = vadd.f32 %v9428_v46, %v12716_v17 }
 0x396   :  { %v6104_v48 = vsel %vm11544_vm2, %v5955_v35, %v6103_v45  ;;  %v6107_v4 = vsel %vm10291_vm11, %v5956_v62, %v6106_v10  ;;  %v9431_v25 = vadd.f32 %v9430_v34, %v9429_v49  ;;  %v6109_v17 = vld [vmem:[#allocation3 + $0x28] sm:$0xf]  ;;  %v9432_v22 = vpop.f32.mrf.mxu0  ;;  %v7444_v45 = vsel %vm10330_vm12, %v12779_v61, %v12773_v3  ;;  %6205 = vst.msk [vmem:[#allocation4 + $0xa0] sm:$0xf] %vm3051_vm5, %v6189_v11  ;;  %v6115_v35 = vld [vmem:[#allocation3 + $0x30] sm:$0xf] }
 0x397   :  { %v5960_v44 = vrot.slane %v5958_v2, 7  ;;  %6105 = vst [vmem:[#allocation3 + $0x20] sm:$0xf] %v6104_v48  ;;  %6108 = vst [vmem:[#allocation3 + $0x24] sm:$0x1] %v6107_v4  ;;  %v5966_v6 = vshrl.u32 %v9236_v31, 16  ;;  %v5822_v8 = vadd.f32 %v12727_v42, %v5725_v19 }
 0x398   :  { %v12769_v12 = vld [vmem:[#allocation3 + $0x8] sm:$0xe]  ;;  %v12771_v26 = vld [vmem:[#allocation3 + $0xc] sm:$0x1]  ;;  %v5969_v30 = vshll.u32 %v9236_v31, 16  ;;  %v5728_v55 = vadd.f32 %v9431_v25, %v12719_v5  ;;  %v9433_v63 = vpop.f32.mrf.mxu0  ;;  %v9934_v48 = vld [vmem:[%s13752_s3 + $0x70] sm:$0xff]  }
 0x399   :  { %v12775_v53 = vld [vmem:[#allocation3 + $0x8] sm:$0xf]  ;;  %v9098_v13 = vrot.slane %v12769_v12, 9  ;;  %v7143_v57 = vrot.slane %v12771_v26, 5  ;;  %v5963_v33 = vor.u32 %v5961_v16, %v5960_v44  ;;  %v5964_v18 = vrot.slane %v5960_v44, 4  ;;  %v9935_v4 = vld [vmem:[%s13752_s3 + $0x30] sm:$0xff]   ;;  %9470 = vmatprep.subr.bf16.mxu0 %v9934_v48  ;;  %v6470_v12 = vpop.permute.xlu0 %6469 }
 0x39a   :  { %v6260_v51 = vshrl.u32 %v12775_v53, 16  ;;  %v6263_v47 = vshll.u32 %v12775_v53, 16  ;;  %v5968_v28 = vrot.slane %v5966_v6, 7  ;;  %v5866_v56 = vmax.f32 %v5822_v8, 0.0  ;;  %v6695_v42 = vld [vmem:[#allocation3 + $0x18] sm:$0xf]  ;;  %v9435_v60 = vpop.f32.mrf.mxu0  ;;  %9471 = vmatpush3.bf16.msra.mxu0 %v9935_v4 }
 0x39b   :  { %v7081_v46 = vld [vmem:[#allocation3 + $0x18] sm:$0xe]  ;;  %v6110_v5 = vsel %vm11544_vm2, %v5963_v33, %v6109_v17  ;;  %v6113_v0 = vsel %vm10291_vm11, %v5964_v18, %v6112_v40  ;;  %v5825_v21 = vadd.f32 %v12745_v59, %v5728_v55  ;;  %v9434_v10 = vadd.f32 %v9433_v63, %v9432_v22  ;;  %6729 = vrot.lane.b32.xlu0 %v6695_v42, %s10049_s1  ;;  %v7082_v54 = vld [vmem:[#allocation3 + $0x1c] sm:$0x1]  ;;  %v6118_v62 = vld [vmem:[#allocation3 + $0x34] sm:$0x1]  ;;  %v12834_v17 = vpop.f32.mrf.mxu1 }
 0x39c   :  { %v12791_v43 = vld [vmem:[#allocation3 + $0x10] sm:$0xe]  ;;  %v12793_v20 = vld [vmem:[#allocation3 + $0x14] sm:$0x1]  ;;  %v12820_v49 = vld [vmem:[#allocation3 + $0x18] sm:$0xf]  ;;  %v5971_v38 = vor.u32 %v5969_v30, %v5968_v28  ;;  %v9237_v2 = vpack.c.bf16 %v5866_v56, %v5866_v56  ;;  %v9436_v30 = vpop.f32.mrf.mxu0 }
 0x39d   :  { %v9099_v9 = vrot.slane %v12791_v43, 9  ;;  %v7147_v7 = vrot.slane %v12793_v20, 5  ;;  %6111 = vst [vmem:[#allocation3 + $0x28] sm:$0xf] %v6110_v5  ;;  %6114 = vst [vmem:[#allocation3 + $0x2c] sm:$0x1] %v6113_v0  ;;  %v5733_v19 = vadd.f32 %v9434_v10, %v12722_v23  ;;  %v9437_v18 = vadd.f32 %v9436_v30, %v9435_v60 }
 0x39e   :  { %v5972_v32 = vrot.slane %v5968_v28, 4  ;;  %v9100_v16 = vrot.slane %v7081_v46, 9  ;;  %v5867_v31 = vmax.f32 %v5825_v21, 0.0  ;;  %v7151_v34 = vrot.slane %v7082_v54, 5  ;;  %v6693_v8 = vld [vmem:[#allocation3 + $0x8] sm:$0xf]  ;;  %v9438_v63 = vpop.f32.mrf.mxu0 }
 0x39f   :  { %v6288_v59 = vshrl.u32 %v12820_v49, 16  ;;  %v6116_v44 = vsel %vm11544_vm2, %v5971_v38, %v6115_v35  ;;  %v5974_v23 = vshrl.u32 %v9237_v2, 16  ;;  %v5977_v6 = vshll.u32 %v9237_v2, 16  ;;  %v6696_v40 = vld [vmem:[#allocation3 + $0x20] sm:$0xf]  ;;  %6725 = vrot.lane.b32.xlu0 %v6693_v8, %s10049_s1 }
 0x3a0   :  { %v6119_v25 = vsel %vm10291_vm11, %v5972_v32, %v6118_v62  ;;  %6117 = vst [vmem:[#allocation3 + $0x30] sm:$0xf] %v6116_v44  ;;  %v9238_v22 = vpack.c.bf16 %v5867_v31, %v5867_v31  ;;  %v5830_v33 = vadd.f32 %v5829_v58, %v5733_v19  ;;  %v7083_v55 = vld [vmem:[#allocation3 + $0x20] sm:$0xe]  ;;  %v7084_v11 = vld [vmem:[#allocation3 + $0x24] sm:$0x1]  ;;  %v7144_v28 = vsel %vm10575_vm1, %v9098_v13, %v7143_v57  ;;  %v5832_v32 = vpop.f32.mrf.mxu1  ;;  %v9439_v62 = vpop.f32.mrf.mxu0 }
 0x3a1   :  { %6120 = vst [vmem:[#allocation3 + $0x34] sm:$0x1] %v6119_v25  ;;  %v5976_v56 = vrot.slane %v5974_v23, 7  ;;  %6731 = vrot.lane.b32.xlu1 %v6696_v40, %s10049_s1  ;;  %v7152_v58 = vsel %vm10575_vm1, %v9100_v16, %v7151_v34  ;;  %v9101_v42 = vrot.slane %v7083_v55, 9  ;;  %v7155_v46 = vrot.slane %v7084_v11, 5  ;;  %v9936_v13 = vld [vmem:[%s13752_s3 + $0x68] sm:$0xff]  }
 0x3a2   :  { %v5982_v5 = vshrl.u32 %v9238_v22, 16  ;;  %v5868_v0 = vmax.f32 %v5830_v33, 0.0  ;;  %v5736_v21 = vadd.f32 %v9437_v18, %v12725_v41  ;;  %v6220_v26 = vld [vmem:[#allocation3 + $0x1c] sm:$0x1]  ;;  %v6290_v10 = vrot.slane %v6288_v59, 4  ;;  %9472 = vmatprep.subr.bf16.mxu0 %v9936_v13  ;;  %v9937_v59 = vld [vmem:[%s13752_s3 + $0x28] sm:$0xff]   ;;  %v9441_v4 = vpop.f32.mrf.mxu0  ;;  %v6486_v33 = vpop.permute.xlu0 %6485 }
 0x3a3   :  { %v5979_v57 = vor.u32 %v5977_v6, %v5976_v56  ;;  %v5980_v54 = vrot.slane %v5976_v56, 4  ;;  %v6121_v38 = vld [vmem:[#allocation3 + $0x38] sm:$0xf]  ;;  %v5985_v35 = vshll.u32 %v9238_v22, 16  ;;  %v6291_v2 = vshll.u32 %v12820_v49, 16  ;;  %7209 = vrot.lane.b32.xlu0 %v7152_v58, %s10049_s1  ;;  %9473 = vmatpush3.bf16.msra.mxu0 %v9937_v59  ;;  %v12863_v18 = vpop.f32.mrf.mxu1 }
 0x3a4   :  { %6517 = vst.msk [vmem:[#allocation4] sm:$0xf] %vm3739_vm3, %v6470_v12  ;;  %v6124_v60 = vld [vmem:[#allocation3 + $0x3c] sm:$0x1]  ;;  %v5984_v41 = vrot.slane %v5982_v5, 7  ;;  %v9239_v16 = vpack.c.bf16 %v5868_v0, %v5868_v0  ;;  %v5833_v31 = vadd.f32 %v5832_v32, %v5736_v21  ;;  %v9440_v19 = vadd.f32 %v9439_v62, %v9438_v63  ;;  %v9442_v63 = vpop.f32.mrf.mxu0 }
 0x3a5   :  { %v6694_v34 = vld [vmem:[#allocation3 + $0x10] sm:$0xf]  ;;  %v6122_v48 = vsel %vm11544_vm2, %v5979_v57, %v6121_v38  ;;  %v6125_v49 = vsel %vm10291_vm11, %v5980_v54, %v6124_v60  ;;  %v6293_v44 = vrot.slane %v6291_v2, 5  ;;  %v6297_v25 = vshll.u32 %v6220_v26, 16  ;;  %v6127_v30 = vld [vmem:[#allocation3 + $0x40] sm:$0xf]  ;;  %v5845_v60 = vpop.f32.mrf.mxu1 }
 0x3a6   :  { %6727 = vrot.lane.b32.xlu1 %v6694_v34, %s10049_s1  ;;  %6123 = vst [vmem:[#allocation3 + $0x38] sm:$0xf] %v6122_v48  ;;  %6126 = vst [vmem:[#allocation3 + $0x3c] sm:$0x1] %v6125_v49  ;;  %v5987_v23 = vor.u32 %v5985_v35, %v5984_v41  ;;  %v5988_v6 = vrot.slane %v5984_v41, 4  ;;  %v5990_v8 = vshrl.u32 %v9239_v16, 16  ;;  %v7156_v22 = vsel %vm10575_vm1, %v9101_v42, %v7155_v46  ;;  %v9444_v12 = vpop.f32.mrf.mxu0 }
 0x3a7   :  { %v6130_v40 = vld [vmem:[#allocation3 + $0x44] sm:$0x1]  ;;  %v5993_v55 = vshll.u32 %v9239_v16, 16  ;;  %v5869_v11 = vmax.f32 %v5833_v31, 0.0  ;;  %v5741_v56 = vadd.f32 %v9440_v19, %v12730_v24  ;;  %v6294_v58 = vor.u32 %v6293_v44, %v6290_v10  ;;  %v12866_v5 = vld [vmem:[#allocation3 + $0x18] sm:$0xf]  ;;  %7205 = vrot.lane.b32.xlu0 %v7144_v28, %s10049_s1 }
 0x3a8   :  { %6525 = vst.msk [vmem:[#allocation4 + $0xa0] sm:$0xf] %vm3739_vm3, %v6486_v33  ;;  %v6128_v0 = vsel %vm11544_vm2, %v5987_v23, %v6127_v30  ;;  %v6131_v42 = vsel %vm10291_vm11, %v5988_v6, %v6130_v40  ;;  %v5992_v46 = vrot.slane %v5990_v8, 7  ;;  %v9443_v21 = vadd.f32 %v9442_v63, %v9441_v4  ;;  %v9938_v24 = vld [vmem:[%s13752_s3 + $0x60] sm:$0xff]   ;;  %v6133_v32 = vld [vmem:[#allocation3 + $0x58] sm:$0xf]  ;;  %v9445_v16 = vpop.f32.mrf.mxu0 }
 0x3a9   :  { %6132 = vst [vmem:[#allocation3 + $0x44] sm:$0x1] %v6131_v42  ;;  %6129 = vst [vmem:[#allocation3 + $0x40] sm:$0xf] %v6128_v0  ;;  %v9240_v26 = vpack.c.bf16 %v5869_v11, %v5869_v11  ;;  %v5838_v10 = vadd.f32 %v12788_v14, %v5741_v56  ;;  %v6295_v13 = vrot.slane %v6294_v58, 4  ;;  %v6299_v57 = vrot.slane %v6297_v25, 5  ;;  %9474 = vmatprep.subr.bf16.mxu0 %v9938_v24 }
 0x3aa   :  { %7211 = vrot.lane.b32.xlu1 %v7156_v22, %s10049_s1  ;;  %v9939_v54 = vld [vmem:[%s13752_s3 + $0x20] sm:$0xff]   ;;  %v5995_v38 = vor.u32 %v5993_v55, %v5992_v46  ;;  %v5996_v28 = vrot.slane %v5992_v46, 4  ;;  %v6136_v35 = vld [vmem:[#allocation3 + $0x5c] sm:$0x1]  ;;  %v5744_v62 = vadd.f32 %v9443_v21, %v12733_v29  ;;  %v7348_v2 = vshrl.u32 %v12866_v5, 16  ;;  %v12907_v22 = vpop.f32.mrf.mxu1 }
 0x3ab   :  { %v5998_v14 = vshrl.u32 %v9240_v26, 16  ;;  %v5870_v41 = vmax.f32 %v5838_v10, 0.0  ;;  %v6300_v31 = vsel %vm10330_vm12, %v6295_v13, %v6299_v57  ;;  %v7148_v19 = vsel %vm10575_vm1, %v9099_v9, %v7147_v7  ;;  %v7304_v34 = vld [vmem:[#allocation3 + $0x1c] sm:$0x1]  ;;  %9475 = vmatpush3.bf16.msra.mxu0 %v9939_v54  ;;  %v9447_v7 = vpop.f32.mrf.mxu0  ;;  %v6139_v55 = vld [vmem:[#allocation3 + $0x60] sm:$0xf] }
 0x3ac   :  { %v9940_v29 = vld [vmem:[%s13752_s3 + $0x58] sm:$0xff]   ;;  %v6134_v59 = vsel %vm11544_vm2, %v5995_v38, %v6133_v32  ;;  %v6137_v48 = vsel %vm10291_vm11, %v5996_v28, %v6136_v35  ;;  %v5841_v49 = vadd.f32 %v12834_v17, %v5744_v62  ;;  %v9446_v20 = vadd.f32 %v9445_v16, %v9444_v12  ;;  %v6697_v57 = vld [vmem:[#allocation3 + $0x28] sm:$0xf]  ;;  %v6536_v3 = vld [vmem:[#allocation3 + $0xc] sm:$0x1] }
 0x3ad   :  { %6138 = vst [vmem:[#allocation3 + $0x5c] sm:$0x1] %v6137_v48  ;;  %6135 = vst [vmem:[#allocation3 + $0x58] sm:$0xf] %v6134_v59  ;;  %v6000_v43 = vrot.slane %v5998_v14, 7  ;;  %v6001_v4 = vshll.u32 %v9240_v26, 16  ;;  %v9241_v9 = vpack.c.bf16 %v5870_v41, %v5870_v41  ;;  %9476 = vmatprep.subr.bf16.mxu0 %v9940_v29  ;;  %v9448_v63 = vpop.f32.mrf.mxu0 }
 0x3ae   :  { %6475 = vrot.lane.b32.xlu1 %v6300_v31, %s10049_s1  ;;  %v6699_v44 = vld [vmem:[#allocation3 + $0x38] sm:$0xf]  ;;  %v7351_v25 = vshll.u32 %v12866_v5, 16  ;;  %v5871_v6 = vmax.f32 %v5841_v49, 0.0  ;;  %v5749_v17 = vadd.f32 %v9446_v20, %v12752_v36  ;;  %v7350_v30 = vrot.slane %v7348_v2, 4  ;;  %v9944_v2 = vld [vmem:[%s13752_s3 + $0x50] sm:$0xff]  }
 0x3af   :  { %v9941_v23 = vld [vmem:[%s13752_s3 + $0x18] sm:$0xff]   ;;  %6737 = vrot.lane.b32.xlu0 %v6699_v44, %s10049_s1  ;;  %v7357_v8 = vshll.u32 %v7304_v34, 16  ;;  %v6003_v33 = vor.u32 %v6001_v4, %v6000_v43  ;;  %v6004_v40 = vrot.slane %v6000_v43, 4  ;;  %v6006_v11 = vshrl.u32 %v9241_v9, 16  ;;  %v6142_v5 = vld [vmem:[#allocation3 + $0x64] sm:$0x1] }
 0x3b0   :  { %v6009_v56 = vshll.u32 %v9241_v9, 16  ;;  %9477 = vmatpush3.bf16.msra.mxu0 %v9941_v23  ;;  %v9942_v58 = vld [vmem:[%s13752_s3 + $0xf8] sm:$0xff]   ;;  %v9242_v0 = vpack.c.bf16 %v5871_v6, %v5871_v6  ;;  %v5846_v36 = vadd.f32 %v5845_v60, %v5749_v17  ;;  %v9449_v42 = vadd.f32 %v9448_v63, %v9447_v7  ;;  %v5848_v60 = vpop.f32.mrf.mxu1  ;;  %v6145_v34 = vld [vmem:[#allocation3 + $0x68] sm:$0xf]  ;;  %v6148_v29 = vld [vmem:[#allocation3 + $0x6c] sm:$0x1] }
 0x3b1   :  { %v7353_v46 = vrot.slane %v7351_v25, 5  ;;  %v7089_v21 = vld [vmem:[#allocation3 + $0x38] sm:$0xe]  ;;  %v6140_v26 = vsel %vm11544_vm2, %v6003_v33, %v6139_v55  ;;  %v6143_v10 = vsel %vm10291_vm11, %v6004_v40, %v6142_v5  ;;  %v6008_v12 = vrot.slane %v6006_v11, 7  ;;  %9532 = vmatprep.subr.bf16.mxu1 %v9942_v58  ;;  %v7090_v62 = vld [vmem:[#allocation3 + $0x3c] sm:$0x1]  ;;  %9478 = vmatprep.subr.bf16.mxu0 %v9944_v2 }
 0x3b2   :  { %v9943_v24 = vld [vmem:[%s13752_s3 + $0xb8] sm:$0xff]   ;;  %v9450_v13 = vpop.f32.mrf.mxu0  ;;  %7207 = vrot.lane.b32.xlu1 %v7148_v19, %s10049_s1  ;;  %v7359_v54 = vrot.slane %v7357_v8, 5  ;;  %6144 = vst [vmem:[#allocation3 + $0x64] sm:$0x1] %v6143_v10  ;;  %6141 = vst [vmem:[#allocation3 + $0x60] sm:$0xf] %v6140_v26  ;;  %v5752_v35 = vadd.f32 %v9449_v42, %v12755_v50 }
 0x3b3   :  { %v6014_v38 = vshrl.u32 %v9242_v0, 16  ;;  %v6017_v28 = vshll.u32 %v9242_v0, 16  ;;  %v5872_v32 = vmax.f32 %v5846_v36, 0.0  ;;  %6733 = vrot.lane.b32.xlu0 %v6697_v57, %s10049_s1  ;;  %9533 = vmatpush3.bf16.msra.mxu1 %v9943_v24  ;;  %v6011_v14 = vor.u32 %v6009_v56, %v6008_v12  ;;  %v9945_v20 = vld [vmem:[%s13752_s3 + $0xf0] sm:$0xff]   ;;  %v6216_v63 = vld [vmem:[#allocation3 + $0xc] sm:$0x1] }
 0x3b4   :  { %v6012_v41 = vrot.slane %v6008_v12, 4  ;;  %v9451_v16 = vpop.f32.mrf.mxu0  ;;  %v7354_v31 = vor.u32 %v7353_v46, %v7350_v30  ;;  %v9104_v19 = vrot.slane %v7089_v21, 9  ;;  %v5849_v49 = vadd.f32 %v5848_v60, %v5752_v35  ;;  %v6151_v6 = vld [vmem:[#allocation3 + $0x70] sm:$0xf]  ;;  %9534 = vmatprep.subr.bf16.mxu1 %v9945_v20  ;;  %v6154_v8 = vld [vmem:[#allocation3 + $0x74] sm:$0x1] }
 0x3b5   :  { %v6016_v59 = vrot.slane %v6014_v38, 7  ;;  %v9243_v48 = vpack.c.bf16 %v5872_v32, %v5872_v32  ;;  %v9452_v50 = vadd.f32 %v9451_v16, %v9450_v13  ;;  %v6146_v43 = vsel %vm11544_vm2, %v6011_v14, %v6145_v34  ;;  %v6157_v36 = vld [vmem:[#allocation3 + $0x78] sm:$0xf]  ;;  %v6160_v42 = vld [vmem:[#allocation3 + $0x7c] sm:$0x1]  ;;  %v9947_v60 = vld [vmem:[%s13752_s3 + $0xb0] sm:$0xff]  }
 0x3b6   :  { %v6149_v4 = vsel %vm10291_vm11, %v6012_v41, %v6148_v29  ;;  %v9453_v9 = vpop.f32.mrf.mxu0  ;;  %v7355_v7 = vrot.slane %v7354_v31, 4  ;;  %v7167_v44 = vrot.slane %v7090_v62, 5  ;;  %6147 = vst [vmem:[#allocation3 + $0x68] sm:$0xf] %v6146_v43  ;;  %v5873_v33 = vmax.f32 %v5849_v49, 0.0 }
 0x3b7   :  { %6150 = vst [vmem:[#allocation3 + $0x6c] sm:$0x1] %v6149_v4  ;;  %v6019_v25 = vor.u32 %v6017_v28, %v6016_v59  ;;  %v6020_v23 = vrot.slane %v6016_v59, 4  ;;  %v6022_v17 = vshrl.u32 %v9243_v48, 16  ;;  %v6025_v30 = vshll.u32 %v9243_v48, 16  ;;  %9535 = vmatpush3.bf16.msra.mxu1 %v9947_v60  ;;  %v9949_v4 = vld [vmem:[%s13752_s3 + $0xe8] sm:$0xff]  }
 0x3b8   :  { %v5757_v40 = vadd.f32 %v9452_v50, %v12759_v27  ;;  %v7360_v55 = vsel %vm10330_vm12, %v7355_v7, %v7359_v54  ;;  %v7168_v11 = vsel %vm10575_vm1, %v9104_v19, %v7167_v44  ;;  %v9454_v56 = vpop.f32.mrf.mxu0  ;;  %v9244_v46 = vpack.c.bf16 %v5873_v33, %v5873_v33  ;;  %v6221_v54 = vld [vmem:[#allocation3 + $0x20] sm:$0xf]  ;;  %v6222_v38 = vld [vmem:[#allocation3 + $0x24] sm:$0x1]  ;;  %v9948_v19 = vld [vmem:[%s13752_s3 + $0x48] sm:$0xff]   ;;  %9536 = vmatprep.subr.bf16.mxu1 %v9949_v4 }
 0x3b9   :  { %v6152_v58 = vsel %vm11544_vm2, %v6019_v25, %v6151_v6  ;;  %v6155_v5 = vsel %vm10291_vm11, %v6020_v23, %v6154_v8  ;;  %v6024_v0 = vrot.slane %v6022_v17, 7  ;;  %7559 = vrot.lane.b32.xlu1 %v7360_v55, %s10049_s1  ;;  %7217 = vrot.lane.b32.xlu0 %v7168_v11, %s10049_s1  ;;  %v9455_v27 = vadd.f32 %v9454_v56, %v9453_v9  ;;  %v12949_v2 = vld [vmem:[#allocation3 + $0x20] sm:$0xf]  ;;  %v6166_v9 = vld [vmem:[#allocation3 + $0x84] sm:$0x1] }
 0x3ba   :  { %6156 = vst [vmem:[#allocation3 + $0x74] sm:$0x1] %v6155_v5  ;;  %6153 = vst [vmem:[#allocation3 + $0x70] sm:$0xf] %v6152_v58  ;;  %v5854_v21 = vadd.f32 %v12863_v18, %v5757_v40  ;;  %v6262_v24 = vrot.slane %v6260_v51, 4  ;;  %v6265_v26 = vrot.slane %v6263_v47, 5 }
 0x3bb   :  { %v6027_v10 = vor.u32 %v6025_v30, %v6024_v0  ;;  %v6028_v12 = vrot.slane %v6024_v0, 4  ;;  %v5760_v13 = vadd.f32 %v9455_v27, %v12807_v52  ;;  %v6269_v57 = vshll.u32 %v6216_v63, 16  ;;  %v9946_v51 = vld [vmem:[%s13752_s3 + $0x10] sm:$0xff]   ;;  %v6163_v50 = vld [vmem:[#allocation3 + $0x80] sm:$0xf] }
 0x3bc   :  { %v6030_v28 = vshrl.u32 %v9244_v46, 16  ;;  %v6033_v32 = vshll.u32 %v9244_v46, 16  ;;  %v5874_v35 = vmax.f32 %v5854_v21, 0.0  ;;  %v6266_v62 = vor.u32 %v6265_v26, %v6262_v24  ;;  %9479 = vmatpush3.bf16.msra.mxu0 %v9946_v51  ;;  %v7306_v6 = vld [vmem:[#allocation3 + $0x24] sm:$0x1] }
 0x3bd   :  { %v6158_v53 = vsel %vm11544_vm2, %v6027_v10, %v6157_v36  ;;  %v6161_v47 = vsel %vm10291_vm11, %v6028_v12, %v6160_v42  ;;  %v5857_v52 = vadd.f32 %v12907_v22, %v5760_v13  ;;  %v6271_v18 = vrot.slane %v6269_v57, 5  ;;  %9480 = vmatprep.subr.bf16.mxu0 %v9948_v19  ;;  %v7085_v40 = vld [vmem:[#allocation3 + $0x28] sm:$0xe]  ;;  %v7086_v55 = vld [vmem:[#allocation3 + $0x2c] sm:$0x1] }
 0x3be   :  { %6162 = vst [vmem:[#allocation3 + $0x7c] sm:$0x1] %v6161_v47  ;;  %6159 = vst [vmem:[#allocation3 + $0x78] sm:$0xf] %v6158_v53  ;;  %v6032_v14 = vrot.slane %v6030_v28, 7  ;;  %v9245_v41 = vpack.c.bf16 %v5874_v35, %v5874_v35  ;;  %v6267_v16 = vrot.slane %v6266_v62, 4 }
 0x3bf   :  { %v6302_v31 = vshrl.u32 %v6221_v54, 16  ;;  %v5875_v34 = vmax.f32 %v5857_v52, 0.0  ;;  %v6305_v29 = vshll.u32 %v6221_v54, 16  ;;  %v6311_v59 = vshll.u32 %v6222_v38, 16  ;;  %v6169_v11 = vld [vmem:[#allocation3 + $0x88] sm:$0xf] }
 0x3c0   :  { %v7362_v22 = vshrl.u32 %v12949_v2, 16  ;;  %v6035_v48 = vor.u32 %v6033_v32, %v6032_v14  ;;  %v6036_v49 = vrot.slane %v6032_v14, 4  ;;  %v6038_v20 = vshrl.u32 %v9245_v41, 16  ;;  %v6172_v56 = vld [vmem:[#allocation3 + $0x8c] sm:$0x1] }
 0x3c1   :  { %v6041_v43 = vshll.u32 %v9245_v41, 16  ;;  %v9246_v7 = vpack.c.bf16 %v5875_v34, %v5875_v34  ;;  %v6272_v44 = vsel %vm10330_vm12, %v6267_v16, %v6271_v18  ;;  %v6304_v25 = vrot.slane %v6302_v31, 4  ;;  %v6700_v0 = vld [vmem:[#allocation3 + $0x40] sm:$0xf]  ;;  %v6217_v36 = vld [vmem:[#allocation3 + $0x10] sm:$0xf] }
 0x3c2   :  { %v6307_v23 = vrot.slane %v6305_v29, 5  ;;  %v6164_v17 = vsel %vm11544_vm2, %v6035_v48, %v6163_v50  ;;  %v6167_v30 = vsel %vm10291_vm11, %v6036_v49, %v6166_v9  ;;  %v6040_v8 = vrot.slane %v6038_v20, 7  ;;  %6471 = vrot.lane.b32.xlu1 %v6272_v44, %s10049_s1  ;;  %v9950_v42 = vld [vmem:[%s13752_s3 + $0x8] sm:$0xff]   ;;  %v7091_v10 = vld [vmem:[#allocation3 + $0x40] sm:$0xe] }
 0x3c3   :  { %v6313_v33 = vrot.slane %v6311_v59, 5  ;;  %6168 = vst [vmem:[#allocation3 + $0x84] sm:$0x1] %v6167_v30  ;;  %6165 = vst [vmem:[#allocation3 + $0x80] sm:$0xf] %v6164_v17  ;;  %v6046_v63 = vshrl.u32 %v9246_v7, 16  ;;  %9481 = vmatpush3.bf16.msra.mxu0 %v9950_v42 }
 0x3c4   :  { %v6049_v58 = vshll.u32 %v9246_v7, 16  ;;  %v6308_v5 = vor.u32 %v6307_v23, %v6304_v25  ;;  %v7364_v27 = vrot.slane %v7362_v22, 4  ;;  %v6043_v46 = vor.u32 %v6041_v43, %v6040_v8  ;;  %v9951_v12 = vld [vmem:[%s13752_s3 + $0xa8] sm:$0xff]   ;;  %v7092_v28 = vld [vmem:[#allocation3 + $0x44] sm:$0x1] }
 0x3c5   :  { %v6044_v21 = vrot.slane %v6040_v8, 4  ;;  %v7365_v24 = vshll.u32 %v12949_v2, 16  ;;  %v7371_v26 = vshll.u32 %v7306_v6, 16  ;;  %v6048_v13 = vrot.slane %v6046_v63, 7  ;;  %v6175_v62 = vld [vmem:[#allocation3 + $0x90] sm:$0xf]  ;;  %9537 = vmatpush3.bf16.msra.mxu1 %v9951_v12 }
 0x3c6   :  { %v6309_v57 = vrot.slane %v6308_v5, 4  ;;  %v9102_v54 = vrot.slane %v7085_v40, 9  ;;  %v7159_v38 = vrot.slane %v7086_v55, 5  ;;  %v6170_v32 = vsel %vm11544_vm2, %v6043_v46, %v6169_v11  ;;  %v6178_v2 = vld [vmem:[#allocation3 + $0x94] sm:$0x1]  ;;  %6739 = vrot.lane.b32.xlu1 %v6700_v0, %s10049_s1  ;;  %v9952_v31 = vld [vmem:[%s13752_s3 + $0x40] sm:$0xff]  }
 0x3c7   :  { %v6173_v35 = vsel %vm10291_vm11, %v6044_v21, %v6172_v56  ;;  %v7367_v51 = vrot.slane %v7365_v24, 5  ;;  %v7373_v53 = vrot.slane %v7371_v26, 5  ;;  %v6218_v47 = vld [vmem:[#allocation3 + $0x14] sm:$0x1]  ;;  %6171 = vst [vmem:[#allocation3 + $0x88] sm:$0xf] %v6170_v32  ;;  %v6051_v52 = vor.u32 %v6049_v58, %v6048_v13  ;;  %9482 = vmatprep.subr.bf16.mxu0 %v9952_v31 }
 0x3c8   :  { %6174 = vst [vmem:[#allocation3 + $0x8c] sm:$0x1] %v6173_v35  ;;  %v6052_v18 = vrot.slane %v6048_v13, 4  ;;  %v6314_v60 = vsel %vm10330_vm12, %v6309_v57, %v6313_v33  ;;  %v12992_v14 = vsel %vm10575_vm1, %v9102_v54, %v7159_v38  ;;  %v7301_v41 = vld [vmem:[#allocation3 + $0x10] sm:$0xf]  ;;  %v9105_v29 = vrot.slane %v7091_v10, 9  ;;  %9483 = vmatpush3.bf16.msra.mxu0 %v9954_v1 }
 0x3c9   :  { %v7302_v16 = vld [vmem:[#allocation3 + $0x14] sm:$0x1]  ;;  %6477 = vrot.lane.b32.xlu0 %v6314_v60, %s10049_s1  ;;  %v7368_v19 = vor.u32 %v7367_v51, %v7364_v27  ;;  %v6698_v34 = vld [vmem:[#allocation3 + $0x30] sm:$0xf]  ;;  %v7171_v59 = vrot.slane %v7092_v28, 5  ;;  %v6274_v22 = vshrl.u32 %v6217_v36, 16  ;;  %v6176_v49 = vsel %vm11544_vm2, %v6051_v52, %v6175_v62 }
 0x3ca   :  { %v9953_v48 = vld [vmem:[%s13752_s3 + $0xe0] sm:$0xff]   ;;  %v6179_v50 = vsel %vm10291_vm11, %v6052_v18, %v6178_v2  ;;  %v6277_v20 = vshll.u32 %v6217_v36, 16  ;;  %v6283_v43 = vshll.u32 %v6218_v47, 16  ;;  %v6227_v4 = vld [vmem:[#allocation3 + $0x38] sm:$0xf]  ;;  %6735 = vrot.lane.b32.xlu1 %v6698_v34, %s10049_s1  ;;  %v7334_v23 = vshrl.u32 %v7301_v41, 16 }
 0x3cb   :  { %v7087_v9 = vld [vmem:[#allocation3 + $0x30] sm:$0xe]  ;;  %6180 = vst [vmem:[#allocation3 + $0x94] sm:$0x1] %v6179_v50  ;;  %6177 = vst [vmem:[#allocation3 + $0x90] sm:$0xf] %v6176_v49  ;;  %v7172_v44 = vsel %vm10575_vm1, %v9105_v29, %v7171_v59  ;;  %9538 = vmatprep.subr.bf16.mxu1 %v9953_v48 }
 0x3cc   :  { %v7369_v7 = vrot.slane %v7368_v19, 4  ;;  %v6276_v25 = vrot.slane %v6274_v22, 4  ;;  %v6228_v39 = vld [vmem:[#allocation3 + $0x3c] sm:$0x1]  ;;  %v6279_v6 = vrot.slane %v6277_v20, 5  ;;  %v6285_v17 = vrot.slane %v6283_v43, 5 }
 0x3cd   :  { %v7337_v30 = vshll.u32 %v7301_v41, 16  ;;  %v7343_v8 = vshll.u32 %v7302_v16, 16  ;;  %v7088_v33 = vld [vmem:[#allocation3 + $0x34] sm:$0x1]  ;;  %v7336_v55 = vrot.slane %v7334_v23, 4  ;;  %v6344_v11 = vshrl.u32 %v6227_v4, 16 }
 0x3ce   :  { %v7374_v40 = vsel %vm10330_vm12, %v7369_v7, %v7373_v53  ;;  %v6347_v56 = vshll.u32 %v6227_v4, 16  ;;  %v7311_v63 = vld [vmem:[#allocation3 + $0x38] sm:$0xf]  ;;  %v9955_v58 = vld [vmem:[%s13752_s3 + $0xa0] sm:$0xff]   ;;  %v6280_v5 = vor.u32 %v6279_v6, %v6276_v25  ;;  %v6353_v36 = vshll.u32 %v6228_v39, 16  ;;  %7219 = vrot.lane.b32.xlu1 %v7172_v44, %s10049_s1  ;;  %v9961_v16 = vld [vmem:[%s13752_s3 + $0xd0] sm:$0xff]  }
 0x3cf   :  { %7561 = vrot.lane.b32.xlu0 %v7374_v40, %s10049_s1  ;;  %v7339_v0 = vrot.slane %v7337_v30, 5  ;;  %v13017_v27 = vrot.slane %v7343_v8, 5  ;;  %v7312_v42 = vld [vmem:[#allocation3 + $0x3c] sm:$0x1]  ;;  %v6346_v21 = vrot.slane %v6344_v11, 4  ;;  %v9103_v26 = vrot.slane %v7087_v9, 9  ;;  %9539 = vmatpush3.bf16.msra.mxu1 %v9955_v58 }
 0x3d0   :  { %v9959_v46 = vld [vmem:[%s13752_s3 + $0xd8] sm:$0xff]   ;;  %v6349_v24 = vrot.slane %v6347_v56, 5  ;;  %v7163_v10 = vrot.slane %v7088_v33, 5  ;;  %v6225_v12 = vld [vmem:[#allocation3 + $0x30] sm:$0xf]  ;;  %v6281_v13 = vrot.slane %v6280_v5, 4 }
 0x3d1   :  { %v7340_v57 = vor.u32 %v7339_v0, %v7336_v55  ;;  %v6355_v54 = vrot.slane %v6353_v36, 5  ;;  %v7404_v38 = vshrl.u32 %v7311_v63, 16  ;;  %9540 = vmatprep.subr.bf16.mxu1 %v9959_v46  ;;  %v9960_v28 = vld [vmem:[%s13752_s3 + $0x98] sm:$0xff]   ;;  %v7407_v62 = vshll.u32 %v7311_v63, 16  ;;  %v6226_v51 = vld [vmem:[#allocation3 + $0x34] sm:$0x1] }
 0x3d2   :  { %v6350_v32 = vor.u32 %v6349_v24, %v6346_v21  ;;  %v7164_v35 = vsel %vm10575_vm1, %v9103_v26, %v7163_v10  ;;  %v7413_v2 = vshll.u32 %v7312_v42, 16  ;;  %v6223_v53 = vld [vmem:[#allocation3 + $0x28] sm:$0xf]  ;;  %v6286_v47 = vsel %vm10330_vm12, %v6281_v13, %v6285_v17  ;;  %v6224_v41 = vld [vmem:[#allocation3 + $0x2c] sm:$0x1]  ;;  %v9962_v50 = vld [vmem:[%s13752_s3 + $0x90] sm:$0xff]  }
 0x3d3   :  { %7213 = vrot.lane.b32.xlu0 %v12992_v14, %s10049_s1  ;;  %v7341_v52 = vrot.slane %v7340_v57, 4  ;;  %v7406_v18 = vrot.slane %v7404_v38, 4  ;;  %v6330_v60 = vshrl.u32 %v6225_v12, 16  ;;  %v7409_v19 = vrot.slane %v7407_v62, 5  ;;  %v7309_v59 = vld [vmem:[#allocation3 + $0x30] sm:$0xf]  ;;  %9541 = vmatpush3.bf16.msra.mxu1 %v9960_v28 }
 0x3d4   :  { %v6351_v31 = vrot.slane %v6350_v32, 4  ;;  %v13035_v34 = vrot.slane %v7413_v2, 5  ;;  %v6333_v29 = vshll.u32 %v6225_v12, 16  ;;  %v6339_v48 = vshll.u32 %v6226_v51, 16  ;;  %9542 = vmatprep.subr.bf16.mxu1 %v9961_v16  ;;  %v7310_v7 = vld [vmem:[#allocation3 + $0x34] sm:$0x1] }
 0x3d5   :  { %v7346_v14 = vsel %vm10330_vm12, %v7341_v52, %v13017_v27  ;;  %v6332_v22 = vrot.slane %v6330_v60, 4  ;;  %v6316_v49 = vshrl.u32 %v6223_v53, 16  ;;  %v7410_v43 = vor.u32 %v7409_v19, %v7406_v18  ;;  %v7307_v44 = vld [vmem:[#allocation3 + $0x28] sm:$0xf]  ;;  %v7308_v33 = vld [vmem:[#allocation3 + $0x2c] sm:$0x1] }
 0x3d6   :  { %v6356_v20 = vsel %vm10330_vm12, %v6351_v31, %v6355_v54  ;;  %v6335_v4 = vrot.slane %v6333_v29, 5  ;;  %v6319_v9 = vshll.u32 %v6223_v53, 16  ;;  %v13047_v25 = vrot.slane %v6339_v48, 5  ;;  %v9963_v40 = vld [vmem:[%s13752_s3 + $0xc8] sm:$0xff]   ;;  %v6237_v58 = vld [vmem:[#allocation3 + $0x70] sm:$0xf] }
 0x3d7   :  { %6473 = vrot.lane.b32.xlu0 %v6286_v47, %s10049_s1  ;;  %6483 = vrot.lane.b32.xlu1 %v6356_v20, %s10049_s1  ;;  %v6318_v23 = vrot.slane %v6316_v49, 4  ;;  %v6325_v39 = vshll.u32 %v6224_v41, 16  ;;  %v7390_v1 = vshrl.u32 %v7309_v59, 16  ;;  %v7411_v6 = vrot.slane %v7410_v43, 4  ;;  %v6238_v42 = vld [vmem:[#allocation3 + $0x74] sm:$0x1] }
 0x3d8   :  { %v6336_v17 = vor.u32 %v6335_v4, %v6332_v22  ;;  %v6321_v30 = vrot.slane %v6319_v9, 5  ;;  %v7393_v8 = vshll.u32 %v7309_v59, 16  ;;  %9543 = vmatpush3.bf16.msra.mxu1 %v9962_v50  ;;  %v7399_v56 = vshll.u32 %v7310_v7, 16  ;;  %v6233_v10 = vld [vmem:[#allocation3 + $0x60] sm:$0xf]  ;;  %v9964_v41 = vld [vmem:[%s13752_s3 + $0x88] sm:$0xff]  }
 0x3d9   :  { %v13052_v55 = vrot.slane %v6325_v39, 5  ;;  %v7392_v11 = vrot.slane %v7390_v1, 4  ;;  %v7376_v63 = vshrl.u32 %v7307_v44, 16  ;;  %v7416_v5 = vsel %vm10330_vm12, %v7411_v6, %v13035_v34  ;;  %9544 = vmatprep.subr.bf16.mxu1 %v9963_v40  ;;  %v6234_v38 = vld [vmem:[#allocation3 + $0x64] sm:$0x1] }
 0x3da   :  { %v13057_v0 = vrot.slane %v6336_v17, 4  ;;  %v6322_v27 = vor.u32 %v6321_v30, %v6318_v23  ;;  %v7395_v36 = vrot.slane %v7393_v8, 5  ;;  %v13061_v46 = vrot.slane %v7399_v56, 5  ;;  %v6235_v2 = vld [vmem:[#allocation3 + $0x68] sm:$0xf]  ;;  %v9968_v59 = vld [vmem:[%s13752_s3 + $0xc0] sm:$0xff]  }
 0x3db   :  { %7557 = vrot.lane.b32.xlu0 %v7346_v14, %s10049_s1  ;;  %7215 = vrot.lane.b32.xlu1 %v7164_v35, %s10049_s1  ;;  %v7378_v21 = vrot.slane %v7376_v63, 4  ;;  %v7379_v24 = vshll.u32 %v7307_v44, 16  ;;  %v7385_v26 = vshll.u32 %v7308_v33, 16  ;;  %v6414_v54 = vshrl.u32 %v6237_v58, 16  ;;  %v7313_v51 = vld [vmem:[#allocation3 + $0x40] sm:$0xf] }
 0x3dc   :  { %v6342_v12 = vsel %vm10330_vm12, %v13057_v0, %v13047_v25  ;;  %v6323_v13 = vrot.slane %v6322_v27, 4  ;;  %v7396_v57 = vor.u32 %v7395_v36, %v7392_v11  ;;  %v6417_v62 = vshll.u32 %v6237_v58, 16  ;;  %v6703_v53 = vld [vmem:[#allocation3 + $0x68] sm:$0xf]  ;;  %v6236_v29 = vld [vmem:[#allocation3 + $0x6c] sm:$0x1]  ;;  %9545 = vmatpush3.bf16.msra.mxu1 %v9964_v41 }
 0x3dd   :  { %v7381_v28 = vrot.slane %v7379_v24, 5  ;;  %v13067_v32 = vrot.slane %v7385_v26, 5  ;;  %v6423_v35 = vshll.u32 %v6238_v42, 16  ;;  %v6416_v18 = vrot.slane %v6414_v54, 4  ;;  %v6701_v14 = vld [vmem:[#allocation3 + $0x58] sm:$0xf]  ;;  %9546 = vmatprep.subr.bf16.mxu1 %v9968_v59 }
 0x3de   :  { %v6328_v47 = vsel %vm10330_vm12, %v6323_v13, %v13052_v55  ;;  %v13072_v52 = vrot.slane %v7396_v57, 4  ;;  %v6386_v60 = vshrl.u32 %v6233_v10, 16  ;;  %v6419_v31 = vrot.slane %v6417_v62, 5  ;;  %v9969_v20 = vld [vmem:[%s13752_s3 + $0x80] sm:$0xff]   ;;  %v9973_v23 = vld [vmem:[%s13752_s3 + $0x118] sm:$0xff]  }
 0x3df   :  { %6745 = vrot.lane.b32.xlu0 %v6703_v53, %s10049_s1  ;;  %7567 = vrot.lane.b32.xlu1 %v7416_v5, %s10049_s1  ;;  %v7382_v16 = vor.u32 %v7381_v28, %v7378_v21  ;;  %v13079_v19 = vrot.slane %v6423_v35, 5  ;;  %v6389_v34 = vshll.u32 %v6233_v10, 16  ;;  %v6395_v49 = vshll.u32 %v6234_v38, 16  ;;  %v7314_v44 = vld [vmem:[#allocation3 + $0x44] sm:$0x1] }
 0x3e0   :  { %v7402_v22 = vsel %vm10330_vm12, %v13072_v52, %v13061_v46  ;;  %v6388_v48 = vrot.slane %v6386_v60, 4  ;;  %v6400_v50 = vshrl.u32 %v6235_v2, 16  ;;  %v6420_v4 = vor.u32 %v6419_v31, %v6416_v18  ;;  %v6231_v30 = vld [vmem:[#allocation3 + $0x58] sm:$0xf]  ;;  %v6232_v11 = vld [vmem:[#allocation3 + $0x5c] sm:$0x1]  ;;  %9547 = vmatpush3.bf16.msra.mxu1 %v9969_v20  ;;  %9794 = vmatprep.subr.bf16.mxu0 %v9973_v23 }
 0x3e1   :  { %v7383_v43 = vrot.slane %v7382_v16, 4  ;;  %v6391_v9 = vrot.slane %v6389_v34, 5  ;;  %v6403_v7 = vshll.u32 %v6235_v2, 16  ;;  %v13094_v39 = vrot.slane %v6395_v49, 5  ;;  %v7093_v56 = vld [vmem:[#allocation3 + $0x58] sm:$0xe] }
 0x3e2   :  { %v6402_v1 = vrot.slane %v6400_v50, 4  ;;  %v6409_v6 = vshll.u32 %v6236_v29, 16  ;;  %v7418_v17 = vshrl.u32 %v7313_v51, 16  ;;  %v13101_v33 = vrot.slane %v6420_v4, 4  ;;  %v6184_v36 = vld [vmem:[#allocation3 + $0x18] sm:$0xf] }
 0x3e3   :  { %6741 = vrot.lane.b32.xlu0 %v6701_v14, %s10049_s1  ;;  %6479 = vrot.lane.b32.xlu1 %v6328_v47, %s10049_s1  ;;  %v7388_v8 = vsel %vm10330_vm12, %v7383_v43, %v13067_v32  ;;  %v6392_v40 = vor.u32 %v6391_v9, %v6388_v48  ;;  %v6405_v55 = vrot.slane %v6403_v7, 5  ;;  %v7421_v5 = vshll.u32 %v7313_v51, 16  ;;  %v7094_v10 = vld [vmem:[#allocation3 + $0x5c] sm:$0x1]  ;;  %v6241_v13 = vld [vmem:[#allocation3 + $0x80] sm:$0xf] }
 0x3e4   :  { %v13103_v63 = vrot.slane %v6409_v6, 5  ;;  %v7420_v58 = vrot.slane %v7418_v17, 4  ;;  %v7427_v27 = vshll.u32 %v7314_v44, 16  ;;  %v6426_v42 = vsel %vm10330_vm12, %v13101_v33, %v13079_v19  ;;  %6200 = vst.msk [vmem:[#allocation4 + $0x3c] sm:$0xf] %vm3051_vm5, %v6184_v36 }
 0x3e5   :  { %v13109_v21 = vrot.slane %v6392_v40, 4  ;;  %v6406_v24 = vor.u32 %v6405_v55, %v6402_v1  ;;  %v6372_v26 = vshrl.u32 %v6231_v30, 16  ;;  %v7423_v57 = vrot.slane %v7421_v5, 5  ;;  %v6242_v32 = vld [vmem:[#allocation3 + $0x84] sm:$0x1] }
 0x3e6   :  { %v13112_v54 = vrot.slane %v7427_v27, 5  ;;  %v6375_v38 = vshll.u32 %v6231_v30, 16  ;;  %v6381_v28 = vshll.u32 %v6232_v11, 16  ;;  %v9106_v51 = vrot.slane %v7093_v56, 9  ;;  %v6243_v53 = vld [vmem:[#allocation3 + $0x88] sm:$0xf] }
 0x3e7   :  { %6481 = vrot.lane.b32.xlu0 %v6342_v12, %s10049_s1  ;;  %7563 = vrot.lane.b32.xlu1 %v7388_v8, %s10049_s1  ;;  %v6398_v62 = vsel %vm10330_vm12, %v13109_v21, %v13094_v39  ;;  %v13125_v35 = vrot.slane %v6406_v24, 4  ;;  %v6374_v2 = vrot.slane %v6372_v26, 4  ;;  %v6704_v47 = vld [vmem:[#allocation3 + $0x70] sm:$0xf]  ;;  %v7424_v18 = vor.u32 %v7423_v57, %v7420_v58  ;;  %v7317_v25 = vld [vmem:[#allocation3 + $0x60] sm:$0xf] }
 0x3e8   :  { %v6377_v60 = vrot.slane %v6375_v38, 5  ;;  %v13127_v41 = vrot.slane %v6381_v28, 5  ;;  %v7175_v16 = vrot.slane %v7094_v10, 5  ;;  %v6442_v12 = vshrl.u32 %v6241_v13, 16  ;;  %v6244_v29 = vld [vmem:[#allocation3 + $0x8c] sm:$0x1] }
 0x3e9   :  { %v6412_v0 = vsel %vm10330_vm12, %v13125_v35, %v13103_v63  ;;  %v6445_v31 = vshll.u32 %v6241_v13, 16  ;;  %v6451_v34 = vshll.u32 %v6242_v32, 16  ;;  %v7318_v59 = vld [vmem:[#allocation3 + $0x64] sm:$0x1]  ;;  %v13133_v14 = vrot.slane %v7424_v18, 4 }
 0x3ea   :  { %v6378_v48 = vor.u32 %v6377_v60, %v6374_v2  ;;  %v13137_v49 = vsel %vm10575_vm1, %v9106_v51, %v7175_v16  ;;  %v6456_v50 = vshrl.u32 %v6243_v53, 16  ;;  %v6239_v20 = vld [vmem:[#allocation3 + $0x78] sm:$0xf]  ;;  %v6444_v4 = vrot.slane %v6442_v12, 4  ;;  %v6240_v23 = vld [vmem:[#allocation3 + $0x7c] sm:$0x1] }
 0x3eb   :  { %v7270_v43 = vld [vmem:[#allocation3 + $0x18] sm:$0xf]  ;;  %7565 = vrot.lane.b32.xlu0 %v7402_v22, %s10049_s1  ;;  %6747 = vrot.lane.b32.xlu1 %v6704_v47, %s10049_s1  ;;  %v6447_v9 = vrot.slane %v6445_v31, 5  ;;  %v13146_v7 = vrot.slane %v6451_v34, 5  ;;  %v6459_v44 = vshll.u32 %v6243_v53, 16  ;;  %v7430_v6 = vsel %vm10330_vm12, %v13133_v14, %v13112_v54 }
 0x3ec   :  { %7286 = vst.msk [vmem:[#allocation4 + $0x20] sm:$0xf] %vm3051_vm5, %v7270_v43  ;;  %v6702_v1 = vld [vmem:[#allocation3 + $0x60] sm:$0xf]  ;;  %v13153_v17 = vrot.slane %v6378_v48, 4  ;;  %v6458_v46 = vrot.slane %v6456_v50, 4 }
 0x3ed   :  { %v6465_v52 = vshll.u32 %v6244_v29, 16  ;;  %v7097_v22 = vld [vmem:[#allocation3 + $0x68] sm:$0xe]  ;;  %v6448_v8 = vor.u32 %v6447_v9, %v6444_v4  ;;  %v6461_v40 = vrot.slane %v6459_v44, 5  ;;  %v7446_v55 = vshrl.u32 %v7317_v25, 16 }
 0x3ee   :  { %v6182_v30 = vld [vmem:[#allocation3 + $0x8] sm:$0xf]  ;;  %v7449_v11 = vshll.u32 %v7317_v25, 16  ;;  %v7098_v56 = vld [vmem:[#allocation3 + $0x6c] sm:$0x1]  ;;  %v6384_v36 = vsel %vm10330_vm12, %v13153_v17, %v13127_v41  ;;  %v7455_v26 = vshll.u32 %v7318_v59, 16 }
 0x3ef   :  { %v7321_v58 = vld [vmem:[#allocation3 + $0x70] sm:$0xf]  ;;  %6198 = vst.msk [vmem:[#allocation4 + $0x14] sm:$0xf] %vm3051_vm5, %v6182_v30  ;;  %v6185_v5 = vld [vmem:[#allocation3 + $0x20] sm:$0xf]  ;;  %6743 = vrot.lane.b32.xlu1 %v6702_v1, %s10049_s1  ;;  %v6462_v57 = vor.u32 %v6461_v40, %v6458_v46 }
 0x3f0   :  { %v6705_v27 = vld [vmem:[#allocation3 + $0x78] sm:$0xf]  ;;  %v13160_v24 = vrot.slane %v6465_v52, 5  ;;  %v6428_v10 = vshrl.u32 %v6239_v20, 16  ;;  %6201 = vst.msk [vmem:[#allocation4 + $0x50] sm:$0xf] %vm3051_vm5, %v6185_v5 }
 0x3f1   :  { %6749 = vrot.lane.b32.xlu0 %v6705_v27, %s10049_s1  ;;  %v13165_v13 = vrot.slane %v6448_v8, 4  ;;  %v7448_v38 = vrot.slane %v7446_v55, 4  ;;  %v7451_v28 = vrot.slane %v7449_v11, 5  ;;  %v7322_v32 = vld [vmem:[#allocation3 + $0x74] sm:$0x1]  ;;  %v13167_v51 = vrot.slane %v7455_v26, 5 }
 0x3f2   :  { %v7095_v2 = vld [vmem:[#allocation3 + $0x60] sm:$0xe]  ;;  %v6430_v53 = vrot.slane %v6428_v10, 4  ;;  %v6431_v47 = vshll.u32 %v6239_v20, 16  ;;  %v6437_v18 = vshll.u32 %v6240_v23, 16  ;;  %v13173_v16 = vrot.slane %v6462_v57, 4 }
 0x3f3   :  { %v7271_v60 = vld [vmem:[#allocation3 + $0x20] sm:$0xf]  ;;  %v6454_v41 = vsel %vm10330_vm12, %v13165_v13, %v13146_v7  ;;  %v7452_v25 = vor.u32 %v7451_v28, %v7448_v38  ;;  %v9108_v12 = vrot.slane %v7097_v22, 9  ;;  %v7096_v31 = vld [vmem:[#allocation3 + $0x64] sm:$0x1]  ;;  %v7183_v48 = vrot.slane %v7098_v56, 5  ;;  %6491 = vrot.lane.b32.xlu1 %v6412_v0, %s10049_s1 }
 0x3f4   :  { %v7101_v34 = vld [vmem:[#allocation3 + $0x78] sm:$0xe]  ;;  %7287 = vst.msk [vmem:[#allocation4 + $0x34] sm:$0xf] %vm3051_vm5, %v7271_v60  ;;  %v6433_v29 = vrot.slane %v6431_v47, 5  ;;  %v13176_v59 = vrot.slane %v6437_v18, 5  ;;  %v6468_v43 = vsel %vm10330_vm12, %v13173_v16, %v13160_v24 }
 0x3f5   :  { %v7474_v50 = vshrl.u32 %v7321_v58, 16  ;;  %v7102_v20 = vld [vmem:[#allocation3 + $0x7c] sm:$0x1]  ;;  %6493 = vrot.lane.b32.xlu0 %v6426_v42, %s10049_s1  ;;  %v13194_v4 = vrot.slane %v7452_v25, 4  ;;  %v7477_v9 = vshll.u32 %v7321_v58, 16  ;;  %v7483_v44 = vshll.u32 %v7322_v32, 16 }
 0x3f6   :  { %v7319_v23 = vld [vmem:[#allocation3 + $0x68] sm:$0xf]  ;;  %v6434_v1 = vor.u32 %v6433_v29, %v6430_v53  ;;  %v13198_v19 = vsel %vm10575_vm1, %v9108_v12, %v7183_v48  ;;  %v9107_v42 = vrot.slane %v7095_v2, 9  ;;  %v7320_v17 = vld [vmem:[#allocation3 + $0x6c] sm:$0x1]  ;;  %v7179_v52 = vrot.slane %v7096_v31, 5 }
 0x3f7   :  { %v7476_v33 = vrot.slane %v7474_v50, 4  ;;  %v7325_v63 = vld [vmem:[#allocation3 + $0x80] sm:$0xf]  ;;  %v7458_v35 = vsel %vm10330_vm12, %v13194_v4, %v13167_v51  ;;  %v7479_v0 = vrot.slane %v7477_v9, 5  ;;  %v13204_v46 = vrot.slane %v7483_v44, 5  ;;  %6487 = vrot.lane.b32.xlu1 %v6384_v36, %s10049_s1 }
 0x3f8   :  { %v7326_v22 = vld [vmem:[#allocation3 + $0x84] sm:$0x1]  ;;  %v7099_v30 = vld [vmem:[#allocation3 + $0x70] sm:$0xe]  ;;  %v7100_v8 = vld [vmem:[#allocation3 + $0x74] sm:$0x1]  ;;  %v13218_v26 = vsel %vm10575_vm1, %v9107_v42, %v7179_v52 }
 0x3f9   :  { %v6183_v40 = vld [vmem:[#allocation3 + $0x10] sm:$0xf]  ;;  %v13206_v55 = vrot.slane %v6434_v1, 4  ;;  %v9110_v11 = vrot.slane %v7101_v34, 9  ;;  %v7191_v56 = vrot.slane %v7102_v20, 5  ;;  %v7460_v58 = vshrl.u32 %v7319_v23, 16  ;;  %6489 = vrot.lane.b32.xlu0 %v6398_v62, %s10049_s1 }
 0x3fa   :  { %6199 = vst.msk [vmem:[#allocation4 + $0x28] sm:$0xf] %vm3051_vm5, %v6183_v40  ;;  %v7269_v5 = vld [vmem:[#allocation3 + $0x10] sm:$0xf]  ;;  %v7480_v27 = vor.u32 %v7479_v0, %v7476_v33  ;;  %v7463_v10 = vshll.u32 %v7319_v23, 16  ;;  %v7469_v57 = vshll.u32 %v7320_v17, 16 }
 0x3fb   :  { %v7105_v38 = vld [vmem:[#allocation3 + $0x88] sm:$0xe]  ;;  %7285 = vst.msk [vmem:[#allocation4 + $0xc] sm:$0xf] %vm3051_vm5, %v7269_v5  ;;  %v6188_v28 = vld [vmem:[#allocation3 + $0x38] sm:$0xf]  ;;  %v6440_v39 = vsel %vm10330_vm12, %v13206_v55, %v13176_v59  ;;  %v13227_v21 = vsel %vm10575_vm1, %v9110_v11, %v7191_v56 }
 0x3fc   :  { %v6706_v32 = vld [vmem:[#allocation3 + $0x80] sm:$0xf]  ;;  %v7462_v62 = vrot.slane %v7460_v58, 4  ;;  %v7502_v36 = vshrl.u32 %v7325_v63, 16  ;;  %v7106_v2 = vld [vmem:[#allocation3 + $0x8c] sm:$0x1] }
 0x3fd   :  { %v7323_v53 = vld [vmem:[#allocation3 + $0x78] sm:$0xf]  ;;  %6204 = vst.msk [vmem:[#allocation4 + $0x8c] sm:$0xf] %vm3051_vm5, %v6188_v28  ;;  %v13230_v47 = vrot.slane %v7480_v27, 4  ;;  %v7465_v18 = vrot.slane %v7463_v10, 5  ;;  %7569 = vrot.lane.b32.xlu0 %v7430_v6, %s10049_s1  ;;  %6751 = vrot.lane.b32.xlu1 %v6706_v32, %s10049_s1 }
 0x3fe   :  { %v13232_v60 = vrot.slane %v7469_v57, 5  ;;  %v7505_v25 = vshll.u32 %v7325_v63, 16  ;;  %v7324_v12 = vld [vmem:[#allocation3 + $0x7c] sm:$0x1]  ;;  %v6537_v31 = vld [vmem:[#allocation3 + $0x10] sm:$0xe] }
 0x3ff   :  { %v6538_v34 = vld [vmem:[#allocation3 + $0x14] sm:$0x1]  ;;  %v7504_v29 = vrot.slane %v7502_v36, 4  ;;  %v7511_v48 = vshll.u32 %v7326_v22, 16  ;;  %v9109_v50 = vrot.slane %v7099_v30, 9  ;;  %v7187_v20 = vrot.slane %v7100_v8, 5 }
 0x400   :  { %v7274_v9 = vld [vmem:[#allocation3 + $0x38] sm:$0xf]  ;;  %v7486_v44 = vsel %vm10330_vm12, %v13230_v47, %v13204_v46  ;;  %v7466_v23 = vor.u32 %v7465_v18, %v7462_v62  ;;  %v7507_v1 = vrot.slane %v7505_v25, 5  ;;  %v9112_v33 = vrot.slane %v7105_v38, 9  ;;  %v7329_v42 = vld [vmem:[#allocation3 + $0x90] sm:$0xf] }
 0x401   :  { %v7330_v17 = vld [vmem:[#allocation3 + $0x94] sm:$0x1]  ;;  %7290 = vst.msk [vmem:[#allocation4 + $0x70] sm:$0xf] %vm3051_vm5, %v7274_v9  ;;  %v6187_v63 = vld [vmem:[#allocation3 + $0x30] sm:$0xf]  ;;  %v13250_v54 = vsel %vm10575_vm1, %v9109_v50, %v7187_v20  ;;  %7571 = vrot.lane.b32.xlu1 %v7444_v45, %s10049_s1 }
 0x402   :  { %v6186_v0 = vld [vmem:[#allocation3 + $0x28] sm:$0xf]  ;;  %v13246_v22 = vrot.slane %v7511_v48, 5  ;;  %v7199_v14 = vrot.slane %v7106_v2, 5  ;;  %v7488_v6 = vshrl.u32 %v7323_v53, 16  ;;  %v13254_v40 = vrot.slane %v7466_v23, 4 }
 0x403   :  { %v6707_v52 = vld [vmem:[#allocation3 + $0x88] sm:$0xf]  ;;  %v7103_v30 = vld [vmem:[#allocation3 + $0x80] sm:$0xe]  ;;  %6203 = vst.msk [vmem:[#allocation4 + $0x78] sm:$0xf] %vm3051_vm5, %v6187_v63  ;;  %v7508_v11 = vor.u32 %v7507_v1, %v7504_v29 }
 0x404   :  { %6202 = vst.msk [vmem:[#allocation4 + $0x64] sm:$0xf] %vm3051_vm5, %v6186_v0  ;;  %v7273_v8 = vld [vmem:[#allocation3 + $0x30] sm:$0xf]  ;;  %v7491_v56 = vshll.u32 %v7323_v53, 16  ;;  %v7497_v58 = vshll.u32 %v7324_v12, 16  ;;  %v13259_v10 = vsel %vm10575_vm1, %v9112_v33, %v7199_v14  ;;  %6753 = vrot.lane.b32.xlu0 %v6707_v52, %s10049_s1  ;;  %v7472_v36 = vsel %vm10330_vm12, %v13254_v40, %v13232_v60 }
 0x405   :  { %v6539_v5 = vld [vmem:[#allocation3 + $0x18] sm:$0xe]  ;;  %7289 = vst.msk [vmem:[#allocation4 + $0x5c] sm:$0xf] %vm3051_vm5, %v7273_v8  ;;  %v7272_v27 = vld [vmem:[#allocation3 + $0x28] sm:$0xf]  ;;  %6499 = vrot.lane.b32.xlu1 %v6468_v43, %s10049_s1 }
 0x406   :  { %v7490_v57 = vrot.slane %v7488_v6, 4  ;;  %v9084_v38 = vrot.slane %v6537_v31, 9  ;;  %v6607_v28 = vrot.slane %v6538_v34, 5  ;;  %v7104_v32 = vld [vmem:[#allocation3 + $0x84] sm:$0x1]  ;;  %v13273_v2 = vrot.slane %v7508_v11, 4 }
 0x407   :  { %v6540_v62 = vld [vmem:[#allocation3 + $0x1c] sm:$0x1]  ;;  %7288 = vst.msk [vmem:[#allocation4 + $0x48] sm:$0xf] %vm3051_vm5, %v7272_v27  ;;  %v7493_v53 = vrot.slane %v7491_v56, 5  ;;  %v13275_v18 = vrot.slane %v7497_v58, 5 }
 0x408   :  { %v6535_v25 = vld [vmem:[#allocation3 + $0x8] sm:$0xe]  ;;  %v6608_v12 = vsel %vm10575_vm1, %v9084_v38, %v6607_v28  ;;  %v7530_v31 = vshrl.u32 %v7329_v42, 16  ;;  %v7533_v34 = vshll.u32 %v7329_v42, 16  ;;  %v7539_v29 = vshll.u32 %v7330_v17, 16  ;;  %7221 = vrot.lane.b32.xlu0 %v13137_v49, %s10049_s1 }
 0x409   :  { %v7327_v48 = vld [vmem:[#allocation3 + $0x88] sm:$0xf]  ;;  %v7514_v61 = vsel %vm10330_vm12, %v13273_v2, %v13246_v22  ;;  %v7494_v45 = vor.u32 %v7493_v53, %v7490_v57  ;;  %6679 = vst.msk [vmem:[#allocation4 + $0x2c] sm:$0xf] %vm3051_vm5, %v6608_v12  ;;  %v9111_v50 = vrot.slane %v7103_v30, 9  ;;  %v7195_v20 = vrot.slane %v7104_v32, 5  ;;  %6495 = vrot.lane.b32.xlu1 %v6440_v39, %s10049_s1 }
 0x40a   :  { %v7328_v9 = vld [vmem:[#allocation3 + $0x8c] sm:$0x1]  ;;  %v6793_v23 = vld [vmem:[#allocation3 + $0x18] sm:$0xf]  ;;  %v6193_v1 = vld [vmem:[#allocation3 + $0x70] sm:$0xf] }
 0x40b   :  { %v7532_v33 = vrot.slane %v7530_v31, 4  ;;  %v7535_v63 = vrot.slane %v7533_v34, 5  ;;  %v13284_v0 = vrot.slane %v7539_v29, 5  ;;  %v9085_v42 = vrot.slane %v6539_v5, 9  ;;  %v6794_v17 = vld [vmem:[#allocation3 + $0x1c] sm:$0x1] }
 0x40c   :  { %v7107_v52 = vld [vmem:[#allocation3 + $0x90] sm:$0xe]  ;;  %6209 = vst.msk [vmem:[#allocation4 + $0xf0] sm:$0xf] %vm3051_vm5, %v6193_v1  ;;  %v13295_v14 = vrot.slane %v7494_v45, 4  ;;  %v13299_v6 = vsel %vm10575_vm1, %v9111_v50, %v7195_v20  ;;  %v6611_v30 = vrot.slane %v6540_v62, 5  ;;  %6497 = vrot.lane.b32.xlu0 %v6454_v41, %s10049_s1 }
 0x40d   :  { %v7516_v8 = vshrl.u32 %v7327_v48, 16  ;;  %v7108_v11 = vld [vmem:[#allocation3 + $0x94] sm:$0x1]  ;;  %v7536_v56 = vor.u32 %v7535_v63, %v7532_v33  ;;  %v7519_v58 = vshll.u32 %v7327_v48, 16  ;;  %v7525_v5 = vshll.u32 %v7328_v9, 16 }
 0x40e   :  { %v9083_v49 = vrot.slane %v6535_v25, 9  ;;  %v6795_v27 = vld [vmem:[#allocation3 + $0x20] sm:$0xf]  ;;  %v7500_v24 = vsel %vm10330_vm12, %v13295_v14, %v13275_v18  ;;  %v6612_v16 = vsel %vm10575_vm1, %v9085_v42, %v6611_v30  ;;  %v6603_v38 = vrot.slane %v6536_v3, 5  ;;  %v6796_v28 = vld [vmem:[#allocation3 + $0x24] sm:$0x1] }
 0x40f   :  { %v6191_v57 = vld [vmem:[#allocation3 + $0x60] sm:$0xf]  ;;  %v7518_v43 = vrot.slane %v7516_v8, 4  ;;  %v6192_v32 = vld [vmem:[#allocation3 + $0x68] sm:$0xf]  ;;  %v13308_v53 = vrot.slane %v7536_v56, 4 }
 0x410   :  { %6207 = vst.msk [vmem:[#allocation4 + $0xc8] sm:$0xf] %vm3051_vm5, %v6191_v57  ;;  %v7275_v62 = vld [vmem:[#allocation3 + $0x40] sm:$0xf]  ;;  %6680 = vst.msk [vmem:[#allocation4 + $0x40] sm:$0xf] %vm3051_vm5, %v6612_v16  ;;  %v6604_v29 = vsel %vm10575_vm1, %v9083_v49, %v6603_v38  ;;  %7573 = vrot.lane.b32.xlu0 %v7458_v35, %s10049_s1 }
 0x411   :  { %v7521_v25 = vrot.slane %v7519_v58, 5  ;;  %v13311_v12 = vrot.slane %v7525_v5, 5  ;;  %v6850_v31 = vshrl.u32 %v6793_v23, 16  ;;  %6208 = vst.msk [vmem:[#allocation4 + $0xdc] sm:$0xf] %vm3051_vm5, %v6192_v32  ;;  %v6853_v48 = vshll.u32 %v6793_v23, 16 }
 0x412   :  { %7291 = vst.msk [vmem:[#allocation4 + $0x84] sm:$0xf] %vm3051_vm5, %v7275_v62  ;;  %v6190_v34 = vld [vmem:[#allocation3 + $0x58] sm:$0xf]  ;;  %v6859_v3 = vshll.u32 %v6794_v17, 16  ;;  %v9113_v45 = vrot.slane %v7107_v52, 9  ;;  %v7542_v7 = vsel %vm10330_vm12, %v13308_v53, %v13284_v0 }
 0x413   :  { %v6789_v50 = vld [vmem:[#allocation3 + $0x8] sm:$0xf]  ;;  %6206 = vst.msk [vmem:[#allocation4 + $0xb4] sm:$0xf] %vm3051_vm5, %v6190_v34  ;;  %v6708_v20 = vld [vmem:[#allocation3 + $0x90] sm:$0xf]  ;;  %v7522_v13 = vor.u32 %v7521_v25, %v7518_v43 }
 0x414   :  { %6678 = vst.msk [vmem:[#allocation4 + $0x18] sm:$0xf] %vm3051_vm5, %v6604_v29  ;;  %v6852_v41 = vrot.slane %v6850_v31, 4  ;;  %v7203_v59 = vrot.slane %v7108_v11, 5  ;;  %v6790_v55 = vld [vmem:[#allocation3 + $0xc] sm:$0x1]  ;;  %6755 = vrot.lane.b32.xlu1 %v6708_v20, %s10049_s1  ;;  %7225 = vrot.lane.b32.xlu0 %v13198_v19, %s10049_s1 }
 0x415   :  { %v7331_v39 = vld [vmem:[#allocation3 + $0x98] sm:$0xf]  ;;  %v6855_v9 = vrot.slane %v6853_v48, 5  ;;  %v6861_v23 = vrot.slane %v6859_v3, 5  ;;  %v6864_v1 = vshrl.u32 %v6795_v27, 16  ;;  %v6867_v33 = vshll.u32 %v6795_v27, 16 }
 0x416   :  { %v7332_v63 = vld [vmem:[#allocation3 + $0x9c] sm:$0x1]  ;;  %v13335_v42 = vrot.slane %v7522_v13, 4  ;;  %v13339_v17 = vsel %vm10575_vm1, %v9113_v45, %v7203_v59  ;;  %v6873_v52 = vshll.u32 %v6796_v28, 16  ;;  %v6822_v30 = vshrl.u32 %v6789_v50, 16 }
 0x417   :  { %v6545_v8 = vld [vmem:[#allocation3 + $0x30] sm:$0xe]  ;;  %v6856_v11 = vor.u32 %v6855_v9, %v6852_v41  ;;  %v6866_v56 = vrot.slane %v6864_v1, 4  ;;  %v6869_v58 = vrot.slane %v6867_v33, 5  ;;  %v6825_v5 = vshll.u32 %v6789_v50, 16 }
 0x418   :  { %v6546_v49 = vld [vmem:[#allocation3 + $0x34] sm:$0x1]  ;;  %v6791_v27 = vld [vmem:[#allocation3 + $0x10] sm:$0xf]  ;;  %v7528_v57 = vsel %vm10330_vm12, %v13335_v42, %v13311_v12  ;;  %v6875_v16 = vrot.slane %v6873_v52, 5  ;;  %v6824_v43 = vrot.slane %v6822_v30, 4  ;;  %7223 = vrot.lane.b32.xlu1 %v13218_v26, %s10049_s1  ;;  %v6730_v26 = vpop.permute.xlu0 %6729  ;;  %7577 = vrot.lane.b32.xlu0 %v7486_v44, %s10049_s1 }
 0x419   :  { %v6831_v38 = vshll.u32 %v6790_v55, 16  ;;  %v6792_v28 = vld [vmem:[#allocation3 + $0x14] sm:$0x1]  ;;  %v6195_v32 = vld [vmem:[#allocation3 + $0x80] sm:$0xf]  ;;  %v6857_v51 = vrot.slane %v6856_v11, 4  ;;  %v6870_v4 = vor.u32 %v6869_v58, %v6866_v56 }
 0x41a   :  { %v6827_v35 = vrot.slane %v6825_v5, 5  ;;  %v7544_v62 = vshrl.u32 %v7331_v39, 16  ;;  %v6541_v25 = vld [vmem:[#allocation3 + $0x20] sm:$0xe]  ;;  %6211 = vst.msk [vmem:[#allocation4 + $0x118] sm:$0xf] %vm3051_vm5, %v6195_v32 }
 0x41b   :  { %v6196_v31 = vld [vmem:[#allocation3 + $0x88] sm:$0xf]  ;;  %v6833_v34 = vrot.slane %v6831_v38, 5  ;;  %v7547_v29 = vshll.u32 %v7331_v39, 16  ;;  %v7553_v48 = vshll.u32 %v7332_v63, 16  ;;  %v9088_v3 = vrot.slane %v6545_v8, 9 }
 0x41c   :  { %v6542_v45 = vld [vmem:[#allocation3 + $0x24] sm:$0x1]  ;;  %6212 = vst.msk [vmem:[#allocation4 + $0x12c] sm:$0xf] %vm3051_vm5, %v6196_v31  ;;  %v7277_v50 = vld [vmem:[#allocation3 + $0x60] sm:$0xf]  ;;  %v6862_v20 = vsel %vm10330_vm12, %v6857_v51, %v6861_v23  ;;  %v6828_v41 = vor.u32 %v6827_v35, %v6824_v43  ;;  %7575 = vrot.lane.b32.xlu1 %v7472_v36, %s10049_s1  ;;  %v6726_v40 = vpop.permute.xlu0 %6725  ;;  %7229 = vrot.lane.b32.xlu0 %v13227_v21, %s10049_s1 }
 0x41d   :  { %v6871_v13 = vrot.slane %v6870_v4, 4  ;;  %v7546_v59 = vrot.slane %v7544_v62, 4  ;;  %v6801_v55 = vld [vmem:[#allocation3 + $0x38] sm:$0xf]  ;;  %v6802_v39 = vld [vmem:[#allocation3 + $0x3c] sm:$0x1] }
 0x41e   :  { %7293 = vst.msk [vmem:[#allocation4 + $0xac] sm:$0xf] %vm3051_vm5, %v7277_v50  ;;  %v6194_v9 = vld [vmem:[#allocation3 + $0x78] sm:$0xf]  ;;  %7063 = vst.msk [vmem:[#allocation4 + $0x30] sm:$0xf] %vm3051_vm5, %v6862_v20 }
 0x41f   :  { %v7549_v1 = vrot.slane %v7547_v29, 5  ;;  %v13362_v33 = vrot.slane %v7553_v48, 5  ;;  %v6623_v19 = vrot.slane %v6546_v49, 5  ;;  %v6836_v63 = vshrl.u32 %v6791_v27, 16  ;;  %v6547_v52 = vld [vmem:[#allocation3 + $0x38] sm:$0xe]  ;;  %v6732_v48 = vpop.permute.xlu1 %6731 }
 0x420   :  { %6210 = vst.msk [vmem:[#allocation4 + $0x104] sm:$0xf] %vm3051_vm5, %v6194_v9  ;;  %v6876_v23 = vsel %vm10330_vm12, %v6871_v13, %v6875_v16  ;;  %v6829_v30 = vrot.slane %v6828_v41, 4  ;;  %v6839_v8 = vshll.u32 %v6791_v27, 16  ;;  %v6845_v11 = vshll.u32 %v6792_v28, 16  ;;  %7227 = vrot.lane.b32.xlu1 %v13250_v54, %s10049_s1  ;;  %v7210_v54 = vpop.permute.xlu0 %7209  ;;  %7581 = vrot.lane.b32.xlu0 %v7514_v61, %s10049_s1 }
 0x421   :  { %v6548_v56 = vld [vmem:[#allocation3 + $0x3c] sm:$0x1]  ;;  %6775 = vst.msk [vmem:[#allocation4 + $0x2c] sm:$0xf] %vm3739_vm3, %v6730_v26  ;;  %v7550_v58 = vor.u32 %v7549_v1, %v7546_v59  ;;  %v6624_v5 = vsel %vm10575_vm1, %v9088_v3, %v6623_v19  ;;  %v6838_v49 = vrot.slane %v6836_v63, 4  ;;  %v9086_v43 = vrot.slane %v6541_v25, 9 }
 0x422   :  { %7064 = vst.msk [vmem:[#allocation4 + $0x44] sm:$0xf] %vm3051_vm5, %v6876_v23  ;;  %v6543_v38 = vld [vmem:[#allocation3 + $0x28] sm:$0xe]  ;;  %v7279_v32 = vld [vmem:[#allocation3 + $0x70] sm:$0xf]  ;;  %v6834_v27 = vsel %vm10330_vm12, %v6829_v30, %v6833_v34 }
 0x423   :  { %6683 = vst.msk [vmem:[#allocation4 + $0x7c] sm:$0xf] %vm3051_vm5, %v6624_v5  ;;  %v6841_v16 = vrot.slane %v6839_v8, 5  ;;  %v6847_v28 = vrot.slane %v6845_v11, 5  ;;  %v6615_v51 = vrot.slane %v6542_v45, 5  ;;  %v13388_v46 = vrot.slane %v7550_v58, 4 }
 0x424   :  { %v6544_v4 = vld [vmem:[#allocation3 + $0x2c] sm:$0x1]  ;;  %7295 = vst.msk [vmem:[#allocation4 + $0xd4] sm:$0xf] %vm3051_vm5, %v7279_v32  ;;  %7061 = vst.msk [vmem:[#allocation4 + $0x8] sm:$0xf] %vm3051_vm5, %v6834_v27  ;;  %7579 = vrot.lane.b32.xlu1 %v7500_v24, %s10049_s1  ;;  %v7206_v18 = vpop.permute.xlu0 %7205  ;;  %7233 = vrot.lane.b32.xlu0 %v13259_v10, %s10049_s1 }
 0x425   :  { %v6906_v47 = vshrl.u32 %v6801_v55, 16  ;;  %v6909_v44 = vshll.u32 %v6801_v55, 16  ;;  %v6915_v35 = vshll.u32 %v6802_v39, 16  ;;  %v6797_v60 = vld [vmem:[#allocation3 + $0x28] sm:$0xf]  ;;  %v6842_v36 = vor.u32 %v6841_v16, %v6838_v49 }
 0x426   :  { %v6616_v62 = vsel %vm10575_vm1, %v9086_v43, %v6615_v51  ;;  %v9089_v25 = vrot.slane %v6547_v52, 9  ;;  %v6627_v31 = vrot.slane %v6548_v56, 5  ;;  %v6798_v34 = vld [vmem:[#allocation3 + $0x2c] sm:$0x1]  ;;  %v6803_v29 = vld [vmem:[#allocation3 + $0x40] sm:$0xf]  ;;  %v7556_v3 = vsel %vm10330_vm12, %v13388_v46, %v13362_v33  ;;  %v6728_v43 = vpop.permute.xlu1 %6727 }
 0x427   :  { %6773 = vst.msk [vmem:[#allocation4 + $0x4] sm:$0xf] %vm3739_vm3, %v6726_v40  ;;  %v6908_v45 = vrot.slane %v6906_v47, 4  ;;  %v6911_v50 = vrot.slane %v6909_v44, 5  ;;  %v6917_v20 = vrot.slane %v6915_v35, 5  ;;  %v6843_v55 = vrot.slane %v6842_v36, 4 }
 0x428   :  { %6681 = vst.msk [vmem:[#allocation4 + $0x54] sm:$0xf] %vm3051_vm5, %v6616_v62  ;;  %v6804_v13 = vld [vmem:[#allocation3 + $0x44] sm:$0x1]  ;;  %v13398_v41 = vld [vmem:[#allocation3 + $0x60] sm:$0xe]  ;;  %v6628_v39 = vsel %vm10575_vm1, %v9089_v25, %v6627_v31  ;;  %7231 = vrot.lane.b32.xlu1 %v13299_v6, %s10049_s1  ;;  %7585 = vrot.lane.b32.xlu0 %v7542_v7, %s10049_s1 }
 0x429   :  { %v7278_v59 = vld [vmem:[#allocation3 + $0x68] sm:$0xf]  ;;  %6776 = vst.msk [vmem:[#allocation4 + $0x40] sm:$0xf] %vm3739_vm3, %v6732_v48  ;;  %v9087_v9 = vrot.slane %v6543_v38, 9  ;;  %v6619_v1 = vrot.slane %v6544_v4, 5  ;;  %v6912_v52 = vor.u32 %v6911_v50, %v6908_v45  ;;  %v6848_v8 = vsel %vm10330_vm12, %v6843_v55, %v6847_v28 }
 0x42a   :  { %v6554_v19 = vld [vmem:[#allocation3 + $0x64] sm:$0x1]  ;;  %7294 = vst.msk [vmem:[#allocation4 + $0xc0] sm:$0xf] %vm3051_vm5, %v7278_v59  ;;  %v7281_v63 = vld [vmem:[#allocation3 + $0x80] sm:$0xf]  ;;  %v7212_v50 = vpop.permute.xlu1 %7211 }
 0x42b   :  { %6684 = vst.msk [vmem:[#allocation4 + $0x90] sm:$0xf] %vm3051_vm5, %v6628_v39  ;;  %v6878_v26 = vshrl.u32 %v6797_v60, 16  ;;  %v6881_v21 = vshll.u32 %v6797_v60, 16  ;;  %v6887_v23 = vshll.u32 %v6798_v34, 16  ;;  %v6620_v11 = vsel %vm10575_vm1, %v9087_v9, %v6619_v1 }
 0x42c   :  { %v6799_v30 = vld [vmem:[#allocation3 + $0x30] sm:$0xf]  ;;  %7297 = vst.msk [vmem:[#allocation4 + $0xfc] sm:$0xf] %vm3051_vm5, %v7281_v63  ;;  %v6920_v56 = vshrl.u32 %v6803_v29, 16  ;;  %v6923_v58 = vshll.u32 %v6803_v29, 16  ;;  %7583 = vrot.lane.b32.xlu1 %v7528_v57, %s10049_s1 }
 0x42d   :  { %v6800_v5 = vld [vmem:[#allocation3 + $0x34] sm:$0x1]  ;;  %v13414_v49 = vld [vmem:[#allocation3 + $0x70] sm:$0xe]  ;;  %7255 = vst.msk [vmem:[#allocation4 + $0x30] sm:$0xf] %vm3739_vm3, %v7210_v54 }
 0x42e   :  { %7062 = vst.msk [vmem:[#allocation4 + $0x1c] sm:$0xf] %vm3051_vm5, %v6848_v8  ;;  %v6913_v38 = vrot.slane %v6912_v52, 4  ;;  %6682 = vst.msk [vmem:[#allocation4 + $0x68] sm:$0xf] %vm3051_vm5, %v6620_v11  ;;  %v6880_v32 = vrot.slane %v6878_v26, 4 }
 0x42f   :  { %v6883_v27 = vrot.slane %v6881_v21, 5  ;;  %v6889_v16 = vrot.slane %v6887_v23, 5  ;;  %v6558_v28 = vld [vmem:[#allocation3 + $0x74] sm:$0x1]  ;;  %6774 = vst.msk [vmem:[#allocation4 + $0x18] sm:$0xf] %vm3739_vm3, %v6728_v43 }
 0x430   :  { %v6922_v51 = vrot.slane %v6920_v56, 4  ;;  %v6925_v4 = vrot.slane %v6923_v58, 5  ;;  %v6929_v47 = vshll.u32 %v6804_v13, 16  ;;  %v9092_v44 = vrot.slane %v13398_v41, 9  ;;  %v6555_v35 = vld [vmem:[#allocation3 + $0x68] sm:$0xe]  ;;  %7235 = vrot.lane.b32.xlu1 %v13339_v17, %s10049_s1 }
 0x431   :  { %v6556_v60 = vld [vmem:[#allocation3 + $0x6c] sm:$0x1]  ;;  %v7280_v40 = vld [vmem:[#allocation3 + $0x78] sm:$0xf]  ;;  %v6918_v22 = vsel %vm10330_vm12, %v6913_v38, %v6917_v20  ;;  %v6884_v2 = vor.u32 %v6883_v27, %v6880_v32  ;;  %v6639_v61 = vrot.slane %v6554_v19, 5  ;;  %v6892_v36 = vshrl.u32 %v6799_v30, 16 }
 0x432   :  { %v6551_v62 = vld [vmem:[#allocation3 + $0x58] sm:$0xe]  ;;  %v6552_v25 = vld [vmem:[#allocation3 + $0x5c] sm:$0x1]  ;;  %7296 = vst.msk [vmem:[#allocation4 + $0xe8] sm:$0xf] %vm3051_vm5, %v7280_v40  ;;  %v6926_v14 = vor.u32 %v6925_v4, %v6922_v51 }
 0x433   :  { %7067 = vst.msk [vmem:[#allocation4 + $0x80] sm:$0xf] %vm3051_vm5, %v6918_v22  ;;  %v6931_v24 = vrot.slane %v6929_v47, 5  ;;  %v6895_v31 = vshll.u32 %v6799_v30, 16  ;;  %v6901_v34 = vshll.u32 %v6800_v5, 16  ;;  %v6885_v20 = vrot.slane %v6884_v2, 4 }
 0x434   :  { %v6561_v29 = vld [vmem:[#allocation3 + $0x80] sm:$0xe]  ;;  %v6562_v48 = vld [vmem:[#allocation3 + $0x84] sm:$0x1]  ;;  %v6559_v45 = vld [vmem:[#allocation3 + $0x78] sm:$0xe]  ;;  %v6640_v13 = vsel %vm10575_vm1, %v9092_v44, %v6639_v61  ;;  %7587 = vrot.lane.b32.xlu1 %v7556_v3, %s10049_s1 }
 0x435   :  { %7253 = vst.msk [vmem:[#allocation4 + $0x8] sm:$0xf] %vm3739_vm3, %v7206_v18  ;;  %v6894_v41 = vrot.slane %v6892_v36, 4  ;;  %v9094_v59 = vrot.slane %v13414_v49, 9  ;;  %v6560_v55 = vld [vmem:[#allocation3 + $0x7c] sm:$0x1]  ;;  %v6890_v21 = vsel %vm10330_vm12, %v6885_v20, %v6889_v16  ;;  %v6476_v49 = vpop.permute.xlu1 %6475 }
 0x436   :  { %v6805_v39 = vld [vmem:[#allocation3 + $0x58] sm:$0xf]  ;;  %7256 = vst.msk [vmem:[#allocation4 + $0x44] sm:$0xf] %vm3739_vm3, %v7212_v50  ;;  %v6927_v9 = vrot.slane %v6926_v14, 4  ;;  %v6897_v1 = vrot.slane %v6895_v31, 5 }
 0x437   :  { %6687 = vst.msk [vmem:[#allocation4 + $0xcc] sm:$0xf] %vm3051_vm5, %v6640_v13  ;;  %v6903_v19 = vrot.slane %v6901_v34, 5  ;;  %v6647_v63 = vrot.slane %v6558_v28, 5  ;;  %v6806_v52 = vld [vmem:[#allocation3 + $0x5c] sm:$0x1]  ;;  %v6738_v28 = vpop.permute.xlu0 %6737 }
 0x438   :  { %v7283_v26 = vld [vmem:[#allocation3 + $0x90] sm:$0xf]  ;;  %v9093_v23 = vrot.slane %v6555_v35, 9  ;;  %v6643_v30 = vrot.slane %v6556_v60, 5  ;;  %v9091_v54 = vrot.slane %v6551_v62, 9  ;;  %v6932_v6 = vsel %vm10330_vm12, %v6927_v9, %v6931_v24 }
 0x439   :  { %v6809_v10 = vld [vmem:[#allocation3 + $0x68] sm:$0xf]  ;;  %7299 = vst.msk [vmem:[#allocation4 + $0x124] sm:$0xf] %vm3051_vm5, %v7283_v26  ;;  %7065 = vst.msk [vmem:[#allocation4 + $0x58] sm:$0xf] %vm3051_vm5, %v6890_v21  ;;  %v6898_v8 = vor.u32 %v6897_v1, %v6894_v41  ;;  %v6648_v11 = vsel %vm10575_vm1, %v9094_v59, %v6647_v63  ;;  %v7208_v61 = vpop.permute.xlu1 %7207 }
 0x43a   :  { %v6635_v56 = vrot.slane %v6552_v25, 5  ;;  %v6810_v58 = vld [vmem:[#allocation3 + $0x6c] sm:$0x1]  ;;  %v7282_v5 = vld [vmem:[#allocation3 + $0x88] sm:$0xf]  ;;  %v6644_v43 = vsel %vm10575_vm1, %v9093_v23, %v6643_v30  ;;  %v9096_v38 = vrot.slane %v6561_v29, 9 }
 0x43b   :  { %7068 = vst.msk [vmem:[#allocation4 + $0x94] sm:$0xf] %vm3051_vm5, %v6932_v6  ;;  %6689 = vst.msk [vmem:[#allocation4 + $0xf4] sm:$0xf] %vm3051_vm5, %v6648_v11  ;;  %v6655_v32 = vrot.slane %v6562_v48, 5  ;;  %v9095_v27 = vrot.slane %v6559_v45, 9  ;;  %v6734_v24 = vpop.permute.xlu0 %6733 }
 0x43c   :  { %v6563_v16 = vld [vmem:[#allocation3 + $0x88] sm:$0xe]  ;;  %7298 = vst.msk [vmem:[#allocation4 + $0x110] sm:$0xf] %vm3051_vm5, %v7282_v5  ;;  %v6899_v51 = vrot.slane %v6898_v8, 4  ;;  %v6636_v4 = vsel %vm10575_vm1, %v9091_v54, %v6635_v56  ;;  %v6651_v47 = vrot.slane %v6560_v55, 5 }
 0x43d   :  { %6520 = vst.msk [vmem:[#allocation4 + $0x3c] sm:$0xf] %vm3739_vm3, %v6476_v49  ;;  %v6934_v44 = vshrl.u32 %v6805_v39, 16  ;;  %v6564_v0 = vld [vmem:[#allocation3 + $0x8c] sm:$0x1]  ;;  %v6656_v53 = vsel %vm10575_vm1, %v9096_v38, %v6655_v32  ;;  %v6937_v12 = vshll.u32 %v6805_v39, 16  ;;  %v7560_v38 = vpop.permute.xlu1 %7559 }
 0x43e   :  { %6688 = vst.msk [vmem:[#allocation4 + $0xe0] sm:$0xf] %vm3051_vm5, %v6644_v43  ;;  %6686 = vst.msk [vmem:[#allocation4 + $0xb8] sm:$0xf] %vm3051_vm5, %v6636_v4  ;;  %v6943_v7 = vshll.u32 %v6806_v52, 16  ;;  %v6962_v42 = vshrl.u32 %v6809_v10, 16  ;;  %v6904_v35 = vsel %vm10330_vm12, %v6899_v51, %v6903_v19  ;;  %v6652_v60 = vsel %vm10575_vm1, %v9095_v27, %v6651_v47 }
 0x43f   :  { %6779 = vst.msk [vmem:[#allocation4 + $0x7c] sm:$0xf] %vm3739_vm3, %v6738_v28  ;;  %v6807_v57 = vld [vmem:[#allocation3 + $0x60] sm:$0xf]  ;;  %v6936_v40 = vrot.slane %v6934_v44, 4  ;;  %v6965_v22 = vshll.u32 %v6809_v10, 16  ;;  %v7218_v32 = vpop.permute.xlu0 %7217 }
 0x440   :  { %6691 = vst.msk [vmem:[#allocation4 + $0x11c] sm:$0xf] %vm3051_vm5, %v6656_v53  ;;  %v6808_v2 = vld [vmem:[#allocation3 + $0x64] sm:$0x1]  ;;  %7066 = vst.msk [vmem:[#allocation4 + $0x6c] sm:$0xf] %vm3051_vm5, %v6904_v35 }
 0x441   :  { %6690 = vst.msk [vmem:[#allocation4 + $0x108] sm:$0xf] %vm3051_vm5, %v6652_v60  ;;  %v6939_v36 = vrot.slane %v6937_v12, 5  ;;  %v6945_v62 = vrot.slane %v6943_v7, 5  ;;  %v6964_v25 = vrot.slane %v6962_v42, 4  ;;  %v6971_v18 = vshll.u32 %v6810_v58, 16 }
 0x442   :  { %v6813_v14 = vld [vmem:[#allocation3 + $0x78] sm:$0xf]  ;;  %7254 = vst.msk [vmem:[#allocation4 + $0x1c] sm:$0xf] %vm3739_vm3, %v7208_v61  ;;  %v6967_v31 = vrot.slane %v6965_v22, 5  ;;  %v9097_v34 = vrot.slane %v6563_v16, 9 }
 0x443   :  { %v6659_v29 = vrot.slane %v6564_v0, 5  ;;  %v6948_v48 = vshrl.u32 %v6807_v57, 16  ;;  %v6814_v45 = vld [vmem:[#allocation3 + $0x7c] sm:$0x1]  ;;  %6777 = vst.msk [vmem:[#allocation4 + $0x54] sm:$0xf] %vm3739_vm3, %v6734_v24  ;;  %v6940_v50 = vor.u32 %v6939_v36, %v6936_v40 }
 0x444   :  { %v6973_v20 = vrot.slane %v6971_v18, 5  ;;  %v6951_v13 = vshll.u32 %v6807_v57, 16  ;;  %v6957_v41 = vshll.u32 %v6808_v2, 16  ;;  %v6811_v59 = vld [vmem:[#allocation3 + $0x70] sm:$0xf]  ;;  %v6968_v55 = vor.u32 %v6967_v31, %v6964_v25 }
 0x445   :  { %v6660_v39 = vsel %vm10575_vm1, %v9097_v34, %v6659_v29  ;;  %v6950_v17 = vrot.slane %v6948_v48, 4  ;;  %v6990_v9 = vshrl.u32 %v6813_v14, 16  ;;  %v6812_v1 = vld [vmem:[#allocation3 + $0x74] sm:$0x1]  ;;  %v6817_v19 = vld [vmem:[#allocation3 + $0x88] sm:$0xf] }
 0x446   :  { %v6941_v63 = vrot.slane %v6940_v50, 4  ;;  %6692 = vst.msk [vmem:[#allocation4 + $0x130] sm:$0xf] %vm3051_vm5, %v6660_v39  ;;  %v6953_v52 = vrot.slane %v6951_v13, 5  ;;  %v6959_v26 = vrot.slane %v6957_v41, 5  ;;  %v6993_v21 = vshll.u32 %v6813_v14, 16 }
 0x447   :  { %v6818_v23 = vld [vmem:[#allocation3 + $0x8c] sm:$0x1]  ;;  %v6969_v30 = vrot.slane %v6968_v55, 4  ;;  %v6992_v54 = vrot.slane %v6990_v9, 4  ;;  %v6999_v10 = vshll.u32 %v6814_v45, 16  ;;  %v6976_v6 = vshrl.u32 %v6811_v59, 16 }
 0x448   :  { %v7621_v8 = vld [vmem:[#allocation3 + $0x10] sm:$0xe]  ;;  %v6946_v11 = vsel %vm10330_vm12, %v6941_v63, %v6945_v62  ;;  %v6954_v56 = vor.u32 %v6953_v52, %v6950_v17  ;;  %v6995_v58 = vrot.slane %v6993_v21, 5  ;;  %v6979_v5 = vshll.u32 %v6811_v59, 16  ;;  %v7622_v49 = vld [vmem:[#allocation3 + $0x14] sm:$0x1] }
 0x449   :  { %v7623_v43 = vld [vmem:[#allocation3 + $0x18] sm:$0xe]  ;;  %7069 = vst.msk [vmem:[#allocation4 + $0xa8] sm:$0xf] %vm3051_vm5, %v6946_v11  ;;  %v6974_v33 = vsel %vm10330_vm12, %v6969_v30, %v6973_v20  ;;  %v7001_v46 = vrot.slane %v6999_v10, 5  ;;  %v6978_v3 = vrot.slane %v6976_v6, 4  ;;  %v6472_v6 = vpop.permute.xlu1 %6471 }
 0x44a   :  { %v6985_v27 = vshll.u32 %v6812_v1, 16  ;;  %v7624_v16 = vld [vmem:[#allocation3 + $0x1c] sm:$0x1]  ;;  %7606 = vst.msk [vmem:[#allocation4 + $0x20] sm:$0xf] %vm3739_vm3, %v7560_v38  ;;  %v6955_v28 = vrot.slane %v6954_v56, 4  ;;  %v6996_v51 = vor.u32 %v6995_v58, %v6992_v54 }
 0x44b   :  { %7259 = vst.msk [vmem:[#allocation4 + $0x80] sm:$0xf] %vm3739_vm3, %v7218_v32  ;;  %v6981_v4 = vrot.slane %v6979_v5, 5  ;;  %v7018_v47 = vshrl.u32 %v6817_v19, 16  ;;  %v6815_v44 = vld [vmem:[#allocation3 + $0x80] sm:$0xf] }
 0x44c   :  { %7071 = vst.msk [vmem:[#allocation4 + $0xd0] sm:$0xf] %vm3051_vm5, %v6974_v33  ;;  %v6987_v0 = vrot.slane %v6985_v27, 5  ;;  %v7021_v53 = vshll.u32 %v6817_v19, 16  ;;  %v7027_v12 = vshll.u32 %v6818_v23, 16  ;;  %v9114_v7 = vrot.slane %v7621_v8, 9 }
 0x44d   :  { %v6816_v42 = vld [vmem:[#allocation3 + $0x84] sm:$0x1]  ;;  %v6960_v57 = vsel %vm10330_vm12, %v6955_v28, %v6959_v26  ;;  %v6997_v35 = vrot.slane %v6996_v51, 4  ;;  %v6982_v60 = vor.u32 %v6981_v4, %v6978_v3  ;;  %v7020_v40 = vrot.slane %v7018_v47, 4  ;;  %v7625_v22 = vld [vmem:[#allocation3 + $0x20] sm:$0xe] }
 0x44e   :  { %v7626_v2 = vld [vmem:[#allocation3 + $0x24] sm:$0x1]  ;;  %7070 = vst.msk [vmem:[#allocation4 + $0xbc] sm:$0xf] %vm3051_vm5, %v6960_v57  ;;  %v7023_v61 = vrot.slane %v7021_v53, 5  ;;  %v7029_v36 = vrot.slane %v7027_v12, 5 }
 0x44f   :  { %v7687_v62 = vrot.slane %v7622_v49, 5  ;;  %v9115_v25 = vrot.slane %v7623_v43, 9  ;;  %v7627_v18 = vld [vmem:[#allocation3 + $0x28] sm:$0xe]  ;;  %v7628_v14 = vld [vmem:[#allocation3 + $0x2c] sm:$0x1]  ;;  %v7002_v34 = vsel %vm10330_vm12, %v6997_v35, %v7001_v46 }
 0x450   :  { %v7629_v24 = vld [vmem:[#allocation3 + $0x30] sm:$0xe]  ;;  %v7630_v31 = vld [vmem:[#allocation3 + $0x34] sm:$0x1]  ;;  %v6983_v29 = vrot.slane %v6982_v60, 4  ;;  %v7691_v48 = vrot.slane %v7624_v16, 5  ;;  %v7024_v20 = vor.u32 %v7023_v61, %v7020_v40 }
 0x451   :  { %v7004_v45 = vshrl.u32 %v6815_v44, 16  ;;  %v7631_v50 = vld [vmem:[#allocation3 + $0x38] sm:$0xe]  ;;  %7073 = vst.msk [vmem:[#allocation4 + $0xf8] sm:$0xf] %vm3051_vm5, %v7002_v34  ;;  %v7688_v13 = vsel %vm10575_vm1, %v9114_v7, %v7687_v62  ;;  %v7007_v41 = vshll.u32 %v6815_v44, 16  ;;  %v6740_v7 = vpop.permute.xlu1 %6739  ;;  %v6478_v62 = vpop.permute.xlu0 %6477 }
 0x452   :  { %v7013_v59 = vshll.u32 %v6816_v42, 16  ;;  %v7632_v55 = vld [vmem:[#allocation3 + $0x3c] sm:$0x1]  ;;  %v6819_v39 = vld [vmem:[#allocation3 + $0x90] sm:$0xf]  ;;  %v6988_v17 = vsel %vm10330_vm12, %v6983_v29, %v6987_v0  ;;  %v7692_v9 = vsel %vm10575_vm1, %v9115_v25, %v7691_v48  ;;  %v9116_v19 = vrot.slane %v7625_v22, 9 }
 0x453   :  { %7765 = vst.msk [vmem:[#allocation4 + $0x10] sm:$0xf] %vm3051_vm5, %v7688_v13  ;;  %v7006_v1 = vrot.slane %v7004_v45, 4  ;;  %v6820_v63 = vld [vmem:[#allocation3 + $0x94] sm:$0x1]  ;;  %v7025_v26 = vrot.slane %v7024_v20, 4 }
 0x454   :  { %v7633_v52 = vld [vmem:[#allocation3 + $0x40] sm:$0xe]  ;;  %7072 = vst.msk [vmem:[#allocation4 + $0xe4] sm:$0xf] %vm3051_vm5, %v6988_v17  ;;  %7766 = vst.msk [vmem:[#allocation4 + $0x24] sm:$0xf] %vm3051_vm5, %v7692_v9 }
 0x455   :  { %v7009_v21 = vrot.slane %v7007_v41, 5  ;;  %v7015_v23 = vrot.slane %v7013_v59, 5  ;;  %v7695_v30 = vrot.slane %v7626_v2, 5  ;;  %v7634_v54 = vld [vmem:[#allocation3 + $0x44] sm:$0x1]  ;;  %v9117_v8 = vrot.slane %v7627_v18, 9  ;;  %v6736_v41 = vpop.permute.xlu1 %6735 }
 0x456   :  { %v7637_v10 = vld [vmem:[#allocation3 + $0x60] sm:$0xe]  ;;  %v7699_v11 = vrot.slane %v7628_v14, 5  ;;  %v9118_v56 = vrot.slane %v7629_v24, 9  ;;  %v7703_v58 = vrot.slane %v7630_v31, 5  ;;  %v7030_v49 = vsel %vm10330_vm12, %v7025_v26, %v7029_v36  ;;  %v9983_v9 = vld [vmem:[%s13752_s3 + $0x110] sm:$0xff]  }
 0x457   :  { %v7638_v5 = vld [vmem:[#allocation3 + $0x64] sm:$0x1]  ;;  %6518 = vst.msk [vmem:[#allocation4 + $0x14] sm:$0xf] %vm3739_vm3, %v6472_v6  ;;  %v7010_v43 = vor.u32 %v7009_v21, %v7006_v1  ;;  %v7696_v38 = vsel %vm10575_vm1, %v9116_v19, %v7695_v30  ;;  %v9119_v32 = vrot.slane %v7631_v50, 9  ;;  %v7707_v16 = vrot.slane %v7632_v55, 5  ;;  %v7562_v21 = vpop.permute.xlu0 %7561 }
 0x458   :  { %v7639_v33 = vld [vmem:[#allocation3 + $0x68] sm:$0xe]  ;;  %v7640_v46 = vld [vmem:[#allocation3 + $0x6c] sm:$0x1]  ;;  %7075 = vst.msk [vmem:[#allocation4 + $0x120] sm:$0xf] %vm3051_vm5, %v7030_v49  ;;  %v7700_v3 = vsel %vm10575_vm1, %v9117_v8, %v7699_v11  ;;  %v7704_v27 = vsel %vm10575_vm1, %v9118_v56, %v7703_v58 }
 0x459   :  { %7767 = vst.msk [vmem:[#allocation4 + $0x38] sm:$0xf] %vm3051_vm5, %v7696_v38  ;;  %v7032_v28 = vshrl.u32 %v6819_v39, 16  ;;  %v7641_v51 = vld [vmem:[#allocation3 + $0x70] sm:$0xe]  ;;  %v7011_v47 = vrot.slane %v7010_v43, 4  ;;  %v7708_v42 = vsel %vm10575_vm1, %v9119_v32, %v7707_v16  ;;  %v7220_v6 = vpop.permute.xlu1 %7219 }
 0x45a   :  { %v7642_v4 = vld [vmem:[#allocation3 + $0x74] sm:$0x1]  ;;  %7768 = vst.msk [vmem:[#allocation4 + $0x4c] sm:$0xf] %vm3051_vm5, %v7700_v3  ;;  %7769 = vst.msk [vmem:[#allocation4 + $0x60] sm:$0xf] %vm3051_vm5, %v7704_v27 }
 0x45b   :  { %v7035_v44 = vshll.u32 %v6819_v39, 16  ;;  %v7041_v0 = vshll.u32 %v6820_v63, 16  ;;  %v9120_v53 = vrot.slane %v7633_v52, 9  ;;  %v7643_v12 = vld [vmem:[#allocation3 + $0x78] sm:$0xe]  ;;  %v7034_v57 = vrot.slane %v7032_v28, 4  ;;  %v7214_v43 = vpop.permute.xlu0 %7213 }
 0x45c   :  { %v7711_v35 = vrot.slane %v7634_v54, 5  ;;  %v9122_v60 = vrot.slane %v7637_v10, 9  ;;  %v7644_v40 = vld [vmem:[#allocation3 + $0x7c] sm:$0x1]  ;;  %6780 = vst.msk [vmem:[#allocation4 + $0x90] sm:$0xf] %vm3739_vm3, %v6740_v7  ;;  %v7016_v22 = vsel %vm10330_vm12, %v7011_v47, %v7015_v23 }
 0x45d   :  { %7770 = vst.msk [vmem:[#allocation4 + $0x74] sm:$0xf] %vm3051_vm5, %v7708_v42  ;;  %v7037_v2 = vrot.slane %v7035_v44, 5  ;;  %v7719_v61 = vrot.slane %v7638_v5, 5  ;;  %v7645_v36 = vld [vmem:[#allocation3 + $0x80] sm:$0xe] }
 0x45e   :  { %7074 = vst.msk [vmem:[#allocation4 + $0x10c] sm:$0xf] %vm3051_vm5, %v7016_v22  ;;  %v7043_v25 = vrot.slane %v7041_v0, 5  ;;  %v7712_v18 = vsel %vm10575_vm1, %v9120_v53, %v7711_v35  ;;  %v9123_v14 = vrot.slane %v7639_v33, 9  ;;  %v7723_v24 = vrot.slane %v7640_v46, 5  ;;  %v10025_v8 = vld [vmem:[%s13752_s3 + $0x118] sm:$0xff]   ;;  %v6484_v46 = vpop.permute.xlu1 %6483 }
 0x45f   :  { %v7646_v31 = vld [vmem:[#allocation3 + $0x84] sm:$0x1]  ;;  %v7647_v34 = vld [vmem:[#allocation3 + $0x88] sm:$0xe]  ;;  %6521 = vst.msk [vmem:[#allocation4 + $0x50] sm:$0xf] %vm3739_vm3, %v6478_v62  ;;  %v7038_v29 = vor.u32 %v7037_v2, %v7034_v57  ;;  %v7720_v48 = vsel %vm10575_vm1, %v9122_v60, %v7719_v61  ;;  %v6474_v33 = vpop.permute.xlu0 %6473 }
 0x460   :  { %7771 = vst.msk [vmem:[#allocation4 + $0x88] sm:$0xf] %vm3051_vm5, %v7712_v18  ;;  %v9124_v45 = vrot.slane %v7641_v51, 9  ;;  %v7727_v50 = vrot.slane %v7642_v4, 5  ;;  %v7648_v20 = vld [vmem:[#allocation3 + $0x8c] sm:$0x1]  ;;  %v7724_v39 = vsel %vm10575_vm1, %v9123_v14, %v7723_v24 }
 0x461   :  { %v7649_v13 = vld [vmem:[#allocation3 + $0x90] sm:$0xe]  ;;  %v9956_v59 = vld [vmem:[#allocation4] ss:$20 sps:$4 sm:$0xff]   ;;  %v9958_v55 = vld [vmem:[#allocation4 + $0x4] ss:$20 sps:$4 sm:$0xff]  }
 0x462   :  { %7773 = vst.msk [vmem:[#allocation4 + $0xb0] sm:$0xf] %vm3051_vm5, %v7720_v48  ;;  %v9125_v17 = vrot.slane %v7643_v12, 9  ;;  %v7039_v1 = vrot.slane %v7038_v29, 4  ;;  %7774 = vst.msk [vmem:[#allocation4 + $0xc4] sm:$0xf] %vm3051_vm5, %v7724_v39  ;;  %v7728_v19 = vsel %vm10575_vm1, %v9124_v45, %v7727_v50  ;;  %8377 = vmatprep.mubr.bf16.mxu0 %v9958_v55  ;;  %v7216_v3 = vpop.permute.xlu1 %7215 }
 0x463   :  { %6778 = vst.msk [vmem:[#allocation4 + $0x68] sm:$0xf] %vm3739_vm3, %v6736_v41  ;;  %v7731_v63 = vrot.slane %v7644_v40, 5  ;;  %v9126_v52 = vrot.slane %v7645_v36, 9  ;;  %v7650_v26 = vld [vmem:[#allocation3 + $0x94] sm:$0x1]  ;;  %8378 = vmatmul.mubr.bf16.vlgmr.msra.gmra.mxu0 %v9956_v59  ;;  %v7558_v15 = vpop.permute.xlu0 %7557 }
 0x464   :  { %7775 = vst.msk [vmem:[#allocation4 + $0xd8] sm:$0xf] %vm3051_vm5, %v7728_v19  ;;  %v7044_v23 = vsel %vm10330_vm12, %v7039_v1, %v7043_v25  ;;  %v7735_v54 = vrot.slane %v7646_v31, 5  ;;  %v9127_v10 = vrot.slane %v7647_v34, 9  ;;  %9795 = vmatpush3.bf16.msra.mxu0 %v10025_v8  ;;  %v7739_v11 = vrot.slane %v7648_v20, 5  ;;  %v9990_v56 = vld [vmem:[%s13752_s3 + $0x108] sm:$0xff]  }
 0x465   :  { %v7732_v30 = vsel %vm10575_vm1, %v9125_v17, %v7731_v63  ;;  %7607 = vst.msk [vmem:[#allocation4 + $0x34] sm:$0xf] %vm3739_vm3, %v7562_v21  ;;  %v9128_v37 = vrot.slane %v7649_v13, 9  ;;  %7260 = vst.msk [vmem:[#allocation4 + $0x94] sm:$0xf] %vm3739_vm3, %v7220_v6  ;;  %9796 = vmatprep.subr.bf16.mxu0 %v9983_v9  ;;  %v7743_v5 = vrot.slane %v7650_v26, 5 }
 0x466   :  { %7076 = vst.msk [vmem:[#allocation4 + $0x134] sm:$0xf] %vm3051_vm5, %v7044_v23  ;;  %7776 = vst.msk [vmem:[#allocation4 + $0xec] sm:$0xf] %vm3051_vm5, %v7732_v30  ;;  %v7736_v58 = vsel %vm10575_vm1, %v9126_v52, %v7735_v54  ;;  %v7740_v49 = vsel %vm10575_vm1, %v9127_v10, %v7739_v11  ;;  %v10000_v32 = vld [vmem:[%s13752_s3 + $0x100] sm:$0xff]   ;;  %v7568_v51 = vpop.permute.xlu1 %7567 }
 0x467   :  { %7777 = vst.msk [vmem:[#allocation4 + $0x100] sm:$0xf] %vm3051_vm5, %v7736_v58  ;;  %7778 = vst.msk [vmem:[#allocation4 + $0x114] sm:$0xf] %vm3051_vm5, %v7740_v49  ;;  %v7744_v38 = vsel %vm10575_vm1, %v9128_v37, %v7743_v5  ;;  %v6746_v27 = vpop.permute.xlu0 %6745  ;;  %v9965_v16 = vld [vmem:[#allocation4 + $0x2c] ss:$20 sps:$4 sm:$0xff]  }
 0x468   :  { %7257 = vst.msk [vmem:[#allocation4 + $0x58] sm:$0xf] %vm3739_vm3, %v7214_v43  ;;  %9797 = vmatpush3.bf16.msra.mxu0 %v9983_v9  ;;  %6519 = vst.msk [vmem:[#allocation4 + $0x28] sm:$0xf] %vm3739_vm3, %v6474_v33  ;;  %8385 = vmatprep.mubr.bf16.mxu0 %v9965_v16  ;;  %v9970_v47 = vld [vmem:[#allocation4 + $0x8] ss:$20 sps:$4 sm:$0xff]  }
 0x469   :  { %7779 = vst.msk [vmem:[#allocation4 + $0x128] sm:$0xf] %vm3051_vm5, %v7744_v38  ;;  %9798 = vmatprep.subr.bf16.mxu0 %v9990_v56  ;;  %v9979_v22 = vld [vmem:[#allocation4 + $0x7c] ss:$20 sps:$4 sm:$0xff]   ;;  %v10009_v33 = vld [vmem:[#allocation4 + $0x60] ss:$20 sps:$4 sm:$0xff]  }
 0x46a   :  { %6524 = vst.msk [vmem:[#allocation4 + $0x8c] sm:$0xf] %vm3739_vm3, %v6484_v46  ;;  %7605 = vst.msk [vmem:[#allocation4 + $0xc] sm:$0xf] %vm3739_vm3, %v7558_v15  ;;  %v6480_v0 = vpop.permute.xlu1 %6479  ;;  %v9976_v35 = vld [vmem:[#allocation4 + $0x54] ss:$20 sps:$4 sm:$0xff]  }
 0x46b   :  { %7258 = vst.msk [vmem:[#allocation4 + $0x6c] sm:$0xf] %vm3739_vm3, %v7216_v3  ;;  %6783 = vst.msk [vmem:[#allocation4 + $0xcc] sm:$0xf] %vm3739_vm3, %v6746_v27  ;;  %v6742_v4 = vpop.permute.xlu0 %6741  ;;  %v9980_v2 = vld [vmem:[#allocation4 + $0x30] ss:$20 sps:$4 sm:$0xff]  }
 0x46c   :  { %9799 = vmatpush3.bf16.msra.mxu0 %v9990_v56  ;;  %7610 = vst.msk [vmem:[#allocation4 + $0x70] sm:$0xf] %vm3739_vm3, %v7568_v51  ;;  %6781 = vst.msk [vmem:[#allocation4 + $0xa4] sm:$0xf] %vm3739_vm3, %v6742_v4  ;;  %v9994_v17 = vld [vmem:[#allocation4 + $0x80] ss:$20 sps:$4 sm:$0xff]  }
 0x46d   :  { %9800 = vmatprep.subr.bf16.mxu0 %v10000_v32  ;;  %6522 = vst.msk [vmem:[#allocation4 + $0x64] sm:$0xf] %vm3739_vm3, %v6480_v0  ;;  %v10004_v37 = vld [vmem:[#allocation4 + $0x10] ss:$20 sps:$4 sm:$0xff]   ;;  %v10018_v0 = vld [vmem:[#allocation4 + $0xd8] ss:$20 sps:$4 sm:$0xff]  }
 0x46e   :  { %v7564_v12 = vpop.permute.xlu1 %7563  ;;  %v10014_v51 = vld [vmem:[#allocation4 + $0xb0] ss:$20 sps:$4 sm:$0xff]  }
 0x46f   :  { %v9967_v28 = vld [vmem:[#allocation4 + $0x28] ss:$20 sps:$4 sm:$0xff]   ;;  %v6482_v53 = vpop.permute.xlu0 %6481  ;;  %7608 = vst.msk [vmem:[#allocation4 + $0x48] sm:$0xf] %vm3739_vm3, %v7564_v12 }
 0x470   :  { %9801 = vmatpush3.bf16.msra.mxu0 %v10000_v32  ;;  %6523 = vst.msk [vmem:[#allocation4 + $0x78] sm:$0xf] %vm3739_vm3, %v6482_v53  ;;  %v10008_v32 = vld [vmem:[#allocation4 + $0x38] ss:$20 sps:$4 sm:$0xff]   ;;  %v10019_v53 = vld [vmem:[#allocation4 + $0x100] ss:$20 sps:$4 sm:$0xff]  }
 0x471   :  { %8386 = vmatmul.mubr.bf16.gmra.mxu0 %v9967_v28  ;;  %v9972_v44 = vld [vmem:[#allocation4 + $0xc] ss:$20 sps:$4 sm:$0xff]   ;;  %v10013_v28 = vld [vmem:[#allocation4 + $0x88] ss:$20 sps:$4 sm:$0xff]  }
 0x472   :  { %8474 = vmatprep.mubr.bf16.mxu1 %v9972_v44  ;;  %v6748_v42 = vpop.permute.xlu1 %6747  ;;  %8393 = vmatprep.mubr.bf16.mxu0 %v9976_v35  ;;  %v9984_v31 = vld [vmem:[#allocation4 + $0x58] ss:$20 sps:$4 sm:$0xff]  }
 0x473   :  { %8475 = vmatmul.mubr.bf16.vlgmr.msra.gmra.mxu1 %v9970_v47  ;;  %v7566_v7 = vpop.permute.xlu0 %7565  ;;  %6784 = vst.msk [vmem:[#allocation4 + $0xe0] sm:$0xf] %vm3739_vm3, %v6748_v42  ;;  %v10023_v42 = vld [vmem:[#allocation4 + $0x128] ss:$20 sps:$4 sm:$0xff]  }
 0x474   :  { %v9974_v57 = vld [vmem:[#allocation4 + $0x50] ss:$20 sps:$4 sm:$0xff]   ;;  %7609 = vst.msk [vmem:[#allocation4 + $0x5c] sm:$0xf] %vm3739_vm3, %v7566_v7 }
 0x476   :  { %v6744_v40 = vpop.permute.xlu1 %6743  ;;  %v9982_v61 = vld [vmem:[#allocation4 + $0x34] ss:$20 sps:$4 sm:$0xff]  }
 0x477   :  { %v6750_v60 = vpop.permute.xlu0 %6749  ;;  %6782 = vst.msk [vmem:[#allocation4 + $0xb8] sm:$0xf] %vm3739_vm3, %v6744_v40  ;;  %8482 = vmatprep.mubr.bf16.mxu1 %v9982_v61  ;;  %v9977_v18 = vld [vmem:[#allocation4 + $0x78] ss:$20 sps:$4 sm:$0xff]  }
 0x478   :  { %6785 = vst.msk [vmem:[#allocation4 + $0xf4] sm:$0xf] %vm3739_vm3, %v6750_v60 }
 0x479   :  { %8394 = vmatmul.mubr.bf16.gmra.mxu0 %v9974_v57 }
 0x47a   :  { %8401 = vmatprep.mubr.bf16.mxu0 %v9979_v22  ;;  %v6492_v62 = vpop.permute.xlu1 %6491  ;;  %v9993_v13 = vld [vmem:[#allocation4 + $0xcc] ss:$20 sps:$4 sm:$0xff]  }
 0x47b   :  { %v6494_v36 = vpop.permute.xlu0 %6493  ;;  %8483 = vmatmul.mubr.bf16.gmra.mxu1 %v9980_v2  ;;  %v9986_v25 = vld [vmem:[#allocation4 + $0x5c] ss:$20 sps:$4 sm:$0xff]   ;;  %6528 = vst.msk [vmem:[#allocation4 + $0xdc] sm:$0xf] %vm3739_vm3, %v6492_v62 }
 0x47c   :  { %6529 = vst.msk [vmem:[#allocation4 + $0xf0] sm:$0xf] %vm3739_vm3, %v6494_v36  ;;  %8490 = vmatprep.mubr.bf16.mxu1 %v9986_v25 }
 0x47e   :  { %v6488_v24 = vpop.permute.xlu1 %6487  ;;  %v9989_v20 = vld [vmem:[#allocation4 + $0xa4] ss:$20 sps:$4 sm:$0xff]  }
 0x47f   :  { %v6490_v14 = vpop.permute.xlu0 %6489  ;;  %6526 = vst.msk [vmem:[#allocation4 + $0xb4] sm:$0xf] %vm3739_vm3, %v6488_v24 }
 0x480   :  { %6527 = vst.msk [vmem:[#allocation4 + $0xc8] sm:$0xf] %vm3739_vm3, %v6490_v14 }
 0x481   :  { %8402 = vmatmul.mubr.bf16.gmra.mxu0 %v9977_v18 }
 0x482   :  { %v6752_v29 = vpop.permute.xlu1 %6751  ;;  %8409 = vmatprep.mubr.bf16.mxu0 %v9989_v20 }
 0x483   :  { %v7570_v34 = vpop.permute.xlu0 %7569  ;;  %8491 = vmatmul.mubr.bf16.gmra.mxu1 %v9984_v31  ;;  %6786 = vst.msk [vmem:[#allocation4 + $0x108] sm:$0xf] %vm3739_vm3, %v6752_v29 }
 0x484   :  { %7611 = vst.msk [vmem:[#allocation4 + $0x84] sm:$0xf] %vm3739_vm3, %v7570_v34 }
 0x486   :  { %v7572_v45 = vpop.permute.xlu1 %7571  ;;  %v9987_v50 = vld [vmem:[#allocation4 + $0xa0] ss:$20 sps:$4 sm:$0xff]  }
 0x487   :  { %v6754_v48 = vpop.permute.xlu0 %6753  ;;  %7612 = vst.msk [vmem:[#allocation4 + $0x98] sm:$0xf] %vm3739_vm3, %v7572_v45  ;;  %v9991_v1 = vld [vmem:[#allocation4 + $0xc8] ss:$20 sps:$4 sm:$0xff]  }
 0x488   :  { %6787 = vst.msk [vmem:[#allocation4 + $0x11c] sm:$0xf] %vm3739_vm3, %v6754_v48 }
 0x489   :  { %8410 = vmatmul.mubr.bf16.gmra.mxu0 %v9987_v50 }
 0x48a   :  { %v6500_v59 = vpop.permute.xlu1 %6499  ;;  %8417 = vmatprep.mubr.bf16.mxu0 %v9993_v13  ;;  %v9999_v23 = vld [vmem:[#allocation4 + $0xf4] ss:$20 sps:$4 sm:$0xff]  }
 0x48b   :  { %v7222_v41 = vpop.permute.xlu0 %7221  ;;  %6532 = vst.msk [vmem:[#allocation4 + $0x12c] sm:$0xf] %vm3739_vm3, %v6500_v59 }
 0x48c   :  { %7261 = vst.msk [vmem:[#allocation4 + $0xa8] sm:$0xf] %vm3739_vm3, %v7222_v41 }
 0x48e   :  { %v6496_v39 = vpop.permute.xlu1 %6495  ;;  %v9996_v9 = vld [vmem:[#allocation4 + $0x84] ss:$20 sps:$4 sm:$0xff]  }
 0x48f   :  { %v6498_v55 = vpop.permute.xlu0 %6497  ;;  %6530 = vst.msk [vmem:[#allocation4 + $0x104] sm:$0xf] %vm3739_vm3, %v6496_v39  ;;  %8498 = vmatprep.mubr.bf16.mxu1 %v9996_v9 }
 0x490   :  { %6531 = vst.msk [vmem:[#allocation4 + $0x118] sm:$0xf] %vm3739_vm3, %v6498_v55  ;;  %8499 = vmatmul.mubr.bf16.gmra.mxu1 %v9994_v17 }
 0x491   :  { %8418 = vmatmul.mubr.bf16.gmra.mxu0 %v9991_v1 }
 0x492   :  { %v6756_v63 = vpop.permute.xlu1 %6755  ;;  %8425 = vmatprep.mubr.bf16.mxu0 %v9999_v23 }
 0x493   :  { %v7574_v19 = vpop.permute.xlu0 %7573  ;;  %6788 = vst.msk [vmem:[#allocation4 + $0x130] sm:$0xf] %vm3739_vm3, %v6756_v63 }
 0x494   :  { %7613 = vst.msk [vmem:[#allocation4 + $0xac] sm:$0xf] %vm3739_vm3, %v7574_v19 }
 0x496   :  { %v7224_v26 = vpop.permute.xlu1 %7223  ;;  %v9997_v21 = vld [vmem:[#allocation4 + $0xf0] ss:$20 sps:$4 sm:$0xff]  }
 0x497   :  { %v7226_v52 = vpop.permute.xlu0 %7225  ;;  %7262 = vst.msk [vmem:[#allocation4 + $0xbc] sm:$0xf] %vm3739_vm3, %v7224_v26  ;;  %v10001_v11 = vld [vmem:[#allocation4 + $0x118] ss:$20 sps:$4 sm:$0xff]  }
 0x498   :  { %7263 = vst.msk [vmem:[#allocation4 + $0xd0] sm:$0xf] %vm3739_vm3, %v7226_v52 }
 0x499   :  { %8426 = vmatmul.mubr.bf16.gmra.mxu0 %v9997_v21 }
 0x49a   :  { %v7576_v54 = vpop.permute.xlu1 %7575  ;;  %v10003_v10 = vld [vmem:[#allocation4 + $0x11c] ss:$20 sps:$4 sm:$0xff]  }
 0x49b   :  { %v7578_v30 = vpop.permute.xlu0 %7577  ;;  %7614 = vst.msk [vmem:[#allocation4 + $0xc0] sm:$0xf] %vm3739_vm3, %v7576_v54  ;;  %8433 = vmatprep.mubr.bf16.mxu0 %v10003_v10 }
 0x49c   :  { %7615 = vst.msk [vmem:[#allocation4 + $0xd4] sm:$0xf] %vm3739_vm3, %v7578_v30 }
 0x49e   :  { %v7228_v8 = vpop.permute.xlu1 %7227  ;;  %v10005_v5 = vld [vmem:[#allocation4 + $0xa8] ss:$20 sps:$4 sm:$0xff]  }
 0x49f   :  { %v7230_v6 = vpop.permute.xlu0 %7229  ;;  %7264 = vst.msk [vmem:[#allocation4 + $0xe4] sm:$0xf] %vm3739_vm3, %v7228_v8 }
 0x4a0   :  { %7265 = vst.msk [vmem:[#allocation4 + $0xf8] sm:$0xf] %vm3739_vm3, %v7230_v6 }
 0x4a1   :  { %8434 = vmatmul.mubr.bf16.gmra.mxu0 %v10001_v11 }
 0x4a2   :  { %v7580_v58 = vpop.permute.xlu1 %7579  ;;  %9802 = vmatprep.mubr.msk.bf16.mxu0 %vm3034_vm0, %v10004_v37  ;;  %v10007_v49 = vld [vmem:[#allocation4 + $0xac] ss:$20 sps:$4 sm:$0xff]  }
 0x4a3   :  { %v7582_v56 = vpop.permute.xlu0 %7581  ;;  %7616 = vst.msk [vmem:[#allocation4 + $0xe8] sm:$0xf] %vm3739_vm3, %v7580_v58  ;;  %8506 = vmatprep.mubr.bf16.mxu1 %v10007_v49 }
 0x4a4   :  { %7617 = vst.msk [vmem:[#allocation4 + $0xfc] sm:$0xf] %vm3739_vm3, %v7582_v56  ;;  %8507 = vmatmul.mubr.bf16.gmra.mxu1 %v10005_v5 }
 0x4a6   :  { %v7232_v38 = vpop.permute.xlu1 %7231  ;;  %v10010_v3 = vld [vmem:[#allocation4 + $0xd0] ss:$20 sps:$4 sm:$0xff]  }
 0x4a7   :  { %v7234_v43 = vpop.permute.xlu0 %7233  ;;  %7266 = vst.msk [vmem:[#allocation4 + $0x10c] sm:$0xf] %vm3739_vm3, %v7232_v38 }
 0x4a8   :  { %7267 = vst.msk [vmem:[#allocation4 + $0x120] sm:$0xf] %vm3739_vm3, %v7234_v43 }
 0x4a9   :  { %9803 = vmatmul.mubr.msk.bf16.vlgmr.msra.gmra.mxu0 %vm3034_vm0, %v10008_v32 }
 0x4aa   :  { %v7584_v15 = vpop.permute.xlu1 %7583  ;;  %9806 = vmatprep.mubr.msk.bf16.mxu0 %vm3034_vm0, %v10009_v33  ;;  %v10012_v27 = vld [vmem:[#allocation4 + $0xd4] ss:$20 sps:$4 sm:$0xff]  }
 0x4ab   :  { %v7586_v46 = vpop.permute.xlu0 %7585  ;;  %7618 = vst.msk [vmem:[#allocation4 + $0x110] sm:$0xf] %vm3739_vm3, %v7584_v15  ;;  %8514 = vmatprep.mubr.bf16.mxu1 %v10012_v27 }
 0x4ac   :  { %7619 = vst.msk [vmem:[#allocation4 + $0x124] sm:$0xf] %vm3739_vm3, %v7586_v46  ;;  %8515 = vmatmul.mubr.bf16.gmra.mxu1 %v10010_v3  ;;  %v13676_v46 = vld [vmem:[%s13753_s4 + $0x2] ss:$0 sm:$0xff]  ;;  %s10050_s4 = smov [#allocation6]  }
 0x4ad   :  { %s8705_s11 = sshll.u32 %s10050_s4, 4  ;;  %s8706_s11 = int_to_ptr.vmem [resolvable:$true] %s8705_s11 }
 0x4ae   :  { %v7236_v16 = vpop.permute.xlu1 %7235  ;;  %v10015_v47 = vld [vmem:[#allocation4 + $0xf8] ss:$20 sps:$4 sm:$0xff]   ;;  %s10026_s12 = scalar_lea.vmem %s8706_s11, 2048  ;;  %p10031_p1 = scmp.lt.s32.totalorder %s8706_s11, %s8706_s11 }
 0x4af   :  { %7268 = vst.msk [vmem:[#allocation4 + $0x134] sm:$0xf] %vm3739_vm3, %v7236_v16  ;;  %p10027_p0 = scmp.ne.s32.totalorder %s8706_s11, %s10026_s12  ;;  %p10032_p2 = scmp.lt.s32.totalorder %s10026_s12, %s10026_s12 }
 0x4b1   :  { %9807 = vmatmul.mubr.msk.bf16.gmra.mxu0 %vm3034_vm0, %v10013_v28  ;;  %p10033_p3 = por %p10032_p2, %p10031_p1 }
 0x4b2   :  { %v7588_v4 = vpop.permute.xlu1 %7587  ;;  %9810 = vmatprep.mubr.msk.bf16.mxu0 %vm3034_vm0, %v10014_v51  ;;  %v10017_v44 = vld [vmem:[#allocation4 + $0xfc] ss:$20 sps:$4 sm:$0xff]  }
 0x4b3   :  { %7620 = vst.msk [vmem:[#allocation4 + $0x138] sm:$0xf] %vm3739_vm3, %v7588_v4  ;;  %8522 = vmatprep.mubr.bf16.mxu1 %v10017_v44  ;;  %p10034_p4 = pnand %p10033_p3, %p10027_p0 }
 0x4b4   :  { %8523 = vmatmul.mubr.bf16.gmra.mxu1 %v10015_v47 }
 0x4b6   :  { %v10020_v12 = vld [vmem:[#allocation4 + $0x120] ss:$20 sps:$4 sm:$0xff]  }
 0x4b9   :  { %9811 = vmatmul.mubr.msk.bf16.gmra.mxu0 %vm3034_vm0, %v10018_v0 }
 0x4ba   :  { %9814 = vmatprep.mubr.msk.bf16.mxu0 %vm3034_vm0, %v10019_v53  ;;  %v10022_v7 = vld [vmem:[#allocation4 + $0x124] ss:$20 sps:$4 sm:$0xff]  }
 0x4bb   :  { %8530 = vmatprep.mubr.bf16.mxu1 %v10022_v7 }
 0x4bc   :  { %8531 = vmatmul.mubr.bf16.gmra.mxu1 %v10020_v12 }
 0x4c1   :  { %9815 = vmatmul.mubr.msk.bf16.gmra.mxu0 %vm3034_vm0, %v10023_v42 }
 0x523   :  { %v9484_v57 = vpop.f32.mrf.mxu0 }
 0x525   :  { %v9485_v35 = vpop.f32.mrf.mxu0 }
 0x526   :  { %v9486_v32 = vadd.f32 %v9485_v35, %v9484_v57 }
 0x527   :  { %v9487_v60 = vpop.f32.mrf.mxu0 }
 0x528   :  { %v8380_v47 = vadd.f32 %v9486_v32, %v13676_v46 }
 0x529   :  { %v9488_v40 = vpop.f32.mrf.mxu0 }
 0x52a   :  { %v9489_v44 = vadd.f32 %v9488_v40, %v9487_v60 }
 0x531   :  { %v9490_v22 = vpop.f32.mrf.mxu0 }
 0x533   :  { %v9491_v2 = vpop.f32.mrf.mxu0  ;;  %v9548_v61 = vpop.f32.mrf.mxu1 }
 0x534   :  { %v9492_v49 = vadd.f32 %v9491_v2, %v9490_v22 }
 0x535   :  { %v9493_v36 = vpop.f32.mrf.mxu0  ;;  %v9549_v62 = vpop.f32.mrf.mxu1 }
 0x536   :  { %v8388_v27 = vadd.f32 %v9492_v49, %v13676_v46  ;;  %v9550_v28 = vadd.f32 %v9549_v62, %v9548_v61  ;;  %v8638_v62 = vld [vmem:[#allocation5 + $0x10] sm:$0xff]  ;;  %v8636_v49 = vld [vmem:[#allocation5] sm:$0xff] }
 0x537   :  { %v9494_v25 = vpop.f32.mrf.mxu0  ;;  %v9551_v18 = vpop.f32.mrf.mxu1 }
 0x538   :  { %v9495_v16 = vadd.f32 %v9494_v25, %v9493_v36  ;;  %v8477_v2 = vadd.f32 %v9550_v28, %v8380_v47 }
 0x539   :  { %v9496_v14 = vpop.f32.mrf.mxu0  ;;  %v9552_v31 = vpop.f32.mrf.mxu1 }
 0x53a   :  { %v8391_v57 = vadd.f32 %v9495_v16, %v13676_v46  ;;  %v9553_v35 = vadd.f32 %v9552_v31, %v9551_v18 }
 0x53b   :  { %v9497_v24 = vpop.f32.mrf.mxu0  ;;  %v9554_v29 = vpop.f32.mrf.mxu1 }
 0x53c   :  { %v9498_v36 = vadd.f32 %v9497_v24, %v9496_v14 }
 0x53d   :  { %v13637_v34 = vpop.f32.mrf.mxu0  ;;  %v9555_v45 = vpop.f32.mrf.mxu1 }
 0x53e   :  { %v9556_v33 = vadd.f32 %v9555_v45, %v9554_v29  ;;  %v8383_v45 = vadd.f32 %v9489_v44, %v13676_v46 }
 0x53f   :  { %v13639_v48 = vpop.f32.mrf.mxu0  ;;  %v9557_v13 = vpop.f32.mrf.mxu1 }
 0x540   :  { %v8485_v53 = vadd.f32 %v9556_v33, %v8388_v27  ;;  %v8480_v24 = vadd.f32 %v9553_v35, %v8383_v45  ;;  %v8639_v27 = vld [vmem:[#allocation5 + $0x18] sm:$0xff] }
 0x541   :  { %v9502_v50 = vpop.f32.mrf.mxu0  ;;  %v9558_v59 = vpop.f32.mrf.mxu1 }
 0x542   :  { %v9559_v0 = vadd.f32 %v9558_v59, %v9557_v13 }
 0x543   :  { %v9503_v20 = vpop.f32.mrf.mxu0  ;;  %v9560_v39 = vpop.f32.mrf.mxu1 }
 0x544   :  { %v9504_v12 = vadd.f32 %v9503_v20, %v9502_v50  ;;  %v8488_v13 = vadd.f32 %v9559_v0, %v8391_v57 }
 0x545   :  { %v9505_v41 = vpop.f32.mrf.mxu0  ;;  %v9561_v1 = vpop.f32.mrf.mxu1 }
 0x546   :  { %v8404_v50 = vadd.f32 %v9504_v12, %v13676_v46  ;;  %v9562_v59 = vadd.f32 %v9561_v1, %v9560_v39 }
 0x547   :  { %v9506_v55 = vpop.f32.mrf.mxu0  ;;  %v13649_v52 = vpop.f32.mrf.mxu1 }
 0x548   :  { %v9507_v20 = vadd.f32 %v9506_v55, %v9505_v41 }
 0x549   :  { %v13641_v17 = vpop.f32.mrf.mxu0  ;;  %v13655_v23 = vpop.f32.mrf.mxu1 }
 0x54a   :  { %v8407_v1 = vadd.f32 %v9507_v20, %v13676_v46 }
 0x54b   :  { %v13643_v9 = vpop.f32.mrf.mxu0 }
 0x54d   :  { %v13645_v19 = vpop.f32.mrf.mxu0 }
 0x54f   :  { %v13647_v63 = vpop.f32.mrf.mxu0 }
 0x550   :  { %v9566_v54 = vpop.f32.mrf.mxu1 }
 0x551   :  { %v13651_v26 = vpop.f32.mrf.mxu0 }
 0x552   :  { %v9567_v8 = vpop.f32.mrf.mxu1 }
 0x553   :  { %v13653_v21 = vpop.f32.mrf.mxu0  ;;  %v9568_v61 = vadd.f32 %v9567_v8, %v9566_v54  ;;  %v8396_v54 = vadd.f32 %v9498_v36, %v13676_v46  ;;  %v9501_v8 = vadd.f32 %v13639_v48, %v13637_v34  ;;  %v9565_v34 = vadd.f32 %v13655_v23, %v13649_v52  ;;  %v8642_v36 = vld [vmem:[#allocation5 + $0x30] sm:$0xff] }
 0x554   :  { %v9569_v56 = vpop.f32.mrf.mxu1  ;;  %v9516_v0 = vadd.f32 %v13653_v21, %v13651_v26 }
 0x555   :  { %v13657_v30 = vpop.f32.mrf.mxu0  ;;  %v8501_v47 = vadd.f32 %v9568_v61, %v8404_v50  ;;  %v8493_v57 = vadd.f32 %v9562_v59, %v8396_v54  ;;  %v8399_v35 = vadd.f32 %v9501_v8, %v13676_v46  ;;  %v8641_v54 = vld [vmem:[#allocation5 + $0x28] sm:$0xff] }
 0x556   :  { %v9570_v43 = vpop.f32.mrf.mxu1  ;;  %v8420_v23 = vadd.f32 %v9516_v0, %v13676_v46 }
 0x557   :  { %v13659_v10 = vpop.f32.mrf.mxu0  ;;  %v9571_v44 = vadd.f32 %v9570_v43, %v9569_v56  ;;  %v8496_v59 = vadd.f32 %v9565_v34, %v8399_v35 }
 0x558   :  { %v9519_v45 = vadd.f32 %v13659_v10, %v13657_v30 }
 0x559   :  { %v13661_v6 = vpop.f32.mrf.mxu0  ;;  %v8504_v52 = vadd.f32 %v9571_v44, %v8407_v1 }
 0x55b   :  { %v13663_v11 = vpop.f32.mrf.mxu0 }
 0x55d   :  { %v13665_v37 = vpop.f32.mrf.mxu0 }
 0x55f   :  { %v13667_v58 = vpop.f32.mrf.mxu0 }
 0x561   :  { %v13669_v5 = vpop.f32.mrf.mxu0 }
 0x563   :  { %v13671_v38 = vpop.f32.mrf.mxu0 }
 0x564   :  { %v13680_v3 = vpop.f32.mrf.mxu1 }
 0x565   :  { %v13678_v15 = vpop.f32.mrf.mxu0 }
 0x566   :  { %v13685_v4 = vpop.f32.mrf.mxu1 }
 0x567   :  { %v13683_v51 = vpop.f32.mrf.mxu0 }
 0x568   :  { %v13688_v7 = vpop.f32.mrf.mxu1 }
 0x569   :  { %v9804_v42 = vpop.f32.mrf.mxu0 }
 0x56a   :  { %v8582_v22 = vadd.f32 %v9804_v42, %v8485_v53  ;;  %v13691_v25 = vpop.f32.mrf.mxu1  ;;  %v8637_v53 = vld [vmem:[#allocation5 + $0x8] sm:$0xff] }
 0x56b   :  { %v8573_v29 = vpop.f32.mrf.mxu0 }
 0x56c   :  { %v8654_v60 = vadd.f32 %v8638_v62, %v8582_v22  ;;  %v8574_v40 = vadd.f32 %v8573_v29, %v8477_v2  ;;  %v9578_v32 = vpop.f32.mrf.mxu1  ;;  %v9510_v22 = vadd.f32 %v13643_v9, %v13641_v17 }
 0x56d   :  { %v9805_v18 = vpop.f32.mrf.mxu0 }
 0x56e   :  { %v8670_v31 = vmax.f32 %v8654_v60, 0.0  ;;  %v8652_v33 = vadd.f32 %v8636_v49, %v8574_v40  ;;  %v8585_v14 = vadd.f32 %v9805_v18, %v8488_v13  ;;  %v9579_v16 = vpop.f32.mrf.mxu1  ;;  %v9574_v60 = vadd.f32 %v13685_v4, %v13680_v3  ;;  %v8640_v40 = vld [vmem:[#allocation5 + $0x20] sm:$0xff]  ;;  %v8643_v18 = vld [vmem:[#allocation5 + $0x38] sm:$0xff] }
 0x56f   :  { %v8576_v28 = vpop.f32.mrf.mxu0  ;;  %v9580_v2 = vadd.f32 %v9579_v16, %v9578_v32  ;;  %v8412_v49 = vadd.f32 %v9510_v22, %v13676_v46  ;;  %v9513_v32 = vadd.f32 %v13647_v63, %v13645_v19  ;;  %v9531_v22 = vadd.f32 %v13683_v51, %v13678_v15 }
 0x570   :  { %8686 = vst.msk [vmem:[#allocation6 + $0x10] sm:$0xff] %vm3034_vm0, %v8670_v31  ;;  %v8668_v41 = vmax.f32 %v8652_v33, 0.0  ;;  %v8655_v55 = vadd.f32 %v8639_v27, %v8585_v14  ;;  %v8577_v39 = vadd.f32 %v8576_v28, %v8480_v24  ;;  %v9581_v12 = vpop.f32.mrf.mxu1  ;;  %v8423_v24 = vadd.f32 %v9519_v45, %v13676_v46 }
 0x571   :  { %v9808_v42 = vpop.f32.mrf.mxu0  ;;  %v8517_v10 = vadd.f32 %v9580_v2, %v8420_v23  ;;  %v8509_v16 = vadd.f32 %v9574_v60, %v8412_v49  ;;  %v9577_v28 = vadd.f32 %v13691_v25, %v13688_v7  ;;  %v8415_v44 = vadd.f32 %v9513_v32, %v13676_v46  ;;  %v8647_v2 = vld [vmem:[#allocation5 + $0x58] sm:$0xff]  ;;  %v8650_v32 = vld [vmem:[#allocation5 + $0x70] sm:$0xff] }
 0x572   :  { %8684 = vst.msk [vmem:[#allocation6] sm:$0xff] %vm3034_vm0, %v8668_v41  ;;  %v8671_v48 = vmax.f32 %v8655_v55, 0.0  ;;  %v8653_v56 = vadd.f32 %v8637_v53, %v8577_v39  ;;  %v8598_v43 = vadd.f32 %v9808_v42, %v8501_v47  ;;  %v9582_v26 = vpop.f32.mrf.mxu1  ;;  %v9522_v41 = vadd.f32 %v13663_v11, %v13661_v6  ;;  %v8646_v39 = vld [vmem:[#allocation5 + $0x50] sm:$0xff] }
 0x573   :  { %v8589_v21 = vpop.f32.mrf.mxu0  ;;  %v9583_v3 = vadd.f32 %v9582_v26, %v9581_v12  ;;  %v9528_v55 = vadd.f32 %v13671_v38, %v13669_v5  ;;  %v9525_v38 = vadd.f32 %v13667_v58, %v13665_v37  ;;  %v8439_v51 = vadd.f32 %v9531_v22, %v13676_v46 }
 0x574   :  { %8687 = vst.msk [vmem:[#allocation6 + $0x18] sm:$0xff] %vm3034_vm0, %v8671_v48  ;;  %v8669_v61 = vmax.f32 %v8653_v56, 0.0  ;;  %v8658_v62 = vadd.f32 %v8642_v36, %v8598_v43  ;;  %v8590_v29 = vadd.f32 %v8589_v21, %v8493_v57  ;;  %v9584_v17 = vpop.f32.mrf.mxu1  ;;  %v8644_v57 = vld [vmem:[#allocation5 + $0x40] sm:$0xff]  ;;  %v8512_v43 = vadd.f32 %v9577_v28, %v8415_v44 }
 0x575   :  { %v9809_v9 = vpop.f32.mrf.mxu0  ;;  %v8520_v12 = vadd.f32 %v9583_v3, %v8423_v24  ;;  %v8428_v5 = vadd.f32 %v9522_v41, %v13676_v46  ;;  %v8436_v35 = vadd.f32 %v9528_v55, %v13676_v46  ;;  %v8431_v15 = vadd.f32 %v9525_v38, %v13676_v46 }
 0x576   :  { %8685 = vst.msk [vmem:[#allocation6 + $0x8] sm:$0xff] %vm3034_vm0, %v8669_v61  ;;  %v8674_v13 = vmax.f32 %v8658_v62, 0.0  ;;  %v8656_v50 = vadd.f32 %v8640_v40, %v8590_v29  ;;  %v8601_v20 = vadd.f32 %v9809_v9, %v8504_v52  ;;  %v9585_v31 = vpop.f32.mrf.mxu1  ;;  %v8645_v52 = vld [vmem:[#allocation5 + $0x48] sm:$0xff] }
 0x577   :  { %v8592_v30 = vpop.f32.mrf.mxu0  ;;  %v9586_v42 = vadd.f32 %v9585_v31, %v9584_v17 }
 0x578   :  { %8690 = vst.msk [vmem:[#allocation6 + $0x30] sm:$0xff] %vm3034_vm0, %v8674_v13  ;;  %v8672_v4 = vmax.f32 %v8656_v50, 0.0  ;;  %v8659_v33 = vadd.f32 %v8643_v18, %v8601_v20  ;;  %v8593_v14 = vadd.f32 %v8592_v30, %v8496_v59  ;;  %v9587_v8 = vpop.f32.mrf.mxu1  ;;  %v8648_v18 = vld [vmem:[#allocation5 + $0x60] sm:$0xff] }
 0x579   :  { %v9812_v27 = vpop.f32.mrf.mxu0  ;;  %v8525_v60 = vadd.f32 %v9586_v42, %v8428_v5 }
 0x57a   :  { %8688 = vst.msk [vmem:[#allocation6 + $0x20] sm:$0xff] %vm3034_vm0, %v8672_v4  ;;  %v8675_v19 = vmax.f32 %v8659_v33, 0.0  ;;  %v8657_v63 = vadd.f32 %v8641_v54, %v8593_v14  ;;  %v8614_v47 = vadd.f32 %v9812_v27, %v8517_v10  ;;  %v9588_v1 = vpop.f32.mrf.mxu1  ;;  %v8649_v27 = vld [vmem:[#allocation5 + $0x68] sm:$0xff] }
 0x57b   :  { %v8605_v0 = vpop.f32.mrf.mxu0  ;;  %v9589_v40 = vadd.f32 %v9588_v1, %v9587_v8  ;;  %v8651_v8 = vld [vmem:[#allocation5 + $0x78] sm:$0xff] }
 0x57c   :  { %8691 = vst.msk [vmem:[#allocation6 + $0x38] sm:$0xff] %vm3034_vm0, %v8675_v19  ;;  %v8673_v53 = vmax.f32 %v8657_v63, 0.0  ;;  %v8662_v7 = vadd.f32 %v8646_v39, %v8614_v47  ;;  %v8606_v25 = vadd.f32 %v8605_v0, %v8509_v16  ;;  %v9590_v34 = vpop.f32.mrf.mxu1 }
 0x57d   :  { %v9813_v48 = vpop.f32.mrf.mxu0  ;;  %v8528_v4 = vadd.f32 %v9589_v40, %v8431_v15 }
 0x57e   :  { %8689 = vst.msk [vmem:[#allocation6 + $0x28] sm:$0xff] %vm3034_vm0, %v8673_v53  ;;  %v8678_v56 = vmax.f32 %v8662_v7, 0.0  ;;  %v8660_v6 = vadd.f32 %v8644_v57, %v8606_v25  ;;  %v8617_v11 = vadd.f32 %v9813_v48, %v8520_v12  ;;  %v9591_v36 = vpop.f32.mrf.mxu1 }
 0x57f   :  { %v8608_v26 = vpop.f32.mrf.mxu0  ;;  %v9592_v62 = vadd.f32 %v9591_v36, %v9590_v34 }
 0x580   :  { %8694 = vst.msk [vmem:[#allocation6 + $0x50] sm:$0xff] %vm3034_vm0, %v8678_v56  ;;  %v8676_v21 = vmax.f32 %v8660_v6, 0.0  ;;  %v8663_v61 = vadd.f32 %v8647_v2, %v8617_v11  ;;  %v8609_v29 = vadd.f32 %v8608_v26, %v8512_v43  ;;  %v9593_v23 = vpop.f32.mrf.mxu1 }
 0x581   :  { %v9816_v45 = vpop.f32.mrf.mxu0  ;;  %v8533_v17 = vadd.f32 %v9592_v62, %v8436_v35 }
 0x582   :  { %8692 = vst.msk [vmem:[#allocation6 + $0x40] sm:$0xff] %vm3034_vm0, %v8676_v21  ;;  %v8679_v37 = vmax.f32 %v8663_v61, 0.0  ;;  %v8661_v58 = vadd.f32 %v8645_v52, %v8609_v29  ;;  %v9594_v9 = vpop.f32.mrf.mxu1 }
 0x583   :  { %v8621_v13 = vpop.f32.mrf.mxu0  ;;  %v8630_v20 = vadd.f32 %v9816_v45, %v8533_v17  ;;  %v9595_v59 = vadd.f32 %v9594_v9, %v9593_v23 }
 0x584   :  { %8695 = vst.msk [vmem:[#allocation6 + $0x58] sm:$0xff] %vm3034_vm0, %v8679_v37  ;;  %v8677_v50 = vmax.f32 %v8661_v58, 0.0  ;;  %v8622_v49 = vadd.f32 %v8621_v13, %v8525_v60 }
 0x585   :  { %v9817_v31 = vpop.f32.mrf.mxu0  ;;  %v8666_v30 = vadd.f32 %v8650_v32, %v8630_v20  ;;  %v8536_v3 = vadd.f32 %v9595_v59, %v8439_v51 }
 0x586   :  { %8693 = vst.msk [vmem:[#allocation6 + $0x48] sm:$0xff] %vm3034_vm0, %v8677_v50  ;;  %v8664_v10 = vadd.f32 %v8648_v18, %v8622_v49 }
 0x587   :  { %v8624_v33 = vpop.f32.mrf.mxu0  ;;  %v8682_v14 = vmax.f32 %v8666_v30, 0.0  ;;  %v8633_v24 = vadd.f32 %v9817_v31, %v8536_v3 }
 0x588   :  { %v8680_v46 = vmax.f32 %v8664_v10, 0.0  ;;  %v8625_v54 = vadd.f32 %v8624_v33, %v8528_v4 }
 0x589   :  { %8698 = vst.msk [vmem:[#allocation6 + $0x70] sm:$0xff] %vm3034_vm0, %v8682_v14  ;;  %v8667_v16 = vadd.f32 %v8651_v8, %v8633_v24 }
 0x58a   :  { %8696 = vst.msk [vmem:[#allocation6 + $0x60] sm:$0xff] %vm3034_vm0, %v8680_v46  ;;  %v8665_v28 = vadd.f32 %v8649_v27, %v8625_v54 }
 0x58b   :  { %v8683_v19 = vmax.f32 %v8667_v16, 0.0 }
 0x58c   :  { %v8681_v63 = vmax.f32 %v8665_v28, 0.0 }
 0x58d   :  { %8699 = vst.msk [vmem:[#allocation6 + $0x78] sm:$0xff] %vm3034_vm0, %v8683_v19 }
 0x58e   :  { %8697 = vst.msk [vmem:[#allocation6 + $0x68] sm:$0xff] %vm3034_vm0, %v8681_v63 }
 0x58f   :  { %10037 = shalt.err (!%p10034_p4)
}
 0x590   :  { %s10051_s13 = smov 128   ;;  %s10052_s0 = smov 8  }
 0x591   :  { %8711 = dma.vmem_to_hbm [thread:$0]  %s8706_s11, 2048, %s13754_s5, [#allocation7], %s10051_s13, %s10051_s13, %s10052_s0  }
 0x592   :  { %10046 = dma.done.wait [#allocation7], 2048  }
 0x593   :  { %10047 = vsyncadd [#allocation7], 4294965248 }
 0x594   :  { %8715 = vsyncpa [#allocation7], 1 }

</bundles_post_ra>
